<compile_context>
chip_gen: v6e
topology: v6e:2x2x1
jax: 0.10.0
libtpu: 0.0.40
codegen_flags: <defaults>
</compile_context>

<pallas_src>
import math
from functools import partial

import numpy as np
import jax
import jax.numpy as jnp
from jax import lax
from jax.experimental import pallas as pl
from jax.experimental.pallas import tpu as pltpu

# ----------------------------- configuration --------------------------------
IMG = (16, 16)
PATCH = (4, 4)
IN_CH = 3
EMBED = 32
DEC_EMBED = 32
DEPTH = 2
DEC_DEPTH = 2
HEADS = 4
DEC_HEADS = 4
MLP_RATIO = 4.0
B = 2
NUM_H = IMG[0] // PATCH[0]
NUM_W = IMG[1] // PATCH[1]
L = NUM_H * NUM_W
PATCH_DIM = PATCH[0] * PATCH[1] * IN_CH          # decoder_pred output dim (SR)
LN_EPS = 1e-5                                    # nn.LayerNorm default eps
LANE = 128                                       # TPU lane width (slab padding)
NBLK = DEPTH + DEC_DEPTH

assert EMBED == DEC_EMBED, "forward_decoder adds decoder_pos_embed to the latent"
assert int(EMBED * MLP_RATIO) <= LANE


# ----------------------- frozen 2D sin-cos pos-embed -------------------------
def _sincos_1d(embed_dim, pos):
    omega = np.arange(embed_dim // 2, dtype=np.float64) / (embed_dim / 2.0)
    omega = 1.0 / (10000.0 ** omega)
    out = np.einsum("m,d->md", pos.reshape(-1).astype(np.float64), omega)
    return np.concatenate([np.sin(out), np.cos(out)], axis=1)


def get_2d_sincos_pos_embed(embed_dim, grid_size):
    gh, gw = grid_size
    grid_h = np.arange(gh, dtype=np.float32)
    grid_w = np.arange(gw, dtype=np.float32)
    grid = np.meshgrid(grid_w, grid_h)                     # w goes first (MAE)
    grid = np.stack(grid, axis=0).reshape([2, 1, gh, gw])
    emb_h = _sincos_1d(embed_dim // 2, grid[0])
    emb_w = _sincos_1d(embed_dim // 2, grid[1])
    return np.concatenate([emb_h, emb_w], axis=1).astype(np.float32)  # (L, D)


# --------------------------- in-kernel building blocks ------------------------
def _layer_norm(x, w, b):
    mu = jnp.mean(x, axis=-1, keepdims=True)
    var = jnp.mean(x * x, axis=-1, keepdims=True) - mu * mu     # single data pass
    return (x - mu) * lax.rsqrt(var + LN_EPS) * w + b


def _gelu_tanh(x):
    # tanh-approx GELU -> EUP slot instead of a long erf VPU polynomial.
    # TODO(synk): nn.GELU() default is the exact erf form; ~1e-3 abs difference.
    c = 0.7978845608028654  # sqrt(2/pi)
    return 0.5 * x * (1.0 + jnp.tanh(c * (x + 0.044715 * x * x * x)))


def _transformer_block(x, qkv_w, proj_w, fc1_w, fc2_w, bv, num_heads, batch, seqlen):
    """timm-style pre-norm Block on a flattened (B*L, D) activation.

    bv is this block's (8, 128) vector slab:
      0 ln1_w | 1 ln1_b | 2 qkv_b | 3 proj_b | 4 ln2_w | 5 ln2_b | 6 fc1_b | 7 fc2_b
    The 1/sqrt(dh) attention scale is pre-folded into the Q columns of qkv_w/qkv_b.
    """
    dim = x.shape[-1]
    dh = dim // num_heads
    hidden = fc1_w.shape[-1]

    ln1_w, ln1_b = bv[0:1, :dim], bv[1:2, :dim]
    qkv_b = bv[2:3, :3 * dim]
    proj_b = bv[3:4, :dim]
    ln2_w, ln2_b = bv[4:5, :dim], bv[5:6, :dim]
    fc1_b = bv[6:7, :hidden]
    fc2_b = bv[7:8, :dim]

    # ---------------- attention -------------------------------------------
    xn = _layer_norm(x, ln1_w, ln1_b)
    qkv = jnp.dot(xn, qkv_w, preferred_element_type=jnp.float32) + qkv_b   # (B*L, 3D)

    # stack all heads along the leading (batch) axis -> one einsum pair total
    q_p, k_p, v_p = [], [], []
    for h in range(num_heads):
        q_p.append(qkv[:, h * dh:(h + 1) * dh].reshape(batch, seqlen, dh))
        k_p.append(qkv[:, dim + h * dh: dim + (h + 1) * dh].reshape(batch, seqlen, dh))
        v_p.append(qkv[:, 2 * dim + h * dh: 2 * dim + (h + 1) * dh].reshape(batch, seqlen, dh))
    q = jnp.concatenate(q_p, axis=0)                                       # (H*B, L, dh)
    k = jnp.concatenate(k_p, axis=0)
    v = jnp.concatenate(v_p, axis=0)

    s = jnp.einsum("bld,bkd->blk", q, k, preferred_element_type=jnp.float32)
    s = s - jnp.max(s, axis=-1, keepdims=True)
    e = jnp.exp(s)
    p = e * pl.reciprocal(jnp.sum(e, axis=-1, keepdims=True), approx=True)
    o = jnp.einsum("blk,bkd->bld", p, v, preferred_element_type=jnp.float32)  # (H*B, L, dh)

    attn = jnp.concatenate(
        [o[h * batch:(h + 1) * batch].reshape(batch * seqlen, dh) for h in range(num_heads)],
        axis=-1)                                                           # (B*L, D)
    x = x + jnp.dot(attn, proj_w, preferred_element_type=jnp.float32) + proj_b

    # ---------------- MLP ---------------------------------------------------
    xn2 = _layer_norm(x, ln2_w, ln2_b)
    h1 = _gelu_tanh(jnp.dot(xn2, fc1_w, preferred_element_type=jnp.float32) + fc1_b)
    x = x + jnp.dot(h1, fc2_w, preferred_element_type=jnp.float32) + fc2_b
    return x


# ------------------------------ fused forward kernel --------------------------
def _fused_forward_kernel(patches_r, target_r, pos_r, pe_w_r, pred_w_r,
                          qkv_w_r, proj_w_r, fc1_w_r, fc2_w_r, blk_vecs_r, misc_r,
                          pred_ref, loss_ref, *,
                          depth, dec_depth, heads, dec_heads, batch, seqlen, dim, patch_dim):
    mv = misc_r[...]                                 # (8, 128) misc vector slab
    pe_b = mv[0:1, :dim]
    norm_w, norm_b = mv[1:2, :dim], mv[2:3, :dim]
    dnorm_w, dnorm_b = mv[3:4, :dim], mv[4:5, :dim]
    pred_b = mv[5:6, :]                              # lane-padded (zeros past patch_dim)

    pos = pos_r[...]                                 # (2L, D): [0,L)=pos, [L,2L)=dec pos

    def add_pos(x, p):                               # in-kernel batch broadcast
        return (x.reshape(batch, seqlen, dim) + p[None]).reshape(batch * seqlen, dim)

    def run_block(x, b, nheads):
        return _transformer_block(x, qkv_w_r[b], proj_w_r[b], fc1_w_r[b], fc2_w_r[b],
                                  blk_vecs_r[b], nheads, batch, seqlen)

    # -------- forward_encoder --------
    x = jnp.dot(patches_r[...], pe_w_r[...],
                preferred_element_type=jnp.float32) + pe_b        # patch embed
    x = add_pos(x, pos[0:seqlen])
    for b in range(depth):
        x = run_block(x, b, heads)
    x = _layer_norm(x, norm_w, norm_b)

    # -------- forward_decoder --------
    x = add_pos(x, pos[seqlen:2 * seqlen])
    for b in range(depth, depth + dec_depth):
        x = run_block(x, b, dec_heads)
    x = _layer_norm(x, dnorm_w, dnorm_b)
    pred = jnp.dot(x, pred_w_r[...], preferred_element_type=jnp.float32) + pred_b
    pred_ref[...] = pred                             # lane-dense (B*L, 128) store

    # -------- compute_pix_loss (pixel_type='SR', norm_pix_loss=False) --------
    d = pred[:, :patch_dim] - target_r[...]
    per_patch = jnp.mean(d * d, axis=-1, keepdims=True)           # (B*L, 1)
    # mask = ones -> (loss*mask).sum()/mask.sum() == mean over patches
    loss_ref[...] = jnp.mean(per_patch, axis=0, keepdims=True)    # (1, 1)


# ------------------------------- glue (plain JAX) ----------------------------
def conv_patchify(imgs, p, q):
    # Conv2d(kernel=patch, stride=patch) input unrolling: per-patch pixels in
    # (c, ph, pw) order -> (N, L, C*p*q)
    N, C, H, W = imgs.shape
    h, w = H // p, W // q
    x = imgs.reshape(N, C, h, p, w, q)
    x = jnp.transpose(x, (0, 2, 4, 1, 3, 5))          # n h w c p q
    return x.reshape(N, h * w, C * p * q)


def mae_patchify(imgs, p, q):
    # UniPixelViT.patchify: nchpwq -> nhwpqc -> (N, L, p*q*3)
    N, C, H, W = imgs.shape
    h, w = H // p, W // q
    x = imgs.reshape(N, C, h, p, w, q)
    x = jnp.transpose(x, (0, 2, 4, 3, 5, 1))          # n h w p q c
    return x.reshape(N, h * w, p * q * C)


# ------------------------------ parameter init -------------------------------
def _xavier(key, shape, fan_in, fan_out):
    a = math.sqrt(6.0 / (fan_in + fan_out))
    return jax.random.uniform(key, shape, jnp.float32, -a, a)


def _init_block(key, dim, mlp_ratio):
    hidden = int(dim * mlp_ratio)
    k1, k2, k3, k4 = jax.random.split(key, 4)
    return dict(
        ln1_w=jnp.ones((1, dim), jnp.float32),
        ln1_b=jnp.zeros((1, dim), jnp.float32),
        qkv_w=_xavier(k1, (dim, 3 * dim), dim, 3 * dim),     # stored (in, out)
        qkv_b=jnp.zeros((1, 3 * dim), jnp.float32),
        proj_w=_xavier(k2, (dim, dim), dim, dim),
        proj_b=jnp.zeros((1, dim), jnp.float32),
        ln2_w=jnp.ones((1, dim), jnp.float32),
        ln2_b=jnp.zeros((1, dim), jnp.float32),
        fc1_w=_xavier(k3, (dim, hidden), dim, hidden),
        fc1_b=jnp.zeros((1, hidden), jnp.float32),
        fc2_w=_xavier(k4, (hidden, dim), hidden, dim),
        fc2_b=jnp.zeros((1, dim), jnp.float32),
    )


def init_params(key):
    keys = jax.random.split(key, 2 + DEPTH + DEC_DEPTH)
    k_pe, k_pred = keys[0], keys[1]
    enc_keys = keys[2:2 + DEPTH]
    dec_keys = keys[2 + DEPTH:]
    patch_in = IN_CH * PATCH[0] * PATCH[1]
    return dict(
        # PatchEmbed conv weight, xavier on flattened view (as in the module)
        pe_w=_xavier(k_pe, (patch_in, EMBED), patch_in, EMBED),
        # TODO(synk): torch Conv2d default (uniform) bias init kept as zeros
        pe_b=jnp.zeros((1, EMBED), jnp.float32),
        pos_embed=jnp.asarray(get_2d_sincos_pos_embed(EMBED, (NUM_H, NUM_W)))[None],
        enc_blocks=[_init_block(k, EMBED, MLP_RATIO) for k in enc_keys],
        norm_w=jnp.ones((1, EMBED), jnp.float32),
        norm_b=jnp.zeros((1, EMBED), jnp.float32),
        dec_pos_embed=jnp.asarray(get_2d_sincos_pos_embed(DEC_EMBED, (NUM_H, NUM_W)))[None],
        dec_blocks=[_init_block(k, DEC_EMBED, MLP_RATIO) for k in dec_keys],
        dnorm_w=jnp.ones((1, DEC_EMBED), jnp.float32),
        dnorm_b=jnp.zeros((1, DEC_EMBED), jnp.float32),
        pred_w=_xavier(k_pred, (DEC_EMBED, PATCH_DIM), DEC_EMBED, PATCH_DIM),
        pred_b=jnp.zeros((1, PATCH_DIM), jnp.float32),
    )


# ----------------------- pack params into a few DMA slabs ---------------------
def _pad_row(v):
    v = jnp.reshape(v, (-1,))
    return jnp.pad(v, (0, LANE - v.shape[0]))


def pack_params(params):
    dim = EMBED
    dh = dim // HEADS
    scale = 1.0 / math.sqrt(dh)
    blocks = list(params["enc_blocks"]) + list(params["dec_blocks"])

    qkv_w_all, proj_w_all, fc1_w_all, fc2_w_all, blk_vecs = [], [], [], [], []
    for blk in blocks:
        # fold the attention scale into the Q columns (weights + bias)
        qkv_w = jnp.concatenate([blk["qkv_w"][:, :dim] * scale, blk["qkv_w"][:, dim:]], axis=1)
        qkv_b = jnp.concatenate([blk["qkv_b"][:, :dim] * scale, blk["qkv_b"][:, dim:]], axis=1)
        qkv_w_all.append(qkv_w)
        proj_w_all.append(blk["proj_w"])
        fc1_w_all.append(blk["fc1_w"])
        fc2_w_all.append(blk["fc2_w"])
        rows = [blk["ln1_w"], blk["ln1_b"], qkv_b, blk["proj_b"],
                blk["ln2_w"], blk["ln2_b"], blk["fc1_b"], blk["fc2_b"]]
        blk_vecs.append(jnp.stack([_pad_row(r) for r in rows], axis=0))     # (8, 128)

    misc_rows = [params["pe_b"], params["norm_w"], params["norm_b"],
                 params["dnorm_w"], params["dnorm_b"], params["pred_b"],
                 jnp.zeros((LANE,), jnp.float32), jnp.zeros((LANE,), jnp.float32)]
    misc = jnp.stack([_pad_row(r) for r in misc_rows], axis=0)              # (8, 128)

    pred_w_pad = jnp.pad(params["pred_w"], ((0, 0), (0, LANE - PATCH_DIM)))  # (D, 128)
    pos_all = jnp.concatenate([params["pos_embed"][0], params["dec_pos_embed"][0]], axis=0)

    return dict(
        pe_w=params["pe_w"],                      # (48, 32)
        pred_w=pred_w_pad,                        # (32, 128)
        pos_all=pos_all,                          # (2L, 32)
        qkv_w=jnp.stack(qkv_w_all, axis=0),       # (NBLK, 32, 96)
        proj_w=jnp.stack(proj_w_all, axis=0),     # (NBLK, 32, 32)
        fc1_w=jnp.stack(fc1_w_all, axis=0),       # (NBLK, 32, 128)
        fc2_w=jnp.stack(fc2_w_all, axis=0),       # (NBLK, 128, 32)
        blk_vecs=jnp.stack(blk_vecs, axis=0),     # (NBLK, 8, 128)
        misc=misc,                                # (8, 128)
    )


# --------------------------------- forward -----------------------------------
@jax.jit
def forward(packed, imgs, gt):
    Bn = imgs.shape[0]
    # layout-only work (patchify) stays in XLA; everything compute-heavy runs
    # in one fused pallas_call with a handful of large VMEM-resident inputs.
    patches = conv_patchify(imgs, PATCH[0], PATCH[1]).reshape(Bn * L, -1)
    target = mae_patchify(gt, PATCH[0], PATCH[1]).reshape(Bn * L, PATCH_DIM)

    inputs = [patches, target, packed["pos_all"], packed["pe_w"], packed["pred_w"],
              packed["qkv_w"], packed["proj_w"], packed["fc1_w"], packed["fc2_w"],
              packed["blk_vecs"], packed["misc"]]
    vmem = pl.BlockSpec(memory_space=pltpu.MemorySpace.VMEM)

    pred_pad, loss = pl.pallas_call(
        partial(_fused_forward_kernel,
                depth=DEPTH, dec_depth=DEC_DEPTH,
                heads=HEADS, dec_heads=DEC_HEADS,
                batch=Bn, seqlen=L, dim=EMBED, patch_dim=PATCH_DIM),
        out_shape=(jax.ShapeDtypeStruct((Bn * L, LANE), jnp.float32),   # lane-padded pred
                   jax.ShapeDtypeStruct((1, 1), jnp.float32)),
        in_specs=[vmem] * len(inputs),
        out_specs=(vmem, vmem),
    )(*inputs)

    pred = pred_pad[:, :PATCH_DIM].reshape(Bn, L, PATCH_DIM)
    return loss[0, 0], pred


if __name__ == "__main__":
    key = jax.random.PRNGKey(0)
    k_param, k_img, k_gt = jax.random.split(key, 3)
    params = init_params(k_param)
    packed = pack_params(params)
    imgs = jax.random.normal(k_img, (B, IN_CH, IMG[0], IMG[1]), jnp.float32)
    gt = jax.random.normal(k_gt, (B, IN_CH, IMG[0], IMG[1]), jnp.float32)

    loss, pred = forward(packed, imgs, gt)
    jax.block_until_ready((loss, pred))
    loss_outputs = {"loss": float(loss)}        # mirrors loss.item()
    assert pred.shape == (B, L, PATCH_DIM)
    print("KERNEL_OK")
</pallas_src>

<mosaic_0001>
module attributes {stable_mosaic.version = 11 : i64} {
  func.func @_fused_forward_kernel(%arg0: memref<32x48xf32, #tpu.memory_space<vmem>>, %arg1: memref<32x48xf32, #tpu.memory_space<vmem>>, %arg2: memref<32x32xf32, #tpu.memory_space<vmem>>, %arg3: memref<48x32xf32, #tpu.memory_space<vmem>>, %arg4: memref<32x128xf32, #tpu.memory_space<vmem>>, %arg5: memref<4x32x96xf32, #tpu.memory_space<vmem>>, %arg6: memref<4x32x32xf32, #tpu.memory_space<vmem>>, %arg7: memref<4x32x128xf32, #tpu.memory_space<vmem>>, %arg8: memref<4x128x32xf32, #tpu.memory_space<vmem>>, %arg9: memref<4x8x128xf32, #tpu.memory_space<vmem>>, %arg10: memref<8x128xf32, #tpu.memory_space<vmem>>, %arg11: memref<32x128xf32, #tpu.memory_space<vmem>>, %arg12: memref<1x1xf32, #tpu.memory_space<vmem>>) attributes {dimension_semantics = [], scalar_prefetch = 0 : i64, scratch_operands = 0 : i64, tpu.core_type = #tpu.core_type<tc>} {
    %c0 = arith.constant 0 : index
    %c0_0 = arith.constant 0 : index
    %0 = vector.load %arg10[%c0, %c0_0] : memref<8x128xf32, #tpu.memory_space<vmem>>, vector<8x128xf32>
    %1 = vector.extract_strided_slice %0 {offsets = [0, 0], sizes = [1, 32], strides = [1, 1]} : vector<8x128xf32> to vector<1x32xf32>
    %2 = vector.extract_strided_slice %0 {offsets = [1, 0], sizes = [1, 32], strides = [1, 1]} : vector<8x128xf32> to vector<1x32xf32>
    %3 = vector.extract_strided_slice %0 {offsets = [2, 0], sizes = [1, 32], strides = [1, 1]} : vector<8x128xf32> to vector<1x32xf32>
    %4 = vector.extract_strided_slice %0 {offsets = [3, 0], sizes = [1, 32], strides = [1, 1]} : vector<8x128xf32> to vector<1x32xf32>
    %5 = vector.extract_strided_slice %0 {offsets = [4, 0], sizes = [1, 32], strides = [1, 1]} : vector<8x128xf32> to vector<1x32xf32>
    %6 = vector.extract_strided_slice %0 {offsets = [5, 0], sizes = [1, 128], strides = [1, 1]} : vector<8x128xf32> to vector<1x128xf32>
    %c0_1 = arith.constant 0 : index
    %c0_2 = arith.constant 0 : index
    %7 = vector.load %arg2[%c0_1, %c0_2] : memref<32x32xf32, #tpu.memory_space<vmem>>, vector<32x32xf32>
    %c0_3 = arith.constant 0 : index
    %c0_4 = arith.constant 0 : index
    %8 = vector.load %arg0[%c0_3, %c0_4] : memref<32x48xf32, #tpu.memory_space<vmem>>, vector<32x48xf32>
    %c0_5 = arith.constant 0 : index
    %c0_6 = arith.constant 0 : index
    %9 = vector.load %arg3[%c0_5, %c0_6] : memref<48x32xf32, #tpu.memory_space<vmem>>, vector<48x32xf32>
    %cst = arith.constant dense<0.000000e+00> : vector<32x32xf32>
    %10 = tpu.matmul %8, %9, %cst {dimension_numbers = #tpu.dot_dimension_numbers<[1], [0], [0], [1], [0, 0, 1, 1], [], []>} : vector<32x48xf32>, vector<48x32xf32>, vector<32x32xf32> -> vector<32x32xf32>
    %11 = vector.broadcast %1 : vector<1x32xf32> to vector<32x32xf32>
    %12 = arith.addf %10, %11 : vector<32x32xf32>
    %13 = vector.extract_strided_slice %7 {offsets = [0, 0], sizes = [16, 32], strides = [1, 1]} : vector<32x32xf32> to vector<16x32xf32>
    %14 = vector.shape_cast %12 : vector<32x32xf32> to vector<2x16x32xf32>
    %15 = vector.shape_cast %13 : vector<16x32xf32> to vector<1x16x32xf32>
    %16 = vector.broadcast %15 : vector<1x16x32xf32> to vector<2x16x32xf32>
    %17 = arith.addf %14, %16 : vector<2x16x32xf32>
    %18 = vector.shape_cast %17 : vector<2x16x32xf32> to vector<32x32xf32>
    %c0_7 = arith.constant 0 : index
    %c0_8 = arith.constant 0 : index
    %c0_9 = arith.constant 0 : index
    %19 = vector.load %arg5[%c0_7, %c0_8, %c0_9] : memref<4x32x96xf32, #tpu.memory_space<vmem>>, vector<1x32x96xf32>
    %20 = vector.shape_cast %19 : vector<1x32x96xf32> to vector<32x96xf32>
    %c0_10 = arith.constant 0 : index
    %c0_11 = arith.constant 0 : index
    %c0_12 = arith.constant 0 : index
    %21 = vector.load %arg6[%c0_10, %c0_11, %c0_12] : memref<4x32x32xf32, #tpu.memory_space<vmem>>, vector<1x32x32xf32>
    %22 = vector.shape_cast %21 : vector<1x32x32xf32> to vector<32x32xf32>
    %c0_13 = arith.constant 0 : index
    %c0_14 = arith.constant 0 : index
    %c0_15 = arith.constant 0 : index
    %23 = vector.load %arg7[%c0_13, %c0_14, %c0_15] : memref<4x32x128xf32, #tpu.memory_space<vmem>>, vector<1x32x128xf32>
    %24 = vector.shape_cast %23 : vector<1x32x128xf32> to vector<32x128xf32>
    %c0_16 = arith.constant 0 : index
    %c0_17 = arith.constant 0 : index
    %c0_18 = arith.constant 0 : index
    %25 = vector.load %arg8[%c0_16, %c0_17, %c0_18] : memref<4x128x32xf32, #tpu.memory_space<vmem>>, vector<1x128x32xf32>
    %26 = vector.shape_cast %25 : vector<1x128x32xf32> to vector<128x32xf32>
    %c0_19 = arith.constant 0 : index
    %c0_20 = arith.constant 0 : index
    %c0_21 = arith.constant 0 : index
    %27 = vector.load %arg9[%c0_19, %c0_20, %c0_21] : memref<4x8x128xf32, #tpu.memory_space<vmem>>, vector<1x8x128xf32>
    %28 = vector.shape_cast %27 : vector<1x8x128xf32> to vector<8x128xf32>
    %29 = vector.extract_strided_slice %28 {offsets = [0, 0], sizes = [1, 32], strides = [1, 1]} : vector<8x128xf32> to vector<1x32xf32>
    %30 = vector.extract_strided_slice %28 {offsets = [1, 0], sizes = [1, 32], strides = [1, 1]} : vector<8x128xf32> to vector<1x32xf32>
    %31 = vector.extract_strided_slice %28 {offsets = [2, 0], sizes = [1, 96], strides = [1, 1]} : vector<8x128xf32> to vector<1x96xf32>
    %32 = vector.extract_strided_slice %28 {offsets = [3, 0], sizes = [1, 32], strides = [1, 1]} : vector<8x128xf32> to vector<1x32xf32>
    %33 = vector.extract_strided_slice %28 {offsets = [4, 0], sizes = [1, 32], strides = [1, 1]} : vector<8x128xf32> to vector<1x32xf32>
    %34 = vector.extract_strided_slice %28 {offsets = [5, 0], sizes = [1, 32], strides = [1, 1]} : vector<8x128xf32> to vector<1x32xf32>
    %35 = vector.extract_strided_slice %28 {offsets = [6, 0], sizes = [1, 128], strides = [1, 1]} : vector<8x128xf32> to vector<1x128xf32>
    %36 = vector.extract_strided_slice %28 {offsets = [7, 0], sizes = [1, 32], strides = [1, 1]} : vector<8x128xf32> to vector<1x32xf32>
    %cst_22 = arith.constant dense<0.000000e+00> : vector<32xf32>
    %37 = vector.multi_reduction <add>, %18, %cst_22 [1] : vector<32x32xf32> to vector<32xf32>
    %38 = vector.shape_cast %37 : vector<32xf32> to vector<32x1xf32>
    %cst_23 = arith.constant 3.200000e+01 : f32
    %39 = vector.broadcast %cst_23 : f32 to vector<32x1xf32>
    %40 = arith.divf %38, %39 : vector<32x1xf32>
    %41 = arith.mulf %18, %18 : vector<32x32xf32>
    %cst_24 = arith.constant dense<0.000000e+00> : vector<32xf32>
    %42 = vector.multi_reduction <add>, %41, %cst_24 [1] : vector<32x32xf32> to vector<32xf32>
    %43 = vector.shape_cast %42 : vector<32xf32> to vector<32x1xf32>
    %cst_25 = arith.constant 3.200000e+01 : f32
    %44 = vector.broadcast %cst_25 : f32 to vector<32x1xf32>
    %45 = arith.divf %43, %44 : vector<32x1xf32>
    %46 = arith.mulf %40, %40 : vector<32x1xf32>
    %47 = arith.subf %45, %46 : vector<32x1xf32>
    %48 = vector.broadcast %40 : vector<32x1xf32> to vector<32x32xf32>
    %49 = arith.subf %18, %48 : vector<32x32xf32>
    %cst_26 = arith.constant 9.99999974E-6 : f32
    %50 = vector.broadcast %cst_26 : f32 to vector<32x1xf32>
    %51 = arith.addf %47, %50 : vector<32x1xf32>
    %52 = math.rsqrt %51 : vector<32x1xf32>
    %53 = vector.broadcast %52 : vector<32x1xf32> to vector<32x32xf32>
    %54 = arith.mulf %49, %53 : vector<32x32xf32>
    %55 = vector.broadcast %29 : vector<1x32xf32> to vector<32x32xf32>
    %56 = arith.mulf %54, %55 : vector<32x32xf32>
    %57 = vector.broadcast %30 : vector<1x32xf32> to vector<32x32xf32>
    %58 = arith.addf %56, %57 : vector<32x32xf32>
    %cst_27 = arith.constant dense<0.000000e+00> : vector<32x96xf32>
    %59 = tpu.matmul %58, %20, %cst_27 {dimension_numbers = #tpu.dot_dimension_numbers<[1], [0], [0], [1], [0, 0, 1, 1], [], []>} : vector<32x32xf32>, vector<32x96xf32>, vector<32x96xf32> -> vector<32x96xf32>
    %60 = vector.broadcast %31 : vector<1x96xf32> to vector<32x96xf32>
    %61 = arith.addf %59, %60 : vector<32x96xf32>
    %62 = vector.extract_strided_slice %61 {offsets = [0, 0], sizes = [32, 8], strides = [1, 1]} : vector<32x96xf32> to vector<32x8xf32>
    %63 = vector.shape_cast %62 : vector<32x8xf32> to vector<2x16x8xf32>
    %64 = vector.extract_strided_slice %61 {offsets = [0, 32], sizes = [32, 8], strides = [1, 1]} : vector<32x96xf32> to vector<32x8xf32>
    %65 = vector.shape_cast %64 : vector<32x8xf32> to vector<2x16x8xf32>
    %66 = vector.extract_strided_slice %61 {offsets = [0, 64], sizes = [32, 8], strides = [1, 1]} : vector<32x96xf32> to vector<32x8xf32>
    %67 = vector.shape_cast %66 : vector<32x8xf32> to vector<2x16x8xf32>
    %68 = vector.extract_strided_slice %61 {offsets = [0, 8], sizes = [32, 8], strides = [1, 1]} : vector<32x96xf32> to vector<32x8xf32>
    %69 = vector.shape_cast %68 : vector<32x8xf32> to vector<2x16x8xf32>
    %70 = vector.extract_strided_slice %61 {offsets = [0, 40], sizes = [32, 8], strides = [1, 1]} : vector<32x96xf32> to vector<32x8xf32>
    %71 = vector.shape_cast %70 : vector<32x8xf32> to vector<2x16x8xf32>
    %72 = vector.extract_strided_slice %61 {offsets = [0, 72], sizes = [32, 8], strides = [1, 1]} : vector<32x96xf32> to vector<32x8xf32>
    %73 = vector.shape_cast %72 : vector<32x8xf32> to vector<2x16x8xf32>
    %74 = vector.extract_strided_slice %61 {offsets = [0, 16], sizes = [32, 8], strides = [1, 1]} : vector<32x96xf32> to vector<32x8xf32>
    %75 = vector.shape_cast %74 : vector<32x8xf32> to vector<2x16x8xf32>
    %76 = vector.extract_strided_slice %61 {offsets = [0, 48], sizes = [32, 8], strides = [1, 1]} : vector<32x96xf32> to vector<32x8xf32>
    %77 = vector.shape_cast %76 : vector<32x8xf32> to vector<2x16x8xf32>
    %78 = vector.extract_strided_slice %61 {offsets = [0, 80], sizes = [32, 8], strides = [1, 1]} : vector<32x96xf32> to vector<32x8xf32>
    %79 = vector.shape_cast %78 : vector<32x8xf32> to vector<2x16x8xf32>
    %80 = vector.extract_strided_slice %61 {offsets = [0, 24], sizes = [32, 8], strides = [1, 1]} : vector<32x96xf32> to vector<32x8xf32>
    %81 = vector.shape_cast %80 : vector<32x8xf32> to vector<2x16x8xf32>
    %82 = vector.extract_strided_slice %61 {offsets = [0, 56], sizes = [32, 8], strides = [1, 1]} : vector<32x96xf32> to vector<32x8xf32>
    %83 = vector.shape_cast %82 : vector<32x8xf32> to vector<2x16x8xf32>
    %84 = vector.extract_strided_slice %61 {offsets = [0, 88], sizes = [32, 8], strides = [1, 1]} : vector<32x96xf32> to vector<32x8xf32>
    %85 = vector.shape_cast %84 : vector<32x8xf32> to vector<2x16x8xf32>
    %86 = tpu.concatenate %63, %69, %75, %81 in 0 : vector<2x16x8xf32>, vector<2x16x8xf32>, vector<2x16x8xf32>, vector<2x16x8xf32> -> vector<8x16x8xf32>
    %87 = tpu.concatenate %65, %71, %77, %83 in 0 : vector<2x16x8xf32>, vector<2x16x8xf32>, vector<2x16x8xf32>, vector<2x16x8xf32> -> vector<8x16x8xf32>
    %88 = tpu.concatenate %67, %73, %79, %85 in 0 : vector<2x16x8xf32>, vector<2x16x8xf32>, vector<2x16x8xf32>, vector<2x16x8xf32> -> vector<8x16x8xf32>
    "tpu.trace_start"() <{level = 10 : i32, message = "bld,bkd->blk"}> : () -> ()
    %cst_28 = arith.constant dense<0.000000e+00> : vector<8x16x16xf32>
    %89 = tpu.matmul %86, %87, %cst_28 {dimension_numbers = #tpu.dot_dimension_numbers<[2], [2], [1], [1], [0, 0, 0, 1, 1, 1], [0], [0]>} : vector<8x16x8xf32>, vector<8x16x8xf32>, vector<8x16x16xf32> -> vector<8x16x16xf32>
    "tpu.trace_stop"() : () -> ()
    %cst_29 = arith.constant dense<0xFF800000> : vector<8x16xf32>
    %90 = vector.multi_reduction <maximumf>, %89, %cst_29 [2] : vector<8x16x16xf32> to vector<8x16xf32>
    %91 = vector.shape_cast %90 : vector<8x16xf32> to vector<8x16x1xf32>
    %92 = vector.broadcast %91 : vector<8x16x1xf32> to vector<8x16x16xf32>
    %93 = arith.subf %89, %92 : vector<8x16x16xf32>
    %94 = math.exp %93 : vector<8x16x16xf32>
    %cst_30 = arith.constant dense<0.000000e+00> : vector<8x16xf32>
    %95 = vector.multi_reduction <add>, %94, %cst_30 [2] : vector<8x16x16xf32> to vector<8x16xf32>
    %96 = vector.shape_cast %95 : vector<8x16xf32> to vector<8x16x1xf32>
    %97 = tpu.reciprocal %96 {approx = true} : vector<8x16x1xf32> -> vector<8x16x1xf32>
    %98 = vector.broadcast %97 : vector<8x16x1xf32> to vector<8x16x16xf32>
    %99 = arith.mulf %94, %98 : vector<8x16x16xf32>
    "tpu.trace_start"() <{level = 10 : i32, message = "blk,bkd->bld"}> : () -> ()
    %cst_31 = arith.constant dense<0.000000e+00> : vector<8x16x8xf32>
    %100 = tpu.matmul %99, %88, %cst_31 {dimension_numbers = #tpu.dot_dimension_numbers<[2], [1], [1], [2], [0, 0, 0, 1, 1, 2], [0], [0]>} : vector<8x16x16xf32>, vector<8x16x8xf32>, vector<8x16x8xf32> -> vector<8x16x8xf32>
    "tpu.trace_stop"() : () -> ()
    %101 = vector.extract_strided_slice %100 {offsets = [0, 0, 0], sizes = [2, 16, 8], strides = [1, 1, 1]} : vector<8x16x8xf32> to vector<2x16x8xf32>
    %102 = vector.shape_cast %101 : vector<2x16x8xf32> to vector<32x8xf32>
    %103 = vector.extract_strided_slice %100 {offsets = [2, 0, 0], sizes = [2, 16, 8], strides = [1, 1, 1]} : vector<8x16x8xf32> to vector<2x16x8xf32>
    %104 = vector.shape_cast %103 : vector<2x16x8xf32> to vector<32x8xf32>
    %105 = vector.extract_strided_slice %100 {offsets = [4, 0, 0], sizes = [2, 16, 8], strides = [1, 1, 1]} : vector<8x16x8xf32> to vector<2x16x8xf32>
    %106 = vector.shape_cast %105 : vector<2x16x8xf32> to vector<32x8xf32>
    %107 = vector.extract_strided_slice %100 {offsets = [6, 0, 0], sizes = [2, 16, 8], strides = [1, 1, 1]} : vector<8x16x8xf32> to vector<2x16x8xf32>
    %108 = vector.shape_cast %107 : vector<2x16x8xf32> to vector<32x8xf32>
    %109 = tpu.concatenate %102, %104, %106, %108 in 1 : vector<32x8xf32>, vector<32x8xf32>, vector<32x8xf32>, vector<32x8xf32> -> vector<32x32xf32>
    %cst_32 = arith.constant dense<0.000000e+00> : vector<32x32xf32>
    %110 = tpu.matmul %109, %22, %cst_32 {dimension_numbers = #tpu.dot_dimension_numbers<[1], [0], [0], [1], [0, 0, 1, 1], [], []>} : vector<32x32xf32>, vector<32x32xf32>, vector<32x32xf32> -> vector<32x32xf32>
    %111 = arith.addf %18, %110 : vector<32x32xf32>
    %112 = vector.broadcast %32 : vector<1x32xf32> to vector<32x32xf32>
    %113 = arith.addf %111, %112 : vector<32x32xf32>
    %cst_33 = arith.constant dense<0.000000e+00> : vector<32xf32>
    %114 = vector.multi_reduction <add>, %113, %cst_33 [1] : vector<32x32xf32> to vector<32xf32>
    %115 = vector.shape_cast %114 : vector<32xf32> to vector<32x1xf32>
    %cst_34 = arith.constant 3.200000e+01 : f32
    %116 = vector.broadcast %cst_34 : f32 to vector<32x1xf32>
    %117 = arith.divf %115, %116 : vector<32x1xf32>
    %118 = arith.mulf %113, %113 : vector<32x32xf32>
    %cst_35 = arith.constant dense<0.000000e+00> : vector<32xf32>
    %119 = vector.multi_reduction <add>, %118, %cst_35 [1] : vector<32x32xf32> to vector<32xf32>
    %120 = vector.shape_cast %119 : vector<32xf32> to vector<32x1xf32>
    %cst_36 = arith.constant 3.200000e+01 : f32
    %121 = vector.broadcast %cst_36 : f32 to vector<32x1xf32>
    %122 = arith.divf %120, %121 : vector<32x1xf32>
    %123 = arith.mulf %117, %117 : vector<32x1xf32>
    %124 = arith.subf %122, %123 : vector<32x1xf32>
    %125 = vector.broadcast %117 : vector<32x1xf32> to vector<32x32xf32>
    %126 = arith.subf %113, %125 : vector<32x32xf32>
    %cst_37 = arith.constant 9.99999974E-6 : f32
    %127 = vector.broadcast %cst_37 : f32 to vector<32x1xf32>
    %128 = arith.addf %124, %127 : vector<32x1xf32>
    %129 = math.rsqrt %128 : vector<32x1xf32>
    %130 = vector.broadcast %129 : vector<32x1xf32> to vector<32x32xf32>
    %131 = arith.mulf %126, %130 : vector<32x32xf32>
    %132 = vector.broadcast %33 : vector<1x32xf32> to vector<32x32xf32>
    %133 = arith.mulf %131, %132 : vector<32x32xf32>
    %134 = vector.broadcast %34 : vector<1x32xf32> to vector<32x32xf32>
    %135 = arith.addf %133, %134 : vector<32x32xf32>
    %cst_38 = arith.constant dense<0.000000e+00> : vector<32x128xf32>
    %136 = tpu.matmul %135, %24, %cst_38 {dimension_numbers = #tpu.dot_dimension_numbers<[1], [0], [0], [1], [0, 0, 1, 1], [], []>} : vector<32x32xf32>, vector<32x128xf32>, vector<32x128xf32> -> vector<32x128xf32>
    %137 = vector.broadcast %35 : vector<1x128xf32> to vector<32x128xf32>
    %138 = arith.addf %136, %137 : vector<32x128xf32>
    %cst_39 = arith.constant 5.000000e-01 : f32
    %139 = vector.broadcast %cst_39 : f32 to vector<32x128xf32>
    %140 = arith.mulf %139, %138 : vector<32x128xf32>
    %cst_40 = arith.constant 4.471500e-02 : f32
    %141 = vector.broadcast %cst_40 : f32 to vector<32x128xf32>
    %142 = arith.mulf %141, %138 : vector<32x128xf32>
    %143 = arith.mulf %142, %138 : vector<32x128xf32>
    %144 = arith.mulf %143, %138 : vector<32x128xf32>
    %145 = arith.addf %138, %144 : vector<32x128xf32>
    %cst_41 = arith.constant 0.797884583 : f32
    %146 = vector.broadcast %cst_41 : f32 to vector<32x128xf32>
    %147 = arith.mulf %146, %145 : vector<32x128xf32>
    %148 = math.tanh %147 : vector<32x128xf32>
    %cst_42 = arith.constant 1.000000e+00 : f32
    %149 = vector.broadcast %cst_42 : f32 to vector<32x128xf32>
    %150 = arith.addf %149, %148 : vector<32x128xf32>
    %151 = arith.mulf %140, %150 : vector<32x128xf32>
    %cst_43 = arith.constant dense<0.000000e+00> : vector<32x32xf32>
    %152 = tpu.matmul %151, %26, %cst_43 {dimension_numbers = #tpu.dot_dimension_numbers<[1], [0], [0], [1], [0, 0, 1, 1], [], []>} : vector<32x128xf32>, vector<128x32xf32>, vector<32x32xf32> -> vector<32x32xf32>
    %153 = arith.addf %113, %152 : vector<32x32xf32>
    %154 = vector.broadcast %36 : vector<1x32xf32> to vector<32x32xf32>
    %155 = arith.addf %153, %154 : vector<32x32xf32>
    %c1 = arith.constant 1 : index
    %c0_44 = arith.constant 0 : index
    %c0_45 = arith.constant 0 : index
    %156 = vector.load %arg5[%c1, %c0_44, %c0_45] : memref<4x32x96xf32, #tpu.memory_space<vmem>>, vector<1x32x96xf32>
    %157 = vector.shape_cast %156 : vector<1x32x96xf32> to vector<32x96xf32>
    %c1_46 = arith.constant 1 : index
    %c0_47 = arith.constant 0 : index
    %c0_48 = arith.constant 0 : index
    %158 = vector.load %arg6[%c1_46, %c0_47, %c0_48] : memref<4x32x32xf32, #tpu.memory_space<vmem>>, vector<1x32x32xf32>
    %159 = vector.shape_cast %158 : vector<1x32x32xf32> to vector<32x32xf32>
    %c1_49 = arith.constant 1 : index
    %c0_50 = arith.constant 0 : index
    %c0_51 = arith.constant 0 : index
    %160 = vector.load %arg7[%c1_49, %c0_50, %c0_51] : memref<4x32x128xf32, #tpu.memory_space<vmem>>, vector<1x32x128xf32>
    %161 = vector.shape_cast %160 : vector<1x32x128xf32> to vector<32x128xf32>
    %c1_52 = arith.constant 1 : index
    %c0_53 = arith.constant 0 : index
    %c0_54 = arith.constant 0 : index
    %162 = vector.load %arg8[%c1_52, %c0_53, %c0_54] : memref<4x128x32xf32, #tpu.memory_space<vmem>>, vector<1x128x32xf32>
    %163 = vector.shape_cast %162 : vector<1x128x32xf32> to vector<128x32xf32>
    %c1_55 = arith.constant 1 : index
    %c0_56 = arith.constant 0 : index
    %c0_57 = arith.constant 0 : index
    %164 = vector.load %arg9[%c1_55, %c0_56, %c0_57] : memref<4x8x128xf32, #tpu.memory_space<vmem>>, vector<1x8x128xf32>
    %165 = vector.shape_cast %164 : vector<1x8x128xf32> to vector<8x128xf32>
    %166 = vector.extract_strided_slice %165 {offsets = [0, 0], sizes = [1, 32], strides = [1, 1]} : vector<8x128xf32> to vector<1x32xf32>
    %167 = vector.extract_strided_slice %165 {offsets = [1, 0], sizes = [1, 32], strides = [1, 1]} : vector<8x128xf32> to vector<1x32xf32>
    %168 = vector.extract_strided_slice %165 {offsets = [2, 0], sizes = [1, 96], strides = [1, 1]} : vector<8x128xf32> to vector<1x96xf32>
    %169 = vector.extract_strided_slice %165 {offsets = [3, 0], sizes = [1, 32], strides = [1, 1]} : vector<8x128xf32> to vector<1x32xf32>
    %170 = vector.extract_strided_slice %165 {offsets = [4, 0], sizes = [1, 32], strides = [1, 1]} : vector<8x128xf32> to vector<1x32xf32>
    %171 = vector.extract_strided_slice %165 {offsets = [5, 0], sizes = [1, 32], strides = [1, 1]} : vector<8x128xf32> to vector<1x32xf32>
    %172 = vector.extract_strided_slice %165 {offsets = [6, 0], sizes = [1, 128], strides = [1, 1]} : vector<8x128xf32> to vector<1x128xf32>
    %173 = vector.extract_strided_slice %165 {offsets = [7, 0], sizes = [1, 32], strides = [1, 1]} : vector<8x128xf32> to vector<1x32xf32>
    %cst_58 = arith.constant dense<0.000000e+00> : vector<32xf32>
    %174 = vector.multi_reduction <add>, %155, %cst_58 [1] : vector<32x32xf32> to vector<32xf32>
    %175 = vector.shape_cast %174 : vector<32xf32> to vector<32x1xf32>
    %cst_59 = arith.constant 3.200000e+01 : f32
    %176 = vector.broadcast %cst_59 : f32 to vector<32x1xf32>
    %177 = arith.divf %175, %176 : vector<32x1xf32>
    %178 = arith.mulf %155, %155 : vector<32x32xf32>
    %cst_60 = arith.constant dense<0.000000e+00> : vector<32xf32>
    %179 = vector.multi_reduction <add>, %178, %cst_60 [1] : vector<32x32xf32> to vector<32xf32>
    %180 = vector.shape_cast %179 : vector<32xf32> to vector<32x1xf32>
    %cst_61 = arith.constant 3.200000e+01 : f32
    %181 = vector.broadcast %cst_61 : f32 to vector<32x1xf32>
    %182 = arith.divf %180, %181 : vector<32x1xf32>
    %183 = arith.mulf %177, %177 : vector<32x1xf32>
    %184 = arith.subf %182, %183 : vector<32x1xf32>
    %185 = vector.broadcast %177 : vector<32x1xf32> to vector<32x32xf32>
    %186 = arith.subf %155, %185 : vector<32x32xf32>
    %cst_62 = arith.constant 9.99999974E-6 : f32
    %187 = vector.broadcast %cst_62 : f32 to vector<32x1xf32>
    %188 = arith.addf %184, %187 : vector<32x1xf32>
    %189 = math.rsqrt %188 : vector<32x1xf32>
    %190 = vector.broadcast %189 : vector<32x1xf32> to vector<32x32xf32>
    %191 = arith.mulf %186, %190 : vector<32x32xf32>
    %192 = vector.broadcast %166 : vector<1x32xf32> to vector<32x32xf32>
    %193 = arith.mulf %191, %192 : vector<32x32xf32>
    %194 = vector.broadcast %167 : vector<1x32xf32> to vector<32x32xf32>
    %195 = arith.addf %193, %194 : vector<32x32xf32>
    %cst_63 = arith.constant dense<0.000000e+00> : vector<32x96xf32>
    %196 = tpu.matmul %195, %157, %cst_63 {dimension_numbers = #tpu.dot_dimension_numbers<[1], [0], [0], [1], [0, 0, 1, 1], [], []>} : vector<32x32xf32>, vector<32x96xf32>, vector<32x96xf32> -> vector<32x96xf32>
    %197 = vector.broadcast %168 : vector<1x96xf32> to vector<32x96xf32>
    %198 = arith.addf %196, %197 : vector<32x96xf32>
    %199 = vector.extract_strided_slice %198 {offsets = [0, 0], sizes = [32, 8], strides = [1, 1]} : vector<32x96xf32> to vector<32x8xf32>
    %200 = vector.shape_cast %199 : vector<32x8xf32> to vector<2x16x8xf32>
    %201 = vector.extract_strided_slice %198 {offsets = [0, 32], sizes = [32, 8], strides = [1, 1]} : vector<32x96xf32> to vector<32x8xf32>
    %202 = vector.shape_cast %201 : vector<32x8xf32> to vector<2x16x8xf32>
    %203 = vector.extract_strided_slice %198 {offsets = [0, 64], sizes = [32, 8], strides = [1, 1]} : vector<32x96xf32> to vector<32x8xf32>
    %204 = vector.shape_cast %203 : vector<32x8xf32> to vector<2x16x8xf32>
    %205 = vector.extract_strided_slice %198 {offsets = [0, 8], sizes = [32, 8], strides = [1, 1]} : vector<32x96xf32> to vector<32x8xf32>
    %206 = vector.shape_cast %205 : vector<32x8xf32> to vector<2x16x8xf32>
    %207 = vector.extract_strided_slice %198 {offsets = [0, 40], sizes = [32, 8], strides = [1, 1]} : vector<32x96xf32> to vector<32x8xf32>
    %208 = vector.shape_cast %207 : vector<32x8xf32> to vector<2x16x8xf32>
    %209 = vector.extract_strided_slice %198 {offsets = [0, 72], sizes = [32, 8], strides = [1, 1]} : vector<32x96xf32> to vector<32x8xf32>
    %210 = vector.shape_cast %209 : vector<32x8xf32> to vector<2x16x8xf32>
    %211 = vector.extract_strided_slice %198 {offsets = [0, 16], sizes = [32, 8], strides = [1, 1]} : vector<32x96xf32> to vector<32x8xf32>
    %212 = vector.shape_cast %211 : vector<32x8xf32> to vector<2x16x8xf32>
    %213 = vector.extract_strided_slice %198 {offsets = [0, 48], sizes = [32, 8], strides = [1, 1]} : vector<32x96xf32> to vector<32x8xf32>
    %214 = vector.shape_cast %213 : vector<32x8xf32> to vector<2x16x8xf32>
    %215 = vector.extract_strided_slice %198 {offsets = [0, 80], sizes = [32, 8], strides = [1, 1]} : vector<32x96xf32> to vector<32x8xf32>
    %216 = vector.shape_cast %215 : vector<32x8xf32> to vector<2x16x8xf32>
    %217 = vector.extract_strided_slice %198 {offsets = [0, 24], sizes = [32, 8], strides = [1, 1]} : vector<32x96xf32> to vector<32x8xf32>
    %218 = vector.shape_cast %217 : vector<32x8xf32> to vector<2x16x8xf32>
    %219 = vector.extract_strided_slice %198 {offsets = [0, 56], sizes = [32, 8], strides = [1, 1]} : vector<32x96xf32> to vector<32x8xf32>
    %220 = vector.shape_cast %219 : vector<32x8xf32> to vector<2x16x8xf32>
    %221 = vector.extract_strided_slice %198 {offsets = [0, 88], sizes = [32, 8], strides = [1, 1]} : vector<32x96xf32> to vector<32x8xf32>
    %222 = vector.shape_cast %221 : vector<32x8xf32> to vector<2x16x8xf32>
    %223 = tpu.concatenate %200, %206, %212, %218 in 0 : vector<2x16x8xf32>, vector<2x16x8xf32>, vector<2x16x8xf32>, vector<2x16x8xf32> -> vector<8x16x8xf32>
    %224 = tpu.concatenate %202, %208, %214, %220 in 0 : vector<2x16x8xf32>, vector<2x16x8xf32>, vector<2x16x8xf32>, vector<2x16x8xf32> -> vector<8x16x8xf32>
    %225 = tpu.concatenate %204, %210, %216, %222 in 0 : vector<2x16x8xf32>, vector<2x16x8xf32>, vector<2x16x8xf32>, vector<2x16x8xf32> -> vector<8x16x8xf32>
    "tpu.trace_start"() <{level = 10 : i32, message = "bld,bkd->blk"}> : () -> ()
    %cst_64 = arith.constant dense<0.000000e+00> : vector<8x16x16xf32>
    %226 = tpu.matmul %223, %224, %cst_64 {dimension_numbers = #tpu.dot_dimension_numbers<[2], [2], [1], [1], [0, 0, 0, 1, 1, 1], [0], [0]>} : vector<8x16x8xf32>, vector<8x16x8xf32>, vector<8x16x16xf32> -> vector<8x16x16xf32>
    "tpu.trace_stop"() : () -> ()
    %cst_65 = arith.constant dense<0xFF800000> : vector<8x16xf32>
    %227 = vector.multi_reduction <maximumf>, %226, %cst_65 [2] : vector<8x16x16xf32> to vector<8x16xf32>
    %228 = vector.shape_cast %227 : vector<8x16xf32> to vector<8x16x1xf32>
    %229 = vector.broadcast %228 : vector<8x16x1xf32> to vector<8x16x16xf32>
    %230 = arith.subf %226, %229 : vector<8x16x16xf32>
    %231 = math.exp %230 : vector<8x16x16xf32>
    %cst_66 = arith.constant dense<0.000000e+00> : vector<8x16xf32>
    %232 = vector.multi_reduction <add>, %231, %cst_66 [2] : vector<8x16x16xf32> to vector<8x16xf32>
    %233 = vector.shape_cast %232 : vector<8x16xf32> to vector<8x16x1xf32>
    %234 = tpu.reciprocal %233 {approx = true} : vector<8x16x1xf32> -> vector<8x16x1xf32>
    %235 = vector.broadcast %234 : vector<8x16x1xf32> to vector<8x16x16xf32>
    %236 = arith.mulf %231, %235 : vector<8x16x16xf32>
    "tpu.trace_start"() <{level = 10 : i32, message = "blk,bkd->bld"}> : () -> ()
    %cst_67 = arith.constant dense<0.000000e+00> : vector<8x16x8xf32>
    %237 = tpu.matmul %236, %225, %cst_67 {dimension_numbers = #tpu.dot_dimension_numbers<[2], [1], [1], [2], [0, 0, 0, 1, 1, 2], [0], [0]>} : vector<8x16x16xf32>, vector<8x16x8xf32>, vector<8x16x8xf32> -> vector<8x16x8xf32>
    "tpu.trace_stop"() : () -> ()
    %238 = vector.extract_strided_slice %237 {offsets = [0, 0, 0], sizes = [2, 16, 8], strides = [1, 1, 1]} : vector<8x16x8xf32> to vector<2x16x8xf32>
    %239 = vector.shape_cast %238 : vector<2x16x8xf32> to vector<32x8xf32>
    %240 = vector.extract_strided_slice %237 {offsets = [2, 0, 0], sizes = [2, 16, 8], strides = [1, 1, 1]} : vector<8x16x8xf32> to vector<2x16x8xf32>
    %241 = vector.shape_cast %240 : vector<2x16x8xf32> to vector<32x8xf32>
    %242 = vector.extract_strided_slice %237 {offsets = [4, 0, 0], sizes = [2, 16, 8], strides = [1, 1, 1]} : vector<8x16x8xf32> to vector<2x16x8xf32>
    %243 = vector.shape_cast %242 : vector<2x16x8xf32> to vector<32x8xf32>
    %244 = vector.extract_strided_slice %237 {offsets = [6, 0, 0], sizes = [2, 16, 8], strides = [1, 1, 1]} : vector<8x16x8xf32> to vector<2x16x8xf32>
    %245 = vector.shape_cast %244 : vector<2x16x8xf32> to vector<32x8xf32>
    %246 = tpu.concatenate %239, %241, %243, %245 in 1 : vector<32x8xf32>, vector<32x8xf32>, vector<32x8xf32>, vector<32x8xf32> -> vector<32x32xf32>
    %cst_68 = arith.constant dense<0.000000e+00> : vector<32x32xf32>
    %247 = tpu.matmul %246, %159, %cst_68 {dimension_numbers = #tpu.dot_dimension_numbers<[1], [0], [0], [1], [0, 0, 1, 1], [], []>} : vector<32x32xf32>, vector<32x32xf32>, vector<32x32xf32> -> vector<32x32xf32>
    %248 = arith.addf %155, %247 : vector<32x32xf32>
    %249 = vector.broadcast %169 : vector<1x32xf32> to vector<32x32xf32>
    %250 = arith.addf %248, %249 : vector<32x32xf32>
    %cst_69 = arith.constant dense<0.000000e+00> : vector<32xf32>
    %251 = vector.multi_reduction <add>, %250, %cst_69 [1] : vector<32x32xf32> to vector<32xf32>
    %252 = vector.shape_cast %251 : vector<32xf32> to vector<32x1xf32>
    %cst_70 = arith.constant 3.200000e+01 : f32
    %253 = vector.broadcast %cst_70 : f32 to vector<32x1xf32>
    %254 = arith.divf %252, %253 : vector<32x1xf32>
    %255 = arith.mulf %250, %250 : vector<32x32xf32>
    %cst_71 = arith.constant dense<0.000000e+00> : vector<32xf32>
    %256 = vector.multi_reduction <add>, %255, %cst_71 [1] : vector<32x32xf32> to vector<32xf32>
    %257 = vector.shape_cast %256 : vector<32xf32> to vector<32x1xf32>
    %cst_72 = arith.constant 3.200000e+01 : f32
    %258 = vector.broadcast %cst_72 : f32 to vector<32x1xf32>
    %259 = arith.divf %257, %258 : vector<32x1xf32>
    %260 = arith.mulf %254, %254 : vector<32x1xf32>
    %261 = arith.subf %259, %260 : vector<32x1xf32>
    %262 = vector.broadcast %254 : vector<32x1xf32> to vector<32x32xf32>
    %263 = arith.subf %250, %262 : vector<32x32xf32>
    %cst_73 = arith.constant 9.99999974E-6 : f32
    %264 = vector.broadcast %cst_73 : f32 to vector<32x1xf32>
    %265 = arith.addf %261, %264 : vector<32x1xf32>
    %266 = math.rsqrt %265 : vector<32x1xf32>
    %267 = vector.broadcast %266 : vector<32x1xf32> to vector<32x32xf32>
    %268 = arith.mulf %263, %267 : vector<32x32xf32>
    %269 = vector.broadcast %170 : vector<1x32xf32> to vector<32x32xf32>
    %270 = arith.mulf %268, %269 : vector<32x32xf32>
    %271 = vector.broadcast %171 : vector<1x32xf32> to vector<32x32xf32>
    %272 = arith.addf %270, %271 : vector<32x32xf32>
    %cst_74 = arith.constant dense<0.000000e+00> : vector<32x128xf32>
    %273 = tpu.matmul %272, %161, %cst_74 {dimension_numbers = #tpu.dot_dimension_numbers<[1], [0], [0], [1], [0, 0, 1, 1], [], []>} : vector<32x32xf32>, vector<32x128xf32>, vector<32x128xf32> -> vector<32x128xf32>
    %274 = vector.broadcast %172 : vector<1x128xf32> to vector<32x128xf32>
    %275 = arith.addf %273, %274 : vector<32x128xf32>
    %cst_75 = arith.constant 5.000000e-01 : f32
    %276 = vector.broadcast %cst_75 : f32 to vector<32x128xf32>
    %277 = arith.mulf %276, %275 : vector<32x128xf32>
    %cst_76 = arith.constant 4.471500e-02 : f32
    %278 = vector.broadcast %cst_76 : f32 to vector<32x128xf32>
    %279 = arith.mulf %278, %275 : vector<32x128xf32>
    %280 = arith.mulf %279, %275 : vector<32x128xf32>
    %281 = arith.mulf %280, %275 : vector<32x128xf32>
    %282 = arith.addf %275, %281 : vector<32x128xf32>
    %cst_77 = arith.constant 0.797884583 : f32
    %283 = vector.broadcast %cst_77 : f32 to vector<32x128xf32>
    %284 = arith.mulf %283, %282 : vector<32x128xf32>
    %285 = math.tanh %284 : vector<32x128xf32>
    %cst_78 = arith.constant 1.000000e+00 : f32
    %286 = vector.broadcast %cst_78 : f32 to vector<32x128xf32>
    %287 = arith.addf %286, %285 : vector<32x128xf32>
    %288 = arith.mulf %277, %287 : vector<32x128xf32>
    %cst_79 = arith.constant dense<0.000000e+00> : vector<32x32xf32>
    %289 = tpu.matmul %288, %163, %cst_79 {dimension_numbers = #tpu.dot_dimension_numbers<[1], [0], [0], [1], [0, 0, 1, 1], [], []>} : vector<32x128xf32>, vector<128x32xf32>, vector<32x32xf32> -> vector<32x32xf32>
    %290 = arith.addf %250, %289 : vector<32x32xf32>
    %291 = vector.broadcast %173 : vector<1x32xf32> to vector<32x32xf32>
    %292 = arith.addf %290, %291 : vector<32x32xf32>
    %cst_80 = arith.constant dense<0.000000e+00> : vector<32xf32>
    %293 = vector.multi_reduction <add>, %292, %cst_80 [1] : vector<32x32xf32> to vector<32xf32>
    %294 = vector.shape_cast %293 : vector<32xf32> to vector<32x1xf32>
    %cst_81 = arith.constant 3.200000e+01 : f32
    %295 = vector.broadcast %cst_81 : f32 to vector<32x1xf32>
    %296 = arith.divf %294, %295 : vector<32x1xf32>
    %297 = arith.mulf %292, %292 : vector<32x32xf32>
    %cst_82 = arith.constant dense<0.000000e+00> : vector<32xf32>
    %298 = vector.multi_reduction <add>, %297, %cst_82 [1] : vector<32x32xf32> to vector<32xf32>
    %299 = vector.shape_cast %298 : vector<32xf32> to vector<32x1xf32>
    %cst_83 = arith.constant 3.200000e+01 : f32
    %300 = vector.broadcast %cst_83 : f32 to vector<32x1xf32>
    %301 = arith.divf %299, %300 : vector<32x1xf32>
    %302 = arith.mulf %296, %296 : vector<32x1xf32>
    %303 = arith.subf %301, %302 : vector<32x1xf32>
    %304 = vector.broadcast %296 : vector<32x1xf32> to vector<32x32xf32>
    %305 = arith.subf %292, %304 : vector<32x32xf32>
    %cst_84 = arith.constant 9.99999974E-6 : f32
    %306 = vector.broadcast %cst_84 : f32 to vector<32x1xf32>
    %307 = arith.addf %303, %306 : vector<32x1xf32>
    %308 = math.rsqrt %307 : vector<32x1xf32>
    %309 = vector.broadcast %308 : vector<32x1xf32> to vector<32x32xf32>
    %310 = arith.mulf %305, %309 : vector<32x32xf32>
    %311 = vector.broadcast %2 : vector<1x32xf32> to vector<32x32xf32>
    %312 = arith.mulf %310, %311 : vector<32x32xf32>
    %313 = vector.broadcast %3 : vector<1x32xf32> to vector<32x32xf32>
    %314 = arith.addf %312, %313 : vector<32x32xf32>
    %315 = vector.extract_strided_slice %7 {offsets = [16, 0], sizes = [16, 32], strides = [1, 1]} : vector<32x32xf32> to vector<16x32xf32>
    %316 = vector.shape_cast %314 : vector<32x32xf32> to vector<2x16x32xf32>
    %317 = vector.shape_cast %315 : vector<16x32xf32> to vector<1x16x32xf32>
    %318 = vector.broadcast %317 : vector<1x16x32xf32> to vector<2x16x32xf32>
    %319 = arith.addf %316, %318 : vector<2x16x32xf32>
    %320 = vector.shape_cast %319 : vector<2x16x32xf32> to vector<32x32xf32>
    %c2 = arith.constant 2 : index
    %c0_85 = arith.constant 0 : index
    %c0_86 = arith.constant 0 : index
    %321 = vector.load %arg5[%c2, %c0_85, %c0_86] : memref<4x32x96xf32, #tpu.memory_space<vmem>>, vector<1x32x96xf32>
    %322 = vector.shape_cast %321 : vector<1x32x96xf32> to vector<32x96xf32>
    %c2_87 = arith.constant 2 : index
    %c0_88 = arith.constant 0 : index
    %c0_89 = arith.constant 0 : index
    %323 = vector.load %arg6[%c2_87, %c0_88, %c0_89] : memref<4x32x32xf32, #tpu.memory_space<vmem>>, vector<1x32x32xf32>
    %324 = vector.shape_cast %323 : vector<1x32x32xf32> to vector<32x32xf32>
    %c2_90 = arith.constant 2 : index
    %c0_91 = arith.constant 0 : index
    %c0_92 = arith.constant 0 : index
    %325 = vector.load %arg7[%c2_90, %c0_91, %c0_92] : memref<4x32x128xf32, #tpu.memory_space<vmem>>, vector<1x32x128xf32>
    %326 = vector.shape_cast %325 : vector<1x32x128xf32> to vector<32x128xf32>
    %c2_93 = arith.constant 2 : index
    %c0_94 = arith.constant 0 : index
    %c0_95 = arith.constant 0 : index
    %327 = vector.load %arg8[%c2_93, %c0_94, %c0_95] : memref<4x128x32xf32, #tpu.memory_space<vmem>>, vector<1x128x32xf32>
    %328 = vector.shape_cast %327 : vector<1x128x32xf32> to vector<128x32xf32>
    %c2_96 = arith.constant 2 : index
    %c0_97 = arith.constant 0 : index
    %c0_98 = arith.constant 0 : index
    %329 = vector.load %arg9[%c2_96, %c0_97, %c0_98] : memref<4x8x128xf32, #tpu.memory_space<vmem>>, vector<1x8x128xf32>
    %330 = vector.shape_cast %329 : vector<1x8x128xf32> to vector<8x128xf32>
    %331 = vector.extract_strided_slice %330 {offsets = [0, 0], sizes = [1, 32], strides = [1, 1]} : vector<8x128xf32> to vector<1x32xf32>
    %332 = vector.extract_strided_slice %330 {offsets = [1, 0], sizes = [1, 32], strides = [1, 1]} : vector<8x128xf32> to vector<1x32xf32>
    %333 = vector.extract_strided_slice %330 {offsets = [2, 0], sizes = [1, 96], strides = [1, 1]} : vector<8x128xf32> to vector<1x96xf32>
    %334 = vector.extract_strided_slice %330 {offsets = [3, 0], sizes = [1, 32], strides = [1, 1]} : vector<8x128xf32> to vector<1x32xf32>
    %335 = vector.extract_strided_slice %330 {offsets = [4, 0], sizes = [1, 32], strides = [1, 1]} : vector<8x128xf32> to vector<1x32xf32>
    %336 = vector.extract_strided_slice %330 {offsets = [5, 0], sizes = [1, 32], strides = [1, 1]} : vector<8x128xf32> to vector<1x32xf32>
    %337 = vector.extract_strided_slice %330 {offsets = [6, 0], sizes = [1, 128], strides = [1, 1]} : vector<8x128xf32> to vector<1x128xf32>
    %338 = vector.extract_strided_slice %330 {offsets = [7, 0], sizes = [1, 32], strides = [1, 1]} : vector<8x128xf32> to vector<1x32xf32>
    %cst_99 = arith.constant dense<0.000000e+00> : vector<32xf32>
    %339 = vector.multi_reduction <add>, %320, %cst_99 [1] : vector<32x32xf32> to vector<32xf32>
    %340 = vector.shape_cast %339 : vector<32xf32> to vector<32x1xf32>
    %cst_100 = arith.constant 3.200000e+01 : f32
    %341 = vector.broadcast %cst_100 : f32 to vector<32x1xf32>
    %342 = arith.divf %340, %341 : vector<32x1xf32>
    %343 = arith.mulf %320, %320 : vector<32x32xf32>
    %cst_101 = arith.constant dense<0.000000e+00> : vector<32xf32>
    %344 = vector.multi_reduction <add>, %343, %cst_101 [1] : vector<32x32xf32> to vector<32xf32>
    %345 = vector.shape_cast %344 : vector<32xf32> to vector<32x1xf32>
    %cst_102 = arith.constant 3.200000e+01 : f32
    %346 = vector.broadcast %cst_102 : f32 to vector<32x1xf32>
    %347 = arith.divf %345, %346 : vector<32x1xf32>
    %348 = arith.mulf %342, %342 : vector<32x1xf32>
    %349 = arith.subf %347, %348 : vector<32x1xf32>
    %350 = vector.broadcast %342 : vector<32x1xf32> to vector<32x32xf32>
    %351 = arith.subf %320, %350 : vector<32x32xf32>
    %cst_103 = arith.constant 9.99999974E-6 : f32
    %352 = vector.broadcast %cst_103 : f32 to vector<32x1xf32>
    %353 = arith.addf %349, %352 : vector<32x1xf32>
    %354 = math.rsqrt %353 : vector<32x1xf32>
    %355 = vector.broadcast %354 : vector<32x1xf32> to vector<32x32xf32>
    %356 = arith.mulf %351, %355 : vector<32x32xf32>
    %357 = vector.broadcast %331 : vector<1x32xf32> to vector<32x32xf32>
    %358 = arith.mulf %356, %357 : vector<32x32xf32>
    %359 = vector.broadcast %332 : vector<1x32xf32> to vector<32x32xf32>
    %360 = arith.addf %358, %359 : vector<32x32xf32>
    %cst_104 = arith.constant dense<0.000000e+00> : vector<32x96xf32>
    %361 = tpu.matmul %360, %322, %cst_104 {dimension_numbers = #tpu.dot_dimension_numbers<[1], [0], [0], [1], [0, 0, 1, 1], [], []>} : vector<32x32xf32>, vector<32x96xf32>, vector<32x96xf32> -> vector<32x96xf32>
    %362 = vector.broadcast %333 : vector<1x96xf32> to vector<32x96xf32>
    %363 = arith.addf %361, %362 : vector<32x96xf32>
    %364 = vector.extract_strided_slice %363 {offsets = [0, 0], sizes = [32, 8], strides = [1, 1]} : vector<32x96xf32> to vector<32x8xf32>
    %365 = vector.shape_cast %364 : vector<32x8xf32> to vector<2x16x8xf32>
    %366 = vector.extract_strided_slice %363 {offsets = [0, 32], sizes = [32, 8], strides = [1, 1]} : vector<32x96xf32> to vector<32x8xf32>
    %367 = vector.shape_cast %366 : vector<32x8xf32> to vector<2x16x8xf32>
    %368 = vector.extract_strided_slice %363 {offsets = [0, 64], sizes = [32, 8], strides = [1, 1]} : vector<32x96xf32> to vector<32x8xf32>
    %369 = vector.shape_cast %368 : vector<32x8xf32> to vector<2x16x8xf32>
    %370 = vector.extract_strided_slice %363 {offsets = [0, 8], sizes = [32, 8], strides = [1, 1]} : vector<32x96xf32> to vector<32x8xf32>
    %371 = vector.shape_cast %370 : vector<32x8xf32> to vector<2x16x8xf32>
    %372 = vector.extract_strided_slice %363 {offsets = [0, 40], sizes = [32, 8], strides = [1, 1]} : vector<32x96xf32> to vector<32x8xf32>
    %373 = vector.shape_cast %372 : vector<32x8xf32> to vector<2x16x8xf32>
    %374 = vector.extract_strided_slice %363 {offsets = [0, 72], sizes = [32, 8], strides = [1, 1]} : vector<32x96xf32> to vector<32x8xf32>
    %375 = vector.shape_cast %374 : vector<32x8xf32> to vector<2x16x8xf32>
    %376 = vector.extract_strided_slice %363 {offsets = [0, 16], sizes = [32, 8], strides = [1, 1]} : vector<32x96xf32> to vector<32x8xf32>
    %377 = vector.shape_cast %376 : vector<32x8xf32> to vector<2x16x8xf32>
    %378 = vector.extract_strided_slice %363 {offsets = [0, 48], sizes = [32, 8], strides = [1, 1]} : vector<32x96xf32> to vector<32x8xf32>
    %379 = vector.shape_cast %378 : vector<32x8xf32> to vector<2x16x8xf32>
    %380 = vector.extract_strided_slice %363 {offsets = [0, 80], sizes = [32, 8], strides = [1, 1]} : vector<32x96xf32> to vector<32x8xf32>
    %381 = vector.shape_cast %380 : vector<32x8xf32> to vector<2x16x8xf32>
    %382 = vector.extract_strided_slice %363 {offsets = [0, 24], sizes = [32, 8], strides = [1, 1]} : vector<32x96xf32> to vector<32x8xf32>
    %383 = vector.shape_cast %382 : vector<32x8xf32> to vector<2x16x8xf32>
    %384 = vector.extract_strided_slice %363 {offsets = [0, 56], sizes = [32, 8], strides = [1, 1]} : vector<32x96xf32> to vector<32x8xf32>
    %385 = vector.shape_cast %384 : vector<32x8xf32> to vector<2x16x8xf32>
    %386 = vector.extract_strided_slice %363 {offsets = [0, 88], sizes = [32, 8], strides = [1, 1]} : vector<32x96xf32> to vector<32x8xf32>
    %387 = vector.shape_cast %386 : vector<32x8xf32> to vector<2x16x8xf32>
    %388 = tpu.concatenate %365, %371, %377, %383 in 0 : vector<2x16x8xf32>, vector<2x16x8xf32>, vector<2x16x8xf32>, vector<2x16x8xf32> -> vector<8x16x8xf32>
    %389 = tpu.concatenate %367, %373, %379, %385 in 0 : vector<2x16x8xf32>, vector<2x16x8xf32>, vector<2x16x8xf32>, vector<2x16x8xf32> -> vector<8x16x8xf32>
    %390 = tpu.concatenate %369, %375, %381, %387 in 0 : vector<2x16x8xf32>, vector<2x16x8xf32>, vector<2x16x8xf32>, vector<2x16x8xf32> -> vector<8x16x8xf32>
    "tpu.trace_start"() <{level = 10 : i32, message = "bld,bkd->blk"}> : () -> ()
    %cst_105 = arith.constant dense<0.000000e+00> : vector<8x16x16xf32>
    %391 = tpu.matmul %388, %389, %cst_105 {dimension_numbers = #tpu.dot_dimension_numbers<[2], [2], [1], [1], [0, 0, 0, 1, 1, 1], [0], [0]>} : vector<8x16x8xf32>, vector<8x16x8xf32>, vector<8x16x16xf32> -> vector<8x16x16xf32>
    "tpu.trace_stop"() : () -> ()
    %cst_106 = arith.constant dense<0xFF800000> : vector<8x16xf32>
    %392 = vector.multi_reduction <maximumf>, %391, %cst_106 [2] : vector<8x16x16xf32> to vector<8x16xf32>
    %393 = vector.shape_cast %392 : vector<8x16xf32> to vector<8x16x1xf32>
    %394 = vector.broadcast %393 : vector<8x16x1xf32> to vector<8x16x16xf32>
    %395 = arith.subf %391, %394 : vector<8x16x16xf32>
    %396 = math.exp %395 : vector<8x16x16xf32>
    %cst_107 = arith.constant dense<0.000000e+00> : vector<8x16xf32>
    %397 = vector.multi_reduction <add>, %396, %cst_107 [2] : vector<8x16x16xf32> to vector<8x16xf32>
    %398 = vector.shape_cast %397 : vector<8x16xf32> to vector<8x16x1xf32>
    %399 = tpu.reciprocal %398 {approx = true} : vector<8x16x1xf32> -> vector<8x16x1xf32>
    %400 = vector.broadcast %399 : vector<8x16x1xf32> to vector<8x16x16xf32>
    %401 = arith.mulf %396, %400 : vector<8x16x16xf32>
    "tpu.trace_start"() <{level = 10 : i32, message = "blk,bkd->bld"}> : () -> ()
    %cst_108 = arith.constant dense<0.000000e+00> : vector<8x16x8xf32>
    %402 = tpu.matmul %401, %390, %cst_108 {dimension_numbers = #tpu.dot_dimension_numbers<[2], [1], [1], [2], [0, 0, 0, 1, 1, 2], [0], [0]>} : vector<8x16x16xf32>, vector<8x16x8xf32>, vector<8x16x8xf32> -> vector<8x16x8xf32>
    "tpu.trace_stop"() : () -> ()
    %403 = vector.extract_strided_slice %402 {offsets = [0, 0, 0], sizes = [2, 16, 8], strides = [1, 1, 1]} : vector<8x16x8xf32> to vector<2x16x8xf32>
    %404 = vector.shape_cast %403 : vector<2x16x8xf32> to vector<32x8xf32>
    %405 = vector.extract_strided_slice %402 {offsets = [2, 0, 0], sizes = [2, 16, 8], strides = [1, 1, 1]} : vector<8x16x8xf32> to vector<2x16x8xf32>
    %406 = vector.shape_cast %405 : vector<2x16x8xf32> to vector<32x8xf32>
    %407 = vector.extract_strided_slice %402 {offsets = [4, 0, 0], sizes = [2, 16, 8], strides = [1, 1, 1]} : vector<8x16x8xf32> to vector<2x16x8xf32>
    %408 = vector.shape_cast %407 : vector<2x16x8xf32> to vector<32x8xf32>
    %409 = vector.extract_strided_slice %402 {offsets = [6, 0, 0], sizes = [2, 16, 8], strides = [1, 1, 1]} : vector<8x16x8xf32> to vector<2x16x8xf32>
    %410 = vector.shape_cast %409 : vector<2x16x8xf32> to vector<32x8xf32>
    %411 = tpu.concatenate %404, %406, %408, %410 in 1 : vector<32x8xf32>, vector<32x8xf32>, vector<32x8xf32>, vector<32x8xf32> -> vector<32x32xf32>
    %cst_109 = arith.constant dense<0.000000e+00> : vector<32x32xf32>
    %412 = tpu.matmul %411, %324, %cst_109 {dimension_numbers = #tpu.dot_dimension_numbers<[1], [0], [0], [1], [0, 0, 1, 1], [], []>} : vector<32x32xf32>, vector<32x32xf32>, vector<32x32xf32> -> vector<32x32xf32>
    %413 = arith.addf %320, %412 : vector<32x32xf32>
    %414 = vector.broadcast %334 : vector<1x32xf32> to vector<32x32xf32>
    %415 = arith.addf %413, %414 : vector<32x32xf32>
    %cst_110 = arith.constant dense<0.000000e+00> : vector<32xf32>
    %416 = vector.multi_reduction <add>, %415, %cst_110 [1] : vector<32x32xf32> to vector<32xf32>
    %417 = vector.shape_cast %416 : vector<32xf32> to vector<32x1xf32>
    %cst_111 = arith.constant 3.200000e+01 : f32
    %418 = vector.broadcast %cst_111 : f32 to vector<32x1xf32>
    %419 = arith.divf %417, %418 : vector<32x1xf32>
    %420 = arith.mulf %415, %415 : vector<32x32xf32>
    %cst_112 = arith.constant dense<0.000000e+00> : vector<32xf32>
    %421 = vector.multi_reduction <add>, %420, %cst_112 [1] : vector<32x32xf32> to vector<32xf32>
    %422 = vector.shape_cast %421 : vector<32xf32> to vector<32x1xf32>
    %cst_113 = arith.constant 3.200000e+01 : f32
    %423 = vector.broadcast %cst_113 : f32 to vector<32x1xf32>
    %424 = arith.divf %422, %423 : vector<32x1xf32>
    %425 = arith.mulf %419, %419 : vector<32x1xf32>
    %426 = arith.subf %424, %425 : vector<32x1xf32>
    %427 = vector.broadcast %419 : vector<32x1xf32> to vector<32x32xf32>
    %428 = arith.subf %415, %427 : vector<32x32xf32>
    %cst_114 = arith.constant 9.99999974E-6 : f32
    %429 = vector.broadcast %cst_114 : f32 to vector<32x1xf32>
    %430 = arith.addf %426, %429 : vector<32x1xf32>
    %431 = math.rsqrt %430 : vector<32x1xf32>
    %432 = vector.broadcast %431 : vector<32x1xf32> to vector<32x32xf32>
    %433 = arith.mulf %428, %432 : vector<32x32xf32>
    %434 = vector.broadcast %335 : vector<1x32xf32> to vector<32x32xf32>
    %435 = arith.mulf %433, %434 : vector<32x32xf32>
    %436 = vector.broadcast %336 : vector<1x32xf32> to vector<32x32xf32>
    %437 = arith.addf %435, %436 : vector<32x32xf32>
    %cst_115 = arith.constant dense<0.000000e+00> : vector<32x128xf32>
    %438 = tpu.matmul %437, %326, %cst_115 {dimension_numbers = #tpu.dot_dimension_numbers<[1], [0], [0], [1], [0, 0, 1, 1], [], []>} : vector<32x32xf32>, vector<32x128xf32>, vector<32x128xf32> -> vector<32x128xf32>
    %439 = vector.broadcast %337 : vector<1x128xf32> to vector<32x128xf32>
    %440 = arith.addf %438, %439 : vector<32x128xf32>
    %cst_116 = arith.constant 5.000000e-01 : f32
    %441 = vector.broadcast %cst_116 : f32 to vector<32x128xf32>
    %442 = arith.mulf %441, %440 : vector<32x128xf32>
    %cst_117 = arith.constant 4.471500e-02 : f32
    %443 = vector.broadcast %cst_117 : f32 to vector<32x128xf32>
    %444 = arith.mulf %443, %440 : vector<32x128xf32>
    %445 = arith.mulf %444, %440 : vector<32x128xf32>
    %446 = arith.mulf %445, %440 : vector<32x128xf32>
    %447 = arith.addf %440, %446 : vector<32x128xf32>
    %cst_118 = arith.constant 0.797884583 : f32
    %448 = vector.broadcast %cst_118 : f32 to vector<32x128xf32>
    %449 = arith.mulf %448, %447 : vector<32x128xf32>
    %450 = math.tanh %449 : vector<32x128xf32>
    %cst_119 = arith.constant 1.000000e+00 : f32
    %451 = vector.broadcast %cst_119 : f32 to vector<32x128xf32>
    %452 = arith.addf %451, %450 : vector<32x128xf32>
    %453 = arith.mulf %442, %452 : vector<32x128xf32>
    %cst_120 = arith.constant dense<0.000000e+00> : vector<32x32xf32>
    %454 = tpu.matmul %453, %328, %cst_120 {dimension_numbers = #tpu.dot_dimension_numbers<[1], [0], [0], [1], [0, 0, 1, 1], [], []>} : vector<32x128xf32>, vector<128x32xf32>, vector<32x32xf32> -> vector<32x32xf32>
    %455 = arith.addf %415, %454 : vector<32x32xf32>
    %456 = vector.broadcast %338 : vector<1x32xf32> to vector<32x32xf32>
    %457 = arith.addf %455, %456 : vector<32x32xf32>
    %c3 = arith.constant 3 : index
    %c0_121 = arith.constant 0 : index
    %c0_122 = arith.constant 0 : index
    %458 = vector.load %arg5[%c3, %c0_121, %c0_122] : memref<4x32x96xf32, #tpu.memory_space<vmem>>, vector<1x32x96xf32>
    %459 = vector.shape_cast %458 : vector<1x32x96xf32> to vector<32x96xf32>
    %c3_123 = arith.constant 3 : index
    %c0_124 = arith.constant 0 : index
    %c0_125 = arith.constant 0 : index
    %460 = vector.load %arg6[%c3_123, %c0_124, %c0_125] : memref<4x32x32xf32, #tpu.memory_space<vmem>>, vector<1x32x32xf32>
    %461 = vector.shape_cast %460 : vector<1x32x32xf32> to vector<32x32xf32>
    %c3_126 = arith.constant 3 : index
    %c0_127 = arith.constant 0 : index
    %c0_128 = arith.constant 0 : index
    %462 = vector.load %arg7[%c3_126, %c0_127, %c0_128] : memref<4x32x128xf32, #tpu.memory_space<vmem>>, vector<1x32x128xf32>
    %463 = vector.shape_cast %462 : vector<1x32x128xf32> to vector<32x128xf32>
    %c3_129 = arith.constant 3 : index
    %c0_130 = arith.constant 0 : index
    %c0_131 = arith.constant 0 : index
    %464 = vector.load %arg8[%c3_129, %c0_130, %c0_131] : memref<4x128x32xf32, #tpu.memory_space<vmem>>, vector<1x128x32xf32>
    %465 = vector.shape_cast %464 : vector<1x128x32xf32> to vector<128x32xf32>
    %c3_132 = arith.constant 3 : index
    %c0_133 = arith.constant 0 : index
    %c0_134 = arith.constant 0 : index
    %466 = vector.load %arg9[%c3_132, %c0_133, %c0_134] : memref<4x8x128xf32, #tpu.memory_space<vmem>>, vector<1x8x128xf32>
    %467 = vector.shape_cast %466 : vector<1x8x128xf32> to vector<8x128xf32>
    %468 = vector.extract_strided_slice %467 {offsets = [0, 0], sizes = [1, 32], strides = [1, 1]} : vector<8x128xf32> to vector<1x32xf32>
    %469 = vector.extract_strided_slice %467 {offsets = [1, 0], sizes = [1, 32], strides = [1, 1]} : vector<8x128xf32> to vector<1x32xf32>
    %470 = vector.extract_strided_slice %467 {offsets = [2, 0], sizes = [1, 96], strides = [1, 1]} : vector<8x128xf32> to vector<1x96xf32>
    %471 = vector.extract_strided_slice %467 {offsets = [3, 0], sizes = [1, 32], strides = [1, 1]} : vector<8x128xf32> to vector<1x32xf32>
    %472 = vector.extract_strided_slice %467 {offsets = [4, 0], sizes = [1, 32], strides = [1, 1]} : vector<8x128xf32> to vector<1x32xf32>
    %473 = vector.extract_strided_slice %467 {offsets = [5, 0], sizes = [1, 32], strides = [1, 1]} : vector<8x128xf32> to vector<1x32xf32>
    %474 = vector.extract_strided_slice %467 {offsets = [6, 0], sizes = [1, 128], strides = [1, 1]} : vector<8x128xf32> to vector<1x128xf32>
    %475 = vector.extract_strided_slice %467 {offsets = [7, 0], sizes = [1, 32], strides = [1, 1]} : vector<8x128xf32> to vector<1x32xf32>
    %cst_135 = arith.constant dense<0.000000e+00> : vector<32xf32>
    %476 = vector.multi_reduction <add>, %457, %cst_135 [1] : vector<32x32xf32> to vector<32xf32>
    %477 = vector.shape_cast %476 : vector<32xf32> to vector<32x1xf32>
    %cst_136 = arith.constant 3.200000e+01 : f32
    %478 = vector.broadcast %cst_136 : f32 to vector<32x1xf32>
    %479 = arith.divf %477, %478 : vector<32x1xf32>
    %480 = arith.mulf %457, %457 : vector<32x32xf32>
    %cst_137 = arith.constant dense<0.000000e+00> : vector<32xf32>
    %481 = vector.multi_reduction <add>, %480, %cst_137 [1] : vector<32x32xf32> to vector<32xf32>
    %482 = vector.shape_cast %481 : vector<32xf32> to vector<32x1xf32>
    %cst_138 = arith.constant 3.200000e+01 : f32
    %483 = vector.broadcast %cst_138 : f32 to vector<32x1xf32>
    %484 = arith.divf %482, %483 : vector<32x1xf32>
    %485 = arith.mulf %479, %479 : vector<32x1xf32>
    %486 = arith.subf %484, %485 : vector<32x1xf32>
    %487 = vector.broadcast %479 : vector<32x1xf32> to vector<32x32xf32>
    %488 = arith.subf %457, %487 : vector<32x32xf32>
    %cst_139 = arith.constant 9.99999974E-6 : f32
    %489 = vector.broadcast %cst_139 : f32 to vector<32x1xf32>
    %490 = arith.addf %486, %489 : vector<32x1xf32>
    %491 = math.rsqrt %490 : vector<32x1xf32>
    %492 = vector.broadcast %491 : vector<32x1xf32> to vector<32x32xf32>
    %493 = arith.mulf %488, %492 : vector<32x32xf32>
    %494 = vector.broadcast %468 : vector<1x32xf32> to vector<32x32xf32>
    %495 = arith.mulf %493, %494 : vector<32x32xf32>
    %496 = vector.broadcast %469 : vector<1x32xf32> to vector<32x32xf32>
    %497 = arith.addf %495, %496 : vector<32x32xf32>
    %cst_140 = arith.constant dense<0.000000e+00> : vector<32x96xf32>
    %498 = tpu.matmul %497, %459, %cst_140 {dimension_numbers = #tpu.dot_dimension_numbers<[1], [0], [0], [1], [0, 0, 1, 1], [], []>} : vector<32x32xf32>, vector<32x96xf32>, vector<32x96xf32> -> vector<32x96xf32>
    %499 = vector.broadcast %470 : vector<1x96xf32> to vector<32x96xf32>
    %500 = arith.addf %498, %499 : vector<32x96xf32>
    %501 = vector.extract_strided_slice %500 {offsets = [0, 0], sizes = [32, 8], strides = [1, 1]} : vector<32x96xf32> to vector<32x8xf32>
    %502 = vector.shape_cast %501 : vector<32x8xf32> to vector<2x16x8xf32>
    %503 = vector.extract_strided_slice %500 {offsets = [0, 32], sizes = [32, 8], strides = [1, 1]} : vector<32x96xf32> to vector<32x8xf32>
    %504 = vector.shape_cast %503 : vector<32x8xf32> to vector<2x16x8xf32>
    %505 = vector.extract_strided_slice %500 {offsets = [0, 64], sizes = [32, 8], strides = [1, 1]} : vector<32x96xf32> to vector<32x8xf32>
    %506 = vector.shape_cast %505 : vector<32x8xf32> to vector<2x16x8xf32>
    %507 = vector.extract_strided_slice %500 {offsets = [0, 8], sizes = [32, 8], strides = [1, 1]} : vector<32x96xf32> to vector<32x8xf32>
    %508 = vector.shape_cast %507 : vector<32x8xf32> to vector<2x16x8xf32>
    %509 = vector.extract_strided_slice %500 {offsets = [0, 40], sizes = [32, 8], strides = [1, 1]} : vector<32x96xf32> to vector<32x8xf32>
    %510 = vector.shape_cast %509 : vector<32x8xf32> to vector<2x16x8xf32>
    %511 = vector.extract_strided_slice %500 {offsets = [0, 72], sizes = [32, 8], strides = [1, 1]} : vector<32x96xf32> to vector<32x8xf32>
    %512 = vector.shape_cast %511 : vector<32x8xf32> to vector<2x16x8xf32>
    %513 = vector.extract_strided_slice %500 {offsets = [0, 16], sizes = [32, 8], strides = [1, 1]} : vector<32x96xf32> to vector<32x8xf32>
    %514 = vector.shape_cast %513 : vector<32x8xf32> to vector<2x16x8xf32>
    %515 = vector.extract_strided_slice %500 {offsets = [0, 48], sizes = [32, 8], strides = [1, 1]} : vector<32x96xf32> to vector<32x8xf32>
    %516 = vector.shape_cast %515 : vector<32x8xf32> to vector<2x16x8xf32>
    %517 = vector.extract_strided_slice %500 {offsets = [0, 80], sizes = [32, 8], strides = [1, 1]} : vector<32x96xf32> to vector<32x8xf32>
    %518 = vector.shape_cast %517 : vector<32x8xf32> to vector<2x16x8xf32>
    %519 = vector.extract_strided_slice %500 {offsets = [0, 24], sizes = [32, 8], strides = [1, 1]} : vector<32x96xf32> to vector<32x8xf32>
    %520 = vector.shape_cast %519 : vector<32x8xf32> to vector<2x16x8xf32>
    %521 = vector.extract_strided_slice %500 {offsets = [0, 56], sizes = [32, 8], strides = [1, 1]} : vector<32x96xf32> to vector<32x8xf32>
    %522 = vector.shape_cast %521 : vector<32x8xf32> to vector<2x16x8xf32>
    %523 = vector.extract_strided_slice %500 {offsets = [0, 88], sizes = [32, 8], strides = [1, 1]} : vector<32x96xf32> to vector<32x8xf32>
    %524 = vector.shape_cast %523 : vector<32x8xf32> to vector<2x16x8xf32>
    %525 = tpu.concatenate %502, %508, %514, %520 in 0 : vector<2x16x8xf32>, vector<2x16x8xf32>, vector<2x16x8xf32>, vector<2x16x8xf32> -> vector<8x16x8xf32>
    %526 = tpu.concatenate %504, %510, %516, %522 in 0 : vector<2x16x8xf32>, vector<2x16x8xf32>, vector<2x16x8xf32>, vector<2x16x8xf32> -> vector<8x16x8xf32>
    %527 = tpu.concatenate %506, %512, %518, %524 in 0 : vector<2x16x8xf32>, vector<2x16x8xf32>, vector<2x16x8xf32>, vector<2x16x8xf32> -> vector<8x16x8xf32>
    "tpu.trace_start"() <{level = 10 : i32, message = "bld,bkd->blk"}> : () -> ()
    %cst_141 = arith.constant dense<0.000000e+00> : vector<8x16x16xf32>
    %528 = tpu.matmul %525, %526, %cst_141 {dimension_numbers = #tpu.dot_dimension_numbers<[2], [2], [1], [1], [0, 0, 0, 1, 1, 1], [0], [0]>} : vector<8x16x8xf32>, vector<8x16x8xf32>, vector<8x16x16xf32> -> vector<8x16x16xf32>
    "tpu.trace_stop"() : () -> ()
    %cst_142 = arith.constant dense<0xFF800000> : vector<8x16xf32>
    %529 = vector.multi_reduction <maximumf>, %528, %cst_142 [2] : vector<8x16x16xf32> to vector<8x16xf32>
    %530 = vector.shape_cast %529 : vector<8x16xf32> to vector<8x16x1xf32>
    %531 = vector.broadcast %530 : vector<8x16x1xf32> to vector<8x16x16xf32>
    %532 = arith.subf %528, %531 : vector<8x16x16xf32>
    %533 = math.exp %532 : vector<8x16x16xf32>
    %cst_143 = arith.constant dense<0.000000e+00> : vector<8x16xf32>
    %534 = vector.multi_reduction <add>, %533, %cst_143 [2] : vector<8x16x16xf32> to vector<8x16xf32>
    %535 = vector.shape_cast %534 : vector<8x16xf32> to vector<8x16x1xf32>
    %536 = tpu.reciprocal %535 {approx = true} : vector<8x16x1xf32> -> vector<8x16x1xf32>
    %537 = vector.broadcast %536 : vector<8x16x1xf32> to vector<8x16x16xf32>
    %538 = arith.mulf %533, %537 : vector<8x16x16xf32>
    "tpu.trace_start"() <{level = 10 : i32, message = "blk,bkd->bld"}> : () -> ()
    %cst_144 = arith.constant dense<0.000000e+00> : vector<8x16x8xf32>
    %539 = tpu.matmul %538, %527, %cst_144 {dimension_numbers = #tpu.dot_dimension_numbers<[2], [1], [1], [2], [0, 0, 0, 1, 1, 2], [0], [0]>} : vector<8x16x16xf32>, vector<8x16x8xf32>, vector<8x16x8xf32> -> vector<8x16x8xf32>
    "tpu.trace_stop"() : () -> ()
    %540 = vector.extract_strided_slice %539 {offsets = [0, 0, 0], sizes = [2, 16, 8], strides = [1, 1, 1]} : vector<8x16x8xf32> to vector<2x16x8xf32>
    %541 = vector.shape_cast %540 : vector<2x16x8xf32> to vector<32x8xf32>
    %542 = vector.extract_strided_slice %539 {offsets = [2, 0, 0], sizes = [2, 16, 8], strides = [1, 1, 1]} : vector<8x16x8xf32> to vector<2x16x8xf32>
    %543 = vector.shape_cast %542 : vector<2x16x8xf32> to vector<32x8xf32>
    %544 = vector.extract_strided_slice %539 {offsets = [4, 0, 0], sizes = [2, 16, 8], strides = [1, 1, 1]} : vector<8x16x8xf32> to vector<2x16x8xf32>
    %545 = vector.shape_cast %544 : vector<2x16x8xf32> to vector<32x8xf32>
    %546 = vector.extract_strided_slice %539 {offsets = [6, 0, 0], sizes = [2, 16, 8], strides = [1, 1, 1]} : vector<8x16x8xf32> to vector<2x16x8xf32>
    %547 = vector.shape_cast %546 : vector<2x16x8xf32> to vector<32x8xf32>
    %548 = tpu.concatenate %541, %543, %545, %547 in 1 : vector<32x8xf32>, vector<32x8xf32>, vector<32x8xf32>, vector<32x8xf32> -> vector<32x32xf32>
    %cst_145 = arith.constant dense<0.000000e+00> : vector<32x32xf32>
    %549 = tpu.matmul %548, %461, %cst_145 {dimension_numbers = #tpu.dot_dimension_numbers<[1], [0], [0], [1], [0, 0, 1, 1], [], []>} : vector<32x32xf32>, vector<32x32xf32>, vector<32x32xf32> -> vector<32x32xf32>
    %550 = arith.addf %457, %549 : vector<32x32xf32>
    %551 = vector.broadcast %471 : vector<1x32xf32> to vector<32x32xf32>
    %552 = arith.addf %550, %551 : vector<32x32xf32>
    %cst_146 = arith.constant dense<0.000000e+00> : vector<32xf32>
    %553 = vector.multi_reduction <add>, %552, %cst_146 [1] : vector<32x32xf32> to vector<32xf32>
    %554 = vector.shape_cast %553 : vector<32xf32> to vector<32x1xf32>
    %cst_147 = arith.constant 3.200000e+01 : f32
    %555 = vector.broadcast %cst_147 : f32 to vector<32x1xf32>
    %556 = arith.divf %554, %555 : vector<32x1xf32>
    %557 = arith.mulf %552, %552 : vector<32x32xf32>
    %cst_148 = arith.constant dense<0.000000e+00> : vector<32xf32>
    %558 = vector.multi_reduction <add>, %557, %cst_148 [1] : vector<32x32xf32> to vector<32xf32>
    %559 = vector.shape_cast %558 : vector<32xf32> to vector<32x1xf32>
    %cst_149 = arith.constant 3.200000e+01 : f32
    %560 = vector.broadcast %cst_149 : f32 to vector<32x1xf32>
    %561 = arith.divf %559, %560 : vector<32x1xf32>
    %562 = arith.mulf %556, %556 : vector<32x1xf32>
    %563 = arith.subf %561, %562 : vector<32x1xf32>
    %564 = vector.broadcast %556 : vector<32x1xf32> to vector<32x32xf32>
    %565 = arith.subf %552, %564 : vector<32x32xf32>
    %cst_150 = arith.constant 9.99999974E-6 : f32
    %566 = vector.broadcast %cst_150 : f32 to vector<32x1xf32>
    %567 = arith.addf %563, %566 : vector<32x1xf32>
    %568 = math.rsqrt %567 : vector<32x1xf32>
    %569 = vector.broadcast %568 : vector<32x1xf32> to vector<32x32xf32>
    %570 = arith.mulf %565, %569 : vector<32x32xf32>
    %571 = vector.broadcast %472 : vector<1x32xf32> to vector<32x32xf32>
    %572 = arith.mulf %570, %571 : vector<32x32xf32>
    %573 = vector.broadcast %473 : vector<1x32xf32> to vector<32x32xf32>
    %574 = arith.addf %572, %573 : vector<32x32xf32>
    %cst_151 = arith.constant dense<0.000000e+00> : vector<32x128xf32>
    %575 = tpu.matmul %574, %463, %cst_151 {dimension_numbers = #tpu.dot_dimension_numbers<[1], [0], [0], [1], [0, 0, 1, 1], [], []>} : vector<32x32xf32>, vector<32x128xf32>, vector<32x128xf32> -> vector<32x128xf32>
    %576 = vector.broadcast %474 : vector<1x128xf32> to vector<32x128xf32>
    %577 = arith.addf %575, %576 : vector<32x128xf32>
    %cst_152 = arith.constant 5.000000e-01 : f32
    %578 = vector.broadcast %cst_152 : f32 to vector<32x128xf32>
    %579 = arith.mulf %578, %577 : vector<32x128xf32>
    %cst_153 = arith.constant 4.471500e-02 : f32
    %580 = vector.broadcast %cst_153 : f32 to vector<32x128xf32>
    %581 = arith.mulf %580, %577 : vector<32x128xf32>
    %582 = arith.mulf %581, %577 : vector<32x128xf32>
    %583 = arith.mulf %582, %577 : vector<32x128xf32>
    %584 = arith.addf %577, %583 : vector<32x128xf32>
    %cst_154 = arith.constant 0.797884583 : f32
    %585 = vector.broadcast %cst_154 : f32 to vector<32x128xf32>
    %586 = arith.mulf %585, %584 : vector<32x128xf32>
    %587 = math.tanh %586 : vector<32x128xf32>
    %cst_155 = arith.constant 1.000000e+00 : f32
    %588 = vector.broadcast %cst_155 : f32 to vector<32x128xf32>
    %589 = arith.addf %588, %587 : vector<32x128xf32>
    %590 = arith.mulf %579, %589 : vector<32x128xf32>
    %cst_156 = arith.constant dense<0.000000e+00> : vector<32x32xf32>
    %591 = tpu.matmul %590, %465, %cst_156 {dimension_numbers = #tpu.dot_dimension_numbers<[1], [0], [0], [1], [0, 0, 1, 1], [], []>} : vector<32x128xf32>, vector<128x32xf32>, vector<32x32xf32> -> vector<32x32xf32>
    %592 = arith.addf %552, %591 : vector<32x32xf32>
    %593 = vector.broadcast %475 : vector<1x32xf32> to vector<32x32xf32>
    %594 = arith.addf %592, %593 : vector<32x32xf32>
    %cst_157 = arith.constant dense<0.000000e+00> : vector<32xf32>
    %595 = vector.multi_reduction <add>, %594, %cst_157 [1] : vector<32x32xf32> to vector<32xf32>
    %596 = vector.shape_cast %595 : vector<32xf32> to vector<32x1xf32>
    %cst_158 = arith.constant 3.200000e+01 : f32
    %597 = vector.broadcast %cst_158 : f32 to vector<32x1xf32>
    %598 = arith.divf %596, %597 : vector<32x1xf32>
    %599 = arith.mulf %594, %594 : vector<32x32xf32>
    %cst_159 = arith.constant dense<0.000000e+00> : vector<32xf32>
    %600 = vector.multi_reduction <add>, %599, %cst_159 [1] : vector<32x32xf32> to vector<32xf32>
    %601 = vector.shape_cast %600 : vector<32xf32> to vector<32x1xf32>
    %cst_160 = arith.constant 3.200000e+01 : f32
    %602 = vector.broadcast %cst_160 : f32 to vector<32x1xf32>
    %603 = arith.divf %601, %602 : vector<32x1xf32>
    %604 = arith.mulf %598, %598 : vector<32x1xf32>
    %605 = arith.subf %603, %604 : vector<32x1xf32>
    %606 = vector.broadcast %598 : vector<32x1xf32> to vector<32x32xf32>
    %607 = arith.subf %594, %606 : vector<32x32xf32>
    %cst_161 = arith.constant 9.99999974E-6 : f32
    %608 = vector.broadcast %cst_161 : f32 to vector<32x1xf32>
    %609 = arith.addf %605, %608 : vector<32x1xf32>
    %610 = math.rsqrt %609 : vector<32x1xf32>
    %611 = vector.broadcast %610 : vector<32x1xf32> to vector<32x32xf32>
    %612 = arith.mulf %607, %611 : vector<32x32xf32>
    %613 = vector.broadcast %4 : vector<1x32xf32> to vector<32x32xf32>
    %614 = arith.mulf %612, %613 : vector<32x32xf32>
    %615 = vector.broadcast %5 : vector<1x32xf32> to vector<32x32xf32>
    %616 = arith.addf %614, %615 : vector<32x32xf32>
    %c0_162 = arith.constant 0 : index
    %c0_163 = arith.constant 0 : index
    %617 = vector.load %arg4[%c0_162, %c0_163] : memref<32x128xf32, #tpu.memory_space<vmem>>, vector<32x128xf32>
    %cst_164 = arith.constant dense<0.000000e+00> : vector<32x128xf32>
    %618 = tpu.matmul %616, %617, %cst_164 {dimension_numbers = #tpu.dot_dimension_numbers<[1], [0], [0], [1], [0, 0, 1, 1], [], []>} : vector<32x32xf32>, vector<32x128xf32>, vector<32x128xf32> -> vector<32x128xf32>
    %619 = vector.broadcast %6 : vector<1x128xf32> to vector<32x128xf32>
    %620 = arith.addf %618, %619 : vector<32x128xf32>
    %c0_165 = arith.constant 0 : index
    %c0_166 = arith.constant 0 : index
    %621 = vector.load %arg11[%c0_165, %c0_166] : memref<32x128xf32, #tpu.memory_space<vmem>>, vector<32x128xf32>
    tpu.vector_store %arg11[%c0_165, %c0_166], %620 {strides = array<i32>} : memref<32x128xf32, #tpu.memory_space<vmem>>, vector<32x128xf32>,
    %622 = vector.extract_strided_slice %620 {offsets = [0, 0], sizes = [32, 48], strides = [1, 1]} : vector<32x128xf32> to vector<32x48xf32>
    %c0_167 = arith.constant 0 : index
    %c0_168 = arith.constant 0 : index
    %623 = vector.load %arg1[%c0_167, %c0_168] : memref<32x48xf32, #tpu.memory_space<vmem>>, vector<32x48xf32>
    %624 = arith.subf %622, %623 : vector<32x48xf32>
    %625 = arith.mulf %624, %624 : vector<32x48xf32>
    %cst_169 = arith.constant dense<0.000000e+00> : vector<32xf32>
    %626 = vector.multi_reduction <add>, %625, %cst_169 [1] : vector<32x48xf32> to vector<32xf32>
    %627 = vector.shape_cast %626 : vector<32xf32> to vector<32x1xf32>
    %cst_170 = arith.constant 4.800000e+01 : f32
    %628 = vector.broadcast %cst_170 : f32 to vector<32x1xf32>
    %629 = arith.divf %627, %628 : vector<32x1xf32>
    %cst_171 = arith.constant dense<0.000000e+00> : vector<1xf32>
    %630 = vector.multi_reduction <add>, %629, %cst_171 [0] : vector<32x1xf32> to vector<1xf32>
    %631 = vector.shape_cast %630 : vector<1xf32> to vector<1x1xf32>
    %cst_172 = arith.constant 3.200000e+01 : f32
    %632 = vector.broadcast %cst_172 : f32 to vector<1x1xf32>
    %633 = arith.divf %631, %632 : vector<1x1xf32>
    %c0_173 = arith.constant 0 : index
    %c0_174 = arith.constant 0 : index
    %634 = vector.load %arg12[%c0_173, %c0_174] : memref<1x1xf32, #tpu.memory_space<vmem>>, vector<1x1xf32>
    tpu.vector_store %arg12[%c0_173, %c0_174], %633 {strides = array<i32>} : memref<1x1xf32, #tpu.memory_space<vmem>>, vector<1x1xf32>,
    return
  }
}

</mosaic_0001>

<bundles_post_ra>
// kernel: forward.1
= control target key start
LH: loop header
LB: loop body
LE: loop exit
PB: predicated region body
PF: predicated region fallthrough
CT: control target
= control target key end

     0   :  { %18 = vsyncpa [#allocation3], 0  ;;  %vm61_vm0 = vcmask 392192   ;;  %s14159_s0 = inlined_call_operand.vmem [shape: f32[32,48], index: 0, kind: input, shape index: {}]   ;;  %s14160_s1 = inlined_call_operand.vmem [shape: f32[32,48], index: 1, kind: input, shape index: {}]   ;;  %s14161_s2 = inlined_call_operand.vmem [shape: f32[32,32], index: 2, kind: input, shape index: {}]   ;;  %s14162_s3 = inlined_call_operand.vmem [shape: f32[48,32], index: 3, kind: input, shape index: {}]   ;;  %s14163_s4 = inlined_call_operand.vmem [shape: f32[32,128], index: 4, kind: input, shape index: {}]   ;;  %s14164_s5 = inlined_call_operand.vmem [shape: f32[4,32,96], index: 5, kind: input, shape index: {}]   ;;  %s14165_s6 = inlined_call_operand.vmem [shape: f32[4,32,32], index: 6, kind: input, shape index: {}]   ;;  %s14166_s7 = inlined_call_operand.vmem [shape: f32[4,32,128], index: 7, kind: input, shape index: {}]   ;;  %s14167_s8 = inlined_call_operand.vmem [shape: f32[4,128,32], index: 8, kind: input, shape index: {}]   ;;  %s14168_s9 = inlined_call_operand.vmem [shape: f32[4,8,128], index: 9, kind: input, shape index: {}]   ;;  %s14169_s10 = inlined_call_operand.vmem [shape: f32[8,128], index: 10, kind: input, shape index: {}]   ;;  %s14170_s11 = inlined_call_operand.hbm [shape: f32[32,128], index: 11, kind: output, shape index: {0}]   ;;  %s14171_s12 = inlined_call_operand.hbm [shape: f32[1,1], index: 12, kind: output, shape index: {1}]  }
   0x1   :  { %v56_v0 = vld [vmem:[%s14162_s3 + $0x28] sm:$0xff]  ;;  %v55_v1 = vld [vmem:[%s14162_s3 + $0x20] sm:$0xff]  ;;  %v54_v2 = vld [vmem:[%s14162_s3 + $0x18] sm:$0xff] }
   0x2   :  { %10428 = vmatprep.subr.mxu0 %v56_v0  ;;  %v47_v3 = vld [vmem:[%s14159_s0] sm:$0xff]  ;;  %v53_v4 = vld [vmem:[%s14162_s3 + $0x10] sm:$0xff] }
   0x3   :  { %10429 = vmatpush3.msra.mxu0 %v56_v0  ;;  %10440 = vmatprep.mubr.msk.f32.mxu0 %vm61_vm0, %v47_v3 }
   0x4   :  { %10430 = vmatprep.subr.mxu0 %v55_v1 }
   0x5   :  { %10431 = vmatpush3.msra.mxu0 %v55_v1 }
   0x6   :  { %19 = vsyncpa [#allocation5], 0  ;;  %10432 = vmatprep.subr.mxu0 %v54_v2  ;;  %v52_v5 = vld [vmem:[%s14162_s3 + $0x8] sm:$0xff]  ;;  %v51_v6 = vld [vmem:[%s14162_s3] sm:$0xff]  ;;  %v57_v10 = vlaneseq  ;;  %vm192_vm1 = vcmask 261120   ;;  %vm403_vm2 = vcmask 64512  }
   0x7   :  { %10433 = vmatpush3.msra.mxu0 %v54_v2  ;;  %v48_v7 = vld [vmem:[%s14159_s0 + $0x8] sm:$0xff]  ;;  %v49_v8 = vld [vmem:[%s14159_s0 + $0x10] sm:$0xff]  ;;  %v50_v9 = vld [vmem:[%s14159_s0 + $0x18] sm:$0xff]  ;;  %s11657_s19 = smov 120   ;;  %s11658_s20 = smov 112   ;;  %vm1096_vm3 = vcmask 130048  }
   0x8   :  { %10434 = vmatprep.subr.mxu0 %v53_v4  ;;  %v11767_v11 = vshrl.u32 %v57_v10, 7  ;;  %v42_v13 = vld [vmem:[%s14169_s10] sm:$0xff]  ;;  %v44_v15 = vld [vmem:[%s14161_s2 + $0x8] sm:$0xff]  ;;  %v166_v41 = vld [vmem:[%s14164_s5 + $0x18] sm:$0xff]  ;;  %s11659_s21 = smov 104   ;;  %s11660_s22 = smov 96  }
   0x9   :  { %10435 = vmatpush3.msra.mxu0 %v53_v4  ;;  %v43_v18 = vld [vmem:[%s14161_s2] sm:$0xff]  ;;  %v165_v42 = vld [vmem:[%s14164_s5 + $0x10] sm:$0xff]  ;;  %v164_v43 = vld [vmem:[%s14164_s5 + $0x8] sm:$0xff]  ;;  %s11661_s3 = smov 64   ;;  %s11662_s23 = smov 8   ;;  %vm2025_vm4 = vcmask 195584  }
   0xa   :  { %10436 = vmatprep.subr.mxu0 %v52_v5  ;;  %v11770_v12 = vsub.s32 0, %v11767_v11  ;;  %v163_v44 = vld [vmem:[%s14164_s5] sm:$0xff]  ;;  %s11663_s13 = smov 16   ;;  %s11664_s14 = smov 24  }
   0xb   :  { %10437 = vmatpush3.msra.mxu0 %v52_v5  ;;  %s11665_s30 = smov [#allocation2]  }
   0xc   :  { %10438 = vmatprep.subr.mxu0 %v51_v6  ;;  %v60_v14 = vrot.slane %v42_v13, %v11770_v12 }
   0xd   :  { %10439 = vmatpush3.msra.mxu0 %v51_v6 }
   0xe   :  { %10441 = vmatmul.mubr.msk.f32.vlgmr.msra.gmra.mxu0 %vm61_vm0, %v48_v7  ;;  %10446 = vmatprep.subr.mxu0 %v166_v41 }
   0xf   :  { %10443 = vmatprep.mubr.msk.f32.mxu0 %vm61_vm0, %v49_v8  ;;  %10447 = vmatpush3.msra.mxu0 %v166_v41 }
  0x10   :  { %10448 = vmatprep.subr.mxu0 %v165_v42 }
  0x11   :  { %10449 = vmatpush3.msra.mxu0 %v165_v42 }
  0x12   :  { %10444 = vmatmul.mubr.msk.f32.gmra.mxu0 %vm61_vm0, %v50_v9  ;;  %10450 = vmatprep.subr.mxu0 %v164_v43  ;;  %v191_v9 = vld [vmem:[%s14168_s9] sm:$0xff] }
  0x13   :  { %10451 = vmatpush3.msra.mxu0 %v164_v43 }
  0x14   :  { %10452 = vmatprep.subr.mxu0 %v163_v44 }
  0x15   :  { %10453 = vmatpush3.msra.mxu0 %v163_v44 }
  0xce   :  { %v10442_v16 = vpop.f32.mrf.mxu0 }
  0xcf   :  { %v146_v17 = vadd.f32 %v10442_v16, %v60_v14  ;;  %v11828_v16 = vsub.s32 1, %v11767_v11 }
  0xd0   :  { %v140_v19 = vpop.f32.mrf.mxu0 }
  0xd1   :  { %v11782_v20 = vadd.f32 %v146_v17, %v44_v15  ;;  %v141_v21 = vadd.f32 %v140_v19, %v60_v14 }
  0xd2   :  { %v10445_v22 = vpop.f32.mrf.mxu0 }
  0xd3   :  { %v11784_v23 = vadd.f32 %v141_v21, %v43_v18  ;;  %v196_v24 = vsel %vm192_vm1, %v11782_v20, 0.0  ;;  %v211_v25 = vmul.f32 %v11782_v20, %v11782_v20  ;;  %v156_v27 = vadd.f32 %v10445_v22, %v60_v14 }
  0xd4   :  { %197 = vadd.xlane.f32.xlu0 %v196_v24  ;;  %v150_v26 = vpop.f32.mrf.mxu0  ;;  %v265_v21 = vrot.slane %v191_v9, %v11828_v16 }
  0xd5   :  { %v151_v28 = vadd.f32 %v150_v26, %v60_v14  ;;  %v217_v29 = vsel %vm192_vm1, %v211_v25, 0.0  ;;  %v210_v30 = vmul.f32 %v11784_v23, %v11784_v23  ;;  %v193_v32 = vsel %vm192_vm1, %v11784_v23, 0.0 }
  0xd6   :  { %218 = vadd.xlane.f32.xlu1 %v217_v29  ;;  %v11797_v33 = vadd.f32 %v156_v27, %v44_v15  ;;  %v257_v15 = vrot.slane %v191_v9, %v11770_v12 }
  0xd7   :  { %v11793_v31 = vadd.f32 %v151_v28, %v43_v18  ;;  %v214_v34 = vsel %vm192_vm1, %v210_v30, 0.0 }
  0xd8   :  { %194 = vadd.xlane.f32.xlu0 %v193_v32  ;;  %v202_v37 = vsel %vm192_vm1, %v11797_v33, 0.0  ;;  %v213_v38 = vmul.f32 %v11797_v33, %v11797_v33 }
  0xd9   :  { %v199_v35 = vsel %vm192_vm1, %v11793_v31, 0.0  ;;  %v212_v36 = vmul.f32 %v11793_v31, %v11793_v31 }
  0xda   :  { %215 = vadd.xlane.f32.xlu1 %v214_v34  ;;  %v223_v40 = vsel %vm192_vm1, %v213_v38, 0.0 }
  0xdb   :  { %v220_v39 = vsel %vm192_vm1, %v212_v36, 0.0 }
  0xdc   :  { %200 = vadd.xlane.f32.xlu0 %v199_v35 }
  0xde   :  { %203 = vadd.xlane.f32.xlu1 %v202_v37 }
  0xe0   :  { %221 = vadd.xlane.f32.xlu0 %v220_v39  ;;  %v11839_v39 = vsub.s32 2, %v11767_v11 }
  0xe2   :  { %224 = vadd.xlane.f32.xlu1 %v223_v40  ;;  %v273_v40 = vrot.slane %v191_v9, %v11839_v39 }
 0x15d   :  { %v198_v45 = vpop.xlane.xlu0 %197 }
 0x15e   :  { %v207_v46 = vmul.f32 0.03125, %v198_v45 }
 0x15f   :  { %v219_v47 = vpop.xlane.xlu1 %218 }
 0x160   :  { %v231_v48 = vmul.f32 %v207_v46, %v207_v46  ;;  %v227_v49 = vmul.f32 0.03125, %v219_v47  ;;  %v239_v13 = vsub.f32 %v11782_v20, %v207_v46 }
 0x161   :  { %v195_v50 = vpop.xlane.xlu0 %194 }
 0x162   :  { %v235_v51 = vsub.f32 %v227_v49, %v231_v48  ;;  %v206_v52 = vmul.f32 0.03125, %v195_v50 }
 0x163   :  { %v216_v53 = vpop.xlane.xlu1 %215 }
 0x164   :  { %v243_v54 = vadd.f32 1e-05, %v235_v51  ;;  %v230_v55 = vmul.f32 %v206_v52, %v206_v52  ;;  %v226_v56 = vmul.f32 0.03125, %v216_v53  ;;  %v238_v17 = vsub.f32 %v11784_v23, %v206_v52 }
 0x165   :  { %v201_v57 = vpop.xlane.xlu0 %200 }
 0x166   :  { %11239 = vrsqrt.f32 %v243_v54  ;;  %v234_v58 = vsub.f32 %v226_v56, %v230_v55  ;;  %v208_v59 = vmul.f32 0.03125, %v201_v57 }
 0x167   :  { %v204_v60 = vpop.xlane.xlu1 %203 }
 0x168   :  { %v242_v61 = vadd.f32 1e-05, %v234_v58  ;;  %v209_v62 = vmul.f32 0.03125, %v204_v60  ;;  %v232_v0 = vmul.f32 %v208_v59, %v208_v59  ;;  %v240_v25 = vsub.f32 %v11793_v31, %v208_v59 }
 0x169   :  { %v222_v63 = vpop.xlane.xlu0 %221 }
 0x16a   :  { %11241 = vrsqrt.f32 %v242_v61  ;;  %v228_v1 = vmul.f32 0.03125, %v222_v63  ;;  %v233_v3 = vmul.f32 %v209_v62, %v209_v62  ;;  %v241_v29 = vsub.f32 %v11797_v33, %v209_v62 }
 0x16b   :  { %v225_v2 = vpop.xlane.xlu1 %224 }
 0x16c   :  { %v236_v4 = vsub.f32 %v228_v1, %v232_v0  ;;  %v229_v5 = vmul.f32 0.03125, %v225_v2 }
 0x16e   :  { %v244_v6 = vadd.f32 1e-05, %v236_v4  ;;  %v237_v7 = vsub.f32 %v229_v5, %v233_v3 }
 0x170   :  { %11243 = vrsqrt.f32 %v244_v6  ;;  %v245_v8 = vadd.f32 1e-05, %v237_v7 }
 0x172   :  { %11245 = vrsqrt.f32 %v245_v8 }
 0x173   :  { %v11240_v10 = vpop.eup %11239 }
 0x174   :  { %v251_v14 = vmul.f32 %v11240_v10, %v239_v13 }
 0x176   :  { %v259_v22 = vmul.f32 %v257_v15, %v251_v14 }
 0x177   :  { %v11242_v18 = vpop.eup %11241 }
 0x178   :  { %v250_v19 = vmul.f32 %v11242_v18, %v238_v17  ;;  %v267_v28 = vadd.f32 %v265_v21, %v259_v22 }
 0x17a   :  { %v258_v24 = vmul.f32 %v257_v15, %v250_v19 }
 0x17c   :  { %v266_v26 = vadd.f32 %v265_v21, %v258_v24 }
 0x17d   :  { %v11244_v27 = vpop.eup %11243 }
 0x17e   :  { %10454 = vmatprep.mubr.msk.f32.mxu0 %vm192_vm1, %v266_v26  ;;  %v252_v30 = vmul.f32 %v11244_v27, %v240_v25 }
 0x17f   :  { %v11246_v32 = vpop.eup %11245  ;;  %10455 = vmatmul.mubr.msk.f32.vlgmr.msra.gmra.mxu0 %vm192_vm1, %v267_v28 }
 0x180   :  { %v260_v34 = vmul.f32 %v257_v15, %v252_v30  ;;  %v253_v35 = vmul.f32 %v11246_v32, %v241_v29 }
 0x182   :  { %v268_v36 = vadd.f32 %v265_v21, %v260_v34  ;;  %v261_v37 = vmul.f32 %v257_v15, %v253_v35 }
 0x184   :  { %10457 = vmatprep.mubr.msk.f32.mxu0 %vm192_vm1, %v268_v36  ;;  %v269_v38 = vadd.f32 %v265_v21, %v261_v37 }
 0x186   :  { %10458 = vmatmul.mubr.msk.f32.gmra.mxu0 %vm192_vm1, %v269_v38 }
 0x23f   :  { %v10456_v41 = vpop.f32.mrf.mxu0 }
 0x240   :  { %v11842_v42 = vadd.f32 %v10456_v41, %v273_v40 }
 0x241   :  { %v352_v43 = vpop.f32.mrf.mxu0 }
 0x242   :  { %v353_v44 = vadd.f32 %v352_v43, %v273_v40  ;;  %377 = vrot.lane.b32.xlu0 %v11842_v42, %s11657_s19 }
 0x244   :  { %375 = vrot.lane.b32.xlu1 %v353_v44, %s11657_s19  ;;  %10464 = vmatprep.mubr.msk.f32.mxu1 %vm403_vm2, %v353_v44 }
 0x246   :  { %385 = vrot.lane.b32.xlu0 %v11842_v42, %s11658_s20  ;;  %v10459_v45 = vpop.f32.mrf.mxu0 }
 0x247   :  { %v11850_v46 = vadd.f32 %v10459_v45, %v273_v40 }
 0x248   :  { %v362_v47 = vpop.f32.mrf.mxu0 }
 0x249   :  { %v363_v48 = vadd.f32 %v362_v47, %v273_v40  ;;  %381 = vrot.lane.b32.xlu1 %v11850_v46, %s11657_s19 }
 0x24a   :  { %389 = vrot.lane.b32.xlu0 %v11850_v46, %s11658_s20 }
 0x24b   :  { %10471 = vmatprep.mubr.msk.f32.mxu0 %vm403_vm2, %v363_v48 }
 0x24d   :  { %379 = vrot.lane.b32.xlu1 %v363_v48, %s11657_s19 }
 0x24e   :  { %393 = vrot.lane.b32.xlu0 %v11842_v42, %s11659_s21 }
 0x251   :  { %383 = vrot.lane.b32.xlu1 %v353_v44, %s11658_s20 }
 0x252   :  { %397 = vrot.lane.b32.xlu0 %v11850_v46, %s11659_s21 }
 0x255   :  { %387 = vrot.lane.b32.xlu1 %v363_v48, %s11658_s20 }
 0x256   :  { %401 = vrot.lane.b32.xlu0 %v11842_v42, %s11660_s22 }
 0x259   :  { %391 = vrot.lane.b32.xlu1 %v353_v44, %s11659_s21 }
 0x25a   :  { %489 = vrot.lane.b32.xlu0 %v11850_v46, %s11660_s22 }
 0x25d   :  { %395 = vrot.lane.b32.xlu1 %v363_v48, %s11659_s21 }
 0x261   :  { %399 = vrot.lane.b32.xlu1 %v353_v44, %s11660_s22 }
 0x265   :  { %487 = vrot.lane.b32.xlu1 %v363_v48, %s11660_s22 }
 0x2b4   :  { %v378_v49 = vpop.permute.xlu0 %377 }
 0x2b5   :  { %576 = vrot.lane.b32.xlu0 %v378_v49, %s11660_s22 }
 0x2b6   :  { %v376_v50 = vpop.permute.xlu1 %375 }
 0x2b7   :  { %574 = vrot.lane.b32.xlu1 %v376_v50, %s11660_s22 }
 0x2b8   :  { %v11874_v51 = vpop.permute.xlu0 %385 }
 0x2bb   :  { %v11876_v52 = vpop.permute.xlu1 %381 }
 0x2bc   :  { %663 = vrot.lane.b32.xlu0 %v11876_v52, %s11660_s22  ;;  %v11880_v53 = vpop.permute.xlu0 %389 }
 0x2bf   :  { %v380_v54 = vpop.permute.xlu1 %379 }
 0x2c0   :  { %661 = vrot.lane.b32.xlu1 %v380_v54, %s11660_s22  ;;  %750 = vrot.lane.b32.xlu0 %v11874_v51, %s11660_s22  ;;  %v11885_v55 = vpop.permute.xlu0 %393 }
 0x2c3   :  { %v384_v56 = vpop.permute.xlu1 %383 }
 0x2c4   :  { %748 = vrot.lane.b32.xlu1 %v384_v56, %s11660_s22  ;;  %837 = vrot.lane.b32.xlu0 %v11880_v53, %s11660_s22  ;;  %v11890_v57 = vpop.permute.xlu0 %397 }
 0x2c7   :  { %v11892_v58 = vpop.permute.xlu1 %387 }
 0x2c8   :  { %835 = vrot.lane.b32.xlu1 %v11892_v58, %s11660_s22  ;;  %924 = vrot.lane.b32.xlu0 %v11885_v55, %s11660_s22  ;;  %v402_v59 = vpop.permute.xlu0 %401 }
 0x2c9   :  { %10460 = vmatprep.subr.msk.mxu1 %vm403_vm2, %v402_v59 }
 0x2ca   :  { %10461 = vmatpush3.xpose.msk.msra.mxu1 %vm403_vm2, %v402_v59 }
 0x2cb   :  { %v11900_v60 = vpop.permute.xlu1 %391 }
 0x2cc   :  { %922 = vrot.lane.b32.xlu1 %v11900_v60, %s11660_s22  ;;  %1011 = vrot.lane.b32.xlu0 %v11890_v57, %s11660_s22  ;;  %v490_v61 = vpop.permute.xlu0 %489 }
 0x2cd   :  { %10467 = vmatprep.subr.msk.mxu0 %vm403_vm2, %v490_v61 }
 0x2ce   :  { %10468 = vmatpush3.xpose.msk.msra.mxu0 %vm403_vm2, %v490_v61 }
 0x2cf   :  { %v11908_v62 = vpop.permute.xlu1 %395 }
 0x2d0   :  { %1009 = vrot.lane.b32.xlu1 %v11908_v62, %s11660_s22  ;;  %1275 = vrot.lane.b32.xlu0 %v11842_v42, %s11661_s3 }
 0x2d3   :  { %v400_v63 = vpop.permute.xlu1 %399 }
 0x2d4   :  { %1273 = vrot.lane.b32.xlu1 %v353_v44, %s11661_s3  ;;  %1360 = vrot.lane.b32.xlu0 %v363_v48, %s11661_s3 }
 0x2d5   :  { %10462 = vmatprep.subr.msk.mxu1 %vm403_vm2, %v400_v63 }
 0x2d6   :  { %10463 = vmatpush3.xpose.msk.msra.mxu1 %vm403_vm2, %v400_v63 }
 0x2d7   :  { %v488_v0 = vpop.permute.xlu1 %487 }
 0x2d8   :  { %1362 = vrot.lane.b32.xlu1 %v11850_v46, %s11661_s3  ;;  %1536 = vrot.lane.b32.xlu0 %v11876_v52, %s11661_s3 }
 0x2d9   :  { %10465 = vmatmul.mubr.msk.f32.vlgmr.msra.gmra.mxu1 %vm403_vm2, %v11842_v42  ;;  %10469 = vmatprep.subr.msk.mxu0 %vm403_vm2, %v488_v0 }
 0x2da   :  { %10470 = vmatpush3.xpose.msk.msra.mxu0 %vm403_vm2, %v488_v0  ;;  %10478 = vmatprep.mubr.msk.f32.mxu1 %vm403_vm2, %v376_v50 }
 0x2dc   :  { %1449 = vrot.lane.b32.xlu1 %v378_v49, %s11661_s3  ;;  %1534 = vrot.lane.b32.xlu0 %v380_v54, %s11661_s3 }
 0x2dd   :  { %10472 = vmatmul.mubr.msk.f32.vlgmr.msra.gmra.mxu0 %vm403_vm2, %v11850_v46 }
 0x2de   :  { %10485 = vmatprep.mubr.msk.f32.mxu0 %vm403_vm2, %v380_v54 }
 0x2e0   :  { %1447 = vrot.lane.b32.xlu1 %v376_v50, %s11661_s3 }
 0x2e4   :  { %1623 = vrot.lane.b32.xlu1 %v11874_v51, %s11661_s3 }
 0x2e8   :  { %1621 = vrot.lane.b32.xlu1 %v384_v56, %s11661_s3 }
 0x327   :  { %v577_v1 = vpop.permute.xlu0 %576 }
 0x328   :  { %10474 = vmatprep.subr.msk.mxu1 %vm403_vm2, %v577_v1 }
 0x329   :  { %v575_v2 = vpop.permute.xlu1 %574  ;;  %10475 = vmatpush3.xpose.msk.msra.mxu1 %vm403_vm2, %v577_v1 }
 0x32a   :  { %10476 = vmatprep.subr.msk.mxu1 %vm403_vm2, %v575_v2 }
 0x32d   :  { %10477 = vmatpush3.xpose.msk.msra.mxu1 %vm403_vm2, %v575_v2 }
 0x32e   :  { %v664_v3 = vpop.permute.xlu0 %663 }
 0x32f   :  { %10481 = vmatprep.subr.msk.mxu0 %vm403_vm2, %v664_v3 }
 0x330   :  { %10479 = vmatmul.mubr.msk.f32.vlgmr.msra.gmra.mxu1 %vm403_vm2, %v378_v49  ;;  %10482 = vmatpush3.xpose.msk.msra.mxu0 %vm403_vm2, %v664_v3 }
 0x331   :  { %10492 = vmatprep.mubr.msk.f32.mxu1 %vm403_vm2, %v384_v56 }
 0x332   :  { %v662_v4 = vpop.permute.xlu1 %661  ;;  %v751_v5 = vpop.permute.xlu0 %750 }
 0x333   :  { %10483 = vmatprep.subr.msk.mxu0 %vm403_vm2, %v662_v4  ;;  %10488 = vmatprep.subr.msk.mxu1 %vm403_vm2, %v751_v5 }
 0x334   :  { %10484 = vmatpush3.xpose.msk.msra.mxu0 %vm403_vm2, %v662_v4  ;;  %10489 = vmatpush3.xpose.msk.msra.mxu1 %vm403_vm2, %v751_v5 }
 0x336   :  { %v749_v6 = vpop.permute.xlu1 %748  ;;  %v838_v7 = vpop.permute.xlu0 %837 }
 0x337   :  { %10486 = vmatmul.mubr.msk.f32.vlgmr.msra.gmra.mxu0 %vm403_vm2, %v11876_v52  ;;  %10490 = vmatprep.subr.msk.mxu1 %vm403_vm2, %v749_v6 }
 0x338   :  { %10495 = vmatprep.subr.msk.mxu0 %vm403_vm2, %v838_v7  ;;  %10491 = vmatpush3.xpose.msk.msra.mxu1 %vm403_vm2, %v749_v6 }
 0x339   :  { %10496 = vmatpush3.xpose.msk.msra.mxu0 %vm403_vm2, %v838_v7  ;;  %10499 = vmatprep.mubr.msk.f32.mxu0 %vm403_vm2, %v11892_v58 }
 0x33a   :  { %v836_v8 = vpop.permute.xlu1 %835  ;;  %v925_v9 = vpop.permute.xlu0 %924 }
 0x33b   :  { %10493 = vmatmul.mubr.msk.f32.vlgmr.msra.gmra.mxu1 %vm403_vm2, %v11874_v51  ;;  %10497 = vmatprep.subr.msk.mxu0 %vm403_vm2, %v836_v8 }
 0x33c   :  { %10502 = vmatprep.subr.msk.mxu1 %vm403_vm2, %v925_v9  ;;  %10506 = vmatprep.mubr.msk.f32.mxu1 %vm403_vm2, %v11900_v60 }
 0x33d   :  { %10498 = vmatpush3.xpose.msk.msra.mxu0 %vm403_vm2, %v836_v8  ;;  %10503 = vmatpush3.xpose.msk.msra.mxu1 %vm403_vm2, %v925_v9 }
 0x33e   :  { %v923_v10 = vpop.permute.xlu1 %922  ;;  %v1012_v13 = vpop.permute.xlu0 %1011 }
 0x33f   :  { %10504 = vmatprep.subr.msk.mxu1 %vm403_vm2, %v923_v10  ;;  %10509 = vmatprep.subr.msk.mxu0 %vm403_vm2, %v1012_v13 }
 0x340   :  { %10500 = vmatmul.mubr.msk.f32.vlgmr.msra.gmra.mxu0 %vm403_vm2, %v11880_v53 }
 0x341   :  { %10505 = vmatpush3.xpose.msk.msra.mxu1 %vm403_vm2, %v923_v10  ;;  %10510 = vmatpush3.xpose.msk.msra.mxu0 %vm403_vm2, %v1012_v13 }
 0x342   :  { %10513 = vmatprep.mubr.msk.f32.mxu0 %vm403_vm2, %v11908_v62  ;;  %v1010_v14 = vpop.permute.xlu1 %1009  ;;  %v1276_v15 = vpop.permute.xlu0 %1275 }
 0x343   :  { %10511 = vmatprep.subr.msk.mxu0 %vm403_vm2, %v1010_v14  ;;  %10516 = vmatprep.subr.mxu1 %v1276_v15 }
 0x344   :  { %10507 = vmatmul.mubr.msk.f32.vlgmr.msra.gmra.mxu1 %vm403_vm2, %v11885_v55 }
 0x345   :  { %10512 = vmatpush3.xpose.msk.msra.mxu0 %vm403_vm2, %v1010_v14  ;;  %10517 = vmatpush3.msra.mxu1 %v1276_v15 }
 0x346   :  { %v1274_v17 = vpop.permute.xlu1 %1273  ;;  %v1361_v18 = vpop.permute.xlu0 %1360 }
 0x347   :  { %10518 = vmatprep.subr.mxu1 %v1274_v17 }
 0x348   :  { %10514 = vmatmul.mubr.msk.f32.vlgmr.msra.gmra.mxu0 %vm403_vm2, %v11890_v57  ;;  %10519 = vmatpush3.msra.mxu1 %v1274_v17 }
 0x34a   :  { %v1363_v19 = vpop.permute.xlu1 %1362  ;;  %v11978_v21 = vpop.permute.xlu0 %1536 }
 0x34b   :  { %10523 = vmatprep.subr.mxu0 %v1363_v19 }
 0x34c   :  { %10524 = vmatpush3.msra.mxu0 %v1363_v19 }
 0x34d   :  { %10525 = vmatprep.subr.mxu0 %v1361_v18 }
 0x34e   :  { %v11980_v22 = vpop.permute.xlu1 %1449  ;;  %10526 = vmatpush3.msra.mxu0 %v1361_v18  ;;  %v12045_v3 = vpop.permute.xlu0 %1534 }
 0x34f   :  { %10530 = vmatprep.subr.mxu1 %v11980_v22  ;;  %10537 = vmatprep.subr.mxu0 %v11978_v21 }
 0x352   :  { %v12039_v1 = vpop.permute.xlu1 %1447 }
 0x356   :  { %v12043_v2 = vpop.permute.xlu1 %1623 }
 0x35a   :  { %v12053_v5 = vpop.permute.xlu1 %1621 }
 0x399   :  { %v11984_v24 = vpop.f32.mrf.mxu1 }
 0x39a   :  { %v1100_v25 = vsel %vm1096_vm3, %v11984_v24, -inf }
 0x39b   :  { %1101 = vmax.xlane.f32.xlu1 %v1100_v25  ;;  %v478_v26 = vpop.f32.mrf.mxu1 }
 0x39c   :  { %v1097_v27 = vsel %vm1096_vm3, %v478_v26, -inf }
 0x39d   :  { %1098 = vmax.xlane.f32.xlu0 %v1097_v27  ;;  %v10473_v28 = vpop.f32.mrf.mxu0 }
 0x39e   :  { %v1106_v29 = vsel %vm1096_vm3, %v10473_v28, -inf }
 0x39f   :  { %v565_v30 = vpop.f32.mrf.mxu0 }
 0x3a0   :  { %v1103_v32 = vsel %vm1096_vm3, %v565_v30, -inf }
 0x3a1   :  { %1107 = vmax.xlane.f32.xlu0 %v1106_v29 }
 0x3a5   :  { %1104 = vmax.xlane.f32.xlu0 %v1103_v32 }
 0x3f0   :  { %v11991_v34 = vpop.f32.mrf.mxu1 }
 0x3f1   :  { %v1112_v35 = vsel %vm1096_vm3, %v11991_v34, -inf }
 0x3f2   :  { %1113 = vmax.xlane.f32.xlu1 %v1112_v35  ;;  %v11995_v36 = vpop.f32.mrf.mxu1 }
 0x3f3   :  { %v1109_v37 = vsel %vm1096_vm3, %v11995_v36, -inf }
 0x3f4   :  { %1110 = vmax.xlane.f32.xlu0 %v1109_v37 }
 0x3f7   :  { %v11999_v38 = vpop.f32.mrf.mxu0 }
 0x3f8   :  { %v1118_v40 = vsel %vm1096_vm3, %v11999_v38, -inf }
 0x3f9   :  { %1119 = vmax.xlane.f32.xlu0 %v1118_v40  ;;  %v12003_v41 = vpop.f32.mrf.mxu0 }
 0x3fa   :  { %v1115_v43 = vsel %vm1096_vm3, %v12003_v41, -inf }
 0x3fb   :  { %v12005_v42 = vpop.f32.mrf.mxu1 }
 0x3fc   :  { %v1124_v44 = vsel %vm1096_vm3, %v12005_v42, -inf }
 0x3fd   :  { %1116 = vmax.xlane.f32.xlu0 %v1115_v43  ;;  %1125 = vmax.xlane.f32.xlu1 %v1124_v44  ;;  %v12011_v45 = vpop.f32.mrf.mxu1 }
 0x3fe   :  { %v1121_v47 = vsel %vm1096_vm3, %v12011_v45, -inf }
 0x400   :  { %v12013_v46 = vpop.f32.mrf.mxu0 }
 0x401   :  { %1122 = vmax.xlane.f32.xlu1 %v1121_v47  ;;  %v1130_v48 = vsel %vm1096_vm3, %v12013_v46, -inf }
 0x402   :  { %1131 = vmax.xlane.f32.xlu0 %v1130_v48  ;;  %v12019_v49 = vpop.f32.mrf.mxu0 }
 0x403   :  { %v1127_v51 = vsel %vm1096_vm3, %v12019_v49, -inf }
 0x404   :  { %v12021_v50 = vpop.f32.mrf.mxu1 }
 0x405   :  { %v1136_v52 = vsel %vm1096_vm3, %v12021_v50, -inf }
 0x406   :  { %1128 = vmax.xlane.f32.xlu0 %v1127_v51  ;;  %1137 = vmax.xlane.f32.xlu1 %v1136_v52  ;;  %v12027_v54 = vpop.f32.mrf.mxu1 }
 0x407   :  { %v1133_v59 = vsel %vm1096_vm3, %v12027_v54, -inf }
 0x408   :  { %v12029_v56 = vpop.f32.mrf.mxu0 }
 0x409   :  { %v1142_v0 = vsel %vm1096_vm3, %v12029_v56, -inf }
 0x40a   :  { %1134 = vmax.xlane.f32.xlu1 %v1133_v59  ;;  %v12033_v61 = vpop.f32.mrf.mxu0 }
 0x40b   :  { %v1139_v63 = vsel %vm1096_vm3, %v12033_v61, -inf }
 0x40c   :  { %1140 = vmax.xlane.f32.xlu0 %v1139_v63 }
 0x40e   :  { %1143 = vmax.xlane.f32.xlu1 %v1142_v0 }
 0x41f   :  { %1797 = vrot.lane.b32.xlu1 %v11885_v55, %s11661_s3 }
 0x422   :  { %1710 = vrot.lane.b32.xlu0 %v11880_v53, %s11661_s3 }
 0x423   :  { %1795 = vrot.lane.b32.xlu1 %v11900_v60, %s11661_s3 }
 0x424   :  { %v1102_v6 = vpop.xlane.xlu1 %1101 }
 0x425   :  { %v1146_v55 = vsub.f32 %v11984_v24, %v1102_v6 }
 0x426   :  { %1708 = vrot.lane.b32.xlu0 %v11892_v58, %s11661_s3  ;;  %v1099_v4 = vpop.xlane.xlu0 %1098 }
 0x427   :  { %v1145_v8 = vsub.f32 %v478_v26, %v1099_v4  ;;  %v1163_v14 = vmul.f32 1.442695, %v1146_v55 }
 0x429   :  { %v1161_v9 = vmul.f32 1.442695, %v1145_v8 }
 0x42a   :  { %v1108_v7 = vpop.xlane.xlu0 %1107 }
 0x42b   :  { %v1148_v10 = vsub.f32 %v10473_v28, %v1108_v7  ;;  %11247 = vpow2.f32 %v1161_v9 }
 0x42c   :  { %11249 = vpow2.f32 %v1163_v14 }
 0x42d   :  { %v1167_v53 = vmul.f32 1.442695, %v1148_v10 }
 0x42e   :  { %v1105_v13 = vpop.xlane.xlu0 %1104 }
 0x42f   :  { %v1147_v15 = vsub.f32 %v565_v30, %v1105_v13  ;;  %11251 = vpow2.f32 %v1167_v53 }
 0x431   :  { %v1165_v60 = vmul.f32 1.442695, %v1147_v15 }
 0x433   :  { %11253 = vpow2.f32 %v1165_v60 }
 0x438   :  { %v12056_v58 = vpop.eup %11247 }
 0x439   :  { %v12058_v17 = vpop.eup %11249  ;;  %v1193_v18 = vsel %vm1096_vm3, %v12056_v58, 0.0 }
 0x43a   :  { %v1196_v24 = vsel %vm1096_vm3, %v12058_v17, 0.0 }
 0x43c   :  { %v12062_v19 = vpop.eup %11251 }
 0x43d   :  { %v1202_v25 = vsel %vm1096_vm3, %v12062_v19, 0.0 }
 0x440   :  { %v12068_v26 = vpop.eup %11253 }
 0x441   :  { %v1199_v27 = vsel %vm1096_vm3, %v12068_v26, 0.0 }
 0x445   :  { %1194 = vadd.xlane.f32.xlu0 %v1193_v18 }
 0x447   :  { %1197 = vadd.xlane.f32.xlu1 %v1196_v24 }
 0x449   :  { %1203 = vadd.xlane.f32.xlu0 %v1202_v25 }
 0x44d   :  { %1200 = vadd.xlane.f32.xlu0 %v1199_v27 }
 0x47b   :  { %v1114_v28 = vpop.xlane.xlu1 %1113 }
 0x47c   :  { %v1150_v29 = vsub.f32 %v11991_v34, %v1114_v28 }
 0x47d   :  { %v1111_v30 = vpop.xlane.xlu0 %1110 }
 0x47e   :  { %v1171_v32 = vmul.f32 1.442695, %v1150_v29  ;;  %v1149_v35 = vsub.f32 %v11995_v36, %v1111_v30 }
 0x480   :  { %11255 = vpow2.f32 %v1171_v32  ;;  %v1169_v37 = vmul.f32 1.442695, %v1149_v35 }
 0x482   :  { %11257 = vpow2.f32 %v1169_v37  ;;  %v1120_v40 = vpop.xlane.xlu0 %1119 }
 0x483   :  { %v1152_v43 = vsub.f32 %v11999_v38, %v1120_v40 }
 0x485   :  { %v1175_v44 = vmul.f32 1.442695, %v1152_v43 }
 0x486   :  { %v1126_v47 = vpop.xlane.xlu1 %1125  ;;  %v1117_v48 = vpop.xlane.xlu0 %1116 }
 0x487   :  { %11259 = vpow2.f32 %v1175_v44  ;;  %v1154_v51 = vsub.f32 %v12005_v42, %v1126_v47  ;;  %v1151_v52 = vsub.f32 %v12003_v41, %v1117_v48 }
 0x489   :  { %v1179_v59 = vmul.f32 1.442695, %v1154_v51  ;;  %v1173_v34 = vmul.f32 1.442695, %v1151_v52 }
 0x48a   :  { %v1123_v63 = vpop.xlane.xlu1 %1122 }
 0x48b   :  { %11261 = vpow2.f32 %v1179_v59  ;;  %v1153_v36 = vsub.f32 %v12011_v45, %v1123_v63  ;;  %v1132_v0 = vpop.xlane.xlu0 %1131 }
 0x48c   :  { %11263 = vpow2.f32 %v1173_v34  ;;  %v1156_v4 = vsub.f32 %v12013_v46, %v1132_v0 }
 0x48d   :  { %v12079_v6 = vpop.eup %11255  ;;  %v1177_v38 = vmul.f32 1.442695, %v1153_v36 }
 0x48e   :  { %v1183_v7 = vmul.f32 1.442695, %v1156_v4  ;;  %v1208_v8 = vsel %vm1096_vm3, %v12079_v6, 0.0 }
 0x48f   :  { %v12083_v42 = vpop.eup %11257  ;;  %11265 = vpow2.f32 %v1177_v38  ;;  %v1138_v41 = vpop.xlane.xlu1 %1137  ;;  %1209 = vadd.xlane.f32.xlu1 %v1208_v8 }
 0x490   :  { %v1129_v55 = vpop.xlane.xlu0 %1128  ;;  %11267 = vpow2.f32 %v1183_v7  ;;  %v1158_v45 = vsub.f32 %v12021_v50, %v1138_v41  ;;  %v1205_v13 = vsel %vm1096_vm3, %v12083_v42, 0.0 }
 0x491   :  { %v1155_v9 = vsub.f32 %v12019_v49, %v1129_v55 }
 0x492   :  { %v1187_v10 = vmul.f32 1.442695, %v1158_v45 }
 0x493   :  { %v1181_v46 = vmul.f32 1.442695, %v1155_v9  ;;  %v1135_v14 = vpop.xlane.xlu1 %1134  ;;  %1206 = vadd.xlane.f32.xlu1 %v1205_v13 }
 0x494   :  { %v12089_v53 = vpop.eup %11259  ;;  %11269 = vpow2.f32 %v1187_v10  ;;  %v1157_v15 = vsub.f32 %v12027_v54, %v1135_v14 }
 0x495   :  { %11271 = vpow2.f32 %v1181_v46  ;;  %v1141_v60 = vpop.xlane.xlu0 %1140  ;;  %v1214_v18 = vsel %vm1096_vm3, %v12089_v53, 0.0 }
 0x496   :  { %v1185_v50 = vmul.f32 1.442695, %v1157_v15  ;;  %v1159_v49 = vsub.f32 %v12033_v61, %v1141_v60  ;;  %1215 = vadd.xlane.f32.xlu0 %v1214_v18 }
 0x497   :  { %v1144_v24 = vpop.xlane.xlu1 %1143 }
 0x498   :  { %v12095_v25 = vpop.eup %11261  ;;  %11273 = vpow2.f32 %v1185_v50  ;;  %v1189_v27 = vmul.f32 1.442695, %v1159_v49  ;;  %v1160_v28 = vsub.f32 %v12029_v56, %v1144_v24 }
 0x499   :  { %v12098_v29 = vpop.eup %11263  ;;  %v1220_v54 = vsel %vm1096_vm3, %v12095_v25, 0.0  ;;  %v12136_v36 = vpop.permute.xlu0 %1710 }
 0x49a   :  { %11275 = vpow2.f32 %v1189_v27  ;;  %v1191_v30 = vmul.f32 1.442695, %v1160_v28  ;;  %1221 = vadd.xlane.f32.xlu1 %v1220_v54  ;;  %v1211_v32 = vsel %vm1096_vm3, %v12098_v29, 0.0 }
 0x49b   :  { %1212 = vadd.xlane.f32.xlu0 %v1211_v32  ;;  %v12138_v0 = vpop.permute.xlu1 %1797 }
 0x49c   :  { %v12104_v61 = vpop.eup %11265  ;;  %11277 = vpow2.f32 %v1191_v30 }
 0x49d   :  { %v12106_v35 = vpop.eup %11267  ;;  %v1217_v56 = vsel %vm1096_vm3, %v12104_v61, 0.0  ;;  %v12140_v4 = vpop.permute.xlu0 %1708 }
 0x49e   :  { %1218 = vadd.xlane.f32.xlu1 %v1217_v56  ;;  %v1226_v37 = vsel %vm1096_vm3, %v12106_v35, 0.0 }
 0x49f   :  { %1227 = vadd.xlane.f32.xlu0 %v1226_v37  ;;  %v12142_v38 = vpop.permute.xlu1 %1795 }
 0x4a1   :  { %v12112_v40 = vpop.eup %11269 }
 0x4a2   :  { %v12114_v43 = vpop.eup %11271  ;;  %v1232_v44 = vsel %vm1096_vm3, %v12112_v40, 0.0 }
 0x4a3   :  { %1233 = vadd.xlane.f32.xlu1 %v1232_v44  ;;  %v1223_v47 = vsel %vm1096_vm3, %v12114_v43, 0.0 }
 0x4a4   :  { %1224 = vadd.xlane.f32.xlu0 %v1223_v47 }
 0x4a5   :  { %v12120_v48 = vpop.eup %11273 }
 0x4a6   :  { %v1229_v51 = vsel %vm1096_vm3, %v12120_v48, 0.0 }
 0x4a7   :  { %v12124_v52 = vpop.eup %11275  ;;  %1230 = vadd.xlane.f32.xlu1 %v1229_v51 }
 0x4a8   :  { %v1235_v59 = vsel %vm1096_vm3, %v12124_v52, 0.0 }
 0x4a9   :  { %v12128_v34 = vpop.eup %11277  ;;  %1236 = vadd.xlane.f32.xlu0 %v1235_v59 }
 0x4aa   :  { %v1238_v63 = vsel %vm1096_vm3, %v12128_v34, 0.0 }
 0x4ab   :  { %1239 = vadd.xlane.f32.xlu1 %v1238_v63 }
 0x4bc   :  { %1882 = vrot.lane.b32.xlu1 %v11908_v62, %s11661_s3 }
 0x4bf   :  { %1884 = vrot.lane.b32.xlu0 %v11890_v57, %s11661_s3 }
 0x4ce   :  { %v1195_v7 = vpop.xlane.xlu0 %1194 }
 0x4cf   :  { %11279 = vrcp.f32 %v1195_v7 }
 0x4d0   :  { %v1198_v8 = vpop.xlane.xlu1 %1197 }
 0x4d1   :  { %11281 = vrcp.f32 %v1198_v8 }
 0x4d2   :  { %v1204_v41 = vpop.xlane.xlu0 %1203 }
 0x4d3   :  { %11283 = vrcp.f32 %v1204_v41 }
 0x4d6   :  { %v1201_v55 = vpop.xlane.xlu0 %1200 }
 0x4d7   :  { %11285 = vrcp.f32 %v1201_v55  ;;  %v168_v55 = vld [vmem:[%s14165_s6 + $0x8] sm:$0xff] }
 0x4dc   :  { %v11280_v62 = vpop.eup %11279 }
 0x4dd   :  { %v1257_v45 = vmul.f32 %v11280_v62, %v12056_v58 }
 0x4de   :  { %v11282_v57 = vpop.eup %11281 }
 0x4df   :  { %10520 = vmatprep.mubr.msk.f32.mxu1 %vm1096_vm3, %v1257_v45  ;;  %v1258_v9 = vmul.f32 %v11282_v57, %v12058_v17  ;;  %v167_v57 = vld [vmem:[%s14165_s6] sm:$0xff] }
 0x4e0   :  { %v11284_v10 = vpop.eup %11283 }
 0x4e1   :  { %10521 = vmatmul.mubr.msk.f32.vlgmr.msra.gmra.mxu1 %vm1096_vm3, %v1258_v9  ;;  %v1260_v58 = vmul.f32 %v11284_v10, %v12062_v19 }
 0x4e2   :  { %10531 = vmatpush3.msra.mxu1 %v11980_v22 }
 0x4e3   :  { %10532 = vmatprep.subr.mxu1 %v12039_v1 }
 0x4e4   :  { %v11286_v46 = vpop.eup %11285  ;;  %10533 = vmatpush3.msra.mxu1 %v12039_v1 }
 0x4e5   :  { %10544 = vmatprep.subr.mxu1 %v12043_v2  ;;  %v1259_v13 = vmul.f32 %v11286_v46, %v12068_v26 }
 0x4e7   :  { %10527 = vmatprep.mubr.msk.f32.mxu0 %vm1096_vm3, %v1259_v13 }
 0x4e8   :  { %10528 = vmatmul.mubr.msk.f32.vlgmr.msra.gmra.mxu0 %vm1096_vm3, %v1260_v58 }
 0x4e9   :  { %10538 = vmatpush3.msra.mxu0 %v11978_v21 }
 0x4ea   :  { %10539 = vmatprep.subr.mxu0 %v12045_v3 }
 0x4eb   :  { %10540 = vmatpush3.msra.mxu0 %v12045_v3 }
 0x4ec   :  { %10551 = vmatprep.subr.mxu0 %v12136_v36 }
 0x518   :  { %v1210_v22 = vpop.xlane.xlu1 %1209 }
 0x519   :  { %11287 = vrcp.f32 %v1210_v22 }
 0x51c   :  { %v1207_v1 = vpop.xlane.xlu1 %1206 }
 0x51d   :  { %11289 = vrcp.f32 %v1207_v1 }
 0x51f   :  { %v1216_v17 = vpop.xlane.xlu0 %1215 }
 0x520   :  { %11291 = vrcp.f32 %v1216_v17 }
 0x523   :  { %v1222_v26 = vpop.xlane.xlu1 %1221 }
 0x524   :  { %v1213_v19 = vpop.xlane.xlu0 %1212 }
 0x525   :  { %11293 = vrcp.f32 %v1213_v19 }
 0x526   :  { %11295 = vrcp.f32 %v1222_v26  ;;  %v11288_v21 = vpop.eup %11287 }
 0x527   :  { %v1219_v14 = vpop.xlane.xlu1 %1218  ;;  %v1262_v50 = vmul.f32 %v11288_v21, %v12079_v6 }
 0x528   :  { %11297 = vrcp.f32 %v1219_v14  ;;  %v1228_v15 = vpop.xlane.xlu0 %1227 }
 0x529   :  { %11299 = vrcp.f32 %v1228_v15 }
 0x52a   :  { %v11290_v60 = vpop.eup %11289 }
 0x52b   :  { %v1261_v18 = vmul.f32 %v11290_v60, %v12083_v42 }
 0x52c   :  { %v1234_v3 = vpop.xlane.xlu1 %1233 }
 0x52d   :  { %v1225_v49 = vpop.xlane.xlu0 %1224  ;;  %10534 = vmatprep.mubr.msk.f32.mxu1 %vm1096_vm3, %v1261_v18  ;;  %v11292_v27 = vpop.eup %11291 }
 0x52e   :  { %11301 = vrcp.f32 %v1225_v49  ;;  %10535 = vmatmul.mubr.msk.f32.vlgmr.msra.gmra.mxu1 %vm1096_vm3, %v1262_v50  ;;  %v1264_v32 = vmul.f32 %v11292_v27, %v12089_v53 }
 0x52f   :  { %10545 = vmatpush3.msra.mxu1 %v12043_v2  ;;  %11303 = vrcp.f32 %v1234_v3 }
 0x530   :  { %v1231_v24 = vpop.xlane.xlu1 %1230  ;;  %10546 = vmatprep.subr.mxu1 %v12053_v5 }
 0x531   :  { %11305 = vrcp.f32 %v1231_v24  ;;  %10547 = vmatpush3.msra.mxu1 %v12053_v5 }
 0x532   :  { %v11294_v42 = vpop.eup %11293  ;;  %10558 = vmatprep.subr.mxu1 %v12138_v0  ;;  %v1237_v6 = vpop.xlane.xlu0 %1236 }
 0x533   :  { %11307 = vrcp.f32 %v1237_v6  ;;  %v1263_v28 = vmul.f32 %v11294_v42, %v12098_v29  ;;  %v11296_v54 = vpop.eup %11295 }
 0x534   :  { %v1240_v30 = vpop.xlane.xlu1 %1239  ;;  %v1266_v5 = vmul.f32 %v11296_v54, %v12095_v25 }
 0x535   :  { %v11298_v2 = vpop.eup %11297  ;;  %11309 = vrcp.f32 %v1240_v30  ;;  %10541 = vmatprep.mubr.msk.f32.mxu0 %vm1096_vm3, %v1263_v28 }
 0x536   :  { %10542 = vmatmul.mubr.msk.f32.vlgmr.msra.gmra.mxu0 %vm1096_vm3, %v1264_v32  ;;  %v1265_v56 = vmul.f32 %v11298_v2, %v12104_v61  ;;  %v1885_v29 = vpop.permute.xlu0 %1884  ;;  %v11300_v53 = vpop.eup %11299 }
 0x537   :  { %10552 = vmatpush3.msra.mxu0 %v12136_v36  ;;  %v1268_v44 = vmul.f32 %v11300_v53, %v12106_v35 }
 0x538   :  { %10553 = vmatprep.subr.mxu0 %v12140_v4  ;;  %10548 = vmatprep.mubr.msk.f32.mxu1 %vm1096_vm3, %v1265_v56  ;;  %v1883_v63 = vpop.permute.xlu1 %1882 }
 0x539   :  { %10554 = vmatpush3.msra.mxu0 %v12140_v4  ;;  %10549 = vmatmul.mubr.msk.f32.vlgmr.msra.gmra.mxu1 %vm1096_vm3, %v1266_v5 }
 0x53a   :  { %10565 = vmatprep.subr.mxu0 %v1885_v29  ;;  %10559 = vmatpush3.msra.mxu1 %v12138_v0 }
 0x53b   :  { %v11302_v37 = vpop.eup %11301  ;;  %10560 = vmatprep.subr.mxu1 %v12142_v38 }
 0x53c   :  { %10561 = vmatpush3.msra.mxu1 %v12142_v38  ;;  %v1267_v25 = vmul.f32 %v11302_v37, %v12114_v43  ;;  %v11304_v61 = vpop.eup %11303  ;;  %v12235_v37 = vsub.s32 3, %v11767_v11 }
 0x53d   :  { %v1270_v36 = vmul.f32 %v11304_v61, %v12112_v40 }
 0x53e   :  { %v11306_v47 = vpop.eup %11305  ;;  %10555 = vmatprep.mubr.msk.f32.mxu0 %vm1096_vm3, %v1267_v25  ;;  %v12240_v25 = vld [vmem:[%s14168_s9] sm:$0xff] }
 0x53f   :  { %10556 = vmatmul.mubr.msk.f32.vlgmr.msra.gmra.mxu0 %vm1096_vm3, %v1268_v44  ;;  %v1269_v51 = vmul.f32 %v11306_v47, %v12120_v48  ;;  %v2134_v61 = vrot.slane %v12240_v25, %v12235_v37 }
 0x540   :  { %v11308_v59 = vpop.eup %11307  ;;  %10566 = vmatpush3.msra.mxu0 %v1885_v29 }
 0x541   :  { %10567 = vmatprep.subr.mxu0 %v1883_v63  ;;  %10562 = vmatprep.mubr.msk.f32.mxu1 %vm1096_vm3, %v1269_v51  ;;  %v1271_v43 = vmul.f32 %v11308_v59, %v12124_v52  ;;  %v170_v52 = vld [vmem:[%s14165_s6 + $0x18] sm:$0xff] }
 0x542   :  { %v11310_v0 = vpop.eup %11309  ;;  %10568 = vmatpush3.msra.mxu0 %v1883_v63  ;;  %10563 = vmatmul.mubr.msk.f32.vlgmr.msra.gmra.mxu1 %vm1096_vm3, %v1270_v36 }
 0x543   :  { %10569 = vmatprep.mubr.msk.f32.mxu0 %vm1096_vm3, %v1271_v43  ;;  %v1272_v35 = vmul.f32 %v11310_v0, %v12128_v34  ;;  %10572 = vmatprep.subr.mxu1 %v170_v52  ;;  %v169_v34 = vld [vmem:[%s14165_s6 + $0x10] sm:$0xff] }
 0x544   :  { %10573 = vmatpush3.msra.mxu1 %v170_v52 }
 0x545   :  { %10570 = vmatmul.mubr.msk.f32.vlgmr.msra.gmra.mxu0 %vm1096_vm3, %v1272_v35  ;;  %10574 = vmatprep.subr.mxu1 %v169_v34 }
 0x546   :  { %10575 = vmatpush3.msra.mxu1 %v169_v34 }
 0x547   :  { %10576 = vmatprep.subr.mxu1 %v168_v55 }
 0x548   :  { %10577 = vmatpush3.msra.mxu1 %v168_v55 }
 0x549   :  { %10578 = vmatprep.subr.mxu1 %v167_v57 }
 0x54a   :  { %10579 = vmatpush3.msra.mxu1 %v167_v57  ;;  %v173_v57 = vld [vmem:[%s14166_s7 + $0x10] sm:$0xff] }
 0x5a1   :  { %v10522_v48 = vpop.f32.mrf.mxu1 }
 0x5a3   :  { %v1351_v4 = vpop.f32.mrf.mxu1 }
 0x5a8   :  { %v10529_v40 = vpop.f32.mrf.mxu0 }
 0x5aa   :  { %v1438_v8 = vpop.f32.mrf.mxu0 }
 0x5ee   :  { %v10536_v38 = vpop.f32.mrf.mxu1 }
 0x5ef   :  { %1975 = vrot.lane.b32.xlu1 %v10536_v38, %s11662_s23 }
 0x5f0   :  { %v1525_v7 = vpop.f32.mrf.mxu1 }
 0x5f1   :  { %1973 = vrot.lane.b32.xlu0 %v1525_v7, %s11662_s23 }
 0x5f6   :  { %v10543_v41 = vpop.f32.mrf.mxu0 }
 0x5f7   :  { %1979 = vrot.lane.b32.xlu1 %v10543_v41, %s11662_s23 }
 0x5f8   :  { %v1612_v62 = vpop.f32.mrf.mxu0 }
 0x5f9   :  { %1977 = vrot.lane.b32.xlu0 %v1612_v62, %s11662_s23  ;;  %v10550_v45 = vpop.f32.mrf.mxu1 }
 0x5fb   :  { %1991 = vrot.lane.b32.xlu1 %v10550_v45, %s11663_s13  ;;  %v1699_v9 = vpop.f32.mrf.mxu1  ;;  %v174_v45 = vld [vmem:[%s14166_s7 + $0x18] sm:$0xff] }
 0x5fc   :  { %10586 = vmatprep.subr.mxu0 %v174_v45 }
 0x5fd   :  { %1989 = vrot.lane.b32.xlu0 %v1699_v9, %s11663_s13  ;;  %10587 = vmatpush3.msra.mxu0 %v174_v45  ;;  %v172_v9 = vld [vmem:[%s14166_s7 + $0x8] sm:$0xff] }
 0x5fe   :  { %10588 = vmatprep.subr.mxu0 %v173_v57 }
 0x5ff   :  { %v10557_v10 = vpop.f32.mrf.mxu0  ;;  %10589 = vmatpush3.msra.mxu0 %v173_v57 }
 0x600   :  { %1995 = vrot.lane.b32.xlu1 %v10557_v10, %s11663_s13  ;;  %v171_v10 = vld [vmem:[%s14166_s7] sm:$0xff]  ;;  %10590 = vmatprep.subr.mxu0 %v172_v9 }
 0x601   :  { %v1786_v46 = vpop.f32.mrf.mxu0  ;;  %10591 = vmatpush3.msra.mxu0 %v172_v9  ;;  %v190_v9 = vld [vmem:[%s14167_s8 + $0x78] sm:$0xff] }
 0x602   :  { %1993 = vrot.lane.b32.xlu0 %v1786_v46, %s11663_s13  ;;  %v10564_v13 = vpop.f32.mrf.mxu1  ;;  %10592 = vmatprep.subr.mxu0 %v171_v10 }
 0x603   :  { %10593 = vmatpush3.msra.mxu0 %v171_v10  ;;  %10600 = vmatprep.subr.mxu1 %v190_v9  ;;  %v189_v10 = vld [vmem:[%s14167_s8 + $0x70] sm:$0xff] }
 0x604   :  { %2007 = vrot.lane.b32.xlu1 %v10564_v13, %s11664_s14  ;;  %v1873_v58 = vpop.f32.mrf.mxu1 }
 0x605   :  { %v10571_v22 = vpop.f32.mrf.mxu0 }
 0x606   :  { %2005 = vrot.lane.b32.xlu0 %v1873_v58, %s11664_s14 }
 0x607   :  { %v1960_v1 = vpop.f32.mrf.mxu0 }
 0x608   :  { %2011 = vrot.lane.b32.xlu1 %v10571_v22, %s11664_s14 }
 0x60a   :  { %2009 = vrot.lane.b32.xlu0 %v1960_v1, %s11664_s14 }
 0x661   :  { %v1976_v17 = vpop.permute.xlu1 %1975 }
 0x662   :  { %v2018_v49 = vsel %vm403_vm2, %v10522_v48, %v1976_v17 }
 0x663   :  { %v1974_v26 = vpop.permute.xlu0 %1973 }
 0x664   :  { %v2017_v50 = vsel %vm403_vm2, %v1351_v4, %v1974_v26 }
 0x669   :  { %v1980_v19 = vpop.permute.xlu1 %1979 }
 0x66a   :  { %v2020_v32 = vsel %vm403_vm2, %v10529_v40, %v1980_v19 }
 0x66b   :  { %v1978_v14 = vpop.permute.xlu0 %1977 }
 0x66c   :  { %v2019_v54 = vsel %vm403_vm2, %v1438_v8, %v1978_v14 }
 0x66d   :  { %v1992_v15 = vpop.permute.xlu1 %1991 }
 0x66e   :  { %v2022_v42 = vsel %vm1096_vm3, %v2018_v49, %v1992_v15 }
 0x66f   :  { %v1990_v21 = vpop.permute.xlu0 %1989 }
 0x670   :  { %v2021_v24 = vsel %vm1096_vm3, %v2017_v50, %v1990_v21 }
 0x672   :  { %v1996_v60 = vpop.permute.xlu1 %1995 }
 0x673   :  { %v2024_v5 = vsel %vm1096_vm3, %v2020_v32, %v1996_v60 }
 0x674   :  { %v1994_v18 = vpop.permute.xlu0 %1993 }
 0x675   :  { %v2023_v2 = vsel %vm1096_vm3, %v2019_v54, %v1994_v18 }
 0x676   :  { %v2008_v3 = vpop.permute.xlu1 %2007 }
 0x677   :  { %v2027_v28 = vsel %vm2025_vm4, %v2022_v42, %v2008_v3 }
 0x678   :  { %v2006_v27 = vpop.permute.xlu0 %2005 }
 0x679   :  { %v2026_v6 = vsel %vm2025_vm4, %v2021_v24, %v2006_v27 }
 0x67a   :  { %10580 = vmatprep.mubr.msk.f32.mxu1 %vm192_vm1, %v2026_v6  ;;  %v2012_v30 = vpop.permute.xlu1 %2011 }
 0x67b   :  { %10581 = vmatmul.mubr.msk.f32.vlgmr.msra.gmra.mxu1 %vm192_vm1, %v2027_v28  ;;  %v2029_v53 = vsel %vm2025_vm4, %v2024_v5, %v2012_v30 }
 0x67c   :  { %v2010_v56 = vpop.permute.xlu0 %2009  ;;  %10601 = vmatpush3.msra.mxu1 %v190_v9 }
 0x67d   :  { %v2028_v29 = vsel %vm2025_vm4, %v2023_v2, %v2010_v56  ;;  %10602 = vmatprep.subr.mxu1 %v189_v10 }
 0x67e   :  { %10583 = vmatprep.mubr.msk.f32.mxu1 %vm192_vm1, %v2028_v29  ;;  %10603 = vmatpush3.msra.mxu1 %v189_v10 }
 0x67f   :  { %10584 = vmatmul.mubr.msk.f32.gmra.mxu1 %vm192_vm1, %v2029_v53  ;;  %v12289_v53 = vsub.s32 4, %v11767_v11 }
 0x73b   :  { %v10582_v44 = vpop.f32.mrf.mxu1 }
 0x73c   :  { %v2128_v47 = vadd.f32 %v10582_v44, %v11782_v20 }
 0x73d   :  { %v2108_v51 = vpop.f32.mrf.mxu1 }
 0x73e   :  { %v12245_v59 = vadd.f32 %v2134_v61, %v2128_v47  ;;  %v2127_v63 = vadd.f32 %v2108_v51, %v11784_v23  ;;  %v2202_v47 = vrot.slane %v12240_v25, %v12289_v53  ;;  %v12295_v51 = vsub.s32 5, %v11767_v11 }
 0x73f   :  { %v10585_v36 = vpop.f32.mrf.mxu1 }
 0x740   :  { %v12248_v43 = vadd.f32 %v2134_v61, %v2127_v63  ;;  %v2130_v0 = vadd.f32 %v10585_v36, %v11797_v33  ;;  %v2142_v35 = vsel %vm192_vm1, %v12245_v59, 0.0  ;;  %v2156_v20 = vmul.f32 %v12245_v59, %v12245_v59 }
 0x741   :  { %2143 = vadd.xlane.f32.xlu1 %v2142_v35  ;;  %v2118_v38 = vpop.f32.mrf.mxu1 }
 0x742   :  { %v12253_v48 = vadd.f32 %v2134_v61, %v2130_v0  ;;  %v2139_v4 = vsel %vm192_vm1, %v12248_v43, 0.0  ;;  %v2129_v40 = vadd.f32 %v2118_v38, %v11793_v31  ;;  %v2162_v7 = vsel %vm192_vm1, %v2156_v20, 0.0 }
 0x743   :  { %2140 = vadd.xlane.f32.xlu0 %v2139_v4  ;;  %v2155_v52 = vmul.f32 %v12248_v43, %v12248_v43  ;;  %v2210_v4 = vrot.slane %v12240_v25, %v12295_v51 }
 0x744   :  { %v2148_v23 = vsel %vm192_vm1, %v12253_v48, 0.0  ;;  %v2158_v33 = vmul.f32 %v12253_v48, %v12253_v48  ;;  %v12268_v34 = vadd.f32 %v2134_v61, %v2129_v40 }
 0x745   :  { %2149 = vadd.xlane.f32.xlu1 %v2148_v23  ;;  %v2159_v41 = vsel %vm192_vm1, %v2155_v52, 0.0 }
 0x746   :  { %v2168_v8 = vsel %vm192_vm1, %v2158_v33, 0.0  ;;  %v2145_v55 = vsel %vm192_vm1, %v12268_v34, 0.0  ;;  %v2157_v31 = vmul.f32 %v12268_v34, %v12268_v34 }
 0x747   :  { %2163 = vadd.xlane.f32.xlu0 %v2162_v7 }
 0x748   :  { %v2165_v62 = vsel %vm192_vm1, %v2157_v31, 0.0 }
 0x749   :  { %2169 = vadd.xlane.f32.xlu1 %v2168_v8 }
 0x74b   :  { %2160 = vadd.xlane.f32.xlu0 %v2159_v41 }
 0x74f   :  { %2146 = vadd.xlane.f32.xlu0 %v2145_v55 }
 0x753   :  { %2166 = vadd.xlane.f32.xlu0 %v2165_v62 }
 0x7ca   :  { %v2144_v46 = vpop.xlane.xlu1 %2143 }
 0x7cb   :  { %v2152_v58 = vmul.f32 0.03125, %v2144_v46  ;;  %v188_v46 = vld [vmem:[%s14167_s8 + $0x68] sm:$0xff] }
 0x7cc   :  { %v2141_v13 = vpop.xlane.xlu0 %2140  ;;  %10604 = vmatprep.subr.mxu1 %v188_v46 }
 0x7cd   :  { %v2176_v26 = vmul.f32 %v2152_v58, %v2152_v58  ;;  %v2151_v19 = vmul.f32 0.03125, %v2141_v13  ;;  %v2184_v44 = vsub.f32 %v12245_v59, %v2152_v58  ;;  %10605 = vmatpush3.msra.mxu1 %v188_v46  ;;  %v187_v13 = vld [vmem:[%s14167_s8 + $0x60] sm:$0xff]  ;;  %v186_v58 = vld [vmem:[%s14167_s8 + $0x58] sm:$0xff] }
 0x7ce   :  { %v2150_v22 = vpop.xlane.xlu1 %2149  ;;  %10606 = vmatprep.subr.mxu1 %v187_v13 }
 0x7cf   :  { %v2154_v1 = vmul.f32 0.03125, %v2150_v22  ;;  %v2175_v50 = vmul.f32 %v2151_v19, %v2151_v19  ;;  %v2183_v36 = vsub.f32 %v12248_v43, %v2151_v19  ;;  %10607 = vmatpush3.msra.mxu1 %v187_v13  ;;  %v185_v22 = vld [vmem:[%s14167_s8 + $0x50] sm:$0xff] }
 0x7d0   :  { %v2164_v17 = vpop.xlane.xlu0 %2163  ;;  %10608 = vmatprep.subr.mxu1 %v186_v58  ;;  %v181_v19 = vld [vmem:[%s14167_s8 + $0x30] sm:$0xff] }
 0x7d1   :  { %v2172_v14 = vmul.f32 0.03125, %v2164_v17  ;;  %v2178_v18 = vmul.f32 %v2154_v1, %v2154_v1  ;;  %v2186_v33 = vsub.f32 %v12253_v48, %v2154_v1  ;;  %10609 = vmatpush3.msra.mxu1 %v186_v58  ;;  %v184_v1 = vld [vmem:[%s14167_s8 + $0x48] sm:$0xff]  ;;  %v183_v17 = vld [vmem:[%s14167_s8 + $0x40] sm:$0xff] }
 0x7d2   :  { %v2170_v15 = vpop.xlane.xlu1 %2169  ;;  %10610 = vmatprep.subr.mxu1 %v185_v22 }
 0x7d3   :  { %v2180_v21 = vsub.f32 %v2172_v14, %v2176_v26  ;;  %v2174_v60 = vmul.f32 0.03125, %v2170_v15  ;;  %10611 = vmatpush3.msra.mxu1 %v185_v22  ;;  %v182_v26 = vld [vmem:[%s14167_s8 + $0x38] sm:$0xff]  ;;  %v180_v14 = vld [vmem:[%s14167_s8 + $0x28] sm:$0xff]  ;;  %v179_v15 = vld [vmem:[%s14167_s8 + $0x20] sm:$0xff] }
 0x7d4   :  { %v2161_v3 = vpop.xlane.xlu0 %2160  ;;  %10612 = vmatprep.subr.mxu1 %v184_v1 }
 0x7d5   :  { %v2188_v49 = vadd.f32 1e-05, %v2180_v21  ;;  %v2171_v24 = vmul.f32 0.03125, %v2161_v3  ;;  %v2182_v27 = vsub.f32 %v2174_v60, %v2178_v18  ;;  %10613 = vmatpush3.msra.mxu1 %v184_v1  ;;  %v178_v21 = vld [vmem:[%s14167_s8 + $0x18] sm:$0xff]  ;;  %v177_v60 = vld [vmem:[%s14167_s8 + $0x10] sm:$0xff]  ;;  %v176_v18 = vld [vmem:[%s14167_s8 + $0x8] sm:$0xff] }
 0x7d6   :  { %10614 = vmatprep.subr.mxu1 %v183_v17  ;;  %v175_v3 = vld [vmem:[%s14167_s8] sm:$0xff] }
 0x7d7   :  { %11311 = vrsqrt.f32 %v2188_v49  ;;  %v2179_v42 = vsub.f32 %v2171_v24, %v2175_v50  ;;  %v2190_v30 = vadd.f32 1e-05, %v2182_v27  ;;  %10615 = vmatpush3.msra.mxu1 %v183_v17  ;;  %v12355_v50 = vsub.s32 6, %v11767_v11 }
 0x7d8   :  { %v2147_v6 = vpop.xlane.xlu0 %2146  ;;  %10616 = vmatprep.subr.mxu1 %v182_v26 }
 0x7d9   :  { %v2187_v28 = vadd.f32 1e-05, %v2179_v42  ;;  %v2153_v54 = vmul.f32 0.03125, %v2147_v6  ;;  %10617 = vmatpush3.msra.mxu1 %v182_v26  ;;  %v2218_v49 = vrot.slane %v12240_v25, %v12355_v50 }
 0x7da   :  { %10618 = vmatprep.subr.mxu1 %v181_v19 }
 0x7db   :  { %11313 = vrsqrt.f32 %v2187_v28  ;;  %v2177_v2 = vmul.f32 %v2153_v54, %v2153_v54  ;;  %v2185_v8 = vsub.f32 %v12268_v34, %v2153_v54  ;;  %10619 = vmatpush3.msra.mxu1 %v181_v19 }
 0x7dc   :  { %v2167_v32 = vpop.xlane.xlu0 %2166  ;;  %11315 = vrsqrt.f32 %v2190_v30  ;;  %10620 = vmatprep.subr.mxu1 %v180_v14 }
 0x7dd   :  { %v2173_v56 = vmul.f32 0.03125, %v2167_v32  ;;  %10621 = vmatpush3.msra.mxu1 %v180_v14  ;;  %v12360_v14 = vsub.s32 7, %v11767_v11 }
 0x7de   :  { %10622 = vmatprep.subr.mxu1 %v179_v15 }
 0x7df   :  { %v2181_v5 = vsub.f32 %v2173_v56, %v2177_v2  ;;  %10623 = vmatpush3.msra.mxu1 %v179_v15  ;;  %v2444_v15 = vrot.slane %v12240_v25, %v12360_v14 }
 0x7e0   :  { %10624 = vmatprep.subr.mxu1 %v178_v21 }
 0x7e1   :  { %v2189_v29 = vadd.f32 1e-05, %v2181_v5  ;;  %10625 = vmatpush3.msra.mxu1 %v178_v21 }
 0x7e2   :  { %10626 = vmatprep.subr.mxu1 %v177_v60 }
 0x7e3   :  { %11317 = vrsqrt.f32 %v2189_v29  ;;  %10627 = vmatpush3.msra.mxu1 %v177_v60 }
 0x7e4   :  { %v11312_v61 = vpop.eup %11311  ;;  %10628 = vmatprep.subr.mxu1 %v176_v18 }
 0x7e5   :  { %v2196_v63 = vmul.f32 %v11312_v61, %v2184_v44  ;;  %10629 = vmatpush3.msra.mxu1 %v176_v18 }
 0x7e6   :  { %10630 = vmatprep.subr.mxu1 %v175_v3 }
 0x7e7   :  { %v2204_v20 = vmul.f32 %v2202_v47, %v2196_v63  ;;  %10631 = vmatpush3.msra.mxu1 %v175_v3 }
 0x7e8   :  { %v11314_v0 = vpop.eup %11313 }
 0x7e9   :  { %v2195_v35 = vmul.f32 %v11314_v0, %v2183_v36  ;;  %v11316_v38 = vpop.eup %11315  ;;  %v2212_v7 = vadd.f32 %v2210_v4, %v2204_v20 }
 0x7ea   :  { %v2198_v52 = vmul.f32 %v11316_v38, %v2186_v33 }
 0x7eb   :  { %v2203_v23 = vmul.f32 %v2202_v47, %v2195_v35 }
 0x7ec   :  { %v2206_v31 = vmul.f32 %v2202_v47, %v2198_v52 }
 0x7ed   :  { %v2211_v40 = vadd.f32 %v2210_v4, %v2203_v23 }
 0x7ee   :  { %v2214_v57 = vadd.f32 %v2210_v4, %v2206_v31 }
 0x7ef   :  { %10594 = vmatprep.mubr.msk.f32.mxu0 %vm192_vm1, %v2211_v40 }
 0x7f0   :  { %v11318_v41 = vpop.eup %11317  ;;  %10595 = vmatmul.mubr.msk.f32.vlgmr.msra.gmra.mxu0 %vm192_vm1, %v2212_v7 }
 0x7f1   :  { %v2197_v55 = vmul.f32 %v11318_v41, %v2185_v8 }
 0x7f3   :  { %v2205_v62 = vmul.f32 %v2202_v47, %v2197_v55 }
 0x7f5   :  { %v2213_v45 = vadd.f32 %v2210_v4, %v2205_v62 }
 0x7f7   :  { %10597 = vmatprep.mubr.msk.f32.mxu0 %vm192_vm1, %v2213_v45 }
 0x7f8   :  { %10598 = vmatmul.mubr.msk.f32.gmra.mxu0 %vm192_vm1, %v2214_v57 }
 0x8b0   :  { %v10596_v24 = vpop.f32.mrf.mxu0 }
 0x8b1   :  { %v2303_v27 = vadd.f32 %v10596_v24, %v2218_v49 }
 0x8b2   :  { %v2297_v42 = vpop.f32.mrf.mxu0 }
 0x8b3   :  { %v2321_v6 = vmul.f32 0.044715, %v2303_v27  ;;  %v2298_v28 = vadd.f32 %v2297_v42, %v2218_v49  ;;  %v2317_v57 = vmul.f32 0.5, %v2303_v27 }
 0x8b5   :  { %v2325_v54 = vmul.f32 %v2321_v6, %v2303_v27  ;;  %v2320_v30 = vmul.f32 0.044715, %v2298_v28  ;;  %v2316_v62 = vmul.f32 0.5, %v2298_v28 }
 0x8b7   :  { %v2329_v32 = vmul.f32 %v2325_v54, %v2303_v27  ;;  %v2324_v2 = vmul.f32 %v2320_v30, %v2298_v28 }
 0x8b8   :  { %v10599_v56 = vpop.f32.mrf.mxu0 }
 0x8b9   :  { %v2333_v5 = vadd.f32 %v2329_v32, %v2303_v27  ;;  %v2313_v29 = vadd.f32 %v10599_v56, %v2218_v49  ;;  %v2328_v61 = vmul.f32 %v2324_v2, %v2298_v28 }
 0x8ba   :  { %v2307_v44 = vpop.f32.mrf.mxu0 }
 0x8bb   :  { %v2337_v47 = vmul.f32 0.7978846, %v2333_v5  ;;  %v2323_v63 = vmul.f32 0.044715, %v2313_v29  ;;  %v2308_v36 = vadd.f32 %v2307_v44, %v2218_v49  ;;  %v2332_v0 = vadd.f32 %v2328_v61, %v2298_v28  ;;  %v9710_v44 = vld [vmem:[%s14164_s5 + $0x38] sm:$0xff] }
 0x8bc   :  { %v2319_v17 = vmul.f32 0.5, %v2313_v29  ;;  %10638 = vmatprep.subr.mxu0 %v9710_v44 }
 0x8bd   :  { %11319 = vtanh.f32 %v2337_v47  ;;  %v2327_v35 = vmul.f32 %v2323_v63, %v2313_v29  ;;  %v2322_v4 = vmul.f32 0.044715, %v2308_v36  ;;  %v2336_v20 = vmul.f32 0.7978846, %v2332_v0  ;;  %v9709_v47 = vld [vmem:[%s14164_s5 + $0x30] sm:$0xff]  ;;  %10639 = vmatpush3.msra.mxu0 %v9710_v44  ;;  %v9708_v63 = vld [vmem:[%s14164_s5 + $0x28] sm:$0xff] }
 0x8be   :  { %v2318_v22 = vmul.f32 0.5, %v2308_v36  ;;  %10640 = vmatprep.subr.mxu0 %v9709_v47 }
 0x8bf   :  { %v2326_v38 = vmul.f32 %v2322_v4, %v2308_v36  ;;  %11321 = vtanh.f32 %v2336_v20  ;;  %v2331_v23 = vmul.f32 %v2327_v35, %v2313_v29  ;;  %10641 = vmatpush3.msra.mxu0 %v9709_v47 }
 0x8c0   :  { %10642 = vmatprep.subr.mxu0 %v9708_v63 }
 0x8c1   :  { %v2330_v33 = vmul.f32 %v2326_v38, %v2308_v36  ;;  %v2335_v40 = vadd.f32 %v2331_v23, %v2313_v29  ;;  %10643 = vmatpush3.msra.mxu0 %v9708_v63 }
 0x8c3   :  { %v2334_v7 = vadd.f32 %v2330_v33, %v2308_v36  ;;  %v2339_v52 = vmul.f32 0.7978846, %v2335_v40  ;;  %v9707_v36 = vld [vmem:[%s14164_s5 + $0x20] sm:$0xff] }
 0x8c4   :  { %10644 = vmatprep.subr.mxu0 %v9707_v36 }
 0x8c5   :  { %v2338_v8 = vmul.f32 0.7978846, %v2334_v7  ;;  %11323 = vtanh.f32 %v2339_v52  ;;  %10645 = vmatpush3.msra.mxu0 %v9707_v36 }
 0x8c7   :  { %11325 = vtanh.f32 %v2338_v8 }
 0x8ca   :  { %v11320_v41 = vpop.eup %11319 }
 0x8cb   :  { %v2345_v31 = vadd.f32 1.0, %v11320_v41 }
 0x8cc   :  { %v11322_v55 = vpop.eup %11321 }
 0x8cd   :  { %v2344_v45 = vadd.f32 1.0, %v11322_v55  ;;  %v2349_v10 = vmul.f32 %v2345_v31, %v2317_v57 }
 0x8cf   :  { %v2348_v9 = vmul.f32 %v2344_v45, %v2316_v62 }
 0x8d1   :  { %10632 = vmatprep.mubr.f32.mxu1 %v2348_v9 }
 0x8d2   :  { %v11324_v46 = vpop.eup %11323  ;;  %10633 = vmatmul.mubr.f32.vlgmr.msra.gmra.mxu1 %v2349_v10 }
 0x8d3   :  { %v2347_v58 = vadd.f32 1.0, %v11324_v46 }
 0x8d4   :  { %v11326_v13 = vpop.eup %11325 }
 0x8d5   :  { %v2346_v1 = vadd.f32 1.0, %v11326_v13  ;;  %v2351_v19 = vmul.f32 %v2347_v58, %v2319_v17 }
 0x8d7   :  { %v2350_v26 = vmul.f32 %v2346_v1, %v2318_v22 }
 0x8d9   :  { %10635 = vmatprep.mubr.f32.mxu1 %v2350_v26 }
 0x8da   :  { %10636 = vmatmul.mubr.f32.gmra.mxu1 %v2351_v19 }
 0x992   :  { %v10634_v21 = vpop.f32.mrf.mxu1 }
 0x993   :  { %v2438_v60 = vadd.f32 %v10634_v21, %v12245_v59  ;;  %v9735_v21 = vld [vmem:[%s14168_s9 + $0x8] sm:$0xff] }
 0x994   :  { %v2418_v18 = vpop.f32.mrf.mxu1  ;;  %v2562_v36 = vrot.slane %v9735_v21, %v11839_v39 }
 0x995   :  { %v12365_v3 = vadd.f32 %v2444_v15, %v2438_v60  ;;  %v2437_v49 = vadd.f32 %v2418_v18, %v12248_v43 }
 0x997   :  { %v12368_v24 = vadd.f32 %v2444_v15, %v2437_v49  ;;  %v2486_v27 = vsel %vm192_vm1, %v12365_v3, 0.0  ;;  %v2500_v11 = vmul.f32 %v12365_v3, %v12365_v3  ;;  %v2546_v49 = vrot.slane %v9735_v21, %v11770_v12 }
 0x998   :  { %2487 = vadd.xlane.f32.xlu1 %v2486_v27 }
 0x999   :  { %v2483_v25 = vsel %vm192_vm1, %v12368_v24, 0.0  ;;  %v2499_v59 = vmul.f32 %v12368_v24, %v12368_v24  ;;  %v2506_v43 = vsel %vm192_vm1, %v2500_v11, 0.0 }
 0x99a   :  { %2484 = vadd.xlane.f32.xlu0 %v2483_v25  ;;  %v10637_v42 = vpop.f32.mrf.mxu1 }
 0x99b   :  { %v2440_v6 = vadd.f32 %v10637_v42, %v12253_v48  ;;  %v2503_v32 = vsel %vm192_vm1, %v2499_v59, 0.0  ;;  %v2554_v42 = vrot.slane %v9735_v21, %v11828_v16 }
 0x99c   :  { %2507 = vadd.xlane.f32.xlu1 %v2506_v43  ;;  %v2428_v28 = vpop.f32.mrf.mxu1 }
 0x99d   :  { %v12380_v54 = vadd.f32 %v2444_v15, %v2440_v6  ;;  %v2439_v30 = vadd.f32 %v2428_v28, %v12268_v34 }
 0x99e   :  { %2504 = vadd.xlane.f32.xlu0 %v2503_v32 }
 0x99f   :  { %v12384_v2 = vadd.f32 %v2444_v15, %v2439_v30  ;;  %v2492_v56 = vsel %vm192_vm1, %v12380_v54, 0.0  ;;  %v2502_v5 = vmul.f32 %v12380_v54, %v12380_v54 }
 0x9a0   :  { %2493 = vadd.xlane.f32.xlu1 %v2492_v56 }
 0x9a1   :  { %v2489_v48 = vsel %vm192_vm1, %v12384_v2, 0.0  ;;  %v2501_v29 = vmul.f32 %v12384_v2, %v12384_v2  ;;  %v2512_v34 = vsel %vm192_vm1, %v2502_v5, 0.0 }
 0x9a2   :  { %2490 = vadd.xlane.f32.xlu0 %v2489_v48 }
 0x9a3   :  { %v2509_v61 = vsel %vm192_vm1, %v2501_v29, 0.0 }
 0x9a4   :  { %2513 = vadd.xlane.f32.xlu1 %v2512_v34 }
 0x9a6   :  { %2510 = vadd.xlane.f32.xlu0 %v2509_v61 }
 0xa21   :  { %v2488_v0 = vpop.xlane.xlu1 %2487 }
 0xa22   :  { %v2496_v35 = vmul.f32 0.03125, %v2488_v0 }
 0xa23   :  { %v2485_v4 = vpop.xlane.xlu0 %2484 }
 0xa24   :  { %v2495_v20 = vmul.f32 0.03125, %v2485_v4  ;;  %v2520_v23 = vmul.f32 %v2496_v35, %v2496_v35  ;;  %v2528_v60 = vsub.f32 %v12365_v3, %v2496_v35 }
 0xa25   :  { %v2508_v38 = vpop.xlane.xlu1 %2507 }
 0xa26   :  { %v2516_v33 = vmul.f32 0.03125, %v2508_v38  ;;  %v2519_v7 = vmul.f32 %v2495_v20, %v2495_v20  ;;  %v2527_v27 = vsub.f32 %v12368_v24, %v2495_v20 }
 0xa27   :  { %v2505_v40 = vpop.xlane.xlu0 %2504 }
 0xa28   :  { %v2524_v52 = vsub.f32 %v2516_v33, %v2520_v23  ;;  %v2515_v8 = vmul.f32 0.03125, %v2505_v40 }
 0xa29   :  { %v2494_v41 = vpop.xlane.xlu1 %2493 }
 0xa2a   :  { %v2532_v55 = vadd.f32 1e-05, %v2524_v52  ;;  %v2523_v31 = vsub.f32 %v2515_v8, %v2519_v7  ;;  %v2498_v62 = vmul.f32 0.03125, %v2494_v41 }
 0xa2b   :  { %v2491_v45 = vpop.xlane.xlu0 %2490 }
 0xa2c   :  { %11327 = vrsqrt.f32 %v2532_v55  ;;  %v2531_v57 = vadd.f32 1e-05, %v2523_v31  ;;  %v2497_v9 = vmul.f32 0.03125, %v2491_v45  ;;  %v2522_v46 = vmul.f32 %v2498_v62, %v2498_v62 }
 0xa2d   :  { %v2514_v10 = vpop.xlane.xlu1 %2513  ;;  %v2530_v28 = vsub.f32 %v12380_v54, %v2498_v62 }
 0xa2e   :  { %11329 = vrsqrt.f32 %v2531_v57  ;;  %v2518_v13 = vmul.f32 0.03125, %v2514_v10  ;;  %v2521_v22 = vmul.f32 %v2497_v9, %v2497_v9  ;;  %v2529_v5 = vsub.f32 %v12384_v2, %v2497_v9 }
 0xa2f   :  { %v2511_v58 = vpop.xlane.xlu0 %2510 }
 0xa30   :  { %v2526_v1 = vsub.f32 %v2518_v13, %v2522_v46  ;;  %v2517_v17 = vmul.f32 0.03125, %v2511_v58 }
 0xa32   :  { %v2534_v26 = vadd.f32 1e-05, %v2526_v1  ;;  %v2525_v19 = vsub.f32 %v2517_v17, %v2521_v22 }
 0xa34   :  { %11331 = vrsqrt.f32 %v2534_v26  ;;  %v2533_v15 = vadd.f32 1e-05, %v2525_v19 }
 0xa36   :  { %11333 = vrsqrt.f32 %v2533_v15 }
 0xa39   :  { %v11328_v18 = vpop.eup %11327 }
 0xa3a   :  { %v2540_v11 = vmul.f32 %v11328_v18, %v2528_v60 }
 0xa3b   :  { %v11330_v25 = vpop.eup %11329 }
 0xa3c   :  { %v2539_v59 = vmul.f32 %v11330_v25, %v2527_v27  ;;  %v2548_v6 = vmul.f32 %v2546_v49, %v2540_v11 }
 0xa3e   :  { %v2547_v43 = vmul.f32 %v2546_v49, %v2539_v59  ;;  %v2556_v56 = vadd.f32 %v2554_v42, %v2548_v6 }
 0xa40   :  { %v2555_v30 = vadd.f32 %v2554_v42, %v2547_v43 }
 0xa41   :  { %v11332_v32 = vpop.eup %11331 }
 0xa42   :  { %10646 = vmatprep.mubr.msk.f32.mxu0 %vm192_vm1, %v2555_v30  ;;  %v2542_v48 = vmul.f32 %v11332_v32, %v2530_v28 }
 0xa43   :  { %v11334_v29 = vpop.eup %11333  ;;  %10647 = vmatmul.mubr.msk.f32.vlgmr.msra.gmra.mxu0 %vm192_vm1, %v2556_v56 }
 0xa44   :  { %v2541_v34 = vmul.f32 %v11334_v29, %v2529_v5  ;;  %v2550_v61 = vmul.f32 %v2546_v49, %v2542_v48 }
 0xa46   :  { %v2549_v44 = vmul.f32 %v2546_v49, %v2541_v34  ;;  %v2558_v63 = vadd.f32 %v2554_v42, %v2550_v61 }
 0xa48   :  { %v2557_v47 = vadd.f32 %v2554_v42, %v2549_v44 }
 0xa4a   :  { %10649 = vmatprep.mubr.msk.f32.mxu0 %vm192_vm1, %v2557_v47 }
 0xa4b   :  { %10650 = vmatmul.mubr.msk.f32.gmra.mxu0 %vm192_vm1, %v2558_v63 }
 0xb03   :  { %v10648_v0 = vpop.f32.mrf.mxu0 }
 0xb04   :  { %v2647_v35 = vadd.f32 %v10648_v0, %v2562_v36 }
 0xb05   :  { %v2641_v4 = vpop.f32.mrf.mxu0 }
 0xb06   :  { %v2642_v20 = vadd.f32 %v2641_v4, %v2562_v36  ;;  %2666 = vrot.lane.b32.xlu0 %v2647_v35, %s11657_s19 }
 0xb08   :  { %2664 = vrot.lane.b32.xlu1 %v2642_v20, %s11657_s19  ;;  %10656 = vmatprep.mubr.msk.f32.mxu0 %vm403_vm2, %v2642_v20 }
 0xb0a   :  { %2674 = vrot.lane.b32.xlu0 %v2647_v35, %s11658_s20 }
 0xb0b   :  { %v10651_v38 = vpop.f32.mrf.mxu0 }
 0xb0c   :  { %v12426_v23 = vadd.f32 %v10651_v38, %v2562_v36 }
 0xb0d   :  { %v2651_v33 = vpop.f32.mrf.mxu0 }
 0xb0e   :  { %2678 = vrot.lane.b32.xlu0 %v12426_v23, %s11658_s20  ;;  %2670 = vrot.lane.b32.xlu1 %v12426_v23, %s11657_s19  ;;  %v2652_v40 = vadd.f32 %v2651_v33, %v2562_v36 }
 0xb12   :  { %2682 = vrot.lane.b32.xlu0 %v2647_v35, %s11659_s21  ;;  %2668 = vrot.lane.b32.xlu1 %v2652_v40, %s11657_s19 }
 0xb16   :  { %2686 = vrot.lane.b32.xlu0 %v12426_v23, %s11659_s21  ;;  %2672 = vrot.lane.b32.xlu1 %v2642_v20, %s11658_s20 }
 0xb1a   :  { %2690 = vrot.lane.b32.xlu0 %v2647_v35, %s11660_s22  ;;  %2676 = vrot.lane.b32.xlu1 %v2652_v40, %s11658_s20 }
 0xb1e   :  { %2777 = vrot.lane.b32.xlu0 %v12426_v23, %s11660_s22  ;;  %2680 = vrot.lane.b32.xlu1 %v2642_v20, %s11659_s21 }
 0xb22   :  { %2684 = vrot.lane.b32.xlu1 %v2652_v40, %s11659_s21 }
 0xb26   :  { %2688 = vrot.lane.b32.xlu1 %v2642_v20, %s11660_s22 }
 0xb2a   :  { %2775 = vrot.lane.b32.xlu1 %v2652_v40, %s11660_s22 }
 0xb78   :  { %v2667_v7 = vpop.permute.xlu0 %2666 }
 0xb79   :  { %2864 = vrot.lane.b32.xlu0 %v2667_v7, %s11660_s22 }
 0xb7a   :  { %v2665_v52 = vpop.permute.xlu1 %2664 }
 0xb7b   :  { %2862 = vrot.lane.b32.xlu1 %v2665_v52, %s11660_s22 }
 0xb7c   :  { %v12447_v8 = vpop.permute.xlu0 %2674 }
 0xb80   :  { %v12449_v41 = vpop.permute.xlu1 %2670  ;;  %v12451_v55 = vpop.permute.xlu0 %2678 }
 0xb81   :  { %2951 = vrot.lane.b32.xlu0 %v12449_v41, %s11660_s22 }
 0xb84   :  { %v2669_v31 = vpop.permute.xlu1 %2668  ;;  %v12455_v62 = vpop.permute.xlu0 %2682 }
 0xb85   :  { %10677 = vmatprep.mubr.msk.f32.mxu1 %vm403_vm2, %v2669_v31  ;;  %2949 = vrot.lane.b32.xlu1 %v2669_v31, %s11660_s22 }
 0xb86   :  { %3038 = vrot.lane.b32.xlu0 %v12447_v8, %s11660_s22 }
 0xb88   :  { %v2673_v45 = vpop.permute.xlu1 %2672  ;;  %v12461_v57 = vpop.permute.xlu0 %2686 }
 0xb89   :  { %3036 = vrot.lane.b32.xlu1 %v2673_v45, %s11660_s22 }
 0xb8a   :  { %3125 = vrot.lane.b32.xlu0 %v12451_v55, %s11660_s22 }
 0xb8c   :  { %v12466_v9 = vpop.permute.xlu1 %2676  ;;  %v2691_v10 = vpop.permute.xlu0 %2690 }
 0xb8d   :  { %3123 = vrot.lane.b32.xlu1 %v12466_v9, %s11660_s22  ;;  %10652 = vmatprep.subr.msk.mxu0 %vm403_vm2, %v2691_v10 }
 0xb8e   :  { %3212 = vrot.lane.b32.xlu0 %v12455_v62, %s11660_s22  ;;  %10653 = vmatpush3.xpose.msk.msra.mxu0 %vm403_vm2, %v2691_v10 }
 0xb90   :  { %v12474_v46 = vpop.permute.xlu1 %2680  ;;  %v2778_v22 = vpop.permute.xlu0 %2777 }
 0xb91   :  { %3210 = vrot.lane.b32.xlu1 %v12474_v46, %s11660_s22 }
 0xb92   :  { %3299 = vrot.lane.b32.xlu0 %v12461_v57, %s11660_s22 }
 0xb94   :  { %v12480_v13 = vpop.permute.xlu1 %2684 }
 0xb95   :  { %3297 = vrot.lane.b32.xlu1 %v12480_v13, %s11660_s22 }
 0xb96   :  { %3562 = vrot.lane.b32.xlu0 %v2647_v35, %s11661_s3 }
 0xb98   :  { %v2689_v58 = vpop.permute.xlu1 %2688 }
 0xb99   :  { %3560 = vrot.lane.b32.xlu1 %v2642_v20, %s11661_s3  ;;  %10654 = vmatprep.subr.msk.mxu0 %vm403_vm2, %v2689_v58 }
 0xb9a   :  { %3647 = vrot.lane.b32.xlu0 %v2652_v40, %s11661_s3  ;;  %10655 = vmatpush3.xpose.msk.msra.mxu0 %vm403_vm2, %v2689_v58 }
 0xb9b   :  { %10659 = vmatprep.subr.msk.mxu0 %vm403_vm2, %v2778_v22 }
 0xb9c   :  { %v2776_v1 = vpop.permute.xlu1 %2775 }
 0xb9d   :  { %3649 = vrot.lane.b32.xlu1 %v12426_v23, %s11661_s3  ;;  %10657 = vmatmul.mubr.msk.f32.vlgmr.msra.gmra.mxu0 %vm403_vm2, %v2647_v35 }
 0xb9e   :  { %3823 = vrot.lane.b32.xlu0 %v12449_v41, %s11661_s3  ;;  %10660 = vmatpush3.xpose.msk.msra.mxu0 %vm403_vm2, %v2778_v22 }
 0xb9f   :  { %10663 = vmatprep.mubr.msk.f32.mxu0 %vm403_vm2, %v2652_v40  ;;  %10661 = vmatprep.subr.msk.mxu0 %vm403_vm2, %v2776_v1 }
 0xba1   :  { %3736 = vrot.lane.b32.xlu1 %v2667_v7, %s11661_s3 }
 0xba2   :  { %3821 = vrot.lane.b32.xlu0 %v2669_v31, %s11661_s3  ;;  %10662 = vmatpush3.xpose.msk.msra.mxu0 %vm403_vm2, %v2776_v1 }
 0xba5   :  { %3734 = vrot.lane.b32.xlu1 %v2665_v52, %s11661_s3  ;;  %10664 = vmatmul.mubr.msk.f32.vlgmr.msra.gmra.mxu0 %vm403_vm2, %v12426_v23 }
 0xba6   :  { %10670 = vmatprep.mubr.msk.f32.mxu0 %vm403_vm2, %v2665_v52 }
 0xba9   :  { %3910 = vrot.lane.b32.xlu1 %v12447_v8, %s11661_s3 }
 0xbad   :  { %3908 = vrot.lane.b32.xlu1 %v2673_v45, %s11661_s3 }
 0xbeb   :  { %v2865_v17 = vpop.permute.xlu0 %2864 }
 0xbec   :  { %10666 = vmatprep.subr.msk.mxu0 %vm403_vm2, %v2865_v17 }
 0xbed   :  { %v2863_v26 = vpop.permute.xlu1 %2862  ;;  %10667 = vmatpush3.xpose.msk.msra.mxu0 %vm403_vm2, %v2865_v17 }
 0xbee   :  { %10668 = vmatprep.subr.msk.mxu0 %vm403_vm2, %v2863_v26 }
 0xbf1   :  { %10669 = vmatpush3.xpose.msk.msra.mxu0 %vm403_vm2, %v2863_v26 }
 0xbf3   :  { %v2952_v19 = vpop.permute.xlu0 %2951 }
 0xbf4   :  { %10671 = vmatmul.mubr.msk.f32.vlgmr.msra.gmra.mxu0 %vm403_vm2, %v2667_v7  ;;  %10673 = vmatprep.subr.msk.mxu1 %vm403_vm2, %v2952_v19 }
 0xbf5   :  { %10674 = vmatpush3.xpose.msk.msra.mxu1 %vm403_vm2, %v2952_v19  ;;  %10684 = vmatprep.mubr.msk.f32.mxu0 %vm403_vm2, %v2673_v45 }
 0xbf7   :  { %v2950_v15 = vpop.permute.xlu1 %2949 }
 0xbf8   :  { %v3039_v21 = vpop.permute.xlu0 %3038  ;;  %10675 = vmatprep.subr.msk.mxu1 %vm403_vm2, %v2950_v15 }
 0xbf9   :  { %10680 = vmatprep.subr.msk.mxu0 %vm403_vm2, %v3039_v21  ;;  %10676 = vmatpush3.xpose.msk.msra.mxu1 %vm403_vm2, %v2950_v15 }
 0xbfa   :  { %10681 = vmatpush3.xpose.msk.msra.mxu0 %vm403_vm2, %v3039_v21 }
 0xbfb   :  { %v3037_v60 = vpop.permute.xlu1 %3036 }
 0xbfc   :  { %v3126_v18 = vpop.permute.xlu0 %3125  ;;  %10678 = vmatmul.mubr.msk.f32.vlgmr.msra.gmra.mxu1 %vm403_vm2, %v12449_v41  ;;  %10682 = vmatprep.subr.msk.mxu0 %vm403_vm2, %v3037_v60 }
 0xbfd   :  { %10687 = vmatprep.subr.msk.mxu1 %vm403_vm2, %v3126_v18  ;;  %10691 = vmatprep.mubr.msk.f32.mxu1 %vm403_vm2, %v12466_v9 }
 0xbfe   :  { %10683 = vmatpush3.xpose.msk.msra.mxu0 %vm403_vm2, %v3037_v60  ;;  %10688 = vmatpush3.xpose.msk.msra.mxu1 %vm403_vm2, %v3126_v18 }
 0xbff   :  { %v3124_v49 = vpop.permute.xlu1 %3123 }
 0xc00   :  { %v3213_v27 = vpop.permute.xlu0 %3212  ;;  %10689 = vmatprep.subr.msk.mxu1 %vm403_vm2, %v3124_v49 }
 0xc01   :  { %10685 = vmatmul.mubr.msk.f32.vlgmr.msra.gmra.mxu0 %vm403_vm2, %v12447_v8  ;;  %10694 = vmatprep.subr.msk.mxu0 %vm403_vm2, %v3213_v27 }
 0xc02   :  { %10690 = vmatpush3.xpose.msk.msra.mxu1 %vm403_vm2, %v3124_v49  ;;  %10695 = vmatpush3.xpose.msk.msra.mxu0 %vm403_vm2, %v3213_v27 }
 0xc03   :  { %10698 = vmatprep.mubr.msk.f32.mxu0 %vm403_vm2, %v12474_v46  ;;  %v3211_v11 = vpop.permute.xlu1 %3210 }
 0xc04   :  { %v3300_v25 = vpop.permute.xlu0 %3299  ;;  %10696 = vmatprep.subr.msk.mxu0 %vm403_vm2, %v3211_v11 }
 0xc05   :  { %10692 = vmatmul.mubr.msk.f32.vlgmr.msra.gmra.mxu1 %vm403_vm2, %v12451_v55  ;;  %10701 = vmatprep.subr.msk.mxu1 %vm403_vm2, %v3300_v25 }
 0xc06   :  { %10697 = vmatpush3.xpose.msk.msra.mxu0 %vm403_vm2, %v3211_v11  ;;  %10702 = vmatpush3.xpose.msk.msra.mxu1 %vm403_vm2, %v3300_v25 }
 0xc07   :  { %10705 = vmatprep.mubr.msk.f32.mxu1 %vm403_vm2, %v12480_v13  ;;  %v3298_v59 = vpop.permute.xlu1 %3297 }
 0xc08   :  { %v3563_v42 = vpop.permute.xlu0 %3562  ;;  %10703 = vmatprep.subr.msk.mxu1 %vm403_vm2, %v3298_v59 }
 0xc09   :  { %10699 = vmatmul.mubr.msk.f32.vlgmr.msra.gmra.mxu0 %vm403_vm2, %v12455_v62  ;;  %10708 = vmatprep.subr.mxu0 %v3563_v42 }
 0xc0a   :  { %10704 = vmatpush3.xpose.msk.msra.mxu1 %vm403_vm2, %v3298_v59  ;;  %10709 = vmatpush3.msra.mxu0 %v3563_v42 }
 0xc0b   :  { %v3561_v6 = vpop.permute.xlu1 %3560 }
 0xc0c   :  { %10710 = vmatprep.subr.mxu0 %v3561_v6  ;;  %v12611_v21 = vpop.permute.xlu0 %3647 }
 0xc0d   :  { %10706 = vmatmul.mubr.msk.f32.vlgmr.msra.gmra.mxu1 %vm403_vm2, %v12461_v57  ;;  %10711 = vmatpush3.msra.mxu0 %v3561_v6 }
 0xc0f   :  { %v12550_v43 = vpop.permute.xlu1 %3649 }
 0xc10   :  { %10715 = vmatprep.subr.mxu0 %v12550_v43  ;;  %v12613_v60 = vpop.permute.xlu0 %3823 }
 0xc13   :  { %v3737_v28 = vpop.permute.xlu1 %3736 }
 0xc14   :  { %10722 = vmatprep.subr.mxu1 %v3737_v28  ;;  %v12619_v18 = vpop.permute.xlu0 %3821 }
 0xc15   :  { %10723 = vmatpush3.msra.mxu1 %v3737_v28 }
 0xc17   :  { %v3735_v30 = vpop.permute.xlu1 %3734 }
 0xc18   :  { %10724 = vmatprep.subr.mxu1 %v3735_v30 }
 0xc19   :  { %10725 = vmatpush3.msra.mxu1 %v3735_v30 }
 0xc1b   :  { %v12553_v32 = vpop.permute.xlu1 %3910 }
 0xc1c   :  { %10736 = vmatprep.subr.mxu1 %v12553_v32 }
 0xc1f   :  { %v12625_v49 = vpop.permute.xlu1 %3908 }
 0xc5d   :  { %v12556_v56 = vpop.f32.mrf.mxu0 }
 0xc5e   :  { %v3387_v5 = vsel %vm1096_vm3, %v12556_v56, -inf }
 0xc5f   :  { %3388 = vmax.xlane.f32.xlu1 %v3387_v5  ;;  %v2766_v48 = vpop.f32.mrf.mxu0 }
 0xc60   :  { %v3384_v29 = vsel %vm1096_vm3, %v2766_v48, -inf }
 0xc61   :  { %3385 = vmax.xlane.f32.xlu0 %v3384_v29 }
 0xc65   :  { %v10665_v34 = vpop.f32.mrf.mxu0 }
 0xc66   :  { %v3393_v61 = vsel %vm1096_vm3, %v10665_v34, -inf }
 0xc67   :  { %3394 = vmax.xlane.f32.xlu0 %v3393_v61  ;;  %v2853_v44 = vpop.f32.mrf.mxu0 }
 0xc68   :  { %v3390_v47 = vsel %vm1096_vm3, %v2853_v44, -inf }
 0xc6b   :  { %3391 = vmax.xlane.f32.xlu0 %v3390_v47 }
 0xcb4   :  { %v12563_v63 = vpop.f32.mrf.mxu0 }
 0xcb5   :  { %v3399_v36 = vsel %vm1096_vm3, %v12563_v63, -inf }
 0xcb6   :  { %3400 = vmax.xlane.f32.xlu1 %v3399_v36  ;;  %v12567_v0 = vpop.f32.mrf.mxu0 }
 0xcb7   :  { %v3396_v35 = vsel %vm1096_vm3, %v12567_v0, -inf }
 0xcb8   :  { %3397 = vmax.xlane.f32.xlu0 %v3396_v35 }
 0xcbc   :  { %v12571_v4 = vpop.f32.mrf.mxu1 }
 0xcbd   :  { %v3405_v20 = vsel %vm1096_vm3, %v12571_v4, -inf }
 0xcbe   :  { %3406 = vmax.xlane.f32.xlu0 %v3405_v20  ;;  %v12575_v38 = vpop.f32.mrf.mxu1 }
 0xcbf   :  { %v3402_v33 = vsel %vm1096_vm3, %v12575_v38, -inf }
 0xcc1   :  { %v12577_v23 = vpop.f32.mrf.mxu0 }
 0xcc2   :  { %3403 = vmax.xlane.f32.xlu0 %v3402_v33  ;;  %v3411_v40 = vsel %vm1096_vm3, %v12577_v23, -inf }
 0xcc3   :  { %3412 = vmax.xlane.f32.xlu1 %v3411_v40  ;;  %v12583_v7 = vpop.f32.mrf.mxu0 }
 0xcc4   :  { %v3408_v8 = vsel %vm1096_vm3, %v12583_v7, -inf }
 0xcc5   :  { %v12585_v52 = vpop.f32.mrf.mxu1 }
 0xcc6   :  { %v3417_v41 = vsel %vm1096_vm3, %v12585_v52, -inf }
 0xcc7   :  { %3409 = vmax.xlane.f32.xlu1 %v3408_v8  ;;  %3418 = vmax.xlane.f32.xlu0 %v3417_v41  ;;  %v12591_v31 = vpop.f32.mrf.mxu1 }
 0xcc8   :  { %v3414_v10 = vsel %vm1096_vm3, %v12591_v31, -inf }
 0xcc9   :  { %v12593_v45 = vpop.f32.mrf.mxu0 }
 0xcca   :  { %v3423_v58 = vsel %vm1096_vm3, %v12593_v45, -inf }
 0xccb   :  { %3415 = vmax.xlane.f32.xlu0 %v3414_v10  ;;  %3424 = vmax.xlane.f32.xlu1 %v3423_v58  ;;  %v12599_v22 = vpop.f32.mrf.mxu0 }
 0xccc   :  { %v3420_v17 = vsel %vm1096_vm3, %v12599_v22, -inf }
 0xccd   :  { %v12601_v1 = vpop.f32.mrf.mxu1 }
 0xcce   :  { %v3429_v15 = vsel %vm1096_vm3, %v12601_v1, -inf }
 0xccf   :  { %3421 = vmax.xlane.f32.xlu1 %v3420_v17  ;;  %v12605_v26 = vpop.f32.mrf.mxu1 }
 0xcd0   :  { %v3426_v19 = vsel %vm1096_vm3, %v12605_v26, -inf }
 0xcd1   :  { %3427 = vmax.xlane.f32.xlu0 %v3426_v19 }
 0xcd3   :  { %3430 = vmax.xlane.f32.xlu1 %v3429_v15 }
 0xce4   :  { %4084 = vrot.lane.b32.xlu1 %v12455_v62, %s11661_s3 }
 0xce7   :  { %3997 = vrot.lane.b32.xlu0 %v12451_v55, %s11661_s3 }
 0xce8   :  { %4082 = vrot.lane.b32.xlu1 %v12474_v46, %s11661_s3  ;;  %v3389_v11 = vpop.xlane.xlu1 %3388 }
 0xce9   :  { %v3433_v42 = vsub.f32 %v12556_v56, %v3389_v11 }
 0xcea   :  { %v3386_v27 = vpop.xlane.xlu0 %3385 }
 0xceb   :  { %3995 = vrot.lane.b32.xlu0 %v12466_v9, %s11661_s3  ;;  %v3432_v59 = vsub.f32 %v2766_v48, %v3386_v27  ;;  %v3450_v55 = vmul.f32 1.442695, %v3433_v42 }
 0xced   :  { %v3448_v62 = vmul.f32 1.442695, %v3432_v59 }
 0xcef   :  { %11335 = vpow2.f32 %v3448_v62 }
 0xcf0   :  { %v3395_v25 = vpop.xlane.xlu0 %3394  ;;  %11337 = vpow2.f32 %v3450_v55 }
 0xcf1   :  { %v3435_v6 = vsub.f32 %v10665_v34, %v3395_v25 }
 0xcf3   :  { %v3454_v30 = vmul.f32 1.442695, %v3435_v6 }
 0xcf4   :  { %v3392_v28 = vpop.xlane.xlu0 %3391 }
 0xcf5   :  { %v3434_v5 = vsub.f32 %v2853_v44, %v3392_v28  ;;  %11339 = vpow2.f32 %v3454_v30 }
 0xcf7   :  { %v3452_v46 = vmul.f32 1.442695, %v3434_v5 }
 0xcf9   :  { %11341 = vpow2.f32 %v3452_v46 }
 0xcfc   :  { %v12628_v9 = vpop.eup %11335 }
 0xcfd   :  { %v12630_v29 = vpop.eup %11337  ;;  %v3480_v48 = vsel %vm1096_vm3, %v12628_v9, 0.0 }
 0xcfe   :  { %v3483_v56 = vsel %vm1096_vm3, %v12630_v29, 0.0 }
 0xd02   :  { %v12634_v61 = vpop.eup %11339 }
 0xd03   :  { %v3489_v34 = vsel %vm1096_vm3, %v12634_v61, 0.0 }
 0xd06   :  { %v12640_v44 = vpop.eup %11341 }
 0xd07   :  { %v3486_v47 = vsel %vm1096_vm3, %v12640_v44, 0.0 }
 0xd0a   :  { %3481 = vadd.xlane.f32.xlu0 %v3480_v48 }
 0xd0c   :  { %3484 = vadd.xlane.f32.xlu1 %v3483_v56 }
 0xd0e   :  { %3490 = vadd.xlane.f32.xlu0 %v3489_v34 }
 0xd12   :  { %3487 = vadd.xlane.f32.xlu0 %v3486_v47 }
 0xd3f   :  { %v3401_v36 = vpop.xlane.xlu1 %3400 }
 0xd40   :  { %v3437_v35 = vsub.f32 %v12563_v63, %v3401_v36 }
 0xd41   :  { %v3398_v20 = vpop.xlane.xlu0 %3397 }
 0xd42   :  { %v3458_v33 = vmul.f32 1.442695, %v3437_v35  ;;  %v3436_v40 = vsub.f32 %v12567_v0, %v3398_v20 }
 0xd44   :  { %11343 = vpow2.f32 %v3458_v33  ;;  %v3456_v8 = vmul.f32 1.442695, %v3436_v40 }
 0xd46   :  { %11345 = vpow2.f32 %v3456_v8 }
 0xd47   :  { %v3407_v41 = vpop.xlane.xlu0 %3406 }
 0xd48   :  { %v3439_v10 = vsub.f32 %v12571_v4, %v3407_v41 }
 0xd4a   :  { %v3462_v58 = vmul.f32 1.442695, %v3439_v10 }
 0xd4b   :  { %v3404_v17 = vpop.xlane.xlu0 %3403 }
 0xd4c   :  { %11347 = vpow2.f32 %v3462_v58  ;;  %v3413_v19 = vpop.xlane.xlu1 %3412  ;;  %v3438_v15 = vsub.f32 %v12575_v38, %v3404_v17 }
 0xd4d   :  { %v3441_v27 = vsub.f32 %v12577_v23, %v3413_v19 }
 0xd4e   :  { %v3460_v11 = vmul.f32 1.442695, %v3438_v15 }
 0xd4f   :  { %v3466_v63 = vmul.f32 1.442695, %v3441_v27 }
 0xd50   :  { %11349 = vpow2.f32 %v3460_v11  ;;  %v3410_v25 = vpop.xlane.xlu1 %3409  ;;  %v3419_v59 = vpop.xlane.xlu0 %3418 }
 0xd51   :  { %v12649_v0 = vpop.eup %11343  ;;  %11351 = vpow2.f32 %v3466_v63  ;;  %v3440_v42 = vsub.f32 %v12583_v7, %v3410_v25  ;;  %v3443_v4 = vsub.f32 %v12585_v52, %v3419_v59 }
 0xd52   :  { %v3495_v62 = vsel %vm1096_vm3, %v12649_v0, 0.0 }
 0xd53   :  { %v12655_v6 = vpop.eup %11345  ;;  %v3464_v38 = vmul.f32 1.442695, %v3440_v42  ;;  %v3470_v28 = vmul.f32 1.442695, %v3443_v4  ;;  %3496 = vadd.xlane.f32.xlu1 %v3495_v62 }
 0xd54   :  { %v3425_v23 = vpop.xlane.xlu1 %3424  ;;  %v3416_v55 = vpop.xlane.xlu0 %3415  ;;  %v3492_v7 = vsel %vm1096_vm3, %v12655_v6, 0.0 }
 0xd55   :  { %11353 = vpow2.f32 %v3464_v38  ;;  %v3445_v30 = vsub.f32 %v12593_v45, %v3425_v23  ;;  %v3442_v5 = vsub.f32 %v12591_v31, %v3416_v55 }
 0xd56   :  { %11355 = vpow2.f32 %v3470_v28 }
 0xd57   :  { %v3474_v52 = vmul.f32 1.442695, %v3445_v30  ;;  %v3468_v46 = vmul.f32 1.442695, %v3442_v5  ;;  %3493 = vadd.xlane.f32.xlu1 %v3492_v7 }
 0xd58   :  { %v3422_v48 = vpop.xlane.xlu1 %3421 }
 0xd59   :  { %v12661_v56 = vpop.eup %11347  ;;  %11357 = vpow2.f32 %v3474_v52  ;;  %v3444_v34 = vsub.f32 %v12599_v22, %v3422_v48 }
 0xd5a   :  { %11359 = vpow2.f32 %v3468_v46  ;;  %v3428_v47 = vpop.xlane.xlu0 %3427  ;;  %v3501_v45 = vsel %vm1096_vm3, %v12661_v56, 0.0 }
 0xd5b   :  { %v3472_v36 = vmul.f32 1.442695, %v3444_v34  ;;  %v3446_v31 = vsub.f32 %v12605_v26, %v3428_v47  ;;  %3502 = vadd.xlane.f32.xlu0 %v3501_v45 }
 0xd5c   :  { %v3431_v35 = vpop.xlane.xlu1 %3430 }
 0xd5d   :  { %v12667_v20 = vpop.eup %11349  ;;  %11361 = vpow2.f32 %v3472_v36  ;;  %v3476_v33 = vmul.f32 1.442695, %v3446_v31  ;;  %v3447_v40 = vsub.f32 %v12601_v1, %v3431_v35 }
 0xd5e   :  { %v12670_v8 = vpop.eup %11351  ;;  %v3498_v22 = vsel %vm1096_vm3, %v12667_v20, 0.0  ;;  %v12708_v38 = vpop.permute.xlu0 %3997 }
 0xd5f   :  { %11363 = vpow2.f32 %v3476_v33  ;;  %v3478_v41 = vmul.f32 1.442695, %v3447_v40  ;;  %v3507_v10 = vsel %vm1096_vm3, %v12670_v8, 0.0  ;;  %3499 = vadd.xlane.f32.xlu0 %v3498_v22 }
 0xd60   :  { %3508 = vadd.xlane.f32.xlu1 %v3507_v10  ;;  %v12710_v28 = vpop.permute.xlu1 %4084 }
 0xd61   :  { %11365 = vpow2.f32 %v3478_v41 }
 0xd62   :  { %v12676_v26 = vpop.eup %11353  ;;  %v12712_v23 = vpop.permute.xlu0 %3995 }
 0xd63   :  { %v12678_v58 = vpop.eup %11355  ;;  %v3504_v1 = vsel %vm1096_vm3, %v12676_v26, 0.0 }
 0xd64   :  { %3505 = vadd.xlane.f32.xlu1 %v3504_v1  ;;  %v3513_v17 = vsel %vm1096_vm3, %v12678_v58, 0.0  ;;  %v12714_v55 = vpop.permute.xlu1 %4082 }
 0xd65   :  { %3514 = vadd.xlane.f32.xlu0 %v3513_v17 }
 0xd66   :  { %v12684_v19 = vpop.eup %11357 }
 0xd67   :  { %v12686_v15 = vpop.eup %11359  ;;  %v3519_v27 = vsel %vm1096_vm3, %v12684_v19, 0.0 }
 0xd68   :  { %3520 = vadd.xlane.f32.xlu1 %v3519_v27  ;;  %v3510_v11 = vsel %vm1096_vm3, %v12686_v15, 0.0 }
 0xd69   :  { %3511 = vadd.xlane.f32.xlu0 %v3510_v11 }
 0xd6a   :  { %v12692_v63 = vpop.eup %11361 }
 0xd6b   :  { %v3516_v25 = vsel %vm1096_vm3, %v12692_v63, 0.0 }
 0xd6c   :  { %v12696_v59 = vpop.eup %11363  ;;  %3517 = vadd.xlane.f32.xlu1 %v3516_v25 }
 0xd6d   :  { %v3522_v42 = vsel %vm1096_vm3, %v12696_v59, 0.0 }
 0xd6e   :  { %v12700_v4 = vpop.eup %11365  ;;  %3523 = vadd.xlane.f32.xlu0 %v3522_v42 }
 0xd6f   :  { %v3525_v62 = vsel %vm1096_vm3, %v12700_v4, 0.0 }
 0xd70   :  { %3526 = vadd.xlane.f32.xlu1 %v3525_v62 }
 0xd81   :  { %4169 = vrot.lane.b32.xlu1 %v12480_v13, %s11661_s3 }
 0xd84   :  { %4171 = vrot.lane.b32.xlu0 %v12461_v57, %s11661_s3 }
 0xd93   :  { %v3482_v30 = vpop.xlane.xlu0 %3481 }
 0xd94   :  { %11367 = vrcp.f32 %v3482_v30 }
 0xd95   :  { %v3485_v5 = vpop.xlane.xlu1 %3484 }
 0xd96   :  { %11369 = vrcp.f32 %v3485_v5 }
 0xd97   :  { %v3491_v7 = vpop.xlane.xlu0 %3490 }
 0xd98   :  { %11371 = vrcp.f32 %v3491_v7 }
 0xd9b   :  { %v3488_v52 = vpop.xlane.xlu0 %3487 }
 0xd9c   :  { %11373 = vrcp.f32 %v3488_v52 }
 0xda1   :  { %v11368_v13 = vpop.eup %11367 }
 0xda2   :  { %v3544_v46 = vmul.f32 %v11368_v13, %v12628_v9 }
 0xda3   :  { %v11370_v57 = vpop.eup %11369 }
 0xda4   :  { %10712 = vmatprep.mubr.msk.f32.mxu0 %vm1096_vm3, %v3544_v46  ;;  %v3545_v48 = vmul.f32 %v11370_v57, %v12630_v29  ;;  %v9714_v46 = vld [vmem:[%s14165_s6 + $0x38] sm:$0xff] }
 0xda5   :  { %v11372_v34 = vpop.eup %11371 }
 0xda6   :  { %10713 = vmatmul.mubr.msk.f32.vlgmr.msra.gmra.mxu0 %vm1096_vm3, %v3545_v48  ;;  %v3547_v9 = vmul.f32 %v11372_v34, %v12634_v61  ;;  %v9712_v34 = vld [vmem:[%s14165_s6 + $0x28] sm:$0xff] }
 0xda7   :  { %10716 = vmatpush3.msra.mxu0 %v12550_v43 }
 0xda8   :  { %10717 = vmatprep.subr.mxu0 %v12611_v21 }
 0xda9   :  { %v11374_v47 = vpop.eup %11373  ;;  %10718 = vmatpush3.msra.mxu0 %v12611_v21 }
 0xdaa   :  { %10729 = vmatprep.subr.mxu0 %v12613_v60  ;;  %v3546_v45 = vmul.f32 %v11374_v47, %v12640_v44  ;;  %v9711_v47 = vld [vmem:[%s14165_s6 + $0x20] sm:$0xff] }
 0xdac   :  { %10719 = vmatprep.mubr.msk.f32.mxu0 %vm1096_vm3, %v3546_v45 }
 0xdad   :  { %10720 = vmatmul.mubr.msk.f32.vlgmr.msra.gmra.mxu0 %vm1096_vm3, %v3547_v9 }
 0xdae   :  { %10730 = vmatpush3.msra.mxu0 %v12613_v60 }
 0xdaf   :  { %10731 = vmatprep.subr.mxu0 %v12619_v18 }
 0xdb0   :  { %10732 = vmatpush3.msra.mxu0 %v12619_v18 }
 0xdb1   :  { %10743 = vmatprep.subr.mxu0 %v12708_v38 }
 0xddc   :  { %v3497_v43 = vpop.xlane.xlu1 %3496 }
 0xddd   :  { %11375 = vrcp.f32 %v3497_v43 }
 0xde0   :  { %v3494_v21 = vpop.xlane.xlu1 %3493 }
 0xde1   :  { %11377 = vrcp.f32 %v3494_v21 }
 0xde4   :  { %v3503_v29 = vpop.xlane.xlu0 %3502 }
 0xde5   :  { %11379 = vrcp.f32 %v3503_v29 }
 0xde8   :  { %v3500_v44 = vpop.xlane.xlu0 %3499 }
 0xde9   :  { %v3509_v61 = vpop.xlane.xlu1 %3508  ;;  %11381 = vrcp.f32 %v3500_v44 }
 0xdea   :  { %v11376_v36 = vpop.eup %11375  ;;  %11383 = vrcp.f32 %v3509_v61 }
 0xdeb   :  { %v3549_v18 = vmul.f32 %v11376_v36, %v12649_v0 }
 0xded   :  { %v3506_v31 = vpop.xlane.xlu1 %3505 }
 0xdee   :  { %v11378_v35 = vpop.eup %11377  ;;  %11385 = vrcp.f32 %v3506_v31  ;;  %v3515_v60 = vpop.xlane.xlu0 %3514 }
 0xdef   :  { %v3548_v33 = vmul.f32 %v11378_v35, %v12655_v6  ;;  %11387 = vrcp.f32 %v3515_v60 }
 0xdf1   :  { %v3521_v40 = vpop.xlane.xlu1 %3520  ;;  %10726 = vmatprep.mubr.msk.f32.mxu1 %vm1096_vm3, %v3548_v33 }
 0xdf2   :  { %v3512_v22 = vpop.xlane.xlu0 %3511  ;;  %10727 = vmatmul.mubr.msk.f32.vlgmr.msra.gmra.mxu1 %vm1096_vm3, %v3549_v18  ;;  %v11380_v41 = vpop.eup %11379 }
 0xdf3   :  { %11389 = vrcp.f32 %v3512_v22  ;;  %10737 = vmatpush3.msra.mxu1 %v12553_v32  ;;  %v3551_v17 = vmul.f32 %v11380_v41, %v12661_v56 }
 0xdf4   :  { %10738 = vmatprep.subr.mxu1 %v12625_v49  ;;  %11391 = vrcp.f32 %v3521_v40 }
 0xdf5   :  { %10739 = vmatpush3.msra.mxu1 %v12625_v49  ;;  %v3518_v10 = vpop.xlane.xlu1 %3517 }
 0xdf6   :  { %v11382_v6 = vpop.eup %11381  ;;  %11393 = vrcp.f32 %v3518_v10  ;;  %10750 = vmatprep.subr.mxu1 %v12710_v28 }
 0xdf7   :  { %v3524_v0 = vpop.xlane.xlu0 %3523  ;;  %v3550_v1 = vmul.f32 %v11382_v6, %v12667_v20  ;;  %v11384_v32 = vpop.eup %11383 }
 0xdf8   :  { %11395 = vrcp.f32 %v3524_v0  ;;  %v3553_v20 = vmul.f32 %v11384_v32, %v12670_v8 }
 0xdf9   :  { %v3527_v27 = vpop.xlane.xlu1 %3526  ;;  %10733 = vmatprep.mubr.msk.f32.mxu0 %vm1096_vm3, %v3550_v1 }
 0xdfa   :  { %11397 = vrcp.f32 %v3527_v27  ;;  %10734 = vmatmul.mubr.msk.f32.vlgmr.msra.gmra.mxu0 %vm1096_vm3, %v3551_v17 }
 0xdfb   :  { %v11386_v11 = vpop.eup %11385  ;;  %10744 = vmatpush3.msra.mxu0 %v12708_v38  ;;  %v4172_v25 = vpop.permute.xlu0 %4171 }
 0xdfc   :  { %10745 = vmatprep.subr.mxu0 %v12712_v23  ;;  %v3552_v49 = vmul.f32 %v11386_v11, %v12676_v26  ;;  %v11388_v56 = vpop.eup %11387 }
 0xdfd   :  { %10746 = vmatpush3.msra.mxu0 %v12712_v23  ;;  %v3555_v26 = vmul.f32 %v11388_v56, %v12678_v58  ;;  %v4170_v5 = vpop.permute.xlu1 %4169 }
 0xdfe   :  { %10740 = vmatprep.mubr.msk.f32.mxu1 %vm1096_vm3, %v3552_v49  ;;  %10757 = vmatprep.subr.mxu0 %v4172_v25 }
 0xdff   :  { %10741 = vmatmul.mubr.msk.f32.vlgmr.msra.gmra.mxu1 %vm1096_vm3, %v3553_v20 }
 0xe00   :  { %v11390_v42 = vpop.eup %11389  ;;  %10751 = vmatpush3.msra.mxu1 %v12710_v28 }
 0xe01   :  { %10752 = vmatprep.subr.mxu1 %v12714_v55  ;;  %v3554_v62 = vmul.f32 %v11390_v42, %v12686_v15  ;;  %v11392_v38 = vpop.eup %11391 }
 0xe02   :  { %10753 = vmatpush3.msra.mxu1 %v12714_v55  ;;  %v3557_v28 = vmul.f32 %v11392_v38, %v12684_v19 }
 0xe03   :  { %v11394_v23 = vpop.eup %11393  ;;  %10747 = vmatprep.mubr.msk.f32.mxu0 %vm1096_vm3, %v3554_v62  ;;  %10764 = vmatprep.subr.mxu1 %v9714_v46 }
 0xe04   :  { %10748 = vmatmul.mubr.msk.f32.vlgmr.msra.gmra.mxu0 %vm1096_vm3, %v3555_v26  ;;  %v3556_v8 = vmul.f32 %v11394_v23, %v12692_v63  ;;  %v12809_v23 = vld [vmem:[%s14168_s9 + $0x8] sm:$0xff] }
 0xe05   :  { %v11396_v30 = vpop.eup %11395  ;;  %10758 = vmatpush3.msra.mxu0 %v4172_v25 }
 0xe06   :  { %10759 = vmatprep.subr.mxu0 %v4170_v5  ;;  %10754 = vmatprep.mubr.msk.f32.mxu1 %vm1096_vm3, %v3556_v8  ;;  %v3558_v15 = vmul.f32 %v11396_v30, %v12696_v59  ;;  %v4420_v8 = vrot.slane %v12809_v23, %v12235_v37 }
 0xe07   :  { %v11398_v55 = vpop.eup %11397  ;;  %10760 = vmatpush3.msra.mxu0 %v4170_v5  ;;  %10755 = vmatmul.mubr.msk.f32.vlgmr.msra.gmra.mxu1 %vm1096_vm3, %v3557_v28 }
 0xe08   :  { %10761 = vmatprep.mubr.msk.f32.mxu0 %vm1096_vm3, %v3558_v15  ;;  %v3559_v58 = vmul.f32 %v11398_v55, %v12700_v4  ;;  %10765 = vmatpush3.msra.mxu1 %v9714_v46  ;;  %v9713_v4 = vld [vmem:[%s14165_s6 + $0x30] sm:$0xff] }
 0xe09   :  { %10766 = vmatprep.subr.mxu1 %v9713_v4 }
 0xe0a   :  { %10762 = vmatmul.mubr.msk.f32.vlgmr.msra.gmra.mxu0 %vm1096_vm3, %v3559_v58  ;;  %10767 = vmatpush3.msra.mxu1 %v9713_v4 }
 0xe0b   :  { %10768 = vmatprep.subr.mxu1 %v9712_v34 }
 0xe0c   :  { %10769 = vmatpush3.msra.mxu1 %v9712_v34 }
 0xe0d   :  { %10770 = vmatprep.subr.mxu1 %v9711_v47 }
 0xe0e   :  { %10771 = vmatpush3.msra.mxu1 %v9711_v47 }
 0xe66   :  { %v10714_v63 = vpop.f32.mrf.mxu0 }
 0xe68   :  { %v3638_v7 = vpop.f32.mrf.mxu0 }
 0xe6d   :  { %v10721_v19 = vpop.f32.mrf.mxu0 }
 0xe6f   :  { %v3725_v59 = vpop.f32.mrf.mxu0 }
 0xeb2   :  { %v10728_v52 = vpop.f32.mrf.mxu1 }
 0xeb3   :  { %4262 = vrot.lane.b32.xlu1 %v10728_v52, %s11662_s23 }
 0xeb4   :  { %v3812_v13 = vpop.f32.mrf.mxu1 }
 0xeb5   :  { %4260 = vrot.lane.b32.xlu0 %v3812_v13, %s11662_s23 }
 0xeba   :  { %v10735_v57 = vpop.f32.mrf.mxu0 }
 0xebb   :  { %4266 = vrot.lane.b32.xlu1 %v10735_v57, %s11662_s23 }
 0xebc   :  { %v3899_v48 = vpop.f32.mrf.mxu0 }
 0xebd   :  { %4264 = vrot.lane.b32.xlu0 %v3899_v48, %s11662_s23 }
 0xebf   :  { %v10742_v45 = vpop.f32.mrf.mxu1 }
 0xec0   :  { %4278 = vrot.lane.b32.xlu1 %v10742_v45, %s11663_s13 }
 0xec1   :  { %v3986_v9 = vpop.f32.mrf.mxu1 }
 0xec2   :  { %4276 = vrot.lane.b32.xlu0 %v3986_v9, %s11663_s13 }
 0xec4   :  { %v10749_v43 = vpop.f32.mrf.mxu0 }
 0xec5   :  { %4282 = vrot.lane.b32.xlu1 %v10749_v43, %s11663_s13  ;;  %v9718_v43 = vld [vmem:[%s14166_s7 + $0x38] sm:$0xff] }
 0xec6   :  { %v4073_v21 = vpop.f32.mrf.mxu0  ;;  %10778 = vmatprep.subr.mxu0 %v9718_v43 }
 0xec7   :  { %4280 = vrot.lane.b32.xlu0 %v4073_v21, %s11663_s13  ;;  %v10756_v29 = vpop.f32.mrf.mxu1  ;;  %v9717_v21 = vld [vmem:[%s14166_s7 + $0x30] sm:$0xff]  ;;  %10779 = vmatpush3.msra.mxu0 %v9718_v43 }
 0xec8   :  { %10780 = vmatprep.subr.mxu0 %v9717_v21 }
 0xec9   :  { %4294 = vrot.lane.b32.xlu1 %v10756_v29, %s11664_s14  ;;  %v4160_v44 = vpop.f32.mrf.mxu1  ;;  %v9716_v29 = vld [vmem:[%s14166_s7 + $0x28] sm:$0xff]  ;;  %10781 = vmatpush3.msra.mxu0 %v9717_v21 }
 0xeca   :  { %v10763_v61 = vpop.f32.mrf.mxu0  ;;  %10782 = vmatprep.subr.mxu0 %v9716_v29 }
 0xecb   :  { %4292 = vrot.lane.b32.xlu0 %v4160_v44, %s11664_s14  ;;  %v9715_v44 = vld [vmem:[%s14166_s7 + $0x20] sm:$0xff]  ;;  %10783 = vmatpush3.msra.mxu0 %v9716_v29 }
 0xecc   :  { %v4247_v36 = vpop.f32.mrf.mxu0  ;;  %10784 = vmatprep.subr.mxu0 %v9715_v44 }
 0xecd   :  { %4298 = vrot.lane.b32.xlu1 %v10763_v61, %s11664_s14  ;;  %10785 = vmatpush3.msra.mxu0 %v9715_v44  ;;  %v9734_v44 = vld [vmem:[%s14167_s8 + $0xf8] sm:$0xff] }
 0xece   :  { %10792 = vmatprep.subr.mxu1 %v9734_v44 }
 0xecf   :  { %4296 = vrot.lane.b32.xlu0 %v4247_v36, %s11664_s14 }
 0xf25   :  { %v4263_v31 = vpop.permute.xlu1 %4262 }
 0xf26   :  { %v4305_v0 = vsel %vm403_vm2, %v10714_v63, %v4263_v31 }
 0xf27   :  { %v4261_v35 = vpop.permute.xlu0 %4260 }
 0xf28   :  { %v4304_v6 = vsel %vm403_vm2, %v3638_v7, %v4261_v35 }
 0xf2d   :  { %v4267_v60 = vpop.permute.xlu1 %4266 }
 0xf2e   :  { %v4307_v20 = vsel %vm403_vm2, %v10721_v19, %v4267_v60 }
 0xf2f   :  { %v4265_v33 = vpop.permute.xlu0 %4264 }
 0xf30   :  { %v4306_v49 = vsel %vm403_vm2, %v3725_v59, %v4265_v33 }
 0xf32   :  { %v4279_v18 = vpop.permute.xlu1 %4278 }
 0xf33   :  { %v4309_v27 = vsel %vm1096_vm3, %v4305_v0, %v4279_v18 }
 0xf34   :  { %v4277_v40 = vpop.permute.xlu0 %4276 }
 0xf35   :  { %v4308_v1 = vsel %vm1096_vm3, %v4304_v6, %v4277_v40 }
 0xf37   :  { %v4283_v22 = vpop.permute.xlu1 %4282 }
 0xf38   :  { %v4311_v62 = vsel %vm1096_vm3, %v4307_v20, %v4283_v22 }
 0xf39   :  { %v4281_v41 = vpop.permute.xlu0 %4280 }
 0xf3a   :  { %v4310_v56 = vsel %vm1096_vm3, %v4306_v49, %v4281_v41 }
 0xf3b   :  { %v4295_v10 = vpop.permute.xlu1 %4294 }
 0xf3c   :  { %v4313_v11 = vsel %vm2025_vm4, %v4309_v27, %v4295_v10 }
 0xf3d   :  { %v4293_v17 = vpop.permute.xlu0 %4292 }
 0xf3e   :  { %v4312_v32 = vsel %vm2025_vm4, %v4308_v1, %v4293_v17 }
 0xf3f   :  { %10772 = vmatprep.mubr.msk.f32.mxu1 %vm192_vm1, %v4312_v32  ;;  %v4299_v25 = vpop.permute.xlu1 %4298 }
 0xf40   :  { %10773 = vmatmul.mubr.msk.f32.vlgmr.msra.gmra.mxu1 %vm192_vm1, %v4313_v11  ;;  %v4315_v26 = vsel %vm2025_vm4, %v4311_v62, %v4299_v25 }
 0xf41   :  { %v4297_v42 = vpop.permute.xlu0 %4296  ;;  %10793 = vmatpush3.msra.mxu1 %v9734_v44 }
 0xf42   :  { %v4314_v38 = vsel %vm2025_vm4, %v4310_v56, %v4297_v42 }
 0xf43   :  { %10775 = vmatprep.mubr.msk.f32.mxu1 %vm192_vm1, %v4314_v38 }
 0xf44   :  { %10776 = vmatmul.mubr.msk.f32.gmra.mxu1 %vm192_vm1, %v4315_v26 }
0x1000   :  { %v10774_v30 = vpop.f32.mrf.mxu1 }
0x1001   :  { %v4414_v5 = vadd.f32 %v10774_v30, %v12365_v3 }
0x1002   :  { %v4394_v28 = vpop.f32.mrf.mxu1 }
0x1003   :  { %v12814_v15 = vadd.f32 %v4420_v8, %v4414_v5  ;;  %v4413_v55 = vadd.f32 %v4394_v28, %v12368_v24 }
0x1004   :  { %v10777_v58 = vpop.f32.mrf.mxu1 }
0x1005   :  { %v12817_v63 = vadd.f32 %v4420_v8, %v4413_v55  ;;  %v4416_v7 = vadd.f32 %v10777_v58, %v12380_v54  ;;  %v4428_v52 = vsel %vm192_vm1, %v12814_v15, 0.0  ;;  %v4442_v3 = vmul.f32 %v12814_v15, %v12814_v15 }
0x1006   :  { %4429 = vadd.xlane.f32.xlu1 %v4428_v52  ;;  %v4404_v59 = vpop.f32.mrf.mxu1  ;;  %v4488_v55 = vrot.slane %v12809_v23, %v12289_v53 }
0x1007   :  { %v12822_v19 = vadd.f32 %v4420_v8, %v4416_v7  ;;  %v4425_v13 = vsel %vm192_vm1, %v12817_v63, 0.0  ;;  %v4415_v46 = vadd.f32 %v4404_v59, %v12384_v2  ;;  %v4448_v57 = vsel %vm192_vm1, %v4442_v3, 0.0 }
0x1008   :  { %4426 = vadd.xlane.f32.xlu0 %v4425_v13  ;;  %v4441_v4 = vmul.f32 %v12817_v63, %v12817_v63  ;;  %v4496_v3 = vrot.slane %v12809_v23, %v12295_v51 }
0x1009   :  { %v4434_v24 = vsel %vm192_vm1, %v12822_v19, 0.0  ;;  %v4444_v54 = vmul.f32 %v12822_v19, %v12822_v19  ;;  %v12837_v34 = vadd.f32 %v4420_v8, %v4415_v46 }
0x100a   :  { %4435 = vadd.xlane.f32.xlu1 %v4434_v24  ;;  %v4445_v47 = vsel %vm192_vm1, %v4441_v4, 0.0 }
0x100b   :  { %v4454_v48 = vsel %vm192_vm1, %v4444_v54, 0.0  ;;  %v4431_v45 = vsel %vm192_vm1, %v12837_v34, 0.0  ;;  %v4443_v2 = vmul.f32 %v12837_v34, %v12837_v34 }
0x100c   :  { %4449 = vadd.xlane.f32.xlu0 %v4448_v57 }
0x100d   :  { %v4451_v9 = vsel %vm192_vm1, %v4443_v2, 0.0 }
0x100e   :  { %4455 = vadd.xlane.f32.xlu1 %v4454_v48 }
0x1010   :  { %4446 = vadd.xlane.f32.xlu0 %v4445_v47 }
0x1014   :  { %4432 = vadd.xlane.f32.xlu0 %v4431_v45 }
0x1018   :  { %4452 = vadd.xlane.f32.xlu0 %v4451_v9 }
0x108f   :  { %v4430_v61 = vpop.xlane.xlu1 %4429 }
0x1090   :  { %v4438_v31 = vmul.f32 0.03125, %v4430_v61  ;;  %v9733_v61 = vld [vmem:[%s14167_s8 + $0xf0] sm:$0xff] }
0x1091   :  { %v4427_v36 = vpop.xlane.xlu0 %4426  ;;  %10794 = vmatprep.subr.mxu1 %v9733_v61 }
0x1092   :  { %v4462_v18 = vmul.f32 %v4438_v31, %v4438_v31  ;;  %v4437_v40 = vmul.f32 0.03125, %v4427_v36  ;;  %v4470_v28 = vsub.f32 %v12814_v15, %v4438_v31  ;;  %10795 = vmatpush3.msra.mxu1 %v9733_v61  ;;  %v9732_v36 = vld [vmem:[%s14167_s8 + $0xe8] sm:$0xff]  ;;  %v9731_v31 = vld [vmem:[%s14167_s8 + $0xe0] sm:$0xff] }
0x1093   :  { %v4436_v35 = vpop.xlane.xlu1 %4435  ;;  %10796 = vmatprep.subr.mxu1 %v9732_v36 }
0x1094   :  { %v4440_v60 = vmul.f32 0.03125, %v4436_v35  ;;  %v4461_v17 = vmul.f32 %v4437_v40, %v4437_v40  ;;  %v4469_v7 = vsub.f32 %v12817_v63, %v4437_v40  ;;  %10797 = vmatpush3.msra.mxu1 %v9732_v36  ;;  %v9730_v35 = vld [vmem:[%s14167_s8 + $0xd8] sm:$0xff] }
0x1095   :  { %v4450_v33 = vpop.xlane.xlu0 %4449  ;;  %10798 = vmatprep.subr.mxu1 %v9731_v31  ;;  %v9726_v40 = vld [vmem:[%s14167_s8 + $0xb8] sm:$0xff] }
0x1096   :  { %v4458_v22 = vmul.f32 0.03125, %v4450_v33  ;;  %v4464_v0 = vmul.f32 %v4440_v60, %v4440_v60  ;;  %v4472_v46 = vsub.f32 %v12822_v19, %v4440_v60  ;;  %10799 = vmatpush3.msra.mxu1 %v9731_v31  ;;  %v9729_v60 = vld [vmem:[%s14167_s8 + $0xd0] sm:$0xff]  ;;  %v9728_v33 = vld [vmem:[%s14167_s8 + $0xc8] sm:$0xff] }
0x1097   :  { %v4456_v41 = vpop.xlane.xlu1 %4455  ;;  %10800 = vmatprep.subr.mxu1 %v9730_v35 }
0x1098   :  { %v4466_v10 = vsub.f32 %v4458_v22, %v4462_v18  ;;  %v4460_v6 = vmul.f32 0.03125, %v4456_v41  ;;  %10801 = vmatpush3.msra.mxu1 %v9730_v35  ;;  %v9727_v18 = vld [vmem:[%s14167_s8 + $0xc0] sm:$0xff]  ;;  %v9725_v22 = vld [vmem:[%s14167_s8 + $0xb0] sm:$0xff]  ;;  %v9724_v41 = vld [vmem:[%s14167_s8 + $0xa8] sm:$0xff] }
0x1099   :  { %v4447_v1 = vpop.xlane.xlu0 %4446  ;;  %10802 = vmatprep.subr.mxu1 %v9729_v60 }
0x109a   :  { %v4474_v27 = vadd.f32 1e-05, %v4466_v10  ;;  %v4457_v32 = vmul.f32 0.03125, %v4447_v1  ;;  %v4468_v11 = vsub.f32 %v4460_v6, %v4464_v0  ;;  %10803 = vmatpush3.msra.mxu1 %v9729_v60  ;;  %v9723_v10 = vld [vmem:[%s14167_s8 + $0xa0] sm:$0xff]  ;;  %v9722_v6 = vld [vmem:[%s14167_s8 + $0x98] sm:$0xff]  ;;  %v9721_v0 = vld [vmem:[%s14167_s8 + $0x90] sm:$0xff] }
0x109b   :  { %10804 = vmatprep.subr.mxu1 %v9728_v33  ;;  %v9720_v1 = vld [vmem:[%s14167_s8 + $0x88] sm:$0xff] }
0x109c   :  { %11399 = vrsqrt.f32 %v4474_v27  ;;  %v4465_v49 = vsub.f32 %v4457_v32, %v4461_v17  ;;  %v4476_v42 = vadd.f32 1e-05, %v4468_v11  ;;  %10805 = vmatpush3.msra.mxu1 %v9728_v33  ;;  %v9719_v17 = vld [vmem:[%s14167_s8 + $0x80] sm:$0xff]  ;;  %v4504_v27 = vrot.slane %v12809_v23, %v12355_v50 }
0x109d   :  { %v4433_v25 = vpop.xlane.xlu0 %4432  ;;  %10806 = vmatprep.subr.mxu1 %v9727_v18 }
0x109e   :  { %v4473_v20 = vadd.f32 1e-05, %v4465_v49  ;;  %v4439_v56 = vmul.f32 0.03125, %v4433_v25  ;;  %10807 = vmatpush3.msra.mxu1 %v9727_v18 }
0x109f   :  { %10808 = vmatprep.subr.mxu1 %v9726_v40 }
0x10a0   :  { %11401 = vrsqrt.f32 %v4473_v20  ;;  %v4463_v38 = vmul.f32 %v4439_v56, %v4439_v56  ;;  %v4471_v47 = vsub.f32 %v12837_v34, %v4439_v56  ;;  %10809 = vmatpush3.msra.mxu1 %v9726_v40 }
0x10a1   :  { %v4453_v62 = vpop.xlane.xlu0 %4452  ;;  %11403 = vrsqrt.f32 %v4476_v42  ;;  %10810 = vmatprep.subr.mxu1 %v9725_v22 }
0x10a2   :  { %v4459_v26 = vmul.f32 0.03125, %v4453_v62  ;;  %10811 = vmatpush3.msra.mxu1 %v9725_v22 }
0x10a3   :  { %10812 = vmatprep.subr.mxu1 %v9724_v41 }
0x10a4   :  { %v4467_v8 = vsub.f32 %v4459_v26, %v4463_v38  ;;  %10813 = vmatpush3.msra.mxu1 %v9724_v41  ;;  %v4730_v41 = vrot.slane %v12809_v23, %v12360_v14 }
0x10a5   :  { %10814 = vmatprep.subr.mxu1 %v9723_v10 }
0x10a6   :  { %v4475_v30 = vadd.f32 1e-05, %v4467_v8  ;;  %10815 = vmatpush3.msra.mxu1 %v9723_v10 }
0x10a7   :  { %10816 = vmatprep.subr.mxu1 %v9722_v6 }
0x10a8   :  { %11405 = vrsqrt.f32 %v4475_v30  ;;  %10817 = vmatpush3.msra.mxu1 %v9722_v6 }
0x10a9   :  { %v11400_v5 = vpop.eup %11399  ;;  %10818 = vmatprep.subr.mxu1 %v9721_v0 }
0x10aa   :  { %v4482_v58 = vmul.f32 %v11400_v5, %v4470_v28  ;;  %10819 = vmatpush3.msra.mxu1 %v9721_v0 }
0x10ab   :  { %10820 = vmatprep.subr.mxu1 %v9720_v1 }
0x10ac   :  { %v4490_v59 = vmul.f32 %v4488_v55, %v4482_v58  ;;  %10821 = vmatpush3.msra.mxu1 %v9720_v1 }
0x10ad   :  { %v11402_v52 = vpop.eup %11401  ;;  %10822 = vmatprep.subr.mxu1 %v9719_v17 }
0x10ae   :  { %v4481_v13 = vmul.f32 %v11402_v52, %v4469_v7  ;;  %v11404_v24 = vpop.eup %11403  ;;  %v4498_v4 = vadd.f32 %v4496_v3, %v4490_v59  ;;  %10823 = vmatpush3.msra.mxu1 %v9719_v17 }
0x10af   :  { %v4484_v48 = vmul.f32 %v11404_v24, %v4472_v46 }
0x10b0   :  { %v4489_v54 = vmul.f32 %v4488_v55, %v4481_v13 }
0x10b1   :  { %v4492_v9 = vmul.f32 %v4488_v55, %v4484_v48 }
0x10b2   :  { %v4497_v57 = vadd.f32 %v4496_v3, %v4489_v54 }
0x10b3   :  { %v4500_v29 = vadd.f32 %v4496_v3, %v4492_v9 }
0x10b4   :  { %10786 = vmatprep.mubr.msk.f32.mxu0 %vm192_vm1, %v4497_v57 }
0x10b5   :  { %v11406_v45 = vpop.eup %11405  ;;  %10787 = vmatmul.mubr.msk.f32.vlgmr.msra.gmra.mxu0 %vm192_vm1, %v4498_v4 }
0x10b6   :  { %v4483_v2 = vmul.f32 %v11406_v45, %v4471_v47 }
0x10b8   :  { %v4491_v43 = vmul.f32 %v4488_v55, %v4483_v2 }
0x10ba   :  { %v4499_v21 = vadd.f32 %v4496_v3, %v4491_v43 }
0x10bc   :  { %10789 = vmatprep.mubr.msk.f32.mxu0 %vm192_vm1, %v4499_v21 }
0x10bd   :  { %10790 = vmatmul.mubr.msk.f32.gmra.mxu0 %vm192_vm1, %v4500_v29 }
0x1175   :  { %v10788_v32 = vpop.f32.mrf.mxu0 }
0x1176   :  { %v4589_v11 = vadd.f32 %v10788_v32, %v4504_v27 }
0x1177   :  { %v4583_v49 = vpop.f32.mrf.mxu0 }
0x1178   :  { %v4607_v25 = vmul.f32 0.044715, %v4589_v11  ;;  %v4584_v20 = vadd.f32 %v4583_v49, %v4504_v27  ;;  %v4603_v29 = vmul.f32 0.5, %v4589_v11 }
0x117a   :  { %v4611_v56 = vmul.f32 %v4607_v25, %v4589_v11  ;;  %v4606_v42 = vmul.f32 0.044715, %v4584_v20  ;;  %v4602_v43 = vmul.f32 0.5, %v4584_v20 }
0x117c   :  { %v4615_v62 = vmul.f32 %v4611_v56, %v4589_v11  ;;  %v4610_v38 = vmul.f32 %v4606_v42, %v4584_v20 }
0x117d   :  { %v10791_v26 = vpop.f32.mrf.mxu0 }
0x117e   :  { %v4619_v8 = vadd.f32 %v4615_v62, %v4589_v11  ;;  %v4599_v30 = vadd.f32 %v10791_v26, %v4504_v27  ;;  %v4614_v5 = vmul.f32 %v4610_v38, %v4584_v20 }
0x117f   :  { %v4593_v28 = vpop.f32.mrf.mxu0 }
0x1180   :  { %v4623_v55 = vmul.f32 0.7978846, %v4619_v8  ;;  %v4609_v58 = vmul.f32 0.044715, %v4599_v30  ;;  %v4594_v7 = vadd.f32 %v4593_v28, %v4504_v27  ;;  %v4618_v52 = vadd.f32 %v4614_v5, %v4584_v20 }
0x1181   :  { %v4605_v18 = vmul.f32 0.5, %v4599_v30 }
0x1182   :  { %11407 = vtanh.f32 %v4623_v55  ;;  %v4613_v13 = vmul.f32 %v4609_v58, %v4599_v30  ;;  %v4608_v3 = vmul.f32 0.044715, %v4594_v7  ;;  %v4622_v59 = vmul.f32 0.7978846, %v4618_v52 }
0x1183   :  { %v4604_v60 = vmul.f32 0.5, %v4594_v7 }
0x1184   :  { %v4612_v24 = vmul.f32 %v4608_v3, %v4594_v7  ;;  %11409 = vtanh.f32 %v4622_v59  ;;  %v4617_v54 = vmul.f32 %v4613_v13, %v4599_v30 }
0x1186   :  { %v4616_v46 = vmul.f32 %v4612_v24, %v4594_v7  ;;  %v4621_v57 = vadd.f32 %v4617_v54, %v4599_v30 }
0x1188   :  { %v4620_v4 = vadd.f32 %v4616_v46, %v4594_v7  ;;  %v4625_v48 = vmul.f32 0.7978846, %v4621_v57 }
0x118a   :  { %v4624_v47 = vmul.f32 0.7978846, %v4620_v4  ;;  %11411 = vtanh.f32 %v4625_v48 }
0x118c   :  { %11413 = vtanh.f32 %v4624_v47 }
0x118f   :  { %v11408_v45 = vpop.eup %11407 }
0x1190   :  { %v4631_v9 = vadd.f32 1.0, %v11408_v45 }
0x1191   :  { %v11410_v2 = vpop.eup %11409 }
0x1192   :  { %v4630_v21 = vadd.f32 1.0, %v11410_v2  ;;  %v4635_v61 = vmul.f32 %v4631_v9, %v4603_v29 }
0x1194   :  { %v4634_v44 = vmul.f32 %v4630_v21, %v4602_v43 }
0x1196   :  { %10824 = vmatprep.mubr.f32.mxu1 %v4634_v44 }
0x1197   :  { %v11412_v36 = vpop.eup %11411  ;;  %10825 = vmatmul.mubr.f32.vlgmr.msra.gmra.mxu1 %v4635_v61 }
0x1198   :  { %v4633_v35 = vadd.f32 1.0, %v11412_v36 }
0x1199   :  { %v11414_v31 = vpop.eup %11413 }
0x119a   :  { %v4632_v33 = vadd.f32 1.0, %v11414_v31  ;;  %v4637_v22 = vmul.f32 %v4633_v35, %v4605_v18 }
0x119c   :  { %v4636_v40 = vmul.f32 %v4632_v33, %v4604_v60 }
0x119e   :  { %10827 = vmatprep.mubr.f32.mxu1 %v4636_v40  ;;  %v11609_v40 = vld [vmem:[%s14169_s10] sm:$0xff] }
0x119f   :  { %10828 = vmatmul.mubr.f32.gmra.mxu1 %v4637_v22  ;;  %v4798_v22 = vrot.slane %v11609_v40, %v11828_v16 }
0x1257   :  { %v10826_v10 = vpop.f32.mrf.mxu1 }
0x1258   :  { %v4724_v6 = vadd.f32 %v10826_v10, %v12814_v15 }
0x1259   :  { %v4704_v0 = vpop.f32.mrf.mxu1 }
0x125a   :  { %v12922_v1 = vadd.f32 %v4730_v41, %v4724_v6  ;;  %v4723_v17 = vadd.f32 %v4704_v0, %v12817_v63  ;;  %v4806_v0 = vrot.slane %v11609_v40, %v11839_v39 }
0x125c   :  { %v12925_v27 = vadd.f32 %v4730_v41, %v4723_v17  ;;  %v4738_v32 = vsel %vm192_vm1, %v12922_v1, 0.0  ;;  %v4752_v11 = vmul.f32 %v12922_v1, %v12922_v1 }
0x125d   :  { %4739 = vadd.xlane.f32.xlu1 %v4738_v32 }
0x125e   :  { %v4735_v23 = vsel %vm192_vm1, %v12925_v27, 0.0  ;;  %v4751_v15 = vmul.f32 %v12925_v27, %v12925_v27  ;;  %v4758_v63 = vsel %vm192_vm1, %v4752_v11, 0.0 }
0x125f   :  { %4736 = vadd.xlane.f32.xlu0 %v4735_v23  ;;  %v10829_v49 = vpop.f32.mrf.mxu1  ;;  %v46_v23 = vld [vmem:[%s14161_s2 + $0x18] sm:$0xff] }
0x1260   :  { %v4726_v25 = vadd.f32 %v10829_v49, %v12822_v19  ;;  %v4755_v62 = vsel %vm192_vm1, %v4751_v15, 0.0  ;;  %v45_v49 = vld [vmem:[%s14161_s2 + $0x10] sm:$0xff] }
0x1261   :  { %4759 = vadd.xlane.f32.xlu1 %v4758_v63  ;;  %v4714_v20 = vpop.f32.mrf.mxu1 }
0x1262   :  { %v12937_v56 = vadd.f32 %v4730_v41, %v4726_v25  ;;  %v4725_v42 = vadd.f32 %v4714_v20, %v12837_v34 }
0x1263   :  { %4756 = vadd.xlane.f32.xlu0 %v4755_v62 }
0x1264   :  { %v12941_v38 = vadd.f32 %v4730_v41, %v4725_v42  ;;  %v4744_v26 = vsel %vm192_vm1, %v12937_v56, 0.0  ;;  %v4754_v8 = vmul.f32 %v12937_v56, %v12937_v56 }
0x1265   :  { %4745 = vadd.xlane.f32.xlu1 %v4744_v26 }
0x1266   :  { %v4741_v19 = vsel %vm192_vm1, %v12941_v38, 0.0  ;;  %v4753_v30 = vmul.f32 %v12941_v38, %v12941_v38  ;;  %v4764_v34 = vsel %vm192_vm1, %v4754_v8, 0.0 }
0x1267   :  { %4742 = vadd.xlane.f32.xlu0 %v4741_v19 }
0x1268   :  { %v4761_v5 = vsel %vm192_vm1, %v4753_v30, 0.0 }
0x1269   :  { %4765 = vadd.xlane.f32.xlu1 %v4764_v34 }
0x126b   :  { %4762 = vadd.xlane.f32.xlu0 %v4761_v5 }
0x12e6   :  { %v4740_v28 = vpop.xlane.xlu1 %4739 }
0x12e7   :  { %v4748_v55 = vmul.f32 0.03125, %v4740_v28 }
0x12e8   :  { %v4737_v58 = vpop.xlane.xlu0 %4736 }
0x12e9   :  { %v4747_v7 = vmul.f32 0.03125, %v4737_v58  ;;  %v4772_v13 = vmul.f32 %v4748_v55, %v4748_v55  ;;  %v4780_v18 = vsub.f32 %v12922_v1, %v4748_v55 }
0x12ea   :  { %v4760_v52 = vpop.xlane.xlu1 %4759 }
0x12eb   :  { %v4768_v3 = vmul.f32 0.03125, %v4760_v52  ;;  %v4771_v24 = vmul.f32 %v4747_v7, %v4747_v7  ;;  %v4779_v10 = vsub.f32 %v12925_v27, %v4747_v7 }
0x12ec   :  { %v4757_v59 = vpop.xlane.xlu0 %4756 }
0x12ed   :  { %v4776_v54 = vsub.f32 %v4768_v3, %v4772_v13  ;;  %v4767_v46 = vmul.f32 0.03125, %v4757_v59 }
0x12ee   :  { %v4746_v57 = vpop.xlane.xlu1 %4745 }
0x12ef   :  { %v4784_v4 = vadd.f32 1e-05, %v4776_v54  ;;  %v4775_v48 = vsub.f32 %v4767_v46, %v4771_v24  ;;  %v4750_v47 = vmul.f32 0.03125, %v4746_v57 }
0x12f0   :  { %v4743_v45 = vpop.xlane.xlu0 %4742 }
0x12f1   :  { %11415 = vrsqrt.f32 %v4784_v4  ;;  %v4783_v2 = vadd.f32 1e-05, %v4775_v48  ;;  %v4749_v9 = vmul.f32 0.03125, %v4743_v45  ;;  %v4774_v21 = vmul.f32 %v4750_v47, %v4750_v47  ;;  %v9799_v48 = vld [vmem:[%s14164_s5 + $0x58] sm:$0xff]  ;;  %v9797_v45 = vld [vmem:[%s14164_s5 + $0x48] sm:$0xff] }
0x12f2   :  { %v4766_v43 = vpop.xlane.xlu1 %4765  ;;  %v4782_v25 = vsub.f32 %v12937_v56, %v4750_v47  ;;  %v9798_v47 = vld [vmem:[%s14164_s5 + $0x50] sm:$0xff]  ;;  %10830 = vmatprep.subr.mxu0 %v9799_v48 }
0x12f3   :  { %11417 = vrsqrt.f32 %v4783_v2  ;;  %v4770_v29 = vmul.f32 0.03125, %v4766_v43  ;;  %v4773_v61 = vmul.f32 %v4749_v9, %v4749_v9  ;;  %v4781_v30 = vsub.f32 %v12941_v38, %v4749_v9  ;;  %10831 = vmatpush3.msra.mxu0 %v9799_v48  ;;  %v9796_v2 = vld [vmem:[%s14164_s5 + $0x40] sm:$0xff] }
0x12f4   :  { %v4763_v44 = vpop.xlane.xlu0 %4762  ;;  %10832 = vmatprep.subr.mxu0 %v9798_v47 }
0x12f5   :  { %v4778_v36 = vsub.f32 %v4770_v29, %v4774_v21  ;;  %v4769_v31 = vmul.f32 0.03125, %v4763_v44  ;;  %10833 = vmatpush3.msra.mxu0 %v9798_v47 }
0x12f6   :  { %10834 = vmatprep.subr.mxu0 %v9797_v45 }
0x12f7   :  { %v4786_v35 = vadd.f32 1e-05, %v4778_v36  ;;  %v4777_v60 = vsub.f32 %v4769_v31, %v4773_v61  ;;  %10835 = vmatpush3.msra.mxu0 %v9797_v45 }
0x12f8   :  { %10836 = vmatprep.subr.mxu0 %v9796_v2 }
0x12f9   :  { %11419 = vrsqrt.f32 %v4786_v35  ;;  %v4785_v33 = vadd.f32 1e-05, %v4777_v60  ;;  %10837 = vmatpush3.msra.mxu0 %v9796_v2 }
0x12fb   :  { %11421 = vrsqrt.f32 %v4785_v33 }
0x12fe   :  { %v11416_v41 = vpop.eup %11415 }
0x12ff   :  { %v4792_v6 = vmul.f32 %v11416_v41, %v4780_v18 }
0x1300   :  { %v11418_v17 = vpop.eup %11417 }
0x1301   :  { %v4800_v32 = vmul.f32 %v4798_v22, %v4792_v6  ;;  %v4791_v11 = vmul.f32 %v11418_v17, %v4779_v10 }
0x1303   :  { %v4808_v1 = vadd.f32 %v4806_v0, %v4800_v32  ;;  %v4799_v15 = vmul.f32 %v4798_v22, %v4791_v11 }
0x1305   :  { %v12967_v63 = vadd.f32 %v4808_v1, %v46_v23  ;;  %v4807_v27 = vadd.f32 %v4806_v0, %v4799_v15 }
0x1306   :  { %v11420_v20 = vpop.eup %11419 }
0x1307   :  { %v4852_v42 = vsel %vm192_vm1, %v12967_v63, 0.0  ;;  %v12971_v62 = vadd.f32 %v4807_v27, %v45_v49  ;;  %v4866_v26 = vmul.f32 %v12967_v63, %v12967_v63  ;;  %v4794_v8 = vmul.f32 %v11420_v20, %v4782_v25 }
0x1308   :  { %v11422_v19 = vpop.eup %11421  ;;  %4853 = vadd.xlane.f32.xlu1 %v4852_v42  ;;  %v9824_v42 = vld [vmem:[%s14168_s9 + $0x10] sm:$0xff] }
0x1309   :  { %v4849_v56 = vsel %vm192_vm1, %v12971_v62, 0.0  ;;  %v4865_v34 = vmul.f32 %v12971_v62, %v12971_v62  ;;  %v4802_v5 = vmul.f32 %v4798_v22, %v4794_v8  ;;  %v4793_v28 = vmul.f32 %v11422_v19, %v4781_v30 }
0x130a   :  { %4850 = vadd.xlane.f32.xlu0 %v4849_v56  ;;  %v4872_v55 = vsel %vm192_vm1, %v4866_v26, 0.0  ;;  %v4912_v19 = vrot.slane %v9824_v42, %v11770_v12  ;;  %v4928_v2 = vrot.slane %v9824_v42, %v11839_v39 }
0x130b   :  { %v4810_v58 = vadd.f32 %v4806_v0, %v4802_v5  ;;  %v4801_v7 = vmul.f32 %v4798_v22, %v4793_v28  ;;  %v4869_v52 = vsel %vm192_vm1, %v4865_v34, 0.0  ;;  %v4920_v28 = vrot.slane %v9824_v42, %v11828_v16 }
0x130c   :  { %4873 = vadd.xlane.f32.xlu1 %v4872_v55 }
0x130d   :  { %v12982_v13 = vadd.f32 %v4810_v58, %v46_v23  ;;  %v4809_v38 = vadd.f32 %v4806_v0, %v4801_v7 }
0x130e   :  { %4870 = vadd.xlane.f32.xlu0 %v4869_v52 }
0x130f   :  { %v4858_v3 = vsel %vm192_vm1, %v12982_v13, 0.0  ;;  %v4868_v59 = vmul.f32 %v12982_v13, %v12982_v13  ;;  %v12988_v24 = vadd.f32 %v4809_v38, %v45_v49 }
0x1310   :  { %4859 = vadd.xlane.f32.xlu1 %v4858_v3 }
0x1311   :  { %v4855_v54 = vsel %vm192_vm1, %v12988_v24, 0.0  ;;  %v4867_v46 = vmul.f32 %v12988_v24, %v12988_v24  ;;  %v4878_v57 = vsel %vm192_vm1, %v4868_v59, 0.0 }
0x1312   :  { %4856 = vadd.xlane.f32.xlu0 %v4855_v54 }
0x1313   :  { %v4875_v4 = vsel %vm192_vm1, %v4867_v46, 0.0 }
0x1314   :  { %4879 = vadd.xlane.f32.xlu1 %v4878_v57 }
0x1316   :  { %4876 = vadd.xlane.f32.xlu0 %v4875_v4 }
0x1391   :  { %v4854_v9 = vpop.xlane.xlu1 %4853 }
0x1392   :  { %v4862_v43 = vmul.f32 0.03125, %v4854_v9 }
0x1393   :  { %v4851_v21 = vpop.xlane.xlu0 %4850 }
0x1394   :  { %v4861_v29 = vmul.f32 0.03125, %v4851_v21  ;;  %v4886_v61 = vmul.f32 %v4862_v43, %v4862_v43  ;;  %v4894_v26 = vsub.f32 %v12967_v63, %v4862_v43 }
0x1395   :  { %v4874_v44 = vpop.xlane.xlu1 %4873 }
0x1396   :  { %v4882_v36 = vmul.f32 0.03125, %v4874_v44  ;;  %v4885_v35 = vmul.f32 %v4861_v29, %v4861_v29  ;;  %v4893_v30 = vsub.f32 %v12971_v62, %v4861_v29 }
0x1397   :  { %v4871_v31 = vpop.xlane.xlu0 %4870 }
0x1398   :  { %v4890_v60 = vsub.f32 %v4882_v36, %v4886_v61  ;;  %v4881_v33 = vmul.f32 0.03125, %v4871_v31 }
0x1399   :  { %v4860_v18 = vpop.xlane.xlu1 %4859 }
0x139a   :  { %v4898_v40 = vadd.f32 1e-05, %v4890_v60  ;;  %v4889_v22 = vsub.f32 %v4881_v33, %v4885_v35  ;;  %v4864_v41 = vmul.f32 0.03125, %v4860_v18 }
0x139b   :  { %v4857_v6 = vpop.xlane.xlu0 %4856 }
0x139c   :  { %11423 = vrsqrt.f32 %v4898_v40  ;;  %v4897_v10 = vadd.f32 1e-05, %v4889_v22  ;;  %v4863_v0 = vmul.f32 0.03125, %v4857_v6  ;;  %v4888_v32 = vmul.f32 %v4864_v41, %v4864_v41 }
0x139d   :  { %v4880_v17 = vpop.xlane.xlu1 %4879  ;;  %v4896_v7 = vsub.f32 %v12982_v13, %v4864_v41 }
0x139e   :  { %11425 = vrsqrt.f32 %v4897_v10  ;;  %v4884_v11 = vmul.f32 0.03125, %v4880_v17  ;;  %v4887_v15 = vmul.f32 %v4863_v0, %v4863_v0  ;;  %v4895_v54 = vsub.f32 %v12988_v24, %v4863_v0 }
0x139f   :  { %v4877_v1 = vpop.xlane.xlu0 %4876 }
0x13a0   :  { %v4892_v23 = vsub.f32 %v4884_v11, %v4888_v32  ;;  %v4883_v49 = vmul.f32 0.03125, %v4877_v1 }
0x13a2   :  { %v4900_v25 = vadd.f32 1e-05, %v4892_v23  ;;  %v4891_v27 = vsub.f32 %v4883_v49, %v4887_v15 }
0x13a4   :  { %11427 = vrsqrt.f32 %v4900_v25  ;;  %v4899_v20 = vadd.f32 1e-05, %v4891_v27 }
0x13a6   :  { %11429 = vrsqrt.f32 %v4899_v20 }
0x13a9   :  { %v11424_v8 = vpop.eup %11423 }
0x13aa   :  { %v4906_v56 = vmul.f32 %v11424_v8, %v4894_v26 }
0x13ab   :  { %v11426_v34 = vpop.eup %11425 }
0x13ac   :  { %v4905_v5 = vmul.f32 %v11426_v34, %v4893_v30  ;;  %v4914_v55 = vmul.f32 %v4912_v19, %v4906_v56 }
0x13ae   :  { %v4913_v58 = vmul.f32 %v4912_v19, %v4905_v5  ;;  %v4922_v3 = vadd.f32 %v4920_v28, %v4914_v55 }
0x13b0   :  { %v4921_v52 = vadd.f32 %v4920_v28, %v4913_v58 }
0x13b1   :  { %v11428_v38 = vpop.eup %11427 }
0x13b2   :  { %10838 = vmatprep.mubr.msk.f32.mxu0 %vm192_vm1, %v4921_v52  ;;  %v4908_v59 = vmul.f32 %v11428_v38, %v4896_v7 }
0x13b3   :  { %10839 = vmatmul.mubr.msk.f32.vlgmr.msra.gmra.mxu0 %vm192_vm1, %v4922_v3  ;;  %v11430_v46 = vpop.eup %11429 }
0x13b4   :  { %v4907_v57 = vmul.f32 %v11430_v46, %v4895_v54  ;;  %v4916_v4 = vmul.f32 %v4912_v19, %v4908_v59 }
0x13b6   :  { %v4915_v48 = vmul.f32 %v4912_v19, %v4907_v57  ;;  %v4924_v45 = vadd.f32 %v4920_v28, %v4916_v4 }
0x13b8   :  { %v4923_v47 = vadd.f32 %v4920_v28, %v4915_v48 }
0x13ba   :  { %10841 = vmatprep.mubr.msk.f32.mxu0 %vm192_vm1, %v4923_v47 }
0x13bb   :  { %10842 = vmatmul.mubr.msk.f32.gmra.mxu0 %vm192_vm1, %v4924_v45 }
0x1473   :  { %v10840_v9 = vpop.f32.mrf.mxu0 }
0x1474   :  { %v5013_v43 = vadd.f32 %v10840_v9, %v4928_v2 }
0x1475   :  { %v5007_v21 = vpop.f32.mrf.mxu0 }
0x1476   :  { %v5008_v29 = vadd.f32 %v5007_v21, %v4928_v2  ;;  %5032 = vrot.lane.b32.xlu0 %v5013_v43, %s11657_s19 }
0x1478   :  { %5030 = vrot.lane.b32.xlu1 %v5008_v29, %s11657_s19  ;;  %10848 = vmatprep.mubr.msk.f32.mxu0 %vm403_vm2, %v5008_v29 }
0x147a   :  { %5040 = vrot.lane.b32.xlu0 %v5013_v43, %s11658_s20 }
0x147b   :  { %v10843_v44 = vpop.f32.mrf.mxu0 }
0x147c   :  { %v13026_v61 = vadd.f32 %v10843_v44, %v4928_v2 }
0x147d   :  { %v5017_v36 = vpop.f32.mrf.mxu0 }
0x147e   :  { %5044 = vrot.lane.b32.xlu0 %v13026_v61, %s11658_s20  ;;  %5036 = vrot.lane.b32.xlu1 %v13026_v61, %s11657_s19  ;;  %v5018_v31 = vadd.f32 %v5017_v36, %v4928_v2 }
0x1482   :  { %5048 = vrot.lane.b32.xlu0 %v5013_v43, %s11659_s21  ;;  %5034 = vrot.lane.b32.xlu1 %v5018_v31, %s11657_s19 }
0x1486   :  { %5052 = vrot.lane.b32.xlu0 %v13026_v61, %s11659_s21  ;;  %5038 = vrot.lane.b32.xlu1 %v5008_v29, %s11658_s20 }
0x148a   :  { %5056 = vrot.lane.b32.xlu0 %v5013_v43, %s11660_s22  ;;  %5042 = vrot.lane.b32.xlu1 %v5018_v31, %s11658_s20 }
0x148e   :  { %5143 = vrot.lane.b32.xlu0 %v13026_v61, %s11660_s22  ;;  %5046 = vrot.lane.b32.xlu1 %v5008_v29, %s11659_s21 }
0x1492   :  { %5050 = vrot.lane.b32.xlu1 %v5018_v31, %s11659_s21 }
0x1496   :  { %5054 = vrot.lane.b32.xlu1 %v5008_v29, %s11660_s22 }
0x149a   :  { %5141 = vrot.lane.b32.xlu1 %v5018_v31, %s11660_s22 }
0x14e8   :  { %v5033_v35 = vpop.permute.xlu0 %5032 }
0x14e9   :  { %5230 = vrot.lane.b32.xlu0 %v5033_v35, %s11660_s22 }
0x14ea   :  { %v5031_v60 = vpop.permute.xlu1 %5030 }
0x14eb   :  { %5228 = vrot.lane.b32.xlu1 %v5031_v60, %s11660_s22 }
0x14ec   :  { %v13047_v33 = vpop.permute.xlu0 %5040 }
0x14f0   :  { %v13049_v18 = vpop.permute.xlu1 %5036  ;;  %v13051_v40 = vpop.permute.xlu0 %5044 }
0x14f1   :  { %5317 = vrot.lane.b32.xlu0 %v13049_v18, %s11660_s22 }
0x14f4   :  { %v5035_v22 = vpop.permute.xlu1 %5034  ;;  %v13055_v41 = vpop.permute.xlu0 %5048 }
0x14f5   :  { %10869 = vmatprep.mubr.msk.f32.mxu1 %vm403_vm2, %v5035_v22  ;;  %5315 = vrot.lane.b32.xlu1 %v5035_v22, %s11660_s22 }
0x14f6   :  { %5404 = vrot.lane.b32.xlu0 %v13047_v33, %s11660_s22 }
0x14f8   :  { %v5039_v10 = vpop.permute.xlu1 %5038  ;;  %v13061_v6 = vpop.permute.xlu0 %5052 }
0x14f9   :  { %5402 = vrot.lane.b32.xlu1 %v5039_v10, %s11660_s22 }
0x14fa   :  { %5491 = vrot.lane.b32.xlu0 %v13051_v40, %s11660_s22 }
0x14fc   :  { %v13066_v0 = vpop.permute.xlu1 %5042  ;;  %v5057_v17 = vpop.permute.xlu0 %5056 }
0x14fd   :  { %5489 = vrot.lane.b32.xlu1 %v13066_v0, %s11660_s22  ;;  %10844 = vmatprep.subr.msk.mxu0 %vm403_vm2, %v5057_v17 }
0x14fe   :  { %5578 = vrot.lane.b32.xlu0 %v13055_v41, %s11660_s22  ;;  %10845 = vmatpush3.xpose.msk.msra.mxu0 %vm403_vm2, %v5057_v17 }
0x1500   :  { %v13074_v32 = vpop.permute.xlu1 %5046  ;;  %v5144_v1 = vpop.permute.xlu0 %5143 }
0x1501   :  { %5576 = vrot.lane.b32.xlu1 %v13074_v32, %s11660_s22 }
0x1502   :  { %5665 = vrot.lane.b32.xlu0 %v13061_v6, %s11660_s22 }
0x1504   :  { %v13080_v11 = vpop.permute.xlu1 %5050 }
0x1505   :  { %5663 = vrot.lane.b32.xlu1 %v13080_v11, %s11660_s22 }
0x1506   :  { %5928 = vrot.lane.b32.xlu0 %v5013_v43, %s11661_s3 }
0x1508   :  { %v5055_v23 = vpop.permute.xlu1 %5054 }
0x1509   :  { %5926 = vrot.lane.b32.xlu1 %v5008_v29, %s11661_s3  ;;  %10846 = vmatprep.subr.msk.mxu0 %vm403_vm2, %v5055_v23 }
0x150a   :  { %6013 = vrot.lane.b32.xlu0 %v5018_v31, %s11661_s3  ;;  %10847 = vmatpush3.xpose.msk.msra.mxu0 %vm403_vm2, %v5055_v23 }
0x150b   :  { %10851 = vmatprep.subr.msk.mxu0 %vm403_vm2, %v5144_v1 }
0x150c   :  { %v5142_v15 = vpop.permute.xlu1 %5141 }
0x150d   :  { %6015 = vrot.lane.b32.xlu1 %v13026_v61, %s11661_s3  ;;  %10849 = vmatmul.mubr.msk.f32.vlgmr.msra.gmra.mxu0 %vm403_vm2, %v5013_v43 }
0x150e   :  { %6189 = vrot.lane.b32.xlu0 %v13049_v18, %s11661_s3  ;;  %10852 = vmatpush3.xpose.msk.msra.mxu0 %vm403_vm2, %v5144_v1 }
0x150f   :  { %10855 = vmatprep.mubr.msk.f32.mxu0 %vm403_vm2, %v5018_v31  ;;  %10853 = vmatprep.subr.msk.mxu0 %vm403_vm2, %v5142_v15 }
0x1511   :  { %6102 = vrot.lane.b32.xlu1 %v5033_v35, %s11661_s3 }
0x1512   :  { %6187 = vrot.lane.b32.xlu0 %v5035_v22, %s11661_s3  ;;  %10854 = vmatpush3.xpose.msk.msra.mxu0 %vm403_vm2, %v5142_v15 }
0x1515   :  { %6100 = vrot.lane.b32.xlu1 %v5031_v60, %s11661_s3  ;;  %10856 = vmatmul.mubr.msk.f32.vlgmr.msra.gmra.mxu0 %vm403_vm2, %v13026_v61 }
0x1516   :  { %10862 = vmatprep.mubr.msk.f32.mxu0 %vm403_vm2, %v5031_v60 }
0x1519   :  { %6276 = vrot.lane.b32.xlu1 %v13047_v33, %s11661_s3 }
0x151d   :  { %6274 = vrot.lane.b32.xlu1 %v5039_v10, %s11661_s3 }
0x155b   :  { %v5231_v49 = vpop.permute.xlu0 %5230 }
0x155c   :  { %10858 = vmatprep.subr.msk.mxu0 %vm403_vm2, %v5231_v49 }
0x155d   :  { %v5229_v25 = vpop.permute.xlu1 %5228  ;;  %10859 = vmatpush3.xpose.msk.msra.mxu0 %vm403_vm2, %v5231_v49 }
0x155e   :  { %10860 = vmatprep.subr.msk.mxu0 %vm403_vm2, %v5229_v25 }
0x1561   :  { %10861 = vmatpush3.xpose.msk.msra.mxu0 %vm403_vm2, %v5229_v25 }
0x1563   :  { %v5318_v27 = vpop.permute.xlu0 %5317 }
0x1564   :  { %10863 = vmatmul.mubr.msk.f32.vlgmr.msra.gmra.mxu0 %vm403_vm2, %v5033_v35  ;;  %10865 = vmatprep.subr.msk.mxu1 %vm403_vm2, %v5318_v27 }
0x1565   :  { %10876 = vmatprep.mubr.msk.f32.mxu0 %vm403_vm2, %v5039_v10  ;;  %10866 = vmatpush3.xpose.msk.msra.mxu1 %vm403_vm2, %v5318_v27 }
0x1567   :  { %v5316_v20 = vpop.permute.xlu1 %5315 }
0x1568   :  { %v5405_v42 = vpop.permute.xlu0 %5404  ;;  %10867 = vmatprep.subr.msk.mxu1 %vm403_vm2, %v5316_v20 }
0x1569   :  { %10872 = vmatprep.subr.msk.mxu0 %vm403_vm2, %v5405_v42  ;;  %10868 = vmatpush3.xpose.msk.msra.mxu1 %vm403_vm2, %v5316_v20 }
0x156a   :  { %10873 = vmatpush3.xpose.msk.msra.mxu0 %vm403_vm2, %v5405_v42 }
0x156b   :  { %v5403_v26 = vpop.permute.xlu1 %5402 }
0x156c   :  { %v5492_v8 = vpop.permute.xlu0 %5491  ;;  %10870 = vmatmul.mubr.msk.f32.vlgmr.msra.gmra.mxu1 %vm403_vm2, %v13049_v18  ;;  %10874 = vmatprep.subr.msk.mxu0 %vm403_vm2, %v5403_v26 }
0x156d   :  { %10879 = vmatprep.subr.msk.mxu1 %vm403_vm2, %v5492_v8  ;;  %10883 = vmatprep.mubr.msk.f32.mxu1 %vm403_vm2, %v13066_v0 }
0x156e   :  { %10875 = vmatpush3.xpose.msk.msra.mxu0 %vm403_vm2, %v5403_v26  ;;  %10880 = vmatpush3.xpose.msk.msra.mxu1 %vm403_vm2, %v5492_v8 }
0x156f   :  { %v5490_v19 = vpop.permute.xlu1 %5489 }
0x1570   :  { %v5579_v30 = vpop.permute.xlu0 %5578  ;;  %10881 = vmatprep.subr.msk.mxu1 %vm403_vm2, %v5490_v19 }
0x1571   :  { %10877 = vmatmul.mubr.msk.f32.vlgmr.msra.gmra.mxu0 %vm403_vm2, %v13047_v33  ;;  %10886 = vmatprep.subr.msk.mxu0 %vm403_vm2, %v5579_v30 }
0x1572   :  { %10882 = vmatpush3.xpose.msk.msra.mxu1 %vm403_vm2, %v5490_v19  ;;  %10887 = vmatpush3.xpose.msk.msra.mxu0 %vm403_vm2, %v5579_v30 }
0x1573   :  { %10890 = vmatprep.mubr.msk.f32.mxu0 %vm403_vm2, %v13074_v32  ;;  %v5577_v56 = vpop.permute.xlu1 %5576 }
0x1574   :  { %v5666_v34 = vpop.permute.xlu0 %5665  ;;  %10888 = vmatprep.subr.msk.mxu0 %vm403_vm2, %v5577_v56 }
0x1575   :  { %10884 = vmatmul.mubr.msk.f32.vlgmr.msra.gmra.mxu1 %vm403_vm2, %v13051_v40  ;;  %10893 = vmatprep.subr.msk.mxu1 %vm403_vm2, %v5666_v34 }
0x1576   :  { %10889 = vmatpush3.xpose.msk.msra.mxu0 %vm403_vm2, %v5577_v56  ;;  %10894 = vmatpush3.xpose.msk.msra.mxu1 %vm403_vm2, %v5666_v34 }
0x1577   :  { %10897 = vmatprep.mubr.msk.f32.mxu1 %vm403_vm2, %v13080_v11  ;;  %v5664_v5 = vpop.permute.xlu1 %5663 }
0x1578   :  { %v5929_v28 = vpop.permute.xlu0 %5928  ;;  %10895 = vmatprep.subr.msk.mxu1 %vm403_vm2, %v5664_v5 }
0x1579   :  { %10891 = vmatmul.mubr.msk.f32.vlgmr.msra.gmra.mxu0 %vm403_vm2, %v13055_v41  ;;  %10900 = vmatprep.subr.mxu0 %v5929_v28 }
0x157a   :  { %10896 = vmatpush3.xpose.msk.msra.mxu1 %vm403_vm2, %v5664_v5  ;;  %10901 = vmatpush3.msra.mxu0 %v5929_v28 }
0x157b   :  { %v5927_v55 = vpop.permute.xlu1 %5926 }
0x157c   :  { %10902 = vmatprep.subr.mxu0 %v5927_v55  ;;  %v13211_v42 = vpop.permute.xlu0 %6013 }
0x157d   :  { %10898 = vmatmul.mubr.msk.f32.vlgmr.msra.gmra.mxu1 %vm403_vm2, %v13061_v6  ;;  %10903 = vmatpush3.msra.mxu0 %v5927_v55 }
0x157f   :  { %v13150_v58 = vpop.permute.xlu1 %6015 }
0x1580   :  { %10907 = vmatprep.subr.mxu0 %v13150_v58  ;;  %v13213_v26 = vpop.permute.xlu0 %6189 }
0x1583   :  { %v6103_v7 = vpop.permute.xlu1 %6102 }
0x1584   :  { %10914 = vmatprep.subr.mxu1 %v6103_v7  ;;  %v13219_v8 = vpop.permute.xlu0 %6187 }
0x1585   :  { %10915 = vmatpush3.msra.mxu1 %v6103_v7 }
0x1587   :  { %v6101_v52 = vpop.permute.xlu1 %6100 }
0x1588   :  { %10916 = vmatprep.subr.mxu1 %v6101_v52 }
0x1589   :  { %10917 = vmatpush3.msra.mxu1 %v6101_v52 }
0x158b   :  { %v13153_v38 = vpop.permute.xlu1 %6276 }
0x158c   :  { %10928 = vmatprep.subr.mxu1 %v13153_v38 }
0x158f   :  { %v13225_v19 = vpop.permute.xlu1 %6274 }
0x15cd   :  { %v13156_v3 = vpop.f32.mrf.mxu0 }
0x15ce   :  { %v5753_v59 = vsel %vm1096_vm3, %v13156_v3, -inf }
0x15cf   :  { %5754 = vmax.xlane.f32.xlu1 %v5753_v59  ;;  %v5132_v54 = vpop.f32.mrf.mxu0 }
0x15d0   :  { %v5750_v46 = vsel %vm1096_vm3, %v5132_v54, -inf }
0x15d1   :  { %5751 = vmax.xlane.f32.xlu0 %v5750_v46 }
0x15d5   :  { %v10857_v57 = vpop.f32.mrf.mxu0 }
0x15d6   :  { %v5759_v4 = vsel %vm1096_vm3, %v10857_v57, -inf }
0x15d7   :  { %5760 = vmax.xlane.f32.xlu0 %v5759_v4  ;;  %v5219_v48 = vpop.f32.mrf.mxu0 }
0x15d8   :  { %v5756_v47 = vsel %vm1096_vm3, %v5219_v48, -inf }
0x15db   :  { %5757 = vmax.xlane.f32.xlu0 %v5756_v47 }
0x1624   :  { %v13163_v45 = vpop.f32.mrf.mxu0 }
0x1625   :  { %v5765_v2 = vsel %vm1096_vm3, %v13163_v45, -inf }
0x1626   :  { %5766 = vmax.xlane.f32.xlu1 %v5765_v2  ;;  %v13167_v9 = vpop.f32.mrf.mxu0 }
0x1627   :  { %v5762_v43 = vsel %vm1096_vm3, %v13167_v9, -inf }
0x1628   :  { %5763 = vmax.xlane.f32.xlu0 %v5762_v43 }
0x162c   :  { %v13171_v21 = vpop.f32.mrf.mxu1 }
0x162d   :  { %v5771_v29 = vsel %vm1096_vm3, %v13171_v21, -inf }
0x162e   :  { %5772 = vmax.xlane.f32.xlu0 %v5771_v29  ;;  %v13175_v44 = vpop.f32.mrf.mxu1 }
0x162f   :  { %v5768_v36 = vsel %vm1096_vm3, %v13175_v44, -inf }
0x1631   :  { %v13177_v61 = vpop.f32.mrf.mxu0 }
0x1632   :  { %5769 = vmax.xlane.f32.xlu0 %v5768_v36  ;;  %v5777_v31 = vsel %vm1096_vm3, %v13177_v61, -inf }
0x1633   :  { %5778 = vmax.xlane.f32.xlu1 %v5777_v31  ;;  %v13183_v35 = vpop.f32.mrf.mxu0 }
0x1634   :  { %v5774_v33 = vsel %vm1096_vm3, %v13183_v35, -inf }
0x1635   :  { %v13185_v60 = vpop.f32.mrf.mxu1 }
0x1636   :  { %v5783_v18 = vsel %vm1096_vm3, %v13185_v60, -inf }
0x1637   :  { %5775 = vmax.xlane.f32.xlu1 %v5774_v33  ;;  %5784 = vmax.xlane.f32.xlu0 %v5783_v18  ;;  %v13191_v22 = vpop.f32.mrf.mxu1 }
0x1638   :  { %v5780_v17 = vsel %vm1096_vm3, %v13191_v22, -inf }
0x1639   :  { %v13193_v10 = vpop.f32.mrf.mxu0 }
0x163a   :  { %v5789_v23 = vsel %vm1096_vm3, %v13193_v10, -inf }
0x163b   :  { %5781 = vmax.xlane.f32.xlu0 %v5780_v17  ;;  %5790 = vmax.xlane.f32.xlu1 %v5789_v23  ;;  %v13199_v1 = vpop.f32.mrf.mxu0 }
0x163c   :  { %v5786_v49 = vsel %vm1096_vm3, %v13199_v1, -inf }
0x163d   :  { %v13201_v15 = vpop.f32.mrf.mxu1 }
0x163e   :  { %v5795_v20 = vsel %vm1096_vm3, %v13201_v15, -inf }
0x163f   :  { %5787 = vmax.xlane.f32.xlu1 %v5786_v49  ;;  %v13205_v25 = vpop.f32.mrf.mxu1 }
0x1640   :  { %v5792_v27 = vsel %vm1096_vm3, %v13205_v25, -inf }
0x1641   :  { %5793 = vmax.xlane.f32.xlu0 %v5792_v27 }
0x1643   :  { %5796 = vmax.xlane.f32.xlu1 %v5795_v20 }
0x1654   :  { %6450 = vrot.lane.b32.xlu1 %v13055_v41, %s11661_s3 }
0x1657   :  { %6363 = vrot.lane.b32.xlu0 %v13051_v40, %s11661_s3 }
0x1658   :  { %6448 = vrot.lane.b32.xlu1 %v13074_v32, %s11661_s3  ;;  %v5755_v56 = vpop.xlane.xlu1 %5754 }
0x1659   :  { %v5799_v28 = vsub.f32 %v13156_v3, %v5755_v56 }
0x165a   :  { %v5752_v30 = vpop.xlane.xlu0 %5751 }
0x165b   :  { %6361 = vrot.lane.b32.xlu0 %v13066_v0, %s11661_s3  ;;  %v5798_v5 = vsub.f32 %v5132_v54, %v5752_v30  ;;  %v5816_v40 = vmul.f32 1.442695, %v5799_v28 }
0x165d   :  { %v5814_v41 = vmul.f32 1.442695, %v5798_v5 }
0x165f   :  { %11431 = vpow2.f32 %v5814_v41 }
0x1660   :  { %v5761_v34 = vpop.xlane.xlu0 %5760  ;;  %11433 = vpow2.f32 %v5816_v40 }
0x1661   :  { %v5801_v55 = vsub.f32 %v10857_v57, %v5761_v34 }
0x1663   :  { %v5820_v52 = vmul.f32 1.442695, %v5801_v55 }
0x1664   :  { %v5758_v7 = vpop.xlane.xlu0 %5757 }
0x1665   :  { %v5800_v59 = vsub.f32 %v5219_v48, %v5758_v7  ;;  %11435 = vpow2.f32 %v5820_v52 }
0x1667   :  { %v5818_v32 = vmul.f32 1.442695, %v5800_v59 }
0x1669   :  { %11437 = vpow2.f32 %v5818_v32 }
0x166c   :  { %v13228_v0 = vpop.eup %11431 }
0x166d   :  { %v13230_v46 = vpop.eup %11433  ;;  %v5846_v54 = vsel %vm1096_vm3, %v13228_v0, 0.0 }
0x166e   :  { %v5849_v3 = vsel %vm1096_vm3, %v13230_v46, 0.0 }
0x1672   :  { %v13234_v4 = vpop.eup %11435 }
0x1673   :  { %v5855_v57 = vsel %vm1096_vm3, %v13234_v4, 0.0 }
0x1676   :  { %v13240_v48 = vpop.eup %11437 }
0x1677   :  { %v5852_v47 = vsel %vm1096_vm3, %v13240_v48, 0.0 }
0x167a   :  { %5847 = vadd.xlane.f32.xlu0 %v5846_v54 }
0x167c   :  { %5850 = vadd.xlane.f32.xlu1 %v5849_v3 }
0x167e   :  { %5856 = vadd.xlane.f32.xlu0 %v5855_v57 }
0x1682   :  { %5853 = vadd.xlane.f32.xlu0 %v5852_v47 }
0x16af   :  { %v5767_v2 = vpop.xlane.xlu1 %5766 }
0x16b0   :  { %v5803_v43 = vsub.f32 %v13163_v45, %v5767_v2 }
0x16b1   :  { %v5764_v29 = vpop.xlane.xlu0 %5763 }
0x16b2   :  { %v5824_v36 = vmul.f32 1.442695, %v5803_v43  ;;  %v5802_v31 = vsub.f32 %v13167_v9, %v5764_v29 }
0x16b4   :  { %11439 = vpow2.f32 %v5824_v36  ;;  %v5822_v33 = vmul.f32 1.442695, %v5802_v31 }
0x16b6   :  { %11441 = vpow2.f32 %v5822_v33 }
0x16b7   :  { %v5773_v18 = vpop.xlane.xlu0 %5772 }
0x16b8   :  { %v5805_v17 = vsub.f32 %v13171_v21, %v5773_v18 }
0x16ba   :  { %v5828_v23 = vmul.f32 1.442695, %v5805_v17 }
0x16bb   :  { %v5770_v49 = vpop.xlane.xlu0 %5769 }
0x16bc   :  { %11443 = vpow2.f32 %v5828_v23  ;;  %v5779_v27 = vpop.xlane.xlu1 %5778  ;;  %v5804_v20 = vsub.f32 %v13175_v44, %v5770_v49 }
0x16bd   :  { %v5807_v30 = vsub.f32 %v13177_v61, %v5779_v27 }
0x16be   :  { %v5826_v56 = vmul.f32 1.442695, %v5804_v20 }
0x16bf   :  { %v5832_v45 = vmul.f32 1.442695, %v5807_v30 }
0x16c0   :  { %11445 = vpow2.f32 %v5826_v56  ;;  %v5776_v9 = vpop.xlane.xlu1 %5775  ;;  %v5785_v5 = vpop.xlane.xlu0 %5784 }
0x16c1   :  { %v13249_v34 = vpop.eup %11439  ;;  %11447 = vpow2.f32 %v5832_v45  ;;  %v5806_v28 = vsub.f32 %v13183_v35, %v5776_v9  ;;  %v5809_v21 = vsub.f32 %v13185_v60, %v5785_v5 }
0x16c2   :  { %v5861_v41 = vsel %vm1096_vm3, %v13249_v34, 0.0 }
0x16c3   :  { %v13255_v55 = vpop.eup %11441  ;;  %5862 = vadd.xlane.f32.xlu1 %v5861_v41  ;;  %v5830_v44 = vmul.f32 1.442695, %v5806_v28  ;;  %v5836_v61 = vmul.f32 1.442695, %v5809_v21 }
0x16c4   :  { %v5791_v7 = vpop.xlane.xlu1 %5790  ;;  %v5782_v40 = vpop.xlane.xlu0 %5781  ;;  %v5858_v35 = vsel %vm1096_vm3, %v13255_v55, 0.0 }
0x16c5   :  { %11449 = vpow2.f32 %v5830_v44  ;;  %v5811_v52 = vsub.f32 %v13193_v10, %v5791_v7  ;;  %v5808_v59 = vsub.f32 %v13191_v22, %v5782_v40 }
0x16c6   :  { %11451 = vpow2.f32 %v5836_v61 }
0x16c7   :  { %5859 = vadd.xlane.f32.xlu1 %v5858_v35  ;;  %v5840_v60 = vmul.f32 1.442695, %v5811_v52  ;;  %v5834_v32 = vmul.f32 1.442695, %v5808_v59 }
0x16c8   :  { %v5788_v54 = vpop.xlane.xlu1 %5787 }
0x16c9   :  { %v13261_v3 = vpop.eup %11443  ;;  %11453 = vpow2.f32 %v5840_v60  ;;  %v5810_v57 = vsub.f32 %v13199_v1, %v5788_v54 }
0x16ca   :  { %11455 = vpow2.f32 %v5834_v32  ;;  %v5794_v47 = vpop.xlane.xlu0 %5793  ;;  %v5867_v10 = vsel %vm1096_vm3, %v13261_v3, 0.0 }
0x16cb   :  { %v5838_v2 = vmul.f32 1.442695, %v5810_v57  ;;  %v5812_v22 = vsub.f32 %v13205_v25, %v5794_v47  ;;  %5868 = vadd.xlane.f32.xlu0 %v5867_v10 }
0x16cc   :  { %v5797_v43 = vpop.xlane.xlu1 %5796 }
0x16cd   :  { %v13267_v29 = vpop.eup %11445  ;;  %11457 = vpow2.f32 %v5838_v2  ;;  %v5842_v36 = vmul.f32 1.442695, %v5812_v22  ;;  %v5813_v31 = vsub.f32 %v13201_v15, %v5797_v43 }
0x16ce   :  { %v13270_v33 = vpop.eup %11447  ;;  %v5864_v1 = vsel %vm1096_vm3, %v13267_v29, 0.0  ;;  %v13308_v44 = vpop.permute.xlu0 %6363 }
0x16cf   :  { %11459 = vpow2.f32 %v5842_v36  ;;  %v5844_v18 = vmul.f32 1.442695, %v5813_v31  ;;  %v5873_v17 = vsel %vm1096_vm3, %v13270_v33, 0.0  ;;  %5865 = vadd.xlane.f32.xlu0 %v5864_v1 }
0x16d0   :  { %5874 = vadd.xlane.f32.xlu1 %v5873_v17  ;;  %v13310_v61 = vpop.permute.xlu1 %6450 }
0x16d1   :  { %11461 = vpow2.f32 %v5844_v18 }
0x16d2   :  { %v13276_v25 = vpop.eup %11449  ;;  %v13312_v7 = vpop.permute.xlu0 %6361 }
0x16d3   :  { %v13278_v23 = vpop.eup %11451  ;;  %v5870_v15 = vsel %vm1096_vm3, %v13276_v25, 0.0 }
0x16d4   :  { %5871 = vadd.xlane.f32.xlu1 %v5870_v15  ;;  %v5879_v49 = vsel %vm1096_vm3, %v13278_v23, 0.0  ;;  %v13314_v40 = vpop.permute.xlu1 %6448 }
0x16d5   :  { %5880 = vadd.xlane.f32.xlu0 %v5879_v49 }
0x16d6   :  { %v13284_v27 = vpop.eup %11453 }
0x16d7   :  { %v13286_v20 = vpop.eup %11455  ;;  %v5885_v30 = vsel %vm1096_vm3, %v13284_v27, 0.0 }
0x16d8   :  { %5886 = vadd.xlane.f32.xlu1 %v5885_v30  ;;  %v5876_v56 = vsel %vm1096_vm3, %v13286_v20, 0.0 }
0x16d9   :  { %5877 = vadd.xlane.f32.xlu0 %v5876_v56 }
0x16da   :  { %v13292_v45 = vpop.eup %11457 }
0x16db   :  { %v5882_v9 = vsel %vm1096_vm3, %v13292_v45, 0.0 }
0x16dc   :  { %v13296_v5 = vpop.eup %11459  ;;  %5883 = vadd.xlane.f32.xlu1 %v5882_v9 }
0x16dd   :  { %v5888_v28 = vsel %vm1096_vm3, %v13296_v5, 0.0 }
0x16de   :  { %v13300_v21 = vpop.eup %11461  ;;  %5889 = vadd.xlane.f32.xlu0 %v5888_v28 }
0x16df   :  { %v5891_v41 = vsel %vm1096_vm3, %v13300_v21, 0.0 }
0x16e0   :  { %5892 = vadd.xlane.f32.xlu1 %v5891_v41 }
0x16f1   :  { %6535 = vrot.lane.b32.xlu1 %v13080_v11, %s11661_s3 }
0x16f4   :  { %6537 = vrot.lane.b32.xlu0 %v13061_v6, %s11661_s3 }
0x1703   :  { %v5848_v52 = vpop.xlane.xlu0 %5847 }
0x1704   :  { %11463 = vrcp.f32 %v5848_v52 }
0x1705   :  { %v5851_v59 = vpop.xlane.xlu1 %5850 }
0x1706   :  { %11465 = vrcp.f32 %v5851_v59 }
0x1707   :  { %v5857_v35 = vpop.xlane.xlu0 %5856 }
0x1708   :  { %11467 = vrcp.f32 %v5857_v35 }
0x170b   :  { %v5854_v60 = vpop.xlane.xlu0 %5853 }
0x170c   :  { %11469 = vrcp.f32 %v5854_v60 }
0x1711   :  { %v11464_v11 = vpop.eup %11463 }
0x1712   :  { %v5910_v32 = vmul.f32 %v11464_v11, %v13228_v0 }
0x1713   :  { %v11466_v6 = vpop.eup %11465 }
0x1714   :  { %10904 = vmatprep.mubr.msk.f32.mxu0 %vm1096_vm3, %v5910_v32  ;;  %v5911_v54 = vmul.f32 %v11466_v6, %v13230_v46  ;;  %v9803_v32 = vld [vmem:[%s14165_s6 + $0x58] sm:$0xff] }
0x1715   :  { %v11468_v57 = vpop.eup %11467 }
0x1716   :  { %10905 = vmatmul.mubr.msk.f32.vlgmr.msra.gmra.mxu0 %vm1096_vm3, %v5911_v54  ;;  %v5913_v0 = vmul.f32 %v11468_v57, %v13234_v4  ;;  %v9801_v57 = vld [vmem:[%s14165_s6 + $0x48] sm:$0xff] }
0x1717   :  { %10908 = vmatpush3.msra.mxu0 %v13150_v58 }
0x1718   :  { %10909 = vmatprep.subr.mxu0 %v13211_v42 }
0x1719   :  { %v11470_v47 = vpop.eup %11469  ;;  %10910 = vmatpush3.msra.mxu0 %v13211_v42 }
0x171a   :  { %10921 = vmatprep.subr.mxu0 %v13213_v26  ;;  %v5912_v10 = vmul.f32 %v11470_v47, %v13240_v48  ;;  %v9800_v47 = vld [vmem:[%s14165_s6 + $0x40] sm:$0xff] }
0x171c   :  { %10911 = vmatprep.mubr.msk.f32.mxu0 %vm1096_vm3, %v5912_v10 }
0x171d   :  { %10912 = vmatmul.mubr.msk.f32.vlgmr.msra.gmra.mxu0 %vm1096_vm3, %v5913_v0 }
0x171e   :  { %10922 = vmatpush3.msra.mxu0 %v13213_v26 }
0x171f   :  { %10923 = vmatprep.subr.mxu0 %v13219_v8 }
0x1720   :  { %10924 = vmatpush3.msra.mxu0 %v13219_v8 }
0x1721   :  { %10935 = vmatprep.subr.mxu0 %v13308_v44 }
0x174c   :  { %v5863_v58 = vpop.xlane.xlu1 %5862 }
0x174d   :  { %11471 = vrcp.f32 %v5863_v58 }
0x1750   :  { %v5860_v42 = vpop.xlane.xlu1 %5859 }
0x1751   :  { %11473 = vrcp.f32 %v5860_v42 }
0x1754   :  { %v5869_v46 = vpop.xlane.xlu0 %5868 }
0x1755   :  { %11475 = vrcp.f32 %v5869_v46 }
0x1758   :  { %v5866_v48 = vpop.xlane.xlu0 %5865 }
0x1759   :  { %v5875_v4 = vpop.xlane.xlu1 %5874  ;;  %11477 = vrcp.f32 %v5866_v48 }
0x175a   :  { %v11472_v2 = vpop.eup %11471  ;;  %11479 = vrcp.f32 %v5875_v4 }
0x175b   :  { %v5915_v8 = vmul.f32 %v11472_v2, %v13249_v34 }
0x175d   :  { %v5872_v43 = vpop.xlane.xlu1 %5871 }
0x175e   :  { %v11474_v22 = vpop.eup %11473  ;;  %11481 = vrcp.f32 %v5872_v43  ;;  %v5881_v26 = vpop.xlane.xlu0 %5880 }
0x175f   :  { %v5914_v36 = vmul.f32 %v11474_v22, %v13255_v55  ;;  %11483 = vrcp.f32 %v5881_v26 }
0x1761   :  { %10918 = vmatprep.mubr.msk.f32.mxu1 %vm1096_vm3, %v5914_v36  ;;  %v5887_v31 = vpop.xlane.xlu1 %5886 }
0x1762   :  { %10919 = vmatmul.mubr.msk.f32.vlgmr.msra.gmra.mxu1 %vm1096_vm3, %v5915_v8  ;;  %v5878_v1 = vpop.xlane.xlu0 %5877  ;;  %v11476_v18 = vpop.eup %11475 }
0x1763   :  { %10929 = vmatpush3.msra.mxu1 %v13153_v38  ;;  %11485 = vrcp.f32 %v5878_v1  ;;  %v5917_v49 = vmul.f32 %v11476_v18, %v13261_v3 }
0x1764   :  { %10930 = vmatprep.subr.mxu1 %v13225_v19  ;;  %11487 = vrcp.f32 %v5887_v31 }
0x1765   :  { %10931 = vmatpush3.msra.mxu1 %v13225_v19  ;;  %v5884_v17 = vpop.xlane.xlu1 %5883 }
0x1766   :  { %10942 = vmatprep.subr.mxu1 %v13310_v61  ;;  %v11478_v34 = vpop.eup %11477  ;;  %11489 = vrcp.f32 %v5884_v17 }
0x1767   :  { %v5890_v55 = vpop.xlane.xlu0 %5889  ;;  %v5916_v15 = vmul.f32 %v11478_v34, %v13267_v29  ;;  %v11480_v38 = vpop.eup %11479 }
0x1768   :  { %11491 = vrcp.f32 %v5890_v55  ;;  %v5919_v29 = vmul.f32 %v11480_v38, %v13270_v33 }
0x1769   :  { %v5893_v30 = vpop.xlane.xlu1 %5892  ;;  %10925 = vmatprep.mubr.msk.f32.mxu0 %vm1096_vm3, %v5916_v15 }
0x176a   :  { %11493 = vrcp.f32 %v5893_v30  ;;  %10926 = vmatmul.mubr.msk.f32.vlgmr.msra.gmra.mxu0 %vm1096_vm3, %v5917_v49 }
0x176b   :  { %v11482_v19 = vpop.eup %11481  ;;  %10936 = vmatpush3.msra.mxu0 %v13308_v44  ;;  %v6538_v9 = vpop.permute.xlu0 %6537 }
0x176c   :  { %10937 = vmatprep.subr.mxu0 %v13312_v7  ;;  %v5918_v56 = vmul.f32 %v11482_v19, %v13276_v25  ;;  %v11484_v3 = vpop.eup %11483 }
0x176d   :  { %10938 = vmatpush3.msra.mxu0 %v13312_v7  ;;  %v5921_v25 = vmul.f32 %v11484_v3, %v13278_v23  ;;  %v6536_v59 = vpop.permute.xlu1 %6535 }
0x176e   :  { %10932 = vmatprep.mubr.msk.f32.mxu1 %vm1096_vm3, %v5918_v56  ;;  %10949 = vmatprep.subr.mxu0 %v6538_v9 }
0x176f   :  { %10933 = vmatmul.mubr.msk.f32.vlgmr.msra.gmra.mxu1 %vm1096_vm3, %v5919_v29 }
0x1770   :  { %v11486_v28 = vpop.eup %11485  ;;  %10943 = vmatpush3.msra.mxu1 %v13310_v61 }
0x1771   :  { %10944 = vmatprep.subr.mxu1 %v13314_v40  ;;  %v5920_v41 = vmul.f32 %v11486_v28, %v13286_v20  ;;  %v11488_v44 = vpop.eup %11487 }
0x1772   :  { %10945 = vmatpush3.msra.mxu1 %v13314_v40  ;;  %v5923_v61 = vmul.f32 %v11488_v44, %v13284_v27 }
0x1773   :  { %v11490_v7 = vpop.eup %11489  ;;  %10939 = vmatprep.mubr.msk.f32.mxu0 %vm1096_vm3, %v5920_v41  ;;  %10956 = vmatprep.subr.mxu1 %v9803_v32 }
0x1774   :  { %10940 = vmatmul.mubr.msk.f32.vlgmr.msra.gmra.mxu0 %vm1096_vm3, %v5921_v25  ;;  %v5922_v33 = vmul.f32 %v11490_v7, %v13292_v45  ;;  %v13409_v7 = vld [vmem:[%s14168_s9 + $0x10] sm:$0xff] }
0x1775   :  { %v11492_v52 = vpop.eup %11491  ;;  %10950 = vmatpush3.msra.mxu0 %v6538_v9 }
0x1776   :  { %10951 = vmatprep.subr.mxu0 %v6536_v59  ;;  %10946 = vmatprep.mubr.msk.f32.mxu1 %vm1096_vm3, %v5922_v33  ;;  %v5924_v20 = vmul.f32 %v11492_v52, %v13296_v5  ;;  %v6786_v33 = vrot.slane %v13409_v7, %v12235_v37 }
0x1777   :  { %v11494_v40 = vpop.eup %11493  ;;  %10952 = vmatpush3.msra.mxu0 %v6536_v59  ;;  %10947 = vmatmul.mubr.msk.f32.vlgmr.msra.gmra.mxu1 %vm1096_vm3, %v5923_v61 }
0x1778   :  { %10953 = vmatprep.mubr.msk.f32.mxu0 %vm1096_vm3, %v5924_v20  ;;  %v5925_v23 = vmul.f32 %v11494_v40, %v13300_v21  ;;  %10957 = vmatpush3.msra.mxu1 %v9803_v32  ;;  %v9802_v21 = vld [vmem:[%s14165_s6 + $0x50] sm:$0xff] }
0x1779   :  { %10958 = vmatprep.subr.mxu1 %v9802_v21 }
0x177a   :  { %10954 = vmatmul.mubr.msk.f32.vlgmr.msra.gmra.mxu0 %vm1096_vm3, %v5925_v23  ;;  %10959 = vmatpush3.msra.mxu1 %v9802_v21 }
0x177b   :  { %10960 = vmatprep.subr.mxu1 %v9801_v57 }
0x177c   :  { %10961 = vmatpush3.msra.mxu1 %v9801_v57 }
0x177d   :  { %10962 = vmatprep.subr.mxu1 %v9800_v47 }
0x177e   :  { %10963 = vmatpush3.msra.mxu1 %v9800_v47 }
0x17d6   :  { %v10906_v45 = vpop.f32.mrf.mxu0 }
0x17d8   :  { %v6004_v60 = vpop.f32.mrf.mxu0 }
0x17dd   :  { %v10913_v11 = vpop.f32.mrf.mxu0 }
0x17df   :  { %v6091_v5 = vpop.f32.mrf.mxu0 }
0x1822   :  { %v10920_v35 = vpop.f32.mrf.mxu1 }
0x1823   :  { %6628 = vrot.lane.b32.xlu1 %v10920_v35, %s11662_s23 }
0x1824   :  { %v6178_v27 = vpop.f32.mrf.mxu1 }
0x1825   :  { %6626 = vrot.lane.b32.xlu0 %v6178_v27, %s11662_s23 }
0x182a   :  { %v10927_v6 = vpop.f32.mrf.mxu0 }
0x182b   :  { %6632 = vrot.lane.b32.xlu1 %v10927_v6, %s11662_s23 }
0x182c   :  { %v6265_v54 = vpop.f32.mrf.mxu0 }
0x182d   :  { %6630 = vrot.lane.b32.xlu0 %v6265_v54, %s11662_s23 }
0x182f   :  { %v10934_v10 = vpop.f32.mrf.mxu1 }
0x1830   :  { %6644 = vrot.lane.b32.xlu1 %v10934_v10, %s11663_s13 }
0x1831   :  { %v6352_v0 = vpop.f32.mrf.mxu1 }
0x1832   :  { %6642 = vrot.lane.b32.xlu0 %v6352_v0, %s11663_s13 }
0x1834   :  { %v10941_v58 = vpop.f32.mrf.mxu0 }
0x1835   :  { %6648 = vrot.lane.b32.xlu1 %v10941_v58, %s11663_s13  ;;  %v9807_v58 = vld [vmem:[%s14166_s7 + $0x58] sm:$0xff] }
0x1836   :  { %v6439_v42 = vpop.f32.mrf.mxu0  ;;  %10970 = vmatprep.subr.mxu0 %v9807_v58 }
0x1837   :  { %6646 = vrot.lane.b32.xlu0 %v6439_v42, %s11663_s13  ;;  %v10948_v46 = vpop.f32.mrf.mxu1  ;;  %v9806_v42 = vld [vmem:[%s14166_s7 + $0x50] sm:$0xff]  ;;  %10971 = vmatpush3.msra.mxu0 %v9807_v58 }
0x1838   :  { %10972 = vmatprep.subr.mxu0 %v9806_v42 }
0x1839   :  { %6660 = vrot.lane.b32.xlu1 %v10948_v46, %s11664_s14  ;;  %v6526_v48 = vpop.f32.mrf.mxu1  ;;  %v9805_v46 = vld [vmem:[%s14166_s7 + $0x48] sm:$0xff]  ;;  %10973 = vmatpush3.msra.mxu0 %v9806_v42 }
0x183a   :  { %v10955_v4 = vpop.f32.mrf.mxu0  ;;  %10974 = vmatprep.subr.mxu0 %v9805_v46 }
0x183b   :  { %6658 = vrot.lane.b32.xlu0 %v6526_v48, %s11664_s14  ;;  %v9804_v48 = vld [vmem:[%s14166_s7 + $0x40] sm:$0xff]  ;;  %10975 = vmatpush3.msra.mxu0 %v9805_v46 }
0x183c   :  { %v6613_v2 = vpop.f32.mrf.mxu0  ;;  %10976 = vmatprep.subr.mxu0 %v9804_v48 }
0x183d   :  { %6664 = vrot.lane.b32.xlu1 %v10955_v4, %s11664_s14  ;;  %10977 = vmatpush3.msra.mxu0 %v9804_v48  ;;  %v9823_v48 = vld [vmem:[%s14167_s8 + $0x178] sm:$0xff] }
0x183e   :  { %10984 = vmatprep.subr.mxu1 %v9823_v48 }
0x183f   :  { %6662 = vrot.lane.b32.xlu0 %v6613_v2, %s11664_s14 }
0x1895   :  { %v6629_v22 = vpop.permute.xlu1 %6628 }
0x1896   :  { %v6671_v55 = vsel %vm403_vm2, %v10906_v45, %v6629_v22 }
0x1897   :  { %v6627_v43 = vpop.permute.xlu0 %6626 }
0x1898   :  { %v6670_v34 = vsel %vm403_vm2, %v6004_v60, %v6627_v43 }
0x189d   :  { %v6633_v26 = vpop.permute.xlu1 %6632 }
0x189e   :  { %v6673_v29 = vsel %vm403_vm2, %v10913_v11, %v6633_v26 }
0x189f   :  { %v6631_v36 = vpop.permute.xlu0 %6630 }
0x18a0   :  { %v6672_v56 = vsel %vm403_vm2, %v6091_v5, %v6631_v36 }
0x18a2   :  { %v6645_v8 = vpop.permute.xlu1 %6644 }
0x18a3   :  { %v6675_v30 = vsel %vm1096_vm3, %v6671_v55, %v6645_v8 }
0x18a4   :  { %v6643_v31 = vpop.permute.xlu0 %6642 }
0x18a5   :  { %v6674_v15 = vsel %vm1096_vm3, %v6670_v34, %v6643_v31 }
0x18a7   :  { %v6649_v1 = vpop.permute.xlu1 %6648 }
0x18a8   :  { %v6677_v41 = vsel %vm1096_vm3, %v6673_v29, %v6649_v1 }
0x18a9   :  { %v6647_v18 = vpop.permute.xlu0 %6646 }
0x18aa   :  { %v6676_v3 = vsel %vm1096_vm3, %v6672_v56, %v6647_v18 }
0x18ab   :  { %v6661_v17 = vpop.permute.xlu1 %6660 }
0x18ac   :  { %v6679_v19 = vsel %vm2025_vm4, %v6675_v30, %v6661_v17 }
0x18ad   :  { %v6659_v49 = vpop.permute.xlu0 %6658 }
0x18ae   :  { %v6678_v38 = vsel %vm2025_vm4, %v6674_v15, %v6659_v49 }
0x18af   :  { %10964 = vmatprep.mubr.msk.f32.mxu1 %vm192_vm1, %v6678_v38  ;;  %v6665_v9 = vpop.permute.xlu1 %6664 }
0x18b0   :  { %10965 = vmatmul.mubr.msk.f32.vlgmr.msra.gmra.mxu1 %vm192_vm1, %v6679_v19  ;;  %v6681_v25 = vsel %vm2025_vm4, %v6677_v41, %v6665_v9 }
0x18b1   :  { %v6663_v28 = vpop.permute.xlu0 %6662  ;;  %10985 = vmatpush3.msra.mxu1 %v9823_v48 }
0x18b2   :  { %v6680_v44 = vsel %vm2025_vm4, %v6676_v3, %v6663_v28 }
0x18b3   :  { %10967 = vmatprep.mubr.msk.f32.mxu1 %vm192_vm1, %v6680_v44 }
0x18b4   :  { %10968 = vmatmul.mubr.msk.f32.gmra.mxu1 %vm192_vm1, %v6681_v25 }
0x1970   :  { %v10966_v52 = vpop.f32.mrf.mxu1 }
0x1971   :  { %v6780_v59 = vadd.f32 %v10966_v52, %v12967_v63 }
0x1972   :  { %v6760_v61 = vpop.f32.mrf.mxu1 }
0x1973   :  { %v13414_v20 = vadd.f32 %v6786_v33, %v6780_v59  ;;  %v6779_v40 = vadd.f32 %v6760_v61, %v12971_v62 }
0x1974   :  { %v10969_v23 = vpop.f32.mrf.mxu1 }
0x1975   :  { %v13417_v45 = vadd.f32 %v6786_v33, %v6779_v40  ;;  %v6782_v35 = vadd.f32 %v10969_v23, %v12982_v13  ;;  %v6794_v60 = vsel %vm192_vm1, %v13414_v20, 0.0  ;;  %v6808_v63 = vmul.f32 %v13414_v20, %v13414_v20 }
0x1976   :  { %6795 = vadd.xlane.f32.xlu1 %v6794_v60  ;;  %v6770_v5 = vpop.f32.mrf.mxu1  ;;  %v6854_v40 = vrot.slane %v13409_v7, %v12289_v53 }
0x1977   :  { %v13422_v27 = vadd.f32 %v6786_v33, %v6782_v35  ;;  %v6791_v11 = vsel %vm192_vm1, %v13417_v45, 0.0  ;;  %v6781_v32 = vadd.f32 %v6770_v5, %v12988_v24  ;;  %v6814_v6 = vsel %vm192_vm1, %v6808_v63, 0.0 }
0x1978   :  { %6792 = vadd.xlane.f32.xlu0 %v6791_v11  ;;  %v6807_v21 = vmul.f32 %v13417_v45, %v13417_v45  ;;  %v6862_v63 = vrot.slane %v13409_v7, %v12295_v51 }
0x1979   :  { %v6800_v62 = vsel %vm192_vm1, %v13422_v27, 0.0  ;;  %v6810_v13 = vmul.f32 %v13422_v27, %v13422_v27  ;;  %v13437_v57 = vadd.f32 %v6786_v33, %v6781_v32 }
0x197a   :  { %6801 = vadd.xlane.f32.xlu1 %v6800_v62  ;;  %v6811_v47 = vsel %vm192_vm1, %v6807_v21, 0.0 }
0x197b   :  { %v6820_v54 = vsel %vm192_vm1, %v6810_v13, 0.0  ;;  %v6797_v10 = vsel %vm192_vm1, %v13437_v57, 0.0  ;;  %v6809_v24 = vmul.f32 %v13437_v57, %v13437_v57 }
0x197c   :  { %6815 = vadd.xlane.f32.xlu0 %v6814_v6 }
0x197d   :  { %v6817_v0 = vsel %vm192_vm1, %v6809_v24, 0.0 }
0x197e   :  { %6821 = vadd.xlane.f32.xlu1 %v6820_v54 }
0x1980   :  { %6812 = vadd.xlane.f32.xlu0 %v6811_v47 }
0x1984   :  { %6798 = vadd.xlane.f32.xlu0 %v6797_v10 }
0x1988   :  { %6818 = vadd.xlane.f32.xlu0 %v6817_v0 }
0x19ff   :  { %v6796_v4 = vpop.xlane.xlu1 %6795 }
0x1a00   :  { %v6804_v22 = vmul.f32 0.03125, %v6796_v4  ;;  %v9822_v4 = vld [vmem:[%s14167_s8 + $0x170] sm:$0xff] }
0x1a01   :  { %v6793_v2 = vpop.xlane.xlu0 %6792  ;;  %10986 = vmatprep.subr.mxu1 %v9822_v4 }
0x1a02   :  { %v6828_v8 = vmul.f32 %v6804_v22, %v6804_v22  ;;  %v6803_v31 = vmul.f32 0.03125, %v6793_v2  ;;  %v6836_v61 = vsub.f32 %v13414_v20, %v6804_v22  ;;  %10987 = vmatpush3.msra.mxu1 %v9822_v4  ;;  %v9821_v2 = vld [vmem:[%s14167_s8 + $0x168] sm:$0xff]  ;;  %v9820_v22 = vld [vmem:[%s14167_s8 + $0x160] sm:$0xff] }
0x1a03   :  { %v6802_v43 = vpop.xlane.xlu1 %6801  ;;  %10988 = vmatprep.subr.mxu1 %v9821_v2 }
0x1a04   :  { %v6806_v26 = vmul.f32 0.03125, %v6802_v43  ;;  %v6827_v49 = vmul.f32 %v6803_v31, %v6803_v31  ;;  %v6835_v35 = vsub.f32 %v13417_v45, %v6803_v31  ;;  %10989 = vmatpush3.msra.mxu1 %v9821_v2  ;;  %v9819_v43 = vld [vmem:[%s14167_s8 + $0x158] sm:$0xff] }
0x1a05   :  { %v6816_v36 = vpop.xlane.xlu0 %6815  ;;  %10990 = vmatprep.subr.mxu1 %v9820_v22  ;;  %v9815_v31 = vld [vmem:[%s14167_s8 + $0x138] sm:$0xff] }
0x1a06   :  { %v6824_v1 = vmul.f32 0.03125, %v6816_v36  ;;  %v6830_v55 = vmul.f32 %v6806_v26, %v6806_v26  ;;  %v6838_v32 = vsub.f32 %v13422_v27, %v6806_v26  ;;  %10991 = vmatpush3.msra.mxu1 %v9820_v22  ;;  %v9818_v26 = vld [vmem:[%s14167_s8 + $0x150] sm:$0xff]  ;;  %v9817_v36 = vld [vmem:[%s14167_s8 + $0x148] sm:$0xff] }
0x1a07   :  { %v6822_v18 = vpop.xlane.xlu1 %6821  ;;  %10992 = vmatprep.subr.mxu1 %v9819_v43 }
0x1a08   :  { %v6832_v17 = vsub.f32 %v6824_v1, %v6828_v8  ;;  %v6826_v34 = vmul.f32 0.03125, %v6822_v18  ;;  %10993 = vmatpush3.msra.mxu1 %v9819_v43  ;;  %v9816_v8 = vld [vmem:[%s14167_s8 + $0x140] sm:$0xff]  ;;  %v9814_v1 = vld [vmem:[%s14167_s8 + $0x130] sm:$0xff]  ;;  %v9813_v18 = vld [vmem:[%s14167_s8 + $0x128] sm:$0xff] }
0x1a09   :  { %v6813_v15 = vpop.xlane.xlu0 %6812  ;;  %10994 = vmatprep.subr.mxu1 %v9818_v26 }
0x1a0a   :  { %v6840_v30 = vadd.f32 1e-05, %v6832_v17  ;;  %v6823_v38 = vmul.f32 0.03125, %v6813_v15  ;;  %v6834_v19 = vsub.f32 %v6826_v34, %v6830_v55  ;;  %10995 = vmatpush3.msra.mxu1 %v9818_v26  ;;  %v9812_v17 = vld [vmem:[%s14167_s8 + $0x120] sm:$0xff]  ;;  %v9811_v34 = vld [vmem:[%s14167_s8 + $0x118] sm:$0xff]  ;;  %v9810_v55 = vld [vmem:[%s14167_s8 + $0x110] sm:$0xff] }
0x1a0b   :  { %10996 = vmatprep.subr.mxu1 %v9817_v36  ;;  %v9809_v15 = vld [vmem:[%s14167_s8 + $0x108] sm:$0xff] }
0x1a0c   :  { %11495 = vrsqrt.f32 %v6840_v30  ;;  %v6831_v56 = vsub.f32 %v6823_v38, %v6827_v49  ;;  %v6842_v28 = vadd.f32 1e-05, %v6834_v19  ;;  %10997 = vmatpush3.msra.mxu1 %v9817_v36  ;;  %v9808_v49 = vld [vmem:[%s14167_s8 + $0x100] sm:$0xff]  ;;  %v6870_v30 = vrot.slane %v13409_v7, %v12355_v50 }
0x1a0d   :  { %v6799_v9 = vpop.xlane.xlu0 %6798  ;;  %10998 = vmatprep.subr.mxu1 %v9816_v8 }
0x1a0e   :  { %v6839_v29 = vadd.f32 1e-05, %v6831_v56  ;;  %v6805_v3 = vmul.f32 0.03125, %v6799_v9  ;;  %10999 = vmatpush3.msra.mxu1 %v9816_v8 }
0x1a0f   :  { %11000 = vmatprep.subr.mxu1 %v9815_v31 }
0x1a10   :  { %11497 = vrsqrt.f32 %v6839_v29  ;;  %v6829_v44 = vmul.f32 %v6805_v3, %v6805_v3  ;;  %v6837_v47 = vsub.f32 %v13437_v57, %v6805_v3  ;;  %11001 = vmatpush3.msra.mxu1 %v9815_v31 }
0x1a11   :  { %v6819_v41 = vpop.xlane.xlu0 %6818  ;;  %11499 = vrsqrt.f32 %v6842_v28  ;;  %11002 = vmatprep.subr.mxu1 %v9814_v1 }
0x1a12   :  { %v6825_v25 = vmul.f32 0.03125, %v6819_v41  ;;  %11003 = vmatpush3.msra.mxu1 %v9814_v1 }
0x1a13   :  { %11004 = vmatprep.subr.mxu1 %v9813_v18 }
0x1a14   :  { %v6833_v33 = vsub.f32 %v6825_v25, %v6829_v44  ;;  %11005 = vmatpush3.msra.mxu1 %v9813_v18  ;;  %v7096_v18 = vrot.slane %v13409_v7, %v12360_v14 }
0x1a15   :  { %11006 = vmatprep.subr.mxu1 %v9812_v17 }
0x1a16   :  { %v6841_v52 = vadd.f32 1e-05, %v6833_v33  ;;  %11007 = vmatpush3.msra.mxu1 %v9812_v17 }
0x1a17   :  { %11008 = vmatprep.subr.mxu1 %v9811_v34 }
0x1a18   :  { %11501 = vrsqrt.f32 %v6841_v52  ;;  %11009 = vmatpush3.msra.mxu1 %v9811_v34 }
0x1a19   :  { %v11496_v59 = vpop.eup %11495  ;;  %11010 = vmatprep.subr.mxu1 %v9810_v55 }
0x1a1a   :  { %v6848_v23 = vmul.f32 %v11496_v59, %v6836_v61  ;;  %11011 = vmatpush3.msra.mxu1 %v9810_v55 }
0x1a1b   :  { %11012 = vmatprep.subr.mxu1 %v9809_v15 }
0x1a1c   :  { %v6856_v5 = vmul.f32 %v6854_v40, %v6848_v23  ;;  %11013 = vmatpush3.msra.mxu1 %v9809_v15 }
0x1a1d   :  { %v11498_v60 = vpop.eup %11497  ;;  %11014 = vmatprep.subr.mxu1 %v9808_v49 }
0x1a1e   :  { %v6847_v11 = vmul.f32 %v11498_v60, %v6835_v35  ;;  %v11500_v62 = vpop.eup %11499  ;;  %v6864_v21 = vadd.f32 %v6862_v63, %v6856_v5  ;;  %11015 = vmatpush3.msra.mxu1 %v9808_v49 }
0x1a1f   :  { %v6850_v54 = vmul.f32 %v11500_v62, %v6838_v32 }
0x1a20   :  { %v6855_v13 = vmul.f32 %v6854_v40, %v6847_v11 }
0x1a21   :  { %v6858_v0 = vmul.f32 %v6854_v40, %v6850_v54 }
0x1a22   :  { %v6863_v6 = vadd.f32 %v6862_v63, %v6855_v13 }
0x1a23   :  { %v6866_v46 = vadd.f32 %v6862_v63, %v6858_v0 }
0x1a24   :  { %10978 = vmatprep.mubr.msk.f32.mxu0 %vm192_vm1, %v6863_v6 }
0x1a25   :  { %v11502_v10 = vpop.eup %11501  ;;  %10979 = vmatmul.mubr.msk.f32.vlgmr.msra.gmra.mxu0 %vm192_vm1, %v6864_v21 }
0x1a26   :  { %v6849_v24 = vmul.f32 %v11502_v10, %v6837_v47 }
0x1a28   :  { %v6857_v58 = vmul.f32 %v6854_v40, %v6849_v24 }
0x1a2a   :  { %v6865_v42 = vadd.f32 %v6862_v63, %v6857_v58 }
0x1a2c   :  { %10981 = vmatprep.mubr.msk.f32.mxu0 %vm192_vm1, %v6865_v42 }
0x1a2d   :  { %10982 = vmatmul.mubr.msk.f32.gmra.mxu0 %vm192_vm1, %v6866_v46 }
0x1ae5   :  { %v10980_v38 = vpop.f32.mrf.mxu0 }
0x1ae6   :  { %v6955_v19 = vadd.f32 %v10980_v38, %v6870_v30 }
0x1ae7   :  { %v6949_v56 = vpop.f32.mrf.mxu0 }
0x1ae8   :  { %v6973_v9 = vmul.f32 0.044715, %v6955_v19  ;;  %v6950_v29 = vadd.f32 %v6949_v56, %v6870_v30  ;;  %v6969_v46 = vmul.f32 0.5, %v6955_v19 }
0x1aea   :  { %v6977_v3 = vmul.f32 %v6973_v9, %v6955_v19  ;;  %v6972_v28 = vmul.f32 0.044715, %v6950_v29  ;;  %v6968_v58 = vmul.f32 0.5, %v6950_v29 }
0x1aec   :  { %v6981_v41 = vmul.f32 %v6977_v3, %v6955_v19  ;;  %v6976_v44 = vmul.f32 %v6972_v28, %v6950_v29 }
0x1aed   :  { %v10983_v25 = vpop.f32.mrf.mxu0 }
0x1aee   :  { %v6985_v33 = vadd.f32 %v6981_v41, %v6955_v19  ;;  %v6965_v52 = vadd.f32 %v10983_v25, %v6870_v30  ;;  %v6980_v59 = vmul.f32 %v6976_v44, %v6950_v29 }
0x1aef   :  { %v6959_v61 = vpop.f32.mrf.mxu0 }
0x1af0   :  { %v6989_v40 = vmul.f32 0.7978846, %v6985_v33  ;;  %v6975_v23 = vmul.f32 0.044715, %v6965_v52  ;;  %v6960_v35 = vadd.f32 %v6959_v61, %v6870_v30  ;;  %v6984_v60 = vadd.f32 %v6980_v59, %v6950_v29  ;;  %v9888_v61 = vld [vmem:[%s14164_s5 + $0x78] sm:$0xff] }
0x1af1   :  { %v6971_v8 = vmul.f32 0.5, %v6965_v52  ;;  %11022 = vmatprep.subr.mxu0 %v9888_v61 }
0x1af2   :  { %11503 = vtanh.f32 %v6989_v40  ;;  %v6979_v11 = vmul.f32 %v6975_v23, %v6965_v52  ;;  %v6974_v63 = vmul.f32 0.044715, %v6960_v35  ;;  %v6988_v5 = vmul.f32 0.7978846, %v6984_v60  ;;  %v9887_v40 = vld [vmem:[%s14164_s5 + $0x70] sm:$0xff]  ;;  %11023 = vmatpush3.msra.mxu0 %v9888_v61  ;;  %v9886_v23 = vld [vmem:[%s14164_s5 + $0x68] sm:$0xff] }
0x1af3   :  { %v6970_v26 = vmul.f32 0.5, %v6960_v35  ;;  %11024 = vmatprep.subr.mxu0 %v9887_v40 }
0x1af4   :  { %v6978_v62 = vmul.f32 %v6974_v63, %v6960_v35  ;;  %11505 = vtanh.f32 %v6988_v5  ;;  %v6983_v13 = vmul.f32 %v6979_v11, %v6965_v52  ;;  %11025 = vmatpush3.msra.mxu0 %v9887_v40 }
0x1af5   :  { %11026 = vmatprep.subr.mxu0 %v9886_v23 }
0x1af6   :  { %v6982_v32 = vmul.f32 %v6978_v62, %v6960_v35  ;;  %v6987_v6 = vadd.f32 %v6983_v13, %v6965_v52  ;;  %11027 = vmatpush3.msra.mxu0 %v9886_v23 }
0x1af8   :  { %v6986_v21 = vadd.f32 %v6982_v32, %v6960_v35  ;;  %v6991_v54 = vmul.f32 0.7978846, %v6987_v6  ;;  %v9885_v35 = vld [vmem:[%s14164_s5 + $0x60] sm:$0xff] }
0x1af9   :  { %11028 = vmatprep.subr.mxu0 %v9885_v35 }
0x1afa   :  { %v6990_v47 = vmul.f32 0.7978846, %v6986_v21  ;;  %11507 = vtanh.f32 %v6991_v54  ;;  %11029 = vmatpush3.msra.mxu0 %v9885_v35 }
0x1afc   :  { %11509 = vtanh.f32 %v6990_v47 }
0x1aff   :  { %v11504_v10 = vpop.eup %11503 }
0x1b00   :  { %v6997_v0 = vadd.f32 1.0, %v11504_v10 }
0x1b01   :  { %v11506_v24 = vpop.eup %11505 }
0x1b02   :  { %v6996_v42 = vadd.f32 1.0, %v11506_v24  ;;  %v7001_v4 = vmul.f32 %v6997_v0, %v6969_v46 }
0x1b04   :  { %v7000_v48 = vmul.f32 %v6996_v42, %v6968_v58 }
0x1b06   :  { %11016 = vmatprep.mubr.f32.mxu1 %v7000_v48 }
0x1b07   :  { %v11508_v2 = vpop.eup %11507  ;;  %11017 = vmatmul.mubr.f32.vlgmr.msra.gmra.mxu1 %v7001_v4 }
0x1b08   :  { %v6999_v43 = vadd.f32 1.0, %v11508_v2 }
0x1b09   :  { %v11510_v22 = vpop.eup %11509 }
0x1b0a   :  { %v6998_v36 = vadd.f32 1.0, %v11510_v22  ;;  %v7003_v1 = vmul.f32 %v6999_v43, %v6971_v8 }
0x1b0c   :  { %v7002_v31 = vmul.f32 %v6998_v36, %v6970_v26 }
0x1b0e   :  { %11019 = vmatprep.mubr.f32.mxu1 %v7002_v31 }
0x1b0f   :  { %11020 = vmatmul.mubr.f32.gmra.mxu1 %v7003_v1 }
0x1bc7   :  { %v11018_v17 = vpop.f32.mrf.mxu1 }
0x1bc8   :  { %v7090_v34 = vadd.f32 %v11018_v17, %v13414_v20  ;;  %v9913_v17 = vld [vmem:[%s14168_s9 + $0x18] sm:$0xff] }
0x1bc9   :  { %v7070_v55 = vpop.f32.mrf.mxu1  ;;  %v7214_v40 = vrot.slane %v9913_v17, %v11839_v39 }
0x1bca   :  { %v13522_v15 = vadd.f32 %v7096_v18, %v7090_v34  ;;  %v7089_v49 = vadd.f32 %v7070_v55, %v13417_v45 }
0x1bcc   :  { %v13525_v30 = vadd.f32 %v7096_v18, %v7089_v49  ;;  %v7138_v38 = vsel %vm192_vm1, %v13522_v15, 0.0  ;;  %v7152_v19 = vmul.f32 %v13522_v15, %v13522_v15  ;;  %v7198_v49 = vrot.slane %v9913_v17, %v11770_v12 }
0x1bcd   :  { %7139 = vadd.xlane.f32.xlu1 %v7138_v38 }
0x1bce   :  { %v7135_v7 = vsel %vm192_vm1, %v13525_v30, 0.0  ;;  %v7151_v20 = vmul.f32 %v13525_v30, %v13525_v30  ;;  %v7158_v45 = vsel %vm192_vm1, %v7152_v19, 0.0 }
0x1bcf   :  { %7136 = vadd.xlane.f32.xlu0 %v7135_v7  ;;  %v11021_v56 = vpop.f32.mrf.mxu1 }
0x1bd0   :  { %v7092_v9 = vadd.f32 %v11021_v56, %v13422_v27  ;;  %v7155_v41 = vsel %vm192_vm1, %v7151_v20, 0.0  ;;  %v7206_v56 = vrot.slane %v9913_v17, %v11828_v16 }
0x1bd1   :  { %7159 = vadd.xlane.f32.xlu1 %v7158_v45  ;;  %v7080_v29 = vpop.f32.mrf.mxu1 }
0x1bd2   :  { %v13537_v3 = vadd.f32 %v7096_v18, %v7092_v9  ;;  %v7091_v28 = vadd.f32 %v7080_v29, %v13437_v57 }
0x1bd3   :  { %7156 = vadd.xlane.f32.xlu0 %v7155_v41 }
0x1bd4   :  { %v13541_v44 = vadd.f32 %v7096_v18, %v7091_v28  ;;  %v7144_v25 = vsel %vm192_vm1, %v13537_v3, 0.0  ;;  %v7154_v33 = vmul.f32 %v13537_v3, %v13537_v3 }
0x1bd5   :  { %7145 = vadd.xlane.f32.xlu1 %v7144_v25 }
0x1bd6   :  { %v7141_v27 = vsel %vm192_vm1, %v13541_v44, 0.0  ;;  %v7153_v52 = vmul.f32 %v13541_v44, %v13541_v44  ;;  %v7164_v57 = vsel %vm192_vm1, %v7154_v33, 0.0 }
0x1bd7   :  { %7142 = vadd.xlane.f32.xlu0 %v7141_v27 }
0x1bd8   :  { %v7161_v59 = vsel %vm192_vm1, %v7153_v52, 0.0 }
0x1bd9   :  { %7165 = vadd.xlane.f32.xlu1 %v7164_v57 }
0x1bdb   :  { %7162 = vadd.xlane.f32.xlu0 %v7161_v59 }
0x1c56   :  { %v7140_v60 = vpop.xlane.xlu1 %7139 }
0x1c57   :  { %v7148_v11 = vmul.f32 0.03125, %v7140_v60 }
0x1c58   :  { %v7137_v63 = vpop.xlane.xlu0 %7136 }
0x1c59   :  { %v7147_v5 = vmul.f32 0.03125, %v7137_v63  ;;  %v7172_v13 = vmul.f32 %v7148_v11, %v7148_v11  ;;  %v7180_v34 = vsub.f32 %v13522_v15, %v7148_v11 }
0x1c5a   :  { %v7160_v62 = vpop.xlane.xlu1 %7159 }
0x1c5b   :  { %v7168_v32 = vmul.f32 0.03125, %v7160_v62  ;;  %v7171_v21 = vmul.f32 %v7147_v5, %v7147_v5  ;;  %v7179_v38 = vsub.f32 %v13525_v30, %v7147_v5 }
0x1c5c   :  { %v7157_v6 = vpop.xlane.xlu0 %7156 }
0x1c5d   :  { %v7176_v54 = vsub.f32 %v7168_v32, %v7172_v13  ;;  %v7167_v47 = vmul.f32 0.03125, %v7157_v6 }
0x1c5e   :  { %v7146_v10 = vpop.xlane.xlu1 %7145 }
0x1c5f   :  { %v7184_v24 = vadd.f32 1e-05, %v7176_v54  ;;  %v7175_v0 = vsub.f32 %v7167_v47, %v7171_v21  ;;  %v7150_v58 = vmul.f32 0.03125, %v7146_v10 }
0x1c60   :  { %v7143_v42 = vpop.xlane.xlu0 %7142 }
0x1c61   :  { %11511 = vrsqrt.f32 %v7184_v24  ;;  %v7183_v46 = vadd.f32 1e-05, %v7175_v0  ;;  %v7149_v48 = vmul.f32 0.03125, %v7143_v42  ;;  %v7174_v2 = vmul.f32 %v7150_v58, %v7150_v58 }
0x1c62   :  { %v7166_v4 = vpop.xlane.xlu1 %7165  ;;  %v7182_v29 = vsub.f32 %v13537_v3, %v7150_v58 }
0x1c63   :  { %11513 = vrsqrt.f32 %v7183_v46  ;;  %v7170_v22 = vmul.f32 0.03125, %v7166_v4  ;;  %v7173_v26 = vmul.f32 %v7149_v48, %v7149_v48  ;;  %v7181_v33 = vsub.f32 %v13541_v44, %v7149_v48 }
0x1c64   :  { %v7163_v43 = vpop.xlane.xlu0 %7162 }
0x1c65   :  { %v7178_v36 = vsub.f32 %v7170_v22, %v7174_v2  ;;  %v7169_v8 = vmul.f32 0.03125, %v7163_v43 }
0x1c67   :  { %v7186_v31 = vadd.f32 1e-05, %v7178_v36  ;;  %v7177_v1 = vsub.f32 %v7169_v8, %v7173_v26 }
0x1c69   :  { %11515 = vrsqrt.f32 %v7186_v31  ;;  %v7185_v18 = vadd.f32 1e-05, %v7177_v1 }
0x1c6b   :  { %11517 = vrsqrt.f32 %v7185_v18 }
0x1c6e   :  { %v11512_v55 = vpop.eup %11511 }
0x1c6f   :  { %v7192_v19 = vmul.f32 %v11512_v55, %v7180_v34 }
0x1c70   :  { %v11514_v7 = vpop.eup %11513 }
0x1c71   :  { %v7191_v20 = vmul.f32 %v11514_v7, %v7179_v38  ;;  %v7200_v9 = vmul.f32 %v7198_v49, %v7192_v19 }
0x1c73   :  { %v7199_v45 = vmul.f32 %v7198_v49, %v7191_v20  ;;  %v7208_v25 = vadd.f32 %v7206_v56, %v7200_v9 }
0x1c75   :  { %v7207_v28 = vadd.f32 %v7206_v56, %v7199_v45 }
0x1c76   :  { %v11516_v41 = vpop.eup %11515 }
0x1c77   :  { %11030 = vmatprep.mubr.msk.f32.mxu0 %vm192_vm1, %v7207_v28  ;;  %v7194_v27 = vmul.f32 %v11516_v41, %v7182_v29 }
0x1c78   :  { %v11518_v12 = vpop.eup %11517  ;;  %11031 = vmatmul.mubr.msk.f32.vlgmr.msra.gmra.mxu0 %vm192_vm1, %v7208_v25 }
0x1c79   :  { %v7193_v52 = vmul.f32 %v11518_v12, %v7181_v33  ;;  %v7202_v57 = vmul.f32 %v7198_v49, %v7194_v27 }
0x1c7b   :  { %v7201_v59 = vmul.f32 %v7198_v49, %v7193_v52  ;;  %v7210_v16 = vadd.f32 %v7206_v56, %v7202_v57 }
0x1c7d   :  { %v7209_v61 = vadd.f32 %v7206_v56, %v7201_v59 }
0x1c7f   :  { %11033 = vmatprep.mubr.msk.f32.mxu0 %vm192_vm1, %v7209_v61 }
0x1c80   :  { %11034 = vmatmul.mubr.msk.f32.gmra.mxu0 %vm192_vm1, %v7210_v16 }
0x1d38   :  { %v11032_v23 = vpop.f32.mrf.mxu0 }
0x1d39   :  { %v7299_v35 = vadd.f32 %v11032_v23, %v7214_v40 }
0x1d3a   :  { %v7293_v60 = vpop.f32.mrf.mxu0 }
0x1d3b   :  { %v7294_v11 = vadd.f32 %v7293_v60, %v7214_v40  ;;  %7318 = vrot.lane.b32.xlu0 %v7299_v35, %s11657_s19 }
0x1d3d   :  { %7316 = vrot.lane.b32.xlu1 %v7294_v11, %s11657_s19  ;;  %11040 = vmatprep.mubr.msk.f32.mxu0 %vm403_vm2, %v7294_v11 }
0x1d3f   :  { %7326 = vrot.lane.b32.xlu0 %v7299_v35, %s11658_s20 }
0x1d40   :  { %v11035_v63 = vpop.f32.mrf.mxu0 }
0x1d41   :  { %v13583_v5 = vadd.f32 %v11035_v63, %v7214_v40 }
0x1d42   :  { %v7303_v62 = vpop.f32.mrf.mxu0 }
0x1d43   :  { %7330 = vrot.lane.b32.xlu0 %v13583_v5, %s11658_s20  ;;  %7322 = vrot.lane.b32.xlu1 %v13583_v5, %s11657_s19  ;;  %v7304_v39 = vadd.f32 %v7303_v62, %v7214_v40 }
0x1d47   :  { %7334 = vrot.lane.b32.xlu0 %v7299_v35, %s11659_s21  ;;  %7320 = vrot.lane.b32.xlu1 %v7304_v39, %s11657_s19 }
0x1d4b   :  { %7338 = vrot.lane.b32.xlu0 %v13583_v5, %s11659_s21  ;;  %7324 = vrot.lane.b32.xlu1 %v7294_v11, %s11658_s20 }
0x1d4f   :  { %7342 = vrot.lane.b32.xlu0 %v7299_v35, %s11660_s22  ;;  %7328 = vrot.lane.b32.xlu1 %v7304_v39, %s11658_s20 }
0x1d53   :  { %7429 = vrot.lane.b32.xlu0 %v13583_v5, %s11660_s22  ;;  %7332 = vrot.lane.b32.xlu1 %v7294_v11, %s11659_s21 }
0x1d57   :  { %7336 = vrot.lane.b32.xlu1 %v7304_v39, %s11659_s21 }
0x1d5b   :  { %7340 = vrot.lane.b32.xlu1 %v7294_v11, %s11660_s22 }
0x1d5f   :  { %7427 = vrot.lane.b32.xlu1 %v7304_v39, %s11660_s22 }
0x1dad   :  { %v7319_v13 = vpop.permute.xlu0 %7318 }
0x1dae   :  { %7516 = vrot.lane.b32.xlu0 %v7319_v13, %s11660_s22 }
0x1daf   :  { %v7317_v32 = vpop.permute.xlu1 %7316 }
0x1db0   :  { %7514 = vrot.lane.b32.xlu1 %v7317_v32, %s11660_s22 }
0x1db1   :  { %v13604_v6 = vpop.permute.xlu0 %7326 }
0x1db5   :  { %v13606_v21 = vpop.permute.xlu1 %7322  ;;  %v13608_v54 = vpop.permute.xlu0 %7330 }
0x1db6   :  { %7603 = vrot.lane.b32.xlu0 %v13606_v21, %s11660_s22 }
0x1db9   :  { %v7321_v47 = vpop.permute.xlu1 %7320  ;;  %v13612_v10 = vpop.permute.xlu0 %7334 }
0x1dba   :  { %11061 = vmatprep.mubr.msk.f32.mxu1 %vm403_vm2, %v7321_v47  ;;  %7601 = vrot.lane.b32.xlu1 %v7321_v47, %s11660_s22 }
0x1dbb   :  { %7690 = vrot.lane.b32.xlu0 %v13604_v6, %s11660_s22 }
0x1dbd   :  { %v7325_v24 = vpop.permute.xlu1 %7324  ;;  %v13618_v0 = vpop.permute.xlu0 %7338 }
0x1dbe   :  { %7688 = vrot.lane.b32.xlu1 %v7325_v24, %s11660_s22 }
0x1dbf   :  { %7777 = vrot.lane.b32.xlu0 %v13608_v54, %s11660_s22 }
0x1dc1   :  { %v13623_v58 = vpop.permute.xlu1 %7328  ;;  %v7343_v42 = vpop.permute.xlu0 %7342 }
0x1dc2   :  { %7775 = vrot.lane.b32.xlu1 %v13623_v58, %s11660_s22  ;;  %11036 = vmatprep.subr.msk.mxu0 %vm403_vm2, %v7343_v42 }
0x1dc3   :  { %7864 = vrot.lane.b32.xlu0 %v13612_v10, %s11660_s22  ;;  %11037 = vmatpush3.xpose.msk.msra.mxu0 %vm403_vm2, %v7343_v42 }
0x1dc5   :  { %v13631_v46 = vpop.permute.xlu1 %7332  ;;  %v7430_v2 = vpop.permute.xlu0 %7429 }
0x1dc6   :  { %7862 = vrot.lane.b32.xlu1 %v13631_v46, %s11660_s22 }
0x1dc7   :  { %7951 = vrot.lane.b32.xlu0 %v13618_v0, %s11660_s22 }
0x1dc9   :  { %v13637_v48 = vpop.permute.xlu1 %7336 }
0x1dca   :  { %7949 = vrot.lane.b32.xlu1 %v13637_v48, %s11660_s22 }
0x1dcb   :  { %8214 = vrot.lane.b32.xlu0 %v7299_v35, %s11661_s3 }
0x1dcd   :  { %v7341_v4 = vpop.permute.xlu1 %7340 }
0x1dce   :  { %8212 = vrot.lane.b32.xlu1 %v7294_v11, %s11661_s3  ;;  %11038 = vmatprep.subr.msk.mxu0 %vm403_vm2, %v7341_v4 }
0x1dcf   :  { %8299 = vrot.lane.b32.xlu0 %v7304_v39, %s11661_s3  ;;  %11039 = vmatpush3.xpose.msk.msra.mxu0 %vm403_vm2, %v7341_v4 }
0x1dd0   :  { %11043 = vmatprep.subr.msk.mxu0 %vm403_vm2, %v7430_v2 }
0x1dd1   :  { %v7428_v22 = vpop.permute.xlu1 %7427 }
0x1dd2   :  { %8301 = vrot.lane.b32.xlu1 %v13583_v5, %s11661_s3  ;;  %11041 = vmatmul.mubr.msk.f32.vlgmr.msra.gmra.mxu0 %vm403_vm2, %v7299_v35 }
0x1dd3   :  { %8475 = vrot.lane.b32.xlu0 %v13606_v21, %s11661_s3  ;;  %11044 = vmatpush3.xpose.msk.msra.mxu0 %vm403_vm2, %v7430_v2 }
0x1dd4   :  { %11047 = vmatprep.mubr.msk.f32.mxu0 %vm403_vm2, %v7304_v39  ;;  %11045 = vmatprep.subr.msk.mxu0 %vm403_vm2, %v7428_v22 }
0x1dd6   :  { %8388 = vrot.lane.b32.xlu1 %v7319_v13, %s11661_s3 }
0x1dd7   :  { %8473 = vrot.lane.b32.xlu0 %v7321_v47, %s11661_s3  ;;  %11046 = vmatpush3.xpose.msk.msra.mxu0 %vm403_vm2, %v7428_v22 }
0x1dda   :  { %8386 = vrot.lane.b32.xlu1 %v7317_v32, %s11661_s3  ;;  %11048 = vmatmul.mubr.msk.f32.vlgmr.msra.gmra.mxu0 %vm403_vm2, %v13583_v5 }
0x1ddb   :  { %11054 = vmatprep.mubr.msk.f32.mxu0 %vm403_vm2, %v7317_v32 }
0x1dde   :  { %8562 = vrot.lane.b32.xlu1 %v13604_v6, %s11661_s3 }
0x1de2   :  { %8560 = vrot.lane.b32.xlu1 %v7325_v24, %s11661_s3 }
0x1e20   :  { %v7517_v43 = vpop.permute.xlu0 %7516 }
0x1e21   :  { %11050 = vmatprep.subr.msk.mxu0 %vm403_vm2, %v7517_v43 }
0x1e22   :  { %v7515_v26 = vpop.permute.xlu1 %7514  ;;  %11051 = vmatpush3.xpose.msk.msra.mxu0 %vm403_vm2, %v7517_v43 }
0x1e23   :  { %11052 = vmatprep.subr.msk.mxu0 %vm403_vm2, %v7515_v26 }
0x1e26   :  { %11053 = vmatpush3.xpose.msk.msra.mxu0 %vm403_vm2, %v7515_v26 }
0x1e28   :  { %v7604_v36 = vpop.permute.xlu0 %7603 }
0x1e29   :  { %11055 = vmatmul.mubr.msk.f32.vlgmr.msra.gmra.mxu0 %vm403_vm2, %v7319_v13  ;;  %11057 = vmatprep.subr.msk.mxu1 %vm403_vm2, %v7604_v36 }
0x1e2a   :  { %11058 = vmatpush3.xpose.msk.msra.mxu1 %vm403_vm2, %v7604_v36  ;;  %11068 = vmatprep.mubr.msk.f32.mxu0 %vm403_vm2, %v7325_v24 }
0x1e2c   :  { %v7602_v8 = vpop.permute.xlu1 %7601 }
0x1e2d   :  { %v7691_v31 = vpop.permute.xlu0 %7690  ;;  %11059 = vmatprep.subr.msk.mxu1 %vm403_vm2, %v7602_v8 }
0x1e2e   :  { %11064 = vmatprep.subr.msk.mxu0 %vm403_vm2, %v7691_v31  ;;  %11060 = vmatpush3.xpose.msk.msra.mxu1 %vm403_vm2, %v7602_v8 }
0x1e2f   :  { %11065 = vmatpush3.xpose.msk.msra.mxu0 %vm403_vm2, %v7691_v31 }
0x1e30   :  { %v7689_v1 = vpop.permute.xlu1 %7688 }
0x1e31   :  { %v7778_v18 = vpop.permute.xlu0 %7777  ;;  %11062 = vmatmul.mubr.msk.f32.vlgmr.msra.gmra.mxu1 %vm403_vm2, %v13606_v21  ;;  %11066 = vmatprep.subr.msk.mxu0 %vm403_vm2, %v7689_v1 }
0x1e32   :  { %11071 = vmatprep.subr.msk.mxu1 %vm403_vm2, %v7778_v18  ;;  %11075 = vmatprep.mubr.msk.f32.mxu1 %vm403_vm2, %v13623_v58 }
0x1e33   :  { %11067 = vmatpush3.xpose.msk.msra.mxu0 %vm403_vm2, %v7689_v1  ;;  %11072 = vmatpush3.xpose.msk.msra.mxu1 %vm403_vm2, %v7778_v18 }
0x1e34   :  { %v7776_v17 = vpop.permute.xlu1 %7775 }
0x1e35   :  { %v7865_v34 = vpop.permute.xlu0 %7864  ;;  %11073 = vmatprep.subr.msk.mxu1 %vm403_vm2, %v7776_v17 }
0x1e36   :  { %11069 = vmatmul.mubr.msk.f32.vlgmr.msra.gmra.mxu0 %vm403_vm2, %v13604_v6  ;;  %11078 = vmatprep.subr.msk.mxu0 %vm403_vm2, %v7865_v34 }
0x1e37   :  { %11074 = vmatpush3.xpose.msk.msra.mxu1 %vm403_vm2, %v7776_v17  ;;  %11079 = vmatpush3.xpose.msk.msra.mxu0 %vm403_vm2, %v7865_v34 }
0x1e38   :  { %11082 = vmatprep.mubr.msk.f32.mxu0 %vm403_vm2, %v13631_v46  ;;  %v7863_v55 = vpop.permute.xlu1 %7862 }
0x1e39   :  { %v7952_v49 = vpop.permute.xlu0 %7951  ;;  %11080 = vmatprep.subr.msk.mxu0 %vm403_vm2, %v7863_v55 }
0x1e3a   :  { %11076 = vmatmul.mubr.msk.f32.vlgmr.msra.gmra.mxu1 %vm403_vm2, %v13608_v54  ;;  %11085 = vmatprep.subr.msk.mxu1 %vm403_vm2, %v7952_v49 }
0x1e3b   :  { %11081 = vmatpush3.xpose.msk.msra.mxu0 %vm403_vm2, %v7863_v55  ;;  %11086 = vmatpush3.xpose.msk.msra.mxu1 %vm403_vm2, %v7952_v49 }
0x1e3c   :  { %11089 = vmatprep.mubr.msk.f32.mxu1 %vm403_vm2, %v13637_v48  ;;  %v7950_v38 = vpop.permute.xlu1 %7949 }
0x1e3d   :  { %v8215_v19 = vpop.permute.xlu0 %8214  ;;  %11087 = vmatprep.subr.msk.mxu1 %vm403_vm2, %v7950_v38 }
0x1e3e   :  { %11083 = vmatmul.mubr.msk.f32.vlgmr.msra.gmra.mxu0 %vm403_vm2, %v13612_v10  ;;  %11092 = vmatprep.subr.mxu0 %v8215_v19 }
0x1e3f   :  { %11088 = vmatpush3.xpose.msk.msra.mxu1 %vm403_vm2, %v7950_v38  ;;  %11093 = vmatpush3.msra.mxu0 %v8215_v19 }
0x1e40   :  { %v8213_v7 = vpop.permute.xlu1 %8212 }
0x1e41   :  { %11094 = vmatprep.subr.mxu0 %v8213_v7  ;;  %v13768_v26 = vpop.permute.xlu0 %8299 }
0x1e42   :  { %11090 = vmatmul.mubr.msk.f32.vlgmr.msra.gmra.mxu1 %vm403_vm2, %v13618_v0  ;;  %11095 = vmatpush3.msra.mxu0 %v8213_v7 }
0x1e44   :  { %v13707_v20 = vpop.permute.xlu1 %8301 }
0x1e45   :  { %11099 = vmatprep.subr.mxu0 %v13707_v20  ;;  %v13770_v36 = vpop.permute.xlu0 %8475 }
0x1e48   :  { %v8389_v56 = vpop.permute.xlu1 %8388 }
0x1e49   :  { %11106 = vmatprep.subr.mxu1 %v8389_v56  ;;  %v13776_v8 = vpop.permute.xlu0 %8473 }
0x1e4a   :  { %11107 = vmatpush3.msra.mxu1 %v8389_v56 }
0x1e4c   :  { %v8387_v9 = vpop.permute.xlu1 %8386 }
0x1e4d   :  { %11108 = vmatprep.subr.mxu1 %v8387_v9 }
0x1e4e   :  { %11109 = vmatpush3.msra.mxu1 %v8387_v9 }
0x1e50   :  { %v13710_v45 = vpop.permute.xlu1 %8562 }
0x1e51   :  { %11120 = vmatprep.subr.mxu1 %v13710_v45 }
0x1e54   :  { %v13782_v31 = vpop.permute.xlu1 %8560 }
0x1e92   :  { %v13713_v29 = vpop.f32.mrf.mxu0 }
0x1e93   :  { %v8039_v28 = vsel %vm1096_vm3, %v13713_v29, -inf }
0x1e94   :  { %8040 = vmax.xlane.f32.xlu1 %v8039_v28  ;;  %v7418_v41 = vpop.f32.mrf.mxu0 }
0x1e95   :  { %v8036_v25 = vsel %vm1096_vm3, %v7418_v41, -inf }
0x1e96   :  { %8037 = vmax.xlane.f32.xlu0 %v8036_v25 }
0x1e9a   :  { %v11049_v33 = vpop.f32.mrf.mxu0 }
0x1e9b   :  { %v8045_v27 = vsel %vm1096_vm3, %v11049_v33, -inf }
0x1e9c   :  { %8046 = vmax.xlane.f32.xlu0 %v8045_v27  ;;  %v7505_v12 = vpop.f32.mrf.mxu0 }
0x1e9d   :  { %v8042_v52 = vsel %vm1096_vm3, %v7505_v12, -inf }
0x1ea0   :  { %8043 = vmax.xlane.f32.xlu0 %v8042_v52 }
0x1ee9   :  { %v13720_v57 = vpop.f32.mrf.mxu0 }
0x1eea   :  { %v8051_v59 = vsel %vm1096_vm3, %v13720_v57, -inf }
0x1eeb   :  { %8052 = vmax.xlane.f32.xlu1 %v8051_v59  ;;  %v13724_v61 = vpop.f32.mrf.mxu0 }
0x1eec   :  { %v8048_v16 = vsel %vm1096_vm3, %v13724_v61, -inf }
0x1eed   :  { %8049 = vmax.xlane.f32.xlu0 %v8048_v16 }
0x1ef1   :  { %v13728_v40 = vpop.f32.mrf.mxu1 }
0x1ef2   :  { %v8057_v23 = vsel %vm1096_vm3, %v13728_v40, -inf }
0x1ef3   :  { %8058 = vmax.xlane.f32.xlu0 %v8057_v23  ;;  %v13732_v35 = vpop.f32.mrf.mxu1 }
0x1ef4   :  { %v8054_v11 = vsel %vm1096_vm3, %v13732_v35, -inf }
0x1ef6   :  { %v13734_v60 = vpop.f32.mrf.mxu0 }
0x1ef7   :  { %8055 = vmax.xlane.f32.xlu0 %v8054_v11  ;;  %v8063_v63 = vsel %vm1096_vm3, %v13734_v60, -inf }
0x1ef8   :  { %8064 = vmax.xlane.f32.xlu1 %v8063_v63  ;;  %v13740_v5 = vpop.f32.mrf.mxu0 }
0x1ef9   :  { %v8060_v39 = vsel %vm1096_vm3, %v13740_v5, -inf }
0x1efa   :  { %v13742_v62 = vpop.f32.mrf.mxu1 }
0x1efb   :  { %v8069_v13 = vsel %vm1096_vm3, %v13742_v62, -inf }
0x1efc   :  { %8061 = vmax.xlane.f32.xlu1 %v8060_v39  ;;  %8070 = vmax.xlane.f32.xlu0 %v8069_v13  ;;  %v13748_v32 = vpop.f32.mrf.mxu1 }
0x1efd   :  { %v8066_v21 = vsel %vm1096_vm3, %v13748_v32, -inf }
0x1efe   :  { %v13750_v6 = vpop.f32.mrf.mxu0 }
0x1eff   :  { %v8075_v47 = vsel %vm1096_vm3, %v13750_v6, -inf }
0x1f00   :  { %8067 = vmax.xlane.f32.xlu0 %v8066_v21  ;;  %8076 = vmax.xlane.f32.xlu1 %v8075_v47  ;;  %v13756_v24 = vpop.f32.mrf.mxu0 }
0x1f01   :  { %v8072_v4 = vsel %vm1096_vm3, %v13756_v24, -inf }
0x1f02   :  { %v13758_v42 = vpop.f32.mrf.mxu1 }
0x1f03   :  { %v8081_v43 = vsel %vm1096_vm3, %v13758_v42, -inf }
0x1f04   :  { %8073 = vmax.xlane.f32.xlu1 %v8072_v4  ;;  %v13762_v2 = vpop.f32.mrf.mxu1 }
0x1f05   :  { %v8078_v22 = vsel %vm1096_vm3, %v13762_v2, -inf }
0x1f06   :  { %8079 = vmax.xlane.f32.xlu0 %v8078_v22 }
0x1f08   :  { %8082 = vmax.xlane.f32.xlu1 %v8081_v43 }
0x1f19   :  { %8736 = vrot.lane.b32.xlu1 %v13612_v10, %s11661_s3 }
0x1f1c   :  { %8649 = vrot.lane.b32.xlu0 %v13608_v54, %s11661_s3 }
0x1f1d   :  { %8734 = vrot.lane.b32.xlu1 %v13631_v46, %s11661_s3  ;;  %v8041_v18 = vpop.xlane.xlu1 %8040 }
0x1f1e   :  { %v8085_v55 = vsub.f32 %v13713_v29, %v8041_v18 }
0x1f1f   :  { %v8038_v1 = vpop.xlane.xlu0 %8037 }
0x1f20   :  { %8647 = vrot.lane.b32.xlu0 %v13623_v58, %s11661_s3  ;;  %v8084_v34 = vsub.f32 %v7418_v41, %v8038_v1  ;;  %v8102_v54 = vmul.f32 1.442695, %v8085_v55 }
0x1f22   :  { %v8100_v10 = vmul.f32 1.442695, %v8084_v34 }
0x1f24   :  { %11519 = vpow2.f32 %v8100_v10 }
0x1f25   :  { %v8047_v17 = vpop.xlane.xlu0 %8046  ;;  %11521 = vpow2.f32 %v8102_v54 }
0x1f26   :  { %v8087_v49 = vsub.f32 %v11049_v33, %v8047_v17 }
0x1f28   :  { %v8106_v19 = vmul.f32 1.442695, %v8087_v49 }
0x1f29   :  { %v8044_v38 = vpop.xlane.xlu0 %8043 }
0x1f2a   :  { %v8086_v7 = vsub.f32 %v7505_v12, %v8044_v38  ;;  %11523 = vpow2.f32 %v8106_v19 }
0x1f2c   :  { %v8104_v46 = vmul.f32 1.442695, %v8086_v7 }
0x1f2e   :  { %11525 = vpow2.f32 %v8104_v46 }
0x1f31   :  { %v13785_v58 = vpop.eup %11519 }
0x1f32   :  { %v13787_v56 = vpop.eup %11521  ;;  %v8132_v9 = vsel %vm1096_vm3, %v13785_v58, 0.0 }
0x1f33   :  { %v8135_v29 = vsel %vm1096_vm3, %v13787_v56, 0.0 }
0x1f37   :  { %v13791_v28 = vpop.eup %11523 }
0x1f38   :  { %v8141_v41 = vsel %vm1096_vm3, %v13791_v28, 0.0 }
0x1f3b   :  { %v13797_v25 = vpop.eup %11525 }
0x1f3c   :  { %v8138_v33 = vsel %vm1096_vm3, %v13797_v25, 0.0 }
0x1f3f   :  { %8133 = vadd.xlane.f32.xlu0 %v8132_v9 }
0x1f41   :  { %8136 = vadd.xlane.f32.xlu1 %v8135_v29 }
0x1f43   :  { %8142 = vadd.xlane.f32.xlu0 %v8141_v41 }
0x1f47   :  { %8139 = vadd.xlane.f32.xlu0 %v8138_v33 }
0x1f74   :  { %v8053_v27 = vpop.xlane.xlu1 %8052 }
0x1f75   :  { %v8089_v12 = vsub.f32 %v13720_v57, %v8053_v27 }
0x1f76   :  { %v8050_v52 = vpop.xlane.xlu0 %8049 }
0x1f77   :  { %v8110_v59 = vmul.f32 1.442695, %v8089_v12  ;;  %v8088_v16 = vsub.f32 %v13724_v61, %v8050_v52 }
0x1f79   :  { %11527 = vpow2.f32 %v8110_v59  ;;  %v8108_v23 = vmul.f32 1.442695, %v8088_v16 }
0x1f7b   :  { %11529 = vpow2.f32 %v8108_v23 }
0x1f7c   :  { %v8059_v11 = vpop.xlane.xlu0 %8058 }
0x1f7d   :  { %v8091_v63 = vsub.f32 %v13728_v40, %v8059_v11 }
0x1f7f   :  { %v8114_v39 = vmul.f32 1.442695, %v8091_v63 }
0x1f80   :  { %v8056_v13 = vpop.xlane.xlu0 %8055 }
0x1f81   :  { %11531 = vpow2.f32 %v8114_v39  ;;  %v8065_v21 = vpop.xlane.xlu1 %8064  ;;  %v8090_v47 = vsub.f32 %v13732_v35, %v8056_v13 }
0x1f82   :  { %v8093_v4 = vsub.f32 %v13734_v60, %v8065_v21 }
0x1f83   :  { %v8112_v22 = vmul.f32 1.442695, %v8090_v47 }
0x1f84   :  { %v8118_v57 = vmul.f32 1.442695, %v8093_v4 }
0x1f85   :  { %11533 = vpow2.f32 %v8112_v22  ;;  %v8062_v43 = vpop.xlane.xlu1 %8061  ;;  %v8071_v1 = vpop.xlane.xlu0 %8070 }
0x1f86   :  { %v13806_v61 = vpop.eup %11527  ;;  %11535 = vpow2.f32 %v8118_v57  ;;  %v8092_v18 = vsub.f32 %v13740_v5, %v8062_v43  ;;  %v8095_v40 = vsub.f32 %v13742_v62, %v8071_v1 }
0x1f87   :  { %v8147_v17 = vsel %vm1096_vm3, %v13806_v61, 0.0 }
0x1f88   :  { %v13812_v34 = vpop.eup %11529  ;;  %v8116_v35 = vmul.f32 1.442695, %v8092_v18  ;;  %v8122_v55 = vmul.f32 1.442695, %v8095_v40  ;;  %8148 = vadd.xlane.f32.xlu1 %v8147_v17 }
0x1f89   :  { %v8077_v60 = vpop.xlane.xlu1 %8076  ;;  %v8068_v10 = vpop.xlane.xlu0 %8067  ;;  %v8144_v5 = vsel %vm1096_vm3, %v13812_v34, 0.0 }
0x1f8a   :  { %11537 = vpow2.f32 %v8116_v35  ;;  %v8097_v49 = vsub.f32 %v13750_v6, %v8077_v60  ;;  %v8094_v38 = vsub.f32 %v13748_v32, %v8068_v10 }
0x1f8b   :  { %11539 = vpow2.f32 %v8122_v55 }
0x1f8c   :  { %v8126_v62 = vmul.f32 1.442695, %v8097_v49  ;;  %v8120_v54 = vmul.f32 1.442695, %v8094_v38  ;;  %8145 = vadd.xlane.f32.xlu1 %v8144_v5 }
0x1f8d   :  { %v8074_v19 = vpop.xlane.xlu1 %8073 }
0x1f8e   :  { %v13818_v7 = vpop.eup %11531  ;;  %11541 = vpow2.f32 %v8126_v62  ;;  %v8096_v46 = vsub.f32 %v13756_v24, %v8074_v19 }
0x1f8f   :  { %11543 = vpow2.f32 %v8120_v54  ;;  %v8080_v9 = vpop.xlane.xlu0 %8079  ;;  %v8153_v6 = vsel %vm1096_vm3, %v13818_v7, 0.0 }
0x1f90   :  { %v8124_v29 = vmul.f32 1.442695, %v8096_v46  ;;  %v8098_v32 = vsub.f32 %v13762_v2, %v8080_v9  ;;  %8154 = vadd.xlane.f32.xlu0 %v8153_v6 }
0x1f91   :  { %v8083_v41 = vpop.xlane.xlu1 %8082 }
0x1f92   :  { %v13824_v33 = vpop.eup %11533  ;;  %11545 = vpow2.f32 %v8124_v29  ;;  %v8128_v27 = vmul.f32 1.442695, %v8098_v32  ;;  %v8099_v12 = vsub.f32 %v13758_v42, %v8083_v41 }
0x1f93   :  { %v13827_v52 = vpop.eup %11535  ;;  %v8150_v24 = vsel %vm1096_vm3, %v13824_v33, 0.0  ;;  %v13865_v18 = vpop.permute.xlu0 %8649 }
0x1f94   :  { %11547 = vpow2.f32 %v8128_v27  ;;  %v8130_v59 = vmul.f32 1.442695, %v8099_v12  ;;  %v8159_v16 = vsel %vm1096_vm3, %v13827_v52, 0.0  ;;  %8151 = vadd.xlane.f32.xlu0 %v8150_v24 }
0x1f95   :  { %8160 = vadd.xlane.f32.xlu1 %v8159_v16  ;;  %v13867_v40 = vpop.permute.xlu1 %8736 }
0x1f96   :  { %11549 = vpow2.f32 %v8130_v59 }
0x1f97   :  { %v13833_v2 = vpop.eup %11537  ;;  %v13869_v17 = vpop.permute.xlu0 %8647 }
0x1f98   :  { %v13835_v23 = vpop.eup %11539  ;;  %v8156_v42 = vsel %vm1096_vm3, %v13833_v2, 0.0 }
0x1f99   :  { %8157 = vadd.xlane.f32.xlu1 %v8156_v42  ;;  %v8165_v11 = vsel %vm1096_vm3, %v13835_v23, 0.0  ;;  %v13871_v35 = vpop.permute.xlu1 %8734 }
0x1f9a   :  { %8166 = vadd.xlane.f32.xlu0 %v8165_v11 }
0x1f9b   :  { %v13841_v63 = vpop.eup %11541 }
0x1f9c   :  { %v13843_v39 = vpop.eup %11543  ;;  %v8171_v13 = vsel %vm1096_vm3, %v13841_v63, 0.0 }
0x1f9d   :  { %8172 = vadd.xlane.f32.xlu1 %v8171_v13  ;;  %v8162_v21 = vsel %vm1096_vm3, %v13843_v39, 0.0 }
0x1f9e   :  { %8163 = vadd.xlane.f32.xlu0 %v8162_v21 }
0x1f9f   :  { %v13849_v47 = vpop.eup %11545 }
0x1fa0   :  { %v8168_v4 = vsel %vm1096_vm3, %v13849_v47, 0.0 }
0x1fa1   :  { %v13853_v22 = vpop.eup %11547  ;;  %8169 = vadd.xlane.f32.xlu1 %v8168_v4 }
0x1fa2   :  { %v8174_v57 = vsel %vm1096_vm3, %v13853_v22, 0.0 }
0x1fa3   :  { %v13857_v43 = vpop.eup %11549  ;;  %8175 = vadd.xlane.f32.xlu0 %v8174_v57 }
0x1fa4   :  { %v8177_v1 = vsel %vm1096_vm3, %v13857_v43, 0.0 }
0x1fa5   :  { %8178 = vadd.xlane.f32.xlu1 %v8177_v1 }
0x1fb6   :  { %8821 = vrot.lane.b32.xlu1 %v13637_v48, %s11661_s3 }
0x1fb9   :  { %8823 = vrot.lane.b32.xlu0 %v13618_v0, %s11661_s3 }
0x1fc8   :  { %v8134_v55 = vpop.xlane.xlu0 %8133 }
0x1fc9   :  { %11551 = vrcp.f32 %v8134_v55 }
0x1fca   :  { %v8137_v60 = vpop.xlane.xlu1 %8136 }
0x1fcb   :  { %11553 = vrcp.f32 %v8137_v60 }
0x1fcc   :  { %v8143_v10 = vpop.xlane.xlu0 %8142 }
0x1fcd   :  { %11555 = vrcp.f32 %v8143_v10  ;;  %v9892_v10 = vld [vmem:[%s14165_s6 + $0x78] sm:$0xff] }
0x1fd0   :  { %v8140_v49 = vpop.xlane.xlu0 %8139 }
0x1fd1   :  { %11557 = vrcp.f32 %v8140_v49 }
0x1fd6   :  { %v11552_v48 = vpop.eup %11551 }
0x1fd7   :  { %v8196_v38 = vmul.f32 %v11552_v48, %v13785_v58 }
0x1fd8   :  { %v11554_v0 = vpop.eup %11553 }
0x1fd9   :  { %11096 = vmatprep.mubr.msk.f32.mxu0 %vm1096_vm3, %v8196_v38  ;;  %v8197_v5 = vmul.f32 %v11554_v0, %v13787_v56  ;;  %v9890_v38 = vld [vmem:[%s14165_s6 + $0x68] sm:$0xff]  ;;  %v9889_v0 = vld [vmem:[%s14165_s6 + $0x60] sm:$0xff] }
0x1fda   :  { %v11556_v62 = vpop.eup %11555 }
0x1fdb   :  { %11097 = vmatmul.mubr.msk.f32.vlgmr.msra.gmra.mxu0 %vm1096_vm3, %v8197_v5  ;;  %v8199_v58 = vmul.f32 %v11556_v62, %v13791_v28 }
0x1fdc   :  { %11100 = vmatpush3.msra.mxu0 %v13707_v20 }
0x1fdd   :  { %11101 = vmatprep.subr.mxu0 %v13768_v26 }
0x1fde   :  { %v11558_v54 = vpop.eup %11557  ;;  %11102 = vmatpush3.msra.mxu0 %v13768_v26 }
0x1fdf   :  { %11113 = vmatprep.subr.mxu0 %v13770_v36  ;;  %v8198_v19 = vmul.f32 %v11558_v54, %v13797_v25 }
0x1fe1   :  { %11103 = vmatprep.mubr.msk.f32.mxu0 %vm1096_vm3, %v8198_v19 }
0x1fe2   :  { %11104 = vmatmul.mubr.msk.f32.vlgmr.msra.gmra.mxu0 %vm1096_vm3, %v8199_v58 }
0x1fe3   :  { %11114 = vmatpush3.msra.mxu0 %v13770_v36 }
0x1fe4   :  { %11115 = vmatprep.subr.mxu0 %v13776_v8 }
0x1fe5   :  { %11116 = vmatpush3.msra.mxu0 %v13776_v8 }
0x1fe6   :  { %11127 = vmatprep.subr.mxu0 %v13865_v18 }
0x2011   :  { %v8149_v20 = vpop.xlane.xlu1 %8148 }
0x2012   :  { %11559 = vrcp.f32 %v8149_v20 }
0x2015   :  { %v8146_v26 = vpop.xlane.xlu1 %8145 }
0x2016   :  { %11561 = vrcp.f32 %v8146_v26 }
0x2019   :  { %v8155_v56 = vpop.xlane.xlu0 %8154 }
0x201a   :  { %11563 = vrcp.f32 %v8155_v56 }
0x201d   :  { %v8152_v25 = vpop.xlane.xlu0 %8151 }
0x201e   :  { %v8161_v28 = vpop.xlane.xlu1 %8160  ;;  %11565 = vrcp.f32 %v8152_v25 }
0x201f   :  { %v11560_v46 = vpop.eup %11559  ;;  %11567 = vrcp.f32 %v8161_v28 }
0x2020   :  { %v8201_v8 = vmul.f32 %v11560_v46, %v13806_v61 }
0x2022   :  { %v8158_v9 = vpop.xlane.xlu1 %8157 }
0x2023   :  { %v11562_v6 = vpop.eup %11561  ;;  %11569 = vrcp.f32 %v8158_v9  ;;  %v8167_v36 = vpop.xlane.xlu0 %8166 }
0x2024   :  { %v8200_v29 = vmul.f32 %v11562_v6, %v13812_v34  ;;  %11571 = vrcp.f32 %v8167_v36 }
0x2026   :  { %v8173_v32 = vpop.xlane.xlu1 %8172  ;;  %11110 = vmatprep.mubr.msk.f32.mxu1 %vm1096_vm3, %v8200_v29 }
0x2027   :  { %v8164_v41 = vpop.xlane.xlu0 %8163  ;;  %11111 = vmatmul.mubr.msk.f32.vlgmr.msra.gmra.mxu1 %vm1096_vm3, %v8201_v8  ;;  %v11564_v27 = vpop.eup %11563 }
0x2028   :  { %11573 = vrcp.f32 %v8164_v41  ;;  %11121 = vmatpush3.msra.mxu1 %v13710_v45  ;;  %v8203_v59 = vmul.f32 %v11564_v27, %v13818_v7 }
0x2029   :  { %11122 = vmatprep.subr.mxu1 %v13782_v31  ;;  %11575 = vrcp.f32 %v8173_v32 }
0x202a   :  { %11123 = vmatpush3.msra.mxu1 %v13782_v31  ;;  %v8170_v12 = vpop.xlane.xlu1 %8169 }
0x202b   :  { %v11566_v34 = vpop.eup %11565  ;;  %11577 = vrcp.f32 %v8170_v12  ;;  %11134 = vmatprep.subr.mxu1 %v13867_v40 }
0x202c   :  { %v8176_v61 = vpop.xlane.xlu0 %8175  ;;  %v8202_v24 = vmul.f32 %v11566_v34, %v13824_v33  ;;  %v11568_v45 = vpop.eup %11567 }
0x202d   :  { %11579 = vrcp.f32 %v8176_v61  ;;  %v8205_v33 = vmul.f32 %v11568_v45, %v13827_v52 }
0x202e   :  { %v8179_v16 = vpop.xlane.xlu1 %8178  ;;  %11117 = vmatprep.mubr.msk.f32.mxu0 %vm1096_vm3, %v8202_v24 }
0x202f   :  { %11581 = vrcp.f32 %v8179_v16  ;;  %11118 = vmatmul.mubr.msk.f32.vlgmr.msra.gmra.mxu0 %vm1096_vm3, %v8203_v59 }
0x2030   :  { %v11570_v42 = vpop.eup %11569  ;;  %11128 = vmatpush3.msra.mxu0 %v13865_v18  ;;  %v8824_v11 = vpop.permute.xlu0 %8823 }
0x2031   :  { %11129 = vmatprep.subr.mxu0 %v13869_v17  ;;  %v8204_v31 = vmul.f32 %v11570_v42, %v13833_v2  ;;  %v11572_v7 = vpop.eup %11571 }
0x2032   :  { %11130 = vmatpush3.msra.mxu0 %v13869_v17  ;;  %v8207_v2 = vmul.f32 %v11572_v7, %v13835_v23  ;;  %v8822_v18 = vpop.permute.xlu1 %8821 }
0x2033   :  { %11124 = vmatprep.mubr.msk.f32.mxu1 %vm1096_vm3, %v8204_v31  ;;  %11141 = vmatprep.subr.mxu0 %v8824_v11 }
0x2034   :  { %11125 = vmatmul.mubr.msk.f32.vlgmr.msra.gmra.mxu1 %vm1096_vm3, %v8205_v33 }
0x2035   :  { %v11574_v13 = vpop.eup %11573  ;;  %11135 = vmatpush3.msra.mxu1 %v13867_v40 }
0x2036   :  { %11136 = vmatprep.subr.mxu1 %v13871_v35  ;;  %v8206_v21 = vmul.f32 %v11574_v13, %v13843_v39  ;;  %v11576_v4 = vpop.eup %11575 }
0x2037   :  { %11137 = vmatpush3.msra.mxu1 %v13871_v35  ;;  %v8209_v40 = vmul.f32 %v11576_v4, %v13841_v63 }
0x2038   :  { %v11578_v57 = vpop.eup %11577  ;;  %11131 = vmatprep.mubr.msk.f32.mxu0 %vm1096_vm3, %v8206_v21  ;;  %11148 = vmatprep.subr.mxu1 %v9892_v10  ;;  %v13966_v21 = vld [vmem:[%s14168_s9 + $0x18] sm:$0xff] }
0x2039   :  { %11132 = vmatmul.mubr.msk.f32.vlgmr.msra.gmra.mxu0 %vm1096_vm3, %v8207_v2  ;;  %v8208_v52 = vmul.f32 %v11578_v57, %v13849_v47  ;;  %v9072_v4 = vrot.slane %v13966_v21, %v12235_v37 }
0x203a   :  { %v11580_v1 = vpop.eup %11579  ;;  %11142 = vmatpush3.msra.mxu0 %v8824_v11 }
0x203b   :  { %11143 = vmatprep.subr.mxu0 %v8822_v18  ;;  %11138 = vmatprep.mubr.msk.f32.mxu1 %vm1096_vm3, %v8208_v52  ;;  %v8210_v39 = vmul.f32 %v11580_v1, %v13853_v22 }
0x203c   :  { %v11582_v17 = vpop.eup %11581  ;;  %11144 = vmatpush3.msra.mxu0 %v8822_v18  ;;  %11139 = vmatmul.mubr.msk.f32.vlgmr.msra.gmra.mxu1 %vm1096_vm3, %v8209_v40 }
0x203d   :  { %11145 = vmatprep.mubr.msk.f32.mxu0 %vm1096_vm3, %v8210_v39  ;;  %v8211_v23 = vmul.f32 %v11582_v17, %v13857_v43  ;;  %11149 = vmatpush3.msra.mxu1 %v9892_v10  ;;  %v9891_v43 = vld [vmem:[%s14165_s6 + $0x70] sm:$0xff] }
0x203e   :  { %11150 = vmatprep.subr.mxu1 %v9891_v43 }
0x203f   :  { %11146 = vmatmul.mubr.msk.f32.vlgmr.msra.gmra.mxu0 %vm1096_vm3, %v8211_v23  ;;  %11151 = vmatpush3.msra.mxu1 %v9891_v43 }
0x2040   :  { %11152 = vmatprep.subr.mxu1 %v9890_v38 }
0x2041   :  { %11153 = vmatpush3.msra.mxu1 %v9890_v38 }
0x2042   :  { %11154 = vmatprep.subr.mxu1 %v9889_v0 }
0x2043   :  { %11155 = vmatpush3.msra.mxu1 %v9889_v0  ;;  %v9896_v0 = vld [vmem:[%s14166_s7 + $0x78] sm:$0xff] }
0x2044   :  { %11162 = vmatprep.subr.mxu0 %v9896_v0 }
0x2045   :  { %11163 = vmatpush3.msra.mxu0 %v9896_v0  ;;  %v9912_v0 = vld [vmem:[%s14167_s8 + $0x1f8] sm:$0xff] }
0x2046   :  { %11176 = vmatprep.subr.mxu1 %v9912_v0 }
0x209b   :  { %v11098_v47 = vpop.f32.mrf.mxu0 }
0x209d   :  { %v8290_v35 = vpop.f32.mrf.mxu0 }
0x20a2   :  { %v11105_v63 = vpop.f32.mrf.mxu0 }
0x20a4   :  { %v8377_v22 = vpop.f32.mrf.mxu0 }
0x20e7   :  { %v11112_v55 = vpop.f32.mrf.mxu1 }
0x20e8   :  { %8914 = vrot.lane.b32.xlu1 %v11112_v55, %s11662_s23 }
0x20e9   :  { %v8464_v60 = vpop.f32.mrf.mxu1 }
0x20ea   :  { %8912 = vrot.lane.b32.xlu0 %v8464_v60, %s11662_s23 }
0x20ef   :  { %v11119_v49 = vpop.f32.mrf.mxu0 }
0x20f0   :  { %8918 = vrot.lane.b32.xlu1 %v11119_v49, %s11662_s23 }
0x20f1   :  { %v8551_v48 = vpop.f32.mrf.mxu0 }
0x20f2   :  { %8916 = vrot.lane.b32.xlu0 %v8551_v48, %s11662_s23 }
0x20f4   :  { %v11126_v5 = vpop.f32.mrf.mxu1 }
0x20f5   :  { %8930 = vrot.lane.b32.xlu1 %v11126_v5, %s11663_s13  ;;  %v9895_v5 = vld [vmem:[%s14166_s7 + $0x70] sm:$0xff] }
0x20f6   :  { %v8638_v62 = vpop.f32.mrf.mxu1  ;;  %11164 = vmatprep.subr.mxu0 %v9895_v5 }
0x20f7   :  { %8928 = vrot.lane.b32.xlu0 %v8638_v62, %s11663_s13  ;;  %v9894_v62 = vld [vmem:[%s14166_s7 + $0x68] sm:$0xff]  ;;  %11165 = vmatpush3.msra.mxu0 %v9895_v5  ;;  %v9911_v5 = vld [vmem:[%s14167_s8 + $0x1f0] sm:$0xff] }
0x20f8   :  { %11166 = vmatprep.subr.mxu0 %v9894_v62 }
0x20f9   :  { %v11133_v54 = vpop.f32.mrf.mxu0  ;;  %11167 = vmatpush3.msra.mxu0 %v9894_v62  ;;  %v9910_v62 = vld [vmem:[%s14167_s8 + $0x1e8] sm:$0xff] }
0x20fa   :  { %8934 = vrot.lane.b32.xlu1 %v11133_v54, %s11663_s13  ;;  %v9893_v54 = vld [vmem:[%s14166_s7 + $0x60] sm:$0xff]  ;;  %s9618_s7 = sshll.u32 %s11665_s30, 4  ;;  %s9619_s7 = int_to_ptr.vmem [resolvable:$true] %s9618_s7 }
0x20fb   :  { %v8725_v19 = vpop.f32.mrf.mxu0  ;;  %11168 = vmatprep.subr.mxu0 %v9893_v54  ;;  %s11613_s2 = scalar_lea.vmem %s9619_s7, 512  ;;  %p11618_p1 = scmp.lt.s32.totalorder %s9619_s7, %s9619_s7 }
0x20fc   :  { %8932 = vrot.lane.b32.xlu0 %v8725_v19, %s11663_s13  ;;  %v11140_v58 = vpop.f32.mrf.mxu1  ;;  %11169 = vmatpush3.msra.mxu0 %v9893_v54  ;;  %v9909_v54 = vld [vmem:[%s14167_s8 + $0x1e0] sm:$0xff]  ;;  %p11614_p0 = scmp.ne.s32.totalorder %s9619_s7, %s11613_s2  ;;  %p11619_p2 = scmp.lt.s32.totalorder %s11613_s2, %s11613_s2 }
0x20fe   :  { %8946 = vrot.lane.b32.xlu1 %v11140_v58, %s11664_s14  ;;  %v8812_v20 = vpop.f32.mrf.mxu1  ;;  %p11620_p3 = por %p11619_p2, %p11618_p1 }
0x20ff   :  { %v11147_v26 = vpop.f32.mrf.mxu0 }
0x2100   :  { %8944 = vrot.lane.b32.xlu0 %v8812_v20, %s11664_s14  ;;  %p11621_p4 = pnand %p11620_p3, %p11614_p0 }
0x2101   :  { %v8899_v56 = vpop.f32.mrf.mxu0 }
0x2102   :  { %8950 = vrot.lane.b32.xlu1 %v11147_v26, %s11664_s14 }
0x2104   :  { %8948 = vrot.lane.b32.xlu0 %v8899_v56, %s11664_s14 }
0x215a   :  { %v8915_v25 = vpop.permute.xlu1 %8914 }
0x215b   :  { %v8957_v27 = vsel %vm403_vm2, %v11098_v47, %v8915_v25 }
0x215c   :  { %v8913_v28 = vpop.permute.xlu0 %8912 }
0x215d   :  { %v8956_v41 = vsel %vm403_vm2, %v8290_v35, %v8913_v28 }
0x2162   :  { %v8919_v46 = vpop.permute.xlu1 %8918 }
0x2163   :  { %v8959_v42 = vsel %vm403_vm2, %v11105_v63, %v8919_v46 }
0x2164   :  { %v8917_v9 = vpop.permute.xlu0 %8916 }
0x2165   :  { %v8958_v16 = vsel %vm403_vm2, %v8377_v22, %v8917_v9 }
0x2167   :  { %v8931_v6 = vpop.permute.xlu1 %8930 }
0x2168   :  { %v8961_v61 = vsel %vm1096_vm3, %v8957_v27, %v8931_v6 }
0x2169   :  { %v8929_v36 = vpop.permute.xlu0 %8928 }
0x216a   :  { %v8960_v12 = vsel %vm1096_vm3, %v8956_v41, %v8929_v36 }
0x216c   :  { %v8935_v29 = vpop.permute.xlu1 %8934 }
0x216d   :  { %v8963_v33 = vsel %vm1096_vm3, %v8959_v42, %v8935_v29 }
0x216e   :  { %v8933_v8 = vpop.permute.xlu0 %8932 }
0x216f   :  { %v8962_v31 = vsel %vm1096_vm3, %v8958_v16, %v8933_v8 }
0x2170   :  { %v8947_v32 = vpop.permute.xlu1 %8946 }
0x2171   :  { %v8965_v59 = vsel %vm2025_vm4, %v8961_v61, %v8947_v32 }
0x2172   :  { %v8945_v34 = vpop.permute.xlu0 %8944 }
0x2173   :  { %v8964_v24 = vsel %vm2025_vm4, %v8960_v12, %v8945_v34 }
0x2174   :  { %11156 = vmatprep.mubr.msk.f32.mxu1 %vm192_vm1, %v8964_v24  ;;  %v8951_v45 = vpop.permute.xlu1 %8950 }
0x2175   :  { %11157 = vmatmul.mubr.msk.f32.vlgmr.msra.gmra.mxu1 %vm192_vm1, %v8965_v59  ;;  %v8967_v13 = vsel %vm2025_vm4, %v8963_v33, %v8951_v45 }
0x2176   :  { %v8949_v11 = vpop.permute.xlu0 %8948  ;;  %11177 = vmatpush3.msra.mxu1 %v9912_v0 }
0x2177   :  { %v8966_v7 = vsel %vm2025_vm4, %v8962_v31, %v8949_v11  ;;  %11178 = vmatprep.subr.mxu1 %v9911_v5 }
0x2178   :  { %11159 = vmatprep.mubr.msk.f32.mxu1 %vm192_vm1, %v8966_v7  ;;  %11179 = vmatpush3.msra.mxu1 %v9911_v5 }
0x2179   :  { %11160 = vmatmul.mubr.msk.f32.gmra.mxu1 %vm192_vm1, %v8967_v13  ;;  %11180 = vmatprep.subr.mxu1 %v9910_v62 }
0x217a   :  { %11181 = vmatpush3.msra.mxu1 %v9910_v62 }
0x217b   :  { %11182 = vmatprep.subr.mxu1 %v9909_v54 }
0x217c   :  { %11183 = vmatpush3.msra.mxu1 %v9909_v54 }
0x2235   :  { %v11158_v2 = vpop.f32.mrf.mxu1 }
0x2236   :  { %v9066_v57 = vadd.f32 %v11158_v2, %v13522_v15  ;;  %v9140_v2 = vrot.slane %v13966_v21, %v12289_v53 }
0x2237   :  { %v9046_v52 = vpop.f32.mrf.mxu1 }
0x2238   :  { %v13971_v1 = vadd.f32 %v9072_v4, %v9066_v57  ;;  %v9065_v18 = vadd.f32 %v9046_v52, %v13525_v30 }
0x2239   :  { %v11161_v40 = vpop.f32.mrf.mxu1 }
0x223a   :  { %v13974_v39 = vadd.f32 %v9072_v4, %v9065_v18  ;;  %v9068_v17 = vadd.f32 %v11161_v40, %v13537_v3  ;;  %v9080_v23 = vsel %vm192_vm1, %v13971_v1, 0.0  ;;  %v9094_v15 = vmul.f32 %v13971_v1, %v13971_v1 }
0x223b   :  { %9081 = vadd.xlane.f32.xlu1 %v9080_v23  ;;  %v9056_v55 = vpop.f32.mrf.mxu1 }
0x223c   :  { %v13979_v47 = vadd.f32 %v9072_v4, %v9068_v17  ;;  %v9077_v35 = vsel %vm192_vm1, %v13974_v39, 0.0  ;;  %v9067_v63 = vadd.f32 %v9056_v55, %v13541_v44  ;;  %v9100_v60 = vsel %vm192_vm1, %v9094_v15, 0.0 }
0x223d   :  { %9078 = vadd.xlane.f32.xlu0 %v9077_v35  ;;  %v9093_v22 = vmul.f32 %v13974_v39, %v13974_v39  ;;  %v9148_v17 = vrot.slane %v13966_v21, %v12295_v51 }
0x223e   :  { %v9086_v30 = vsel %vm192_vm1, %v13979_v47, 0.0  ;;  %v9096_v3 = vmul.f32 %v13979_v47, %v13979_v47  ;;  %v13994_v49 = vadd.f32 %v9072_v4, %v9067_v63 }
0x223f   :  { %9087 = vadd.xlane.f32.xlu1 %v9086_v30  ;;  %v9097_v43 = vsel %vm192_vm1, %v9093_v22, 0.0 }
0x2240   :  { %v9106_v10 = vsel %vm192_vm1, %v9096_v3, 0.0  ;;  %v9083_v48 = vsel %vm192_vm1, %v13994_v49, 0.0  ;;  %v9095_v44 = vmul.f32 %v13994_v49, %v13994_v49 }
0x2241   :  { %9101 = vadd.xlane.f32.xlu0 %v9100_v60 }
0x2242   :  { %v9103_v38 = vsel %vm192_vm1, %v9095_v44, 0.0 }
0x2243   :  { %9107 = vadd.xlane.f32.xlu1 %v9106_v10 }
0x2245   :  { %9098 = vadd.xlane.f32.xlu0 %v9097_v43 }
0x2249   :  { %9084 = vadd.xlane.f32.xlu0 %v9083_v48 }
0x224d   :  { %9104 = vadd.xlane.f32.xlu0 %v9103_v38 }
0x22c4   :  { %v9082_v19 = vpop.xlane.xlu1 %9081 }
0x22c5   :  { %v9090_v20 = vmul.f32 0.03125, %v9082_v19  ;;  %v9908_v19 = vld [vmem:[%s14167_s8 + $0x1d8] sm:$0xff] }
0x22c6   :  { %v9079_v58 = vpop.xlane.xlu0 %9078  ;;  %11184 = vmatprep.subr.mxu1 %v9908_v19 }
0x22c7   :  { %v9114_v28 = vmul.f32 %v9090_v20, %v9090_v20  ;;  %v9089_v46 = vmul.f32 0.03125, %v9079_v58  ;;  %v9122_v4 = vsub.f32 %v13971_v1, %v9090_v20  ;;  %11185 = vmatpush3.msra.mxu1 %v9908_v19  ;;  %v9907_v58 = vld [vmem:[%s14167_s8 + $0x1d0] sm:$0xff]  ;;  %v9906_v20 = vld [vmem:[%s14167_s8 + $0x1c8] sm:$0xff] }
0x22c8   :  { %v9088_v26 = vpop.xlane.xlu1 %9087  ;;  %11186 = vmatprep.subr.mxu1 %v9907_v58 }
0x22c9   :  { %v9092_v56 = vmul.f32 0.03125, %v9088_v26  ;;  %v9113_v41 = vmul.f32 %v9089_v46, %v9089_v46  ;;  %v9121_v52 = vsub.f32 %v13974_v39, %v9089_v46  ;;  %11187 = vmatpush3.msra.mxu1 %v9907_v58  ;;  %v9905_v26 = vld [vmem:[%s14167_s8 + $0x1c0] sm:$0xff] }
0x22ca   :  { %v9102_v25 = vpop.xlane.xlu0 %9101  ;;  %11188 = vmatprep.subr.mxu1 %v9906_v20  ;;  %v9901_v46 = vld [vmem:[%s14167_s8 + $0x1a0] sm:$0xff] }
0x22cb   :  { %v9110_v9 = vmul.f32 0.03125, %v9102_v25  ;;  %v9116_v8 = vmul.f32 %v9092_v56, %v9092_v56  ;;  %v9124_v55 = vsub.f32 %v13979_v47, %v9092_v56  ;;  %11189 = vmatpush3.msra.mxu1 %v9906_v20  ;;  %v9904_v56 = vld [vmem:[%s14167_s8 + $0x1b8] sm:$0xff]  ;;  %v9903_v25 = vld [vmem:[%s14167_s8 + $0x1b0] sm:$0xff]  ;;  %v9382_v20 = vrot.slane %v13966_v21, %v12360_v14 }
0x22cc   :  { %v9108_v6 = vpop.xlane.xlu1 %9107  ;;  %11190 = vmatprep.subr.mxu1 %v9905_v26 }
0x22cd   :  { %v9118_v36 = vsub.f32 %v9110_v9, %v9114_v28  ;;  %v9112_v29 = vmul.f32 0.03125, %v9108_v6  ;;  %11191 = vmatpush3.msra.mxu1 %v9905_v26  ;;  %v9902_v28 = vld [vmem:[%s14167_s8 + $0x1a8] sm:$0xff]  ;;  %v9900_v9 = vld [vmem:[%s14167_s8 + $0x198] sm:$0xff]  ;;  %v9899_v6 = vld [vmem:[%s14167_s8 + $0x190] sm:$0xff] }
0x22ce   :  { %v9099_v32 = vpop.xlane.xlu0 %9098  ;;  %11192 = vmatprep.subr.mxu1 %v9904_v56 }
0x22cf   :  { %v9126_v27 = vadd.f32 1e-05, %v9118_v36  ;;  %v9109_v12 = vmul.f32 0.03125, %v9099_v32  ;;  %v9120_v34 = vsub.f32 %v9112_v29, %v9116_v8  ;;  %11193 = vmatpush3.msra.mxu1 %v9904_v56  ;;  %v9898_v36 = vld [vmem:[%s14167_s8 + $0x188] sm:$0xff]  ;;  %v9897_v29 = vld [vmem:[%s14167_s8 + $0x180] sm:$0xff]  ;;  %v9156_v8 = vrot.slane %v13966_v21, %v12355_v50 }
0x22d0   :  { %11194 = vmatprep.subr.mxu1 %v9903_v25 }
0x22d1   :  { %11583 = vrsqrt.f32 %v9126_v27  ;;  %v9117_v61 = vsub.f32 %v9109_v12, %v9113_v41  ;;  %v9128_v45 = vadd.f32 1e-05, %v9120_v34  ;;  %11195 = vmatpush3.msra.mxu1 %v9903_v25 }
0x22d2   :  { %v9085_v24 = vpop.xlane.xlu0 %9084  ;;  %11196 = vmatprep.subr.mxu1 %v9902_v28 }
0x22d3   :  { %v9125_v59 = vadd.f32 1e-05, %v9117_v61  ;;  %v9091_v16 = vmul.f32 0.03125, %v9085_v24  ;;  %11197 = vmatpush3.msra.mxu1 %v9902_v28 }
0x22d4   :  { %11198 = vmatprep.subr.mxu1 %v9901_v46 }
0x22d5   :  { %11585 = vrsqrt.f32 %v9125_v59  ;;  %v9115_v31 = vmul.f32 %v9091_v16, %v9091_v16  ;;  %v9123_v60 = vsub.f32 %v13994_v49, %v9091_v16  ;;  %11199 = vmatpush3.msra.mxu1 %v9901_v46 }
0x22d6   :  { %v9105_v42 = vpop.xlane.xlu0 %9104  ;;  %11587 = vrsqrt.f32 %v9128_v45  ;;  %11200 = vmatprep.subr.mxu1 %v9900_v9 }
0x22d7   :  { %v9111_v11 = vmul.f32 0.03125, %v9105_v42  ;;  %11201 = vmatpush3.msra.mxu1 %v9900_v9 }
0x22d8   :  { %11202 = vmatprep.subr.mxu1 %v9899_v6 }
0x22d9   :  { %v9119_v33 = vsub.f32 %v9111_v11, %v9115_v31  ;;  %11203 = vmatpush3.msra.mxu1 %v9899_v6 }
0x22da   :  { %11204 = vmatprep.subr.mxu1 %v9898_v36 }
0x22db   :  { %v9127_v7 = vadd.f32 1e-05, %v9119_v33  ;;  %11205 = vmatpush3.msra.mxu1 %v9898_v36 }
0x22dc   :  { %11206 = vmatprep.subr.mxu1 %v9897_v29 }
0x22dd   :  { %11589 = vrsqrt.f32 %v9127_v7  ;;  %11207 = vmatpush3.msra.mxu1 %v9897_v29 }
0x22de   :  { %v11584_v13 = vpop.eup %11583 }
0x22df   :  { %v9134_v57 = vmul.f32 %v11584_v13, %v9122_v4 }
0x22e1   :  { %v9142_v23 = vmul.f32 %v9140_v2, %v9134_v57 }
0x22e2   :  { %v11586_v18 = vpop.eup %11585 }
0x22e3   :  { %v9133_v40 = vmul.f32 %v11586_v18, %v9121_v52  ;;  %v11588_v35 = vpop.eup %11587  ;;  %v9150_v3 = vadd.f32 %v9148_v17, %v9142_v23 }
0x22e4   :  { %v9136_v63 = vmul.f32 %v11588_v35, %v9124_v55 }
0x22e5   :  { %v9141_v15 = vmul.f32 %v9140_v2, %v9133_v40 }
0x22e6   :  { %v9144_v43 = vmul.f32 %v9140_v2, %v9136_v63 }
0x22e7   :  { %v9149_v30 = vadd.f32 %v9148_v17, %v9141_v15 }
0x22e8   :  { %v9152_v38 = vadd.f32 %v9148_v17, %v9144_v43 }
0x22e9   :  { %11170 = vmatprep.mubr.msk.f32.mxu0 %vm192_vm1, %v9149_v30 }
0x22ea   :  { %v11590_v22 = vpop.eup %11589  ;;  %11171 = vmatmul.mubr.msk.f32.vlgmr.msra.gmra.mxu0 %vm192_vm1, %v9150_v3 }
0x22eb   :  { %v9135_v10 = vmul.f32 %v11590_v22, %v9123_v60 }
0x22ed   :  { %v9143_v48 = vmul.f32 %v9140_v2, %v9135_v10 }
0x22ef   :  { %v9151_v44 = vadd.f32 %v9148_v17, %v9143_v48 }
0x22f1   :  { %11173 = vmatprep.mubr.msk.f32.mxu0 %vm192_vm1, %v9151_v44 }
0x22f2   :  { %11174 = vmatmul.mubr.msk.f32.gmra.mxu0 %vm192_vm1, %v9152_v38 }
0x23aa   :  { %v11172_v32 = vpop.f32.mrf.mxu0 }
0x23ab   :  { %v9241_v41 = vadd.f32 %v11172_v32, %v9156_v8 }
0x23ac   :  { %v9235_v27 = vpop.f32.mrf.mxu0 }
0x23ad   :  { %v9259_v12 = vmul.f32 0.044715, %v9241_v41  ;;  %v9236_v34 = vadd.f32 %v9235_v27, %v9156_v8  ;;  %v9255_v10 = vmul.f32 0.5, %v9241_v41 }
0x23af   :  { %v9263_v61 = vmul.f32 %v9259_v12, %v9241_v41  ;;  %v9258_v24 = vmul.f32 0.044715, %v9236_v34  ;;  %v9254_v60 = vmul.f32 0.5, %v9236_v34 }
0x23b1   :  { %v9267_v59 = vmul.f32 %v9263_v61, %v9241_v41  ;;  %v9262_v16 = vmul.f32 %v9258_v24, %v9236_v34 }
0x23b2   :  { %v11175_v45 = vpop.f32.mrf.mxu0 }
0x23b3   :  { %v9271_v42 = vadd.f32 %v9267_v59, %v9241_v41  ;;  %v9251_v31 = vadd.f32 %v11175_v45, %v9156_v8  ;;  %v9266_v11 = vmul.f32 %v9262_v16, %v9236_v34  ;;  %v9466_v16 = vld [vmem:[%s14163_s4 + $0x18] sm:$0xff]  ;;  %v9465_v45 = vld [vmem:[%s14163_s4 + $0x10] sm:$0xff] }
0x23b4   :  { %v9245_v33 = vpop.f32.mrf.mxu0  ;;  %11214 = vmatprep.subr.mxu0 %v9466_v16 }
0x23b5   :  { %v9275_v7 = vmul.f32 0.7978846, %v9271_v42  ;;  %v9261_v13 = vmul.f32 0.044715, %v9251_v31  ;;  %v9246_v4 = vadd.f32 %v9245_v33, %v9156_v8  ;;  %v9270_v2 = vadd.f32 %v9266_v11, %v9236_v34  ;;  %11215 = vmatpush3.msra.mxu0 %v9466_v16  ;;  %v9464_v42 = vld [vmem:[%s14163_s4 + $0x8] sm:$0xff] }
0x23b6   :  { %v9257_v54 = vmul.f32 0.5, %v9251_v31  ;;  %11216 = vmatprep.subr.mxu0 %v9465_v45 }
0x23b7   :  { %11591 = vtanh.f32 %v9275_v7  ;;  %v9265_v50 = vmul.f32 %v9261_v13, %v9251_v31  ;;  %v9260_v57 = vmul.f32 0.044715, %v9246_v4  ;;  %v9274_v52 = vmul.f32 0.7978846, %v9270_v2  ;;  %11217 = vmatpush3.msra.mxu0 %v9465_v45 }
0x23b8   :  { %v9256_v5 = vmul.f32 0.5, %v9246_v4  ;;  %11218 = vmatprep.subr.mxu0 %v9464_v42 }
0x23b9   :  { %v9264_v18 = vmul.f32 %v9260_v57, %v9246_v4  ;;  %11593 = vtanh.f32 %v9274_v52  ;;  %v9269_v40 = vmul.f32 %v9265_v50, %v9251_v31  ;;  %11219 = vmatpush3.msra.mxu0 %v9464_v42 }
0x23bb   :  { %v9268_v17 = vmul.f32 %v9264_v18, %v9246_v4  ;;  %v9273_v23 = vadd.f32 %v9269_v40, %v9251_v31  ;;  %v9463_v31 = vld [vmem:[%s14163_s4] sm:$0xff] }
0x23bc   :  { %11220 = vmatprep.subr.mxu0 %v9463_v31 }
0x23bd   :  { %v9272_v35 = vadd.f32 %v9268_v17, %v9246_v4  ;;  %v9277_v15 = vmul.f32 0.7978846, %v9273_v23  ;;  %11221 = vmatpush3.msra.mxu0 %v9463_v31 }
0x23bf   :  { %v9276_v55 = vmul.f32 0.7978846, %v9272_v35  ;;  %11595 = vtanh.f32 %v9277_v15 }
0x23c1   :  { %11597 = vtanh.f32 %v9276_v55 }
0x23c4   :  { %v11592_v30 = vpop.eup %11591 }
0x23c5   :  { %v9283_v63 = vadd.f32 1.0, %v11592_v30 }
0x23c6   :  { %v11594_v3 = vpop.eup %11593 }
0x23c7   :  { %v9282_v22 = vadd.f32 1.0, %v11594_v3  ;;  %v9287_v48 = vmul.f32 %v9283_v63, %v9255_v10 }
0x23c9   :  { %v9286_v43 = vmul.f32 %v9282_v22, %v9254_v60 }
0x23cb   :  { %11208 = vmatprep.mubr.f32.mxu1 %v9286_v43 }
0x23cc   :  { %v11596_v44 = vpop.eup %11595  ;;  %11209 = vmatmul.mubr.f32.vlgmr.msra.gmra.mxu1 %v9287_v48 }
0x23cd   :  { %v9285_v0 = vadd.f32 1.0, %v11596_v44 }
0x23ce   :  { %v11598_v38 = vpop.eup %11597 }
0x23cf   :  { %v9284_v62 = vadd.f32 1.0, %v11598_v38  ;;  %v9289_v58 = vmul.f32 %v9285_v0, %v9257_v54 }
0x23d1   :  { %v9288_v19 = vmul.f32 %v9284_v62, %v9256_v5 }
0x23d3   :  { %11211 = vmatprep.mubr.f32.mxu1 %v9288_v19  ;;  %v11612_v19 = vld [vmem:[%s14169_s10] sm:$0xff] }
0x23d4   :  { %11212 = vmatmul.mubr.f32.gmra.mxu1 %v9289_v58  ;;  %v9450_v58 = vrot.slane %v11612_v19, %v12235_v37 }
0x248c   :  { %v11210_v26 = vpop.f32.mrf.mxu1 }
0x248d   :  { %v9376_v56 = vadd.f32 %v11210_v26, %v13971_v1 }
0x248e   :  { %v9356_v25 = vpop.f32.mrf.mxu1 }
0x248f   :  { %v14079_v28 = vadd.f32 %v9382_v20, %v9376_v56  ;;  %v9375_v46 = vadd.f32 %v9356_v25, %v13974_v39 }
0x2491   :  { %v14082_v9 = vadd.f32 %v9382_v20, %v9375_v46  ;;  %v9390_v6 = vsel %vm192_vm1, %v14079_v28, 0.0  ;;  %v9404_v36 = vmul.f32 %v14079_v28, %v14079_v28 }
0x2492   :  { %9391 = vadd.xlane.f32.xlu1 %v9390_v6  ;;  %v9458_v6 = vrot.slane %v11612_v19, %v12289_v53  ;;  %v9470_v53 = vrot.slane %v11612_v19, %v12295_v51 }
0x2493   :  { %v9387_v14 = vsel %vm192_vm1, %v14082_v9, 0.0  ;;  %v9403_v21 = vmul.f32 %v14082_v9, %v14082_v9  ;;  %v9410_v39 = vsel %vm192_vm1, %v9404_v36, 0.0 }
0x2494   :  { %9388 = vadd.xlane.f32.xlu0 %v9387_v14  ;;  %v11213_v1 = vpop.f32.mrf.mxu1 }
0x2495   :  { %v9378_v29 = vadd.f32 %v11213_v1, %v13979_v47  ;;  %v9407_v27 = vsel %vm192_vm1, %v9403_v21, 0.0 }
0x2496   :  { %9411 = vadd.xlane.f32.xlu1 %v9410_v39  ;;  %v9366_v8 = vpop.f32.mrf.mxu1 }
0x2497   :  { %v14094_v32 = vadd.f32 %v9382_v20, %v9378_v29  ;;  %v9377_v41 = vadd.f32 %v9366_v8, %v13994_v49 }
0x2498   :  { %9408 = vadd.xlane.f32.xlu0 %v9407_v27 }
0x2499   :  { %v14098_v12 = vadd.f32 %v9382_v20, %v9377_v41  ;;  %v9396_v34 = vsel %vm192_vm1, %v14094_v32, 0.0  ;;  %v9406_v61 = vmul.f32 %v14094_v32, %v14094_v32 }
0x249a   :  { %9397 = vadd.xlane.f32.xlu1 %v9396_v34 }
0x249b   :  { %v9393_v47 = vsel %vm192_vm1, %v14098_v12, 0.0  ;;  %v9405_v24 = vmul.f32 %v14098_v12, %v14098_v12  ;;  %v9416_v49 = vsel %vm192_vm1, %v9406_v61, 0.0 }
0x249c   :  { %9394 = vadd.xlane.f32.xlu0 %v9393_v47 }
0x249d   :  { %v9413_v59 = vsel %vm192_vm1, %v9405_v24, 0.0  ;;  %v9572_v24 = vld [vmem:[%s14160_s1] sm:$0xff] }
0x249e   :  { %9417 = vadd.xlane.f32.xlu1 %v9416_v49 }
0x24a0   :  { %9414 = vadd.xlane.f32.xlu0 %v9413_v59 }
0x251b   :  { %v9392_v11 = vpop.xlane.xlu1 %9391 }
0x251c   :  { %v9400_v33 = vmul.f32 0.03125, %v9392_v11  ;;  %v9575_v11 = vld [vmem:[%s14160_s1 + $0x18] sm:$0xff] }
0x251d   :  { %v9389_v7 = vpop.xlane.xlu0 %9388 }
0x251e   :  { %v9399_v13 = vmul.f32 0.03125, %v9389_v7  ;;  %v9424_v2 = vmul.f32 %v9400_v33, %v9400_v33  ;;  %v9432_v62 = vsub.f32 %v14079_v28, %v9400_v33 }
0x251f   :  { %v9412_v4 = vpop.xlane.xlu1 %9411 }
0x2520   :  { %v9420_v50 = vmul.f32 0.03125, %v9412_v4  ;;  %v9423_v52 = vmul.f32 %v9399_v13, %v9399_v13  ;;  %v9431_v20 = vsub.f32 %v14082_v9, %v9399_v13  ;;  %v9574_v4 = vld [vmem:[%s14160_s1 + $0x10] sm:$0xff] }
0x2521   :  { %v9409_v57 = vpop.xlane.xlu0 %9408 }
0x2522   :  { %v9428_v18 = vsub.f32 %v9420_v50, %v9424_v2  ;;  %v9419_v40 = vmul.f32 0.03125, %v9409_v57 }
0x2523   :  { %v9398_v17 = vpop.xlane.xlu1 %9397 }
0x2524   :  { %v9436_v23 = vadd.f32 1e-05, %v9428_v18  ;;  %v9427_v35 = vsub.f32 %v9419_v40, %v9423_v52  ;;  %v9402_v15 = vmul.f32 0.03125, %v9398_v17 }
0x2525   :  { %v9395_v55 = vpop.xlane.xlu0 %9394 }
0x2526   :  { %11599 = vrsqrt.f32 %v9436_v23  ;;  %v9435_v30 = vadd.f32 1e-05, %v9427_v35  ;;  %v9401_v3 = vmul.f32 0.03125, %v9395_v55  ;;  %v9426_v60 = vmul.f32 %v9402_v15, %v9402_v15 }
0x2527   :  { %v9418_v63 = vpop.xlane.xlu1 %9417  ;;  %v9434_v14 = vsub.f32 %v14094_v32, %v9402_v15 }
0x2528   :  { %11601 = vrsqrt.f32 %v9435_v30  ;;  %v9422_v22 = vmul.f32 0.03125, %v9418_v63  ;;  %v9425_v43 = vmul.f32 %v9401_v3, %v9401_v3  ;;  %v9433_v29 = vsub.f32 %v14098_v12, %v9401_v3  ;;  %v9573_v12 = vld [vmem:[%s14160_s1 + $0x8] sm:$0xff] }
0x2529   :  { %v9415_v10 = vpop.xlane.xlu0 %9414 }
0x252a   :  { %v9430_v48 = vsub.f32 %v9422_v22, %v9426_v60  ;;  %v9421_v44 = vmul.f32 0.03125, %v9415_v10 }
0x252c   :  { %v9438_v38 = vadd.f32 1e-05, %v9430_v48  ;;  %v9429_v0 = vsub.f32 %v9421_v44, %v9425_v43 }
0x252e   :  { %11603 = vrsqrt.f32 %v9438_v38  ;;  %v9437_v5 = vadd.f32 1e-05, %v9429_v0 }
0x2530   :  { %11605 = vrsqrt.f32 %v9437_v5 }
0x2533   :  { %v11600_v54 = vpop.eup %11599 }
0x2534   :  { %v9444_v26 = vmul.f32 %v11600_v54, %v9432_v62 }
0x2535   :  { %v11602_v56 = vpop.eup %11601 }
0x2536   :  { %v9443_v25 = vmul.f32 %v11602_v56, %v9431_v20  ;;  %v9452_v46 = vmul.f32 %v9450_v58, %v9444_v26 }
0x2538   :  { %v9451_v36 = vmul.f32 %v9450_v58, %v9443_v25  ;;  %v9460_v1 = vadd.f32 %v9458_v6, %v9452_v46 }
0x253a   :  { %v9459_v21 = vadd.f32 %v9458_v6, %v9451_v36 }
0x253b   :  { %v11604_v28 = vpop.eup %11603 }
0x253c   :  { %11222 = vmatprep.mubr.msk.f32.mxu0 %vm192_vm1, %v9459_v21  ;;  %v9446_v39 = vmul.f32 %v11604_v28, %v9434_v14 }
0x253d   :  { %v11606_v37 = vpop.eup %11605  ;;  %11223 = vmatmul.mubr.msk.f32.vlgmr.msra.gmra.mxu0 %vm192_vm1, %v9460_v1 }
0x253e   :  { %v9445_v9 = vmul.f32 %v11606_v37, %v9433_v29  ;;  %v9454_v8 = vmul.f32 %v9450_v58, %v9446_v39 }
0x2540   :  { %v9453_v41 = vmul.f32 %v9450_v58, %v9445_v9  ;;  %v9462_v34 = vadd.f32 %v9458_v6, %v9454_v8 }
0x2542   :  { %v9461_v27 = vadd.f32 %v9458_v6, %v9453_v41 }
0x2544   :  { %11225 = vmatprep.mubr.msk.f32.mxu0 %vm192_vm1, %v9461_v27 }
0x2545   :  { %11226 = vmatmul.mubr.msk.f32.gmra.mxu0 %vm192_vm1, %v9462_v34 }
0x25fd   :  { %v11224_v32 = vpop.f32.mrf.mxu0 }
0x25fe   :  { %v9555_v61 = vadd.f32 %v11224_v32, %v9470_v53 }
0x25ff   :  { %v9549_v47 = vpop.f32.mrf.mxu0 }
0x2600   :  { %9569 = vst [vmem:[#allocation2 + $0x8] sm:$0xff] %v9555_v61  ;;  %v9577_v49 = vsub.f32 %v9555_v61, %v9573_v12  ;;  %v9550_v59 = vadd.f32 %v9549_v47, %v9470_v53 }
0x2602   :  { %v9581_v16 = vmul.f32 %v9577_v49, %v9577_v49  ;;  %9568 = vst [vmem:[#allocation2] sm:$0xff] %v9550_v59  ;;  %v9576_v45 = vsub.f32 %v9550_v59, %v9572_v24 }
0x2604   :  { %v9580_v42 = vmul.f32 %v9576_v45, %v9576_v45  ;;  %v9587_v51 = vsel %vm61_vm0, %v9581_v16, 0.0 }
0x2605   :  { %9588 = vadd.xlane.f32.xlu1 %v9587_v51  ;;  %v11227_v31 = vpop.f32.mrf.mxu0 }
0x2606   :  { %v9565_v33 = vadd.f32 %v11227_v31, %v9470_v53  ;;  %v9584_v7 = vsel %vm61_vm0, %v9580_v42, 0.0 }
0x2607   :  { %9585 = vadd.xlane.f32.xlu0 %v9584_v7  ;;  %v9559_v13 = vpop.f32.mrf.mxu0 }
0x2608   :  { %9571 = vst [vmem:[#allocation2 + $0x18] sm:$0xff] %v9565_v33  ;;  %v9579_v2 = vsub.f32 %v9565_v33, %v9575_v11  ;;  %v9560_v50 = vadd.f32 %v9559_v13, %v9470_v53 }
0x260a   :  { %v9583_v57 = vmul.f32 %v9579_v2, %v9579_v2  ;;  %9570 = vst [vmem:[#allocation2 + $0x10] sm:$0xff] %v9560_v50  ;;  %v9578_v52 = vsub.f32 %v9560_v50, %v9574_v4 }
0x260c   :  { %v9582_v18 = vmul.f32 %v9578_v52, %v9578_v52  ;;  %v9593_v40 = vsel %vm61_vm0, %v9583_v57, 0.0 }
0x260d   :  { %9594 = vadd.xlane.f32.xlu1 %v9593_v40 }
0x260e   :  { %v9590_v17 = vsel %vm61_vm0, %v9582_v18, 0.0 }
0x260f   :  { %9591 = vadd.xlane.f32.xlu0 %v9590_v17 }
0x2610   :  { %11624 = shalt.err (!%p11621_p4)
}
0x2611   :  { %s11666_s1 = smov 128   ;;  %s11667_s5 = smov [#allocation4]   ;;  %vm9611_vm5 = vcmask 0  }
0x2612   :  { %9624 = dma.vmem_to_hbm [thread:$0]  %s9619_s7, 512, %s14170_s11, [#allocation3], %s11666_s1, %s11666_s1, %s11662_s23  }
0x2613   :  { %s9631_s17 = sshll.u32 %s11667_s5, 4  ;;  %s9632_s17 = int_to_ptr.vmem [resolvable:$true] %s9631_s17 }
0x2614   :  { %s11633_s11 = scalar_lea.vmem %s9632_s17, 16  ;;  %s11637_s23 = scalar_lea.vmem %s9632_s17, 32 }
0x2615   :  { %p11634_p5 = scmp.ne.s32.totalorder %s9632_s17, %s11633_s11  ;;  %p11638_p6 = scmp.lt.s32.totalorder %s9632_s17, %s9632_s17 }
0x2616   :  { %p11639_p7 = scmp.lt.s32.totalorder %s11637_s23, %s11633_s11 }
0x2618   :  { %p11640_p8 = por %p11639_p7, %p11638_p6 }
0x261a   :  { %p11641_p9 = pnand %p11640_p8, %p11634_p5 }
0x268e   :  { %v9589_v35 = vpop.xlane.xlu1 %9588 }
0x268f   :  { %v9598_v55 = vmul.f32 0.020833334, %v9589_v35 }
0x2690   :  { %v9586_v23 = vpop.xlane.xlu0 %9585 }
0x2691   :  { %v9597_v15 = vmul.f32 0.020833334, %v9586_v23 }
0x2693   :  { %v9601_v63 = vadd.f32 %v9598_v55, %v9597_v15 }
0x2696   :  { %v9595_v30 = vpop.xlane.xlu1 %9594 }
0x2697   :  { %v9600_v22 = vmul.f32 0.020833334, %v9595_v30 }
0x2698   :  { %v9592_v3 = vpop.xlane.xlu0 %9591 }
0x2699   :  { %v9599_v60 = vmul.f32 0.020833334, %v9592_v3 }
0x269b   :  { %v9602_v10 = vadd.f32 %v9601_v63, %v9599_v60 }
0x269d   :  { %v9603_v43 = vadd.f32 %v9602_v10, %v9600_v22 }
0x269f   :  { %v9604_v48 = vrot.slane %v9603_v43, 4 }
0x26a1   :  { %v9605_v44 = vadd.f32 %v9604_v48, %v9603_v43 }
0x26a3   :  { %v9606_v38 = vrot.slane %v9605_v44, 2 }
0x26a5   :  { %v9607_v0 = vadd.f32 %v9606_v38, %v9605_v44 }
0x26a7   :  { %v9608_v5 = vrot.slane %v9607_v0, 1 }
0x26a9   :  { %v9609_v62 = vadd.f32 %v9608_v5, %v9607_v0 }
0x26ab   :  { %v9610_v54 = vmul.f32 0.03125, %v9609_v62 }
0x26ad   :  { %9612 = vst.msk [vmem:[#allocation4] sm:$0x1] %vm9611_vm5, %v9610_v54 }
0x26ae   :  { %11644 = shalt.err (!%p11641_p9)
}
0x26af   :  { %9634 = dma.vmem_to_hbm [thread:$0]  %s9632_s17, 16, %s14171_s12, [#allocation5]  }
0x26b0   :  { %11653 = dma.done.wait [#allocation3], 512  }
0x26b1   :  { %11654 = vsyncadd [#allocation3], 4294966784 }
0x26b2   :  { %11655 = dma.done.wait [#allocation5], 16  }
0x26b3   :  { %11656 = vsyncadd [#allocation5], 4294967280 }
0x26b4   :  { %9641 = vsyncpa [#allocation3], 1 }
0x26b5   :  { %9642 = vsyncpa [#allocation5], 1 }

</bundles_post_ra>
